<compile_context>
chip_gen: v5e
topology: v5e:2x2
jax: 0.10.0
libtpu: 0.0.40
codegen_flags: <defaults>
</compile_context>

<pallas_src>
import jax
import jax.numpy as jnp
from jax import lax
from jax.experimental import pallas as pl
from jax.experimental.pallas import tpu as pltpu

# ----------------------- model configuration (small demo sizes) -----------------------
D_MODEL    = 64
D_STATE    = 16      # mamba_d_state
D_CONV     = 4       # mamba_d_conv
EXPAND     = 2       # mamba_expand
HEADDIM    = 32      # mamba_headdim
MLP_EXPAND = 4
NGROUPS    = 1

D_INNER    = EXPAND * D_MODEL                              # 128
NHEADS     = D_INNER // HEADDIM                            # 4
CONV_DIM   = D_INNER + 2 * NGROUPS * D_STATE               # 160
D_IN_PROJ  = 2 * D_INNER + 2 * NGROUPS * D_STATE + NHEADS  # 292
D_HIDDEN   = D_MODEL * MLP_EXPAND                          # 256

EPS_RMS    = 1e-6    # block_norm = RMSNorm(eps=1e-6)
EPS_GATED  = 1e-5    # Mamba2 RMSNormGated default eps
CTX_ROWS   = 8       # sublane-aligned conv-context rows kept across chunks (need 3)

NT_DIMS = (((1,), (1,)), ((), ()))   # contract trailing dims: A @ B^T
TN_DIMS = (((0,), (0,)), ((), ()))   # contract leading dims:  A^T @ B
TM_DIMS = (((0,), (1,)), ((), ()))   # lhs dim0 with rhs dim1


def _expand_heads(a):
    """(R, NHEADS) -> (R, D_INNER): repeat each head's value across its HEADDIM lanes."""
    r = a.shape[0]
    return jnp.concatenate(
        [jnp.broadcast_to(a[:, h:h + 1], (r, HEADDIM)) for h in range(NHEADS)], axis=1)


# ----------------------------------- Pallas kernel ------------------------------------
def _make_kernel(n_chunks):
    carry_state = n_chunks > 1

    def kernel(x_ref, wn1_ref, wzT_ref, wxbcdtT_ref, wconv_ref, bconv_ref,
               aneg_ref, dtb_ref, dskip_ref, wg_ref, woT_ref,
               wn2_ref, w1T_ref, b1_ref, w2T_ref, b2_ref,
               out_ref, state_ref, ctx_ref):
        T = x_ref.shape[0]
        c = pl.program_id(1)

        # chunk 0 of every batch element: reset SSM state and conv context
        @pl.when(c == 0)
        def _():
            state_ref[...] = jnp.zeros_like(state_ref)
            ctx_ref[...] = jnp.zeros_like(ctx_ref)

        # ---- RMSNorm(x) + split in_proj (bf16 MXU operands, f32 accumulate) ----
        x = x_ref[...].astype(jnp.float32)                               # (T, D_MODEL)
        xn = (x * lax.rsqrt(jnp.mean(x * x, axis=-1, keepdims=True) + EPS_RMS)
              * wn1_ref[...]).astype(jnp.bfloat16)
        z = jnp.dot(xn, wzT_ref[...], preferred_element_type=jnp.float32)       # (T, 128)
        xbcdt = jnp.dot(xn, wxbcdtT_ref[...], preferred_element_type=jnp.float32)  # (T, 164)
        xBC = xbcdt[:, :CONV_DIM]                                        # (T, 160)
        dtr = xbcdt[:, CONV_DIM:CONV_DIM + NHEADS]                       # (T, 4)

        # ---- causal depthwise conv + bias + SiLU (cross-chunk context in scratch) ----
        xcat = jnp.concatenate([ctx_ref[...], xBC], axis=0)              # (T+8, 160)
        if carry_state:
            ctx_ref[...] = xBC[T - CTX_ROWS:, :]                         # context for c+1
        acc = jnp.broadcast_to(bconv_ref[...], (T, CONV_DIM))
        for k in range(D_CONV):                                          # static taps
            s = D_CONV - 1 - k
            acc = acc + xcat[CTX_ROWS - s:CTX_ROWS - s + T, :] * wconv_ref[k:k + 1, :]
        xconv = acc * jax.nn.sigmoid(acc)                                # (T, 160)
        x_ssm = xconv[:, :D_INNER]                                       # (T, 128)
        Bm = xconv[:, D_INNER:D_INNER + D_STATE]                         # (T, 16)
        Cm = xconv[:, D_INNER + D_STATE:]                                # (T, 16)

        # ---- per-head dt / decay cumsums (f32) ----
        dt = jax.nn.softplus(dtr + dtb_ref[...])                         # (T, H)
        alpha = dt * aneg_ref[...]                                       # (T, H), <= 0
        rr = lax.broadcasted_iota(jnp.int32, (T, T), 0)
        cc = lax.broadcasted_iota(jnp.int32, (T, T), 1)
        m_inc = (cc <= rr).astype(jnp.float32)                           # causal (incl diag)
        cum = jnp.dot(m_inc, alpha, preferred_element_type=jnp.float32)  # (T,H): s_t
        cum_t = lax.dot_general(alpha, m_inc, TM_DIMS,
                                preferred_element_type=jnp.float32)      # (H,T): s_tau

        dtx = _expand_heads(dt) * x_ssm                                  # (T, 128)
        dtx_bf = dtx.astype(jnp.bfloat16)
        B_bf = Bm.astype(jnp.bfloat16)
        C_bf = Cm.astype(jnp.bfloat16)
        CB = lax.dot_general(C_bf, B_bf, NT_DIMS,
                             preferred_element_type=jnp.float32)         # (T,T): C_t.B_tau

        # intra-chunk contribution (decay differs per head; matmul stays per-head)
        y_heads = []
        for h in range(NHEADS):                                          # static, 4 heads
            diff = cum[:, h:h + 1] - cum_t[h:h + 1, :]                   # s_t - s_tau
            Ldec = jnp.exp(jnp.minimum(diff, 0.0)) * m_inc               # clamp -> mask
            y_heads.append(jnp.dot((Ldec * CB).astype(jnp.bfloat16),
                                   dtx_bf[:, h * HEADDIM:(h + 1) * HEADDIM],
                                   preferred_element_type=jnp.float32))
        y = jnp.concatenate(y_heads, axis=1) + dskip_ref[...] * x_ssm    # + D skip

        # inter-chunk readout + state carry (head-fused, lane-dense (16,128) matmuls)
        if carry_state:
            tot_log = jnp.sum(alpha, axis=0, keepdims=True)              # (1,H): s_T
            seg_start = jnp.exp(cum)                                     # exp(s_t)
            seg_end = jnp.exp(tot_log - cum)                             # exp(s_T - s_t)
            tot = jnp.exp(tot_log)                                       # exp(s_T)
            state = state_ref[...]                                       # (16, 128) f32
            y = y + _expand_heads(seg_start) * jnp.dot(
                C_bf, state.astype(jnp.bfloat16), preferred_element_type=jnp.float32)
            su = (_expand_heads(seg_end) * dtx).astype(jnp.bfloat16)     # (T, 128)
            state_ref[...] = _expand_heads(tot) * state + lax.dot_general(
                B_bf, su, TN_DIMS, preferred_element_type=jnp.float32)

        # ---- gated RMSNorm(y * silu(z)) + out_proj + residual ----
        g = y * (z * jax.nn.sigmoid(z))
        gn = (g * lax.rsqrt(jnp.mean(g * g, axis=-1, keepdims=True) + EPS_GATED)
              * wg_ref[...]).astype(jnp.bfloat16)
        x1 = x + jnp.dot(gn, woT_ref[...], preferred_element_type=jnp.float32)

        # ---- fused MLP tail: out = x1 + fc2(silu(fc1(rmsnorm(x1)))) ----
        xn2 = (x1 * lax.rsqrt(jnp.mean(x1 * x1, axis=-1, keepdims=True) + EPS_RMS)
               * wn2_ref[...]).astype(jnp.bfloat16)
        hdn = jnp.dot(xn2, w1T_ref[...], preferred_element_type=jnp.float32) + b1_ref[...]
        hdn = hdn * jax.nn.sigmoid(hdn)
        out_ref[...] = x1 + jnp.dot(hdn.astype(jnp.bfloat16), w2T_ref[...],
                                    preferred_element_type=jnp.float32) + b2_ref[...]

    return kernel


def _pick_chunk(L):
    for t in (128, 64, 32, 16, 8):
        if L % t == 0:
            return t
    # TODO(synk): pad / ragged-handle awkward L instead of one whole-sequence chunk.
    return L


# ------------------------------------ forward pass ------------------------------------
def mpts_block_forward(x, prep):
    bsz, L, D = x.shape
    assert D == D_MODEL
    T = _pick_chunk(L)
    n_chunks = L // T

    def full(shape):
        return pl.BlockSpec(shape, lambda b, c: (0, 0))

    return pl.pallas_call(
        _make_kernel(n_chunks),
        grid=(bsz, n_chunks),
        in_specs=[
            pl.BlockSpec((None, T, D), lambda b, c: (b, c, 0)),   # x
            full((1, D_MODEL)),                                   # w_norm1
            full((D_MODEL, D_INNER)),                             # wzT    (bf16)
            full((D_MODEL, CONV_DIM + NHEADS)),                   # w[xBC|dt]T (bf16)
            full((D_CONV, CONV_DIM)),                             # conv weight
            full((1, CONV_DIM)),                                  # conv bias
            full((1, NHEADS)),                                    # A_neg
            full((1, NHEADS)),                                    # dt_bias
            full((1, D_INNER)),                                   # D skip (head-expanded)
            full((1, D_INNER)),                                   # w_gnorm
            full((D_INNER, D_MODEL)),                             # woT   (bf16)
            full((1, D_MODEL)),                                   # w_norm2
            full((D_MODEL, D_HIDDEN)),                            # w1T   (bf16)
            full((1, D_HIDDEN)),                                  # b_fc1
            full((D_HIDDEN, D_MODEL)),                            # w2T   (bf16)
            full((1, D_MODEL)),                                   # b_fc2
        ],
        out_specs=pl.BlockSpec((None, T, D), lambda b, c: (b, c, 0)),
        out_shape=jax.ShapeDtypeStruct((bsz, L, D), jnp.float32),
        scratch_shapes=[pltpu.VMEM((D_STATE, D_INNER), jnp.float32),   # SSM state carry
                        pltpu.VMEM((CTX_ROWS, CONV_DIM), jnp.float32)],  # conv context
        compiler_params=pltpu.CompilerParams(
            dimension_semantics=("parallel", "arbitrary"),
            vmem_limit_bytes=32 * 1024 * 1024),
    )(x, prep["w_norm1"], prep["wzT"], prep["wxbcdtT"], prep["w_conv"],
      prep["b_conv"], prep["A_neg"], prep["dt_bias_h"], prep["D_exp"],
      prep["w_gnorm"], prep["woT"], prep["w_norm2"], prep["w1T"],
      prep["b_fc1"], prep["w2T"], prep["b_fc2"])


# ------------------------ one-time parameter preparation (no per-call .T) --------------
def prepare_params(p):
    prep = {}
    prep["w_norm1"] = p["w_norm1"].reshape(1, D_MODEL)
    prep["w_norm2"] = p["w_norm2"].reshape(1, D_MODEL)
    w_in = p["w_inproj"]                                               # (292, 64)
    prep["wzT"]     = jnp.transpose(w_in[:D_INNER, :]).astype(jnp.bfloat16)     # (64,128)
    prep["wxbcdtT"] = jnp.transpose(w_in[D_INNER:, :]).astype(jnp.bfloat16)     # (64,164)
    prep["w_conv"] = jnp.transpose(p["w_conv"][:, 0, :], (1, 0))       # (K, CONV_DIM)
    prep["b_conv"] = p["b_conv"].reshape(1, CONV_DIM)
    prep["A_neg"]     = (-jnp.exp(p["A_log"])).reshape(1, NHEADS)
    prep["dt_bias_h"] = p["dt_bias"].reshape(1, NHEADS)
    prep["D_exp"]     = jnp.repeat(p["D"], HEADDIM).reshape(1, D_INNER)
    prep["w_gnorm"] = p["w_gnorm"].reshape(1, D_INNER)
    prep["woT"]   = jnp.transpose(p["w_outproj"]).astype(jnp.bfloat16)
    prep["w1T"]   = jnp.transpose(p["w_fc1"]).astype(jnp.bfloat16)
    prep["b_fc1"] = p["b_fc1"].reshape(1, D_HIDDEN)
    prep["w2T"]   = jnp.transpose(p["w_fc2"]).astype(jnp.bfloat16)
    prep["b_fc2"] = p["b_fc2"].reshape(1, D_MODEL)
    return prep


# --------------------------- pure-JAX reference (for checking) -------------------------
def reference_forward(x, params):
    bsz, L, D = x.shape

    def rmsnorm(v, w, eps):
        return v * lax.rsqrt(jnp.mean(v * v, axis=-1, keepdims=True) + eps) * w

    xn = rmsnorm(x, params["w_norm1"], EPS_RMS)
    zxbcdt = xn @ params["w_inproj"].T
    z   = zxbcdt[..., :D_INNER]
    xBC = zxbcdt[..., D_INNER:D_INNER + CONV_DIM]
    dtr = zxbcdt[..., D_INNER + CONV_DIM:]

    w = params["w_conv"][:, 0, :]                               # (CONV_DIM, K)
    xpad = jnp.pad(xBC, ((0, 0), (D_CONV - 1, 0), (0, 0)))
    conv = sum(xpad[:, k:k + L, :] * w[:, k] for k in range(D_CONV)) + params["b_conv"]
    conv = conv * jax.nn.sigmoid(conv)

    xs = conv[..., :D_INNER]
    Bm = conv[..., D_INNER:D_INNER + D_STATE]
    Cm = conv[..., D_INNER + D_STATE:]
    A  = -jnp.exp(params["A_log"])
    dtv = jax.nn.softplus(dtr + params["dt_bias"])
    xh = xs.reshape(bsz, L, NHEADS, HEADDIM)

    def step(state, inp):
        x_t, dt_t, B_t, C_t = inp
        dA = jnp.exp(dt_t * A)                                   # (bsz, H)
        state = state * dA[:, :, None, None] \
            + (dt_t[:, :, None] * x_t)[..., None] * B_t[:, None, None, :]
        y_t = jnp.einsum("bhpn,bn->bhp", state, C_t)
        return state, y_t

    state0 = jnp.zeros((bsz, NHEADS, HEADDIM, D_STATE), jnp.float32)
    _, ys = lax.scan(step, state0,
                     (jnp.moveaxis(xh, 1, 0), jnp.moveaxis(dtv, 1, 0),
                      jnp.moveaxis(Bm, 1, 0), jnp.moveaxis(Cm, 1, 0)))
    ys = jnp.moveaxis(ys, 0, 1) + xh * params["D"][None, None, :, None]
    yv = ys.reshape(bsz, L, D_INNER)

    g = yv * (z * jax.nn.sigmoid(z))
    gn = rmsnorm(g, params["w_gnorm"], EPS_GATED)
    x1 = x + gn @ params["w_outproj"].T

    xn2 = rmsnorm(x1, params["w_norm2"], EPS_RMS)
    h = xn2 @ params["w_fc1"].T + params["b_fc1"]
    h = h * jax.nn.sigmoid(h)
    return x1 + h @ params["w_fc2"].T + params["b_fc2"]


# ------------------------------- deterministic parameters ------------------------------
def init_params(key):
    ks = jax.random.split(key, 10)
    p = {}
    p["w_norm1"]   = jnp.ones((D_MODEL,), jnp.float32)
    p["w_norm2"]   = jnp.ones((D_MODEL,), jnp.float32)
    p["w_inproj"]  = 0.02 * jax.random.normal(ks[0], (D_IN_PROJ, D_MODEL), jnp.float32)
    p["w_conv"]    = 0.10 * jax.random.normal(ks[1], (CONV_DIM, 1, D_CONV), jnp.float32)
    p["b_conv"]    = 0.10 * jax.random.normal(ks[2], (CONV_DIM,), jnp.float32)
    # Mamba2-style SSM parameter init
    A = jax.random.uniform(ks[3], (NHEADS,), jnp.float32, minval=1.0, maxval=16.0)
    p["A_log"] = jnp.log(A)
    dt = jnp.exp(jax.random.uniform(ks[4], (NHEADS,), jnp.float32)
                 * (jnp.log(0.1) - jnp.log(0.001)) + jnp.log(0.001))
    dt = jnp.maximum(dt, 1e-4)
    p["dt_bias"] = dt + jnp.log(-jnp.expm1(-dt))   # inverse softplus
    p["D"]       = jnp.ones((NHEADS,), jnp.float32)
    p["w_gnorm"] = jnp.ones((D_INNER,), jnp.float32)
    p["w_outproj"] = 0.02 * jax.random.normal(ks[5], (D_MODEL, D_INNER), jnp.float32)
    p["w_fc1"]   = 0.02 * jax.random.normal(ks[6], (D_HIDDEN, D_MODEL), jnp.float32)
    p["b_fc1"]   = 0.02 * jax.random.normal(ks[7], (D_HIDDEN,), jnp.float32)
    p["w_fc2"]   = 0.02 * jax.random.normal(ks[8], (D_MODEL, D_HIDDEN), jnp.float32)
    p["b_fc2"]   = 0.02 * jax.random.normal(ks[9], (D_MODEL,), jnp.float32)
    return p


if __name__ == "__main__":
    key = jax.random.PRNGKey(0)
    kx, kp = jax.random.split(key)
    bsz, seq = 2, 256              # seq=256 -> two 128-row chunks: exercises the carries
    x = jax.random.normal(kx, (bsz, seq, D_MODEL), jnp.float32)
    params = init_params(kp)
    prep = prepare_params(params)  # one-time transpose / split / bf16 cast

    out = jax.block_until_ready(jax.jit(mpts_block_forward)(x, prep))
    ref = jax.block_until_ready(jax.jit(reference_forward)(x, params))

    assert out.shape == (bsz, seq, D_MODEL)
    assert bool(jnp.all(jnp.isfinite(out)))
    max_err = float(jnp.max(jnp.abs(out - ref)))
    assert bool(jnp.allclose(out, ref, rtol=2e-2, atol=2e-2)), max_err
    print("KERNEL_OK")
</pallas_src>

<mosaic_0001>
module attributes {stable_mosaic.version = 11 : i64} {
  func.func @kernel(%arg0: i32, %arg1: i32, %arg2: memref<1x128x64xf32, #tpu.memory_space<vmem>>, %arg3: memref<1x64xf32, #tpu.memory_space<vmem>>, %arg4: memref<64x128xbf16, #tpu.memory_space<vmem>>, %arg5: memref<64x164xbf16, #tpu.memory_space<vmem>>, %arg6: memref<4x160xf32, #tpu.memory_space<vmem>>, %arg7: memref<1x160xf32, #tpu.memory_space<vmem>>, %arg8: memref<1x4xf32, #tpu.memory_space<vmem>>, %arg9: memref<1x4xf32, #tpu.memory_space<vmem>>, %arg10: memref<1x128xf32, #tpu.memory_space<vmem>>, %arg11: memref<1x128xf32, #tpu.memory_space<vmem>>, %arg12: memref<128x64xbf16, #tpu.memory_space<vmem>>, %arg13: memref<1x64xf32, #tpu.memory_space<vmem>>, %arg14: memref<64x256xbf16, #tpu.memory_space<vmem>>, %arg15: memref<1x256xf32, #tpu.memory_space<vmem>>, %arg16: memref<256x64xbf16, #tpu.memory_space<vmem>>, %arg17: memref<1x64xf32, #tpu.memory_space<vmem>>, %arg18: memref<1x128x64xf32, #tpu.memory_space<vmem>>, %arg19: memref<16x128xf32, #tpu.memory_space<vmem>>, %arg20: memref<8x160xf32, #tpu.memory_space<vmem>>) attributes {dimension_semantics = [#tpu.dimension_semantics<parallel>, #tpu.dimension_semantics<arbitrary>], iteration_bounds = array<i64: 2, 2>, scalar_prefetch = 0 : i64, scratch_operands = 2 : i64, tpu.core_type = #tpu.core_type<tc>, window_params = [{transform_indices = @transform_0, window_bounds = array<i64: 1, 128, 64>}, {pipeline_mode = #tpu.pipeline_mode<synchronous>, transform_indices = @transform_1, window_bounds = array<i64: 1, 64>}, {pipeline_mode = #tpu.pipeline_mode<synchronous>, transform_indices = @transform_2, window_bounds = array<i64: 64, 128>}, {pipeline_mode = #tpu.pipeline_mode<synchronous>, transform_indices = @transform_3, window_bounds = array<i64: 64, 164>}, {pipeline_mode = #tpu.pipeline_mode<synchronous>, transform_indices = @transform_4, window_bounds = array<i64: 4, 160>}, {pipeline_mode = #tpu.pipeline_mode<synchronous>, transform_indices = @transform_5, window_bounds = array<i64: 1, 160>}, {pipeline_mode = #tpu.pipeline_mode<synchronous>, transform_indices = @transform_6, window_bounds = array<i64: 1, 4>}, {pipeline_mode = #tpu.pipeline_mode<synchronous>, transform_indices = @transform_7, window_bounds = array<i64: 1, 4>}, {pipeline_mode = #tpu.pipeline_mode<synchronous>, transform_indices = @transform_8, window_bounds = array<i64: 1, 128>}, {pipeline_mode = #tpu.pipeline_mode<synchronous>, transform_indices = @transform_9, window_bounds = array<i64: 1, 128>}, {pipeline_mode = #tpu.pipeline_mode<synchronous>, transform_indices = @transform_10, window_bounds = array<i64: 128, 64>}, {pipeline_mode = #tpu.pipeline_mode<synchronous>, transform_indices = @transform_11, window_bounds = array<i64: 1, 64>}, {pipeline_mode = #tpu.pipeline_mode<synchronous>, transform_indices = @transform_12, window_bounds = array<i64: 64, 256>}, {pipeline_mode = #tpu.pipeline_mode<synchronous>, transform_indices = @transform_13, window_bounds = array<i64: 1, 256>}, {pipeline_mode = #tpu.pipeline_mode<synchronous>, transform_indices = @transform_14, window_bounds = array<i64: 256, 64>}, {pipeline_mode = #tpu.pipeline_mode<synchronous>, transform_indices = @transform_15, window_bounds = array<i64: 1, 64>}, {transform_indices = @transform_16, window_bounds = array<i64: 1, 128, 64>}]} {
    %c0_i32 = arith.constant 0 : i32
    %0 = arith.cmpi eq, %arg1, %c0_i32 : i32
    %1 = arith.extui %0 : i1 to i32
    %c0_i32_0 = arith.constant 0 : i32
    %2 = arith.cmpi ne, %1, %c0_i32_0 : i32
    scf.if %2 {
      %cst_79 = arith.constant 0.000000e+00 : f32
      %280 = vector.broadcast %cst_79 : f32 to vector<16x128xf32>
      %c0_80 = arith.constant 0 : index
      %c0_81 = arith.constant 0 : index
      %281 = vector.load %arg19[%c0_80, %c0_81] : memref<16x128xf32, #tpu.memory_space<vmem>>, vector<16x128xf32>
      tpu.vector_store %arg19[%c0_80, %c0_81], %280 {strides = array<i32>} : memref<16x128xf32, #tpu.memory_space<vmem>>, vector<16x128xf32>,
      %cst_82 = arith.constant 0.000000e+00 : f32
      %282 = vector.broadcast %cst_82 : f32 to vector<8x160xf32>
      %c0_83 = arith.constant 0 : index
      %c0_84 = arith.constant 0 : index
      %283 = vector.load %arg20[%c0_83, %c0_84] : memref<8x160xf32, #tpu.memory_space<vmem>>, vector<8x160xf32>
      tpu.vector_store %arg20[%c0_83, %c0_84], %282 {strides = array<i32>} : memref<8x160xf32, #tpu.memory_space<vmem>>, vector<8x160xf32>,
    } else {
    }
    %c0 = arith.constant 0 : index
    %c0_1 = arith.constant 0 : index
    %c0_2 = arith.constant 0 : index
    %3 = vector.load %arg2[%c0, %c0_1, %c0_2] : memref<1x128x64xf32, #tpu.memory_space<vmem>>, vector<1x128x64xf32>
    %4 = vector.shape_cast %3 : vector<1x128x64xf32> to vector<128x64xf32>
    %5 = arith.mulf %4, %4 : vector<128x64xf32>
    %cst = arith.constant dense<0.000000e+00> : vector<128xf32>
    %6 = vector.multi_reduction <add>, %5, %cst [1] : vector<128x64xf32> to vector<128xf32>
    %7 = vector.shape_cast %6 : vector<128xf32> to vector<128x1xf32>
    %cst_3 = arith.constant 6.400000e+01 : f32
    %8 = vector.broadcast %cst_3 : f32 to vector<128x1xf32>
    %9 = arith.divf %7, %8 : vector<128x1xf32>
    %cst_4 = arith.constant 9.99999997E-7 : f32
    %10 = vector.broadcast %cst_4 : f32 to vector<128x1xf32>
    %11 = arith.addf %9, %10 : vector<128x1xf32>
    %12 = math.rsqrt %11 : vector<128x1xf32>
    %13 = vector.broadcast %12 : vector<128x1xf32> to vector<128x64xf32>
    %14 = arith.mulf %4, %13 : vector<128x64xf32>
    %c0_5 = arith.constant 0 : index
    %c0_6 = arith.constant 0 : index
    %15 = vector.load %arg3[%c0_5, %c0_6] : memref<1x64xf32, #tpu.memory_space<vmem>>, vector<1x64xf32>
    %16 = vector.broadcast %15 : vector<1x64xf32> to vector<128x64xf32>
    %17 = arith.mulf %14, %16 : vector<128x64xf32>
    %18 = arith.truncf %17 : vector<128x64xf32> to vector<128x64xbf16>
    %c0_7 = arith.constant 0 : index
    %c0_8 = arith.constant 0 : index
    %19 = vector.load %arg4[%c0_7, %c0_8] : memref<64x128xbf16, #tpu.memory_space<vmem>>, vector<64x128xbf16>
    %cst_9 = arith.constant dense<0.000000e+00> : vector<128x128xf32>
    %20 = tpu.matmul %18, %19, %cst_9 {dimension_numbers = #tpu.dot_dimension_numbers<[1], [0], [0], [1], [0, 0, 1, 1], [], []>} : vector<128x64xbf16>, vector<64x128xbf16>, vector<128x128xf32> -> vector<128x128xf32>
    %c0_10 = arith.constant 0 : index
    %c0_11 = arith.constant 0 : index
    %21 = vector.load %arg5[%c0_10, %c0_11] : memref<64x164xbf16, #tpu.memory_space<vmem>>, vector<64x164xbf16>
    %cst_12 = arith.constant dense<0.000000e+00> : vector<128x164xf32>
    %22 = tpu.matmul %18, %21, %cst_12 {dimension_numbers = #tpu.dot_dimension_numbers<[1], [0], [0], [1], [0, 0, 1, 1], [], []>} : vector<128x64xbf16>, vector<64x164xbf16>, vector<128x164xf32> -> vector<128x164xf32>
    %23 = vector.extract_strided_slice %22 {offsets = [0, 0], sizes = [128, 160], strides = [1, 1]} : vector<128x164xf32> to vector<128x160xf32>
    %24 = vector.extract_strided_slice %22 {offsets = [0, 160], sizes = [128, 4], strides = [1, 1]} : vector<128x164xf32> to vector<128x4xf32>
    %c0_13 = arith.constant 0 : index
    %c0_14 = arith.constant 0 : index
    %25 = vector.load %arg20[%c0_13, %c0_14] : memref<8x160xf32, #tpu.memory_space<vmem>>, vector<8x160xf32>
    %26 = tpu.concatenate %25, %23 in 0 : vector<8x160xf32>, vector<128x160xf32> -> vector<136x160xf32>
    %27 = vector.extract_strided_slice %23 {offsets = [120, 0], sizes = [8, 160], strides = [1, 1]} : vector<128x160xf32> to vector<8x160xf32>
    %c0_15 = arith.constant 0 : index
    %c0_16 = arith.constant 0 : index
    %28 = vector.load %arg20[%c0_15, %c0_16] : memref<8x160xf32, #tpu.memory_space<vmem>>, vector<8x160xf32>
    tpu.vector_store %arg20[%c0_15, %c0_16], %27 {strides = array<i32>} : memref<8x160xf32, #tpu.memory_space<vmem>>, vector<8x160xf32>,
    %c0_17 = arith.constant 0 : index
    %c0_18 = arith.constant 0 : index
    %29 = vector.load %arg7[%c0_17, %c0_18] : memref<1x160xf32, #tpu.memory_space<vmem>>, vector<1x160xf32>
    %30 = vector.shape_cast %29 : vector<1x160xf32> to vector<1x160xf32>
    %31 = vector.broadcast %30 : vector<1x160xf32> to vector<128x160xf32>
    %32 = vector.extract_strided_slice %26 {offsets = [5, 0], sizes = [128, 160], strides = [1, 1]} : vector<136x160xf32> to vector<128x160xf32>
    %c0_19 = arith.constant 0 : index
    %c0_20 = arith.constant 0 : index
    %33 = vector.load %arg6[%c0_19, %c0_20] : memref<4x160xf32, #tpu.memory_space<vmem>>, vector<1x160xf32>
    %34 = vector.broadcast %33 : vector<1x160xf32> to vector<128x160xf32>
    %35 = arith.mulf %32, %34 : vector<128x160xf32>
    %36 = arith.addf %31, %35 : vector<128x160xf32>
    %37 = vector.extract_strided_slice %26 {offsets = [6, 0], sizes = [128, 160], strides = [1, 1]} : vector<136x160xf32> to vector<128x160xf32>
    %c1 = arith.constant 1 : index
    %c0_21 = arith.constant 0 : index
    %38 = vector.load %arg6[%c1, %c0_21] : memref<4x160xf32, #tpu.memory_space<vmem>>, vector<1x160xf32>
    %39 = vector.broadcast %38 : vector<1x160xf32> to vector<128x160xf32>
    %40 = arith.mulf %37, %39 : vector<128x160xf32>
    %41 = arith.addf %36, %40 : vector<128x160xf32>
    %42 = vector.extract_strided_slice %26 {offsets = [7, 0], sizes = [128, 160], strides = [1, 1]} : vector<136x160xf32> to vector<128x160xf32>
    %c2 = arith.constant 2 : index
    %c0_22 = arith.constant 0 : index
    %43 = vector.load %arg6[%c2, %c0_22] : memref<4x160xf32, #tpu.memory_space<vmem>>, vector<1x160xf32>
    %44 = vector.broadcast %43 : vector<1x160xf32> to vector<128x160xf32>
    %45 = arith.mulf %42, %44 : vector<128x160xf32>
    %46 = arith.addf %41, %45 : vector<128x160xf32>
    %47 = vector.extract_strided_slice %26 {offsets = [8, 0], sizes = [128, 160], strides = [1, 1]} : vector<136x160xf32> to vector<128x160xf32>
    %c3 = arith.constant 3 : index
    %c0_23 = arith.constant 0 : index
    %48 = vector.load %arg6[%c3, %c0_23] : memref<4x160xf32, #tpu.memory_space<vmem>>, vector<1x160xf32>
    %49 = vector.broadcast %48 : vector<1x160xf32> to vector<128x160xf32>
    %50 = arith.mulf %47, %49 : vector<128x160xf32>
    %51 = arith.addf %46, %50 : vector<128x160xf32>
    %52 = arith.negf %51 : vector<128x160xf32>
    %53 = math.exp %52 : vector<128x160xf32>
    %cst_24 = arith.constant 1.000000e+00 : f32
    %54 = vector.broadcast %cst_24 : f32 to vector<128x160xf32>
    %55 = arith.addf %54, %53 : vector<128x160xf32>
    %56 = arith.divf %54, %55 : vector<128x160xf32>
    %57 = arith.mulf %51, %56 : vector<128x160xf32>
    %58 = vector.extract_strided_slice %57 {offsets = [0, 0], sizes = [128, 128], strides = [1, 1]} : vector<128x160xf32> to vector<128x128xf32>
    %59 = vector.extract_strided_slice %57 {offsets = [0, 128], sizes = [128, 16], strides = [1, 1]} : vector<128x160xf32> to vector<128x16xf32>
    %60 = vector.extract_strided_slice %57 {offsets = [0, 144], sizes = [128, 16], strides = [1, 1]} : vector<128x160xf32> to vector<128x16xf32>
    %c0_25 = arith.constant 0 : index
    %c0_26 = arith.constant 0 : index
    %61 = vector.load %arg9[%c0_25, %c0_26] : memref<1x4xf32, #tpu.memory_space<vmem>>, vector<1x4xf32>
    %62 = vector.broadcast %61 : vector<1x4xf32> to vector<128x4xf32>
    %63 = arith.addf %24, %62 : vector<128x4xf32>
    %cst_27 = arith.constant 0.000000e+00 : f32
    %64 = vector.broadcast %cst_27 : f32 to vector<128x4xf32>
    %65 = arith.maximumf %63, %64 : vector<128x4xf32>
    %66 = vector.broadcast %cst_27 : f32 to vector<128x4xf32>
    %67 = arith.subf %63, %66 : vector<128x4xf32>
    %68 = arith.cmpf one, %67, %67 : vector<128x4xf32>
    %69 = vector.broadcast %cst_27 : f32 to vector<128x4xf32>
    %70 = arith.addf %63, %69 : vector<128x4xf32>
    %71 = math.absf %67 : vector<128x4xf32>
    %cst_28 = arith.constant 0.000000e+00 : f32
    %72 = vector.broadcast %cst_28 : f32 to vector<128x4xf32>
    %73 = arith.subf %72, %71 : vector<128x4xf32>
    %74 = math.exp %73 : vector<128x4xf32>
    %75 = math.log1p %74 : vector<128x4xf32>
    %76 = arith.addf %65, %75 : vector<128x4xf32>
    %77 = arith.select %68, %70, %76 : vector<128x4xi1>, vector<128x4xf32>
    %c0_29 = arith.constant 0 : index
    %c0_30 = arith.constant 0 : index
    %78 = vector.load %arg8[%c0_29, %c0_30] : memref<1x4xf32, #tpu.memory_space<vmem>>, vector<1x4xf32>
    %79 = vector.broadcast %78 : vector<1x4xf32> to vector<128x4xf32>
    %80 = arith.mulf %77, %79 : vector<128x4xf32>
    %81 = tpu.iota {dimensions = array<i32: 0>} : vector<128x128xi32>
    %82 = tpu.iota {dimensions = array<i32: 1>} : vector<128x128xi32>
    %83 = arith.cmpi sle, %82, %81 : vector<128x128xi32>
    %84 = arith.extui %83 : vector<128x128xi1> to vector<128x128xi32>
    %85 = arith.sitofp %84 : vector<128x128xi32> to vector<128x128xf32>
    %cst_31 = arith.constant dense<0.000000e+00> : vector<128x4xf32>
    %86 = tpu.matmul %85, %80, %cst_31 {dimension_numbers = #tpu.dot_dimension_numbers<[1], [0], [0], [1], [0, 0, 1, 1], [], []>} : vector<128x128xf32>, vector<128x4xf32>, vector<128x4xf32> -> vector<128x4xf32>
    %cst_32 = arith.constant dense<0.000000e+00> : vector<4x128xf32>
    %87 = tpu.matmul %80, %85, %cst_32 {dimension_numbers = #tpu.dot_dimension_numbers<[0], [1], [1], [0], [0, 1, 1, 0], [], []>} : vector<128x4xf32>, vector<128x128xf32>, vector<4x128xf32> -> vector<4x128xf32>
    %88 = vector.extract_strided_slice %77 {offsets = [0, 0], sizes = [128, 1], strides = [1, 1]} : vector<128x4xf32> to vector<128x1xf32>
    %89 = vector.shape_cast %88 : vector<128x1xf32> to vector<128x1xf32>
    %90 = vector.broadcast %89 : vector<128x1xf32> to vector<128x32xf32>
    %91 = vector.extract_strided_slice %77 {offsets = [0, 1], sizes = [128, 1], strides = [1, 1]} : vector<128x4xf32> to vector<128x1xf32>
    %92 = vector.shape_cast %91 : vector<128x1xf32> to vector<128x1xf32>
    %93 = vector.broadcast %92 : vector<128x1xf32> to vector<128x32xf32>
    %94 = vector.extract_strided_slice %77 {offsets = [0, 2], sizes = [128, 1], strides = [1, 1]} : vector<128x4xf32> to vector<128x1xf32>
    %95 = vector.shape_cast %94 : vector<128x1xf32> to vector<128x1xf32>
    %96 = vector.broadcast %95 : vector<128x1xf32> to vector<128x32xf32>
    %97 = vector.extract_strided_slice %77 {offsets = [0, 3], sizes = [128, 1], strides = [1, 1]} : vector<128x4xf32> to vector<128x1xf32>
    %98 = vector.shape_cast %97 : vector<128x1xf32> to vector<128x1xf32>
    %99 = vector.broadcast %98 : vector<128x1xf32> to vector<128x32xf32>
    %100 = tpu.concatenate %90, %93, %96, %99 in 1 : vector<128x32xf32>, vector<128x32xf32>, vector<128x32xf32>, vector<128x32xf32> -> vector<128x128xf32>
    %101 = arith.mulf %100, %58 : vector<128x128xf32>
    %102 = arith.truncf %101 : vector<128x128xf32> to vector<128x128xbf16>
    %103 = arith.truncf %59 : vector<128x16xf32> to vector<128x16xbf16>
    %104 = arith.truncf %60 : vector<128x16xf32> to vector<128x16xbf16>
    %cst_33 = arith.constant dense<0.000000e+00> : vector<128x128xf32>
    %105 = tpu.matmul %104, %103, %cst_33 {dimension_numbers = #tpu.dot_dimension_numbers<[1], [1], [0], [0], [0, 0, 1, 0], [], []>} : vector<128x16xbf16>, vector<128x16xbf16>, vector<128x128xf32> -> vector<128x128xf32>
    %106 = vector.extract_strided_slice %86 {offsets = [0, 0], sizes = [128, 1], strides = [1, 1]} : vector<128x4xf32> to vector<128x1xf32>
    %107 = vector.extract_strided_slice %87 {offsets = [0, 0], sizes = [1, 128], strides = [1, 1]} : vector<4x128xf32> to vector<1x128xf32>
    %108 = vector.broadcast %106 : vector<128x1xf32> to vector<128x128xf32>
    %109 = vector.broadcast %107 : vector<1x128xf32> to vector<128x128xf32>
    %110 = arith.subf %108, %109 : vector<128x128xf32>
    %cst_34 = arith.constant 0.000000e+00 : f32
    %111 = vector.broadcast %cst_34 : f32 to vector<128x128xf32>
    %112 = arith.minimumf %110, %111 : vector<128x128xf32>
    %113 = math.exp %112 : vector<128x128xf32>
    %114 = arith.mulf %113, %85 : vector<128x128xf32>
    %115 = arith.mulf %114, %105 : vector<128x128xf32>
    %116 = arith.truncf %115 : vector<128x128xf32> to vector<128x128xbf16>
    %117 = vector.extract_strided_slice %102 {offsets = [0, 0], sizes = [128, 32], strides = [1, 1]} : vector<128x128xbf16> to vector<128x32xbf16>
    %cst_35 = arith.constant dense<0.000000e+00> : vector<128x32xf32>
    %118 = tpu.matmul %116, %117, %cst_35 {dimension_numbers = #tpu.dot_dimension_numbers<[1], [0], [0], [1], [0, 0, 1, 1], [], []>} : vector<128x128xbf16>, vector<128x32xbf16>, vector<128x32xf32> -> vector<128x32xf32>
    %119 = vector.extract_strided_slice %86 {offsets = [0, 1], sizes = [128, 1], strides = [1, 1]} : vector<128x4xf32> to vector<128x1xf32>
    %120 = vector.extract_strided_slice %87 {offsets = [1, 0], sizes = [1, 128], strides = [1, 1]} : vector<4x128xf32> to vector<1x128xf32>
    %121 = vector.broadcast %119 : vector<128x1xf32> to vector<128x128xf32>
    %122 = vector.broadcast %120 : vector<1x128xf32> to vector<128x128xf32>
    %123 = arith.subf %121, %122 : vector<128x128xf32>
    %cst_36 = arith.constant 0.000000e+00 : f32
    %124 = vector.broadcast %cst_36 : f32 to vector<128x128xf32>
    %125 = arith.minimumf %123, %124 : vector<128x128xf32>
    %126 = math.exp %125 : vector<128x128xf32>
    %127 = arith.mulf %126, %85 : vector<128x128xf32>
    %128 = arith.mulf %127, %105 : vector<128x128xf32>
    %129 = arith.truncf %128 : vector<128x128xf32> to vector<128x128xbf16>
    %130 = vector.extract_strided_slice %102 {offsets = [0, 32], sizes = [128, 32], strides = [1, 1]} : vector<128x128xbf16> to vector<128x32xbf16>
    %cst_37 = arith.constant dense<0.000000e+00> : vector<128x32xf32>
    %131 = tpu.matmul %129, %130, %cst_37 {dimension_numbers = #tpu.dot_dimension_numbers<[1], [0], [0], [1], [0, 0, 1, 1], [], []>} : vector<128x128xbf16>, vector<128x32xbf16>, vector<128x32xf32> -> vector<128x32xf32>
    %132 = vector.extract_strided_slice %86 {offsets = [0, 2], sizes = [128, 1], strides = [1, 1]} : vector<128x4xf32> to vector<128x1xf32>
    %133 = vector.extract_strided_slice %87 {offsets = [2, 0], sizes = [1, 128], strides = [1, 1]} : vector<4x128xf32> to vector<1x128xf32>
    %134 = vector.broadcast %132 : vector<128x1xf32> to vector<128x128xf32>
    %135 = vector.broadcast %133 : vector<1x128xf32> to vector<128x128xf32>
    %136 = arith.subf %134, %135 : vector<128x128xf32>
    %cst_38 = arith.constant 0.000000e+00 : f32
    %137 = vector.broadcast %cst_38 : f32 to vector<128x128xf32>
    %138 = arith.minimumf %136, %137 : vector<128x128xf32>
    %139 = math.exp %138 : vector<128x128xf32>
    %140 = arith.mulf %139, %85 : vector<128x128xf32>
    %141 = arith.mulf %140, %105 : vector<128x128xf32>
    %142 = arith.truncf %141 : vector<128x128xf32> to vector<128x128xbf16>
    %143 = vector.extract_strided_slice %102 {offsets = [0, 64], sizes = [128, 32], strides = [1, 1]} : vector<128x128xbf16> to vector<128x32xbf16>
    %cst_39 = arith.constant dense<0.000000e+00> : vector<128x32xf32>
    %144 = tpu.matmul %142, %143, %cst_39 {dimension_numbers = #tpu.dot_dimension_numbers<[1], [0], [0], [1], [0, 0, 1, 1], [], []>} : vector<128x128xbf16>, vector<128x32xbf16>, vector<128x32xf32> -> vector<128x32xf32>
    %145 = vector.extract_strided_slice %86 {offsets = [0, 3], sizes = [128, 1], strides = [1, 1]} : vector<128x4xf32> to vector<128x1xf32>
    %146 = vector.extract_strided_slice %87 {offsets = [3, 0], sizes = [1, 128], strides = [1, 1]} : vector<4x128xf32> to vector<1x128xf32>
    %147 = vector.broadcast %145 : vector<128x1xf32> to vector<128x128xf32>
    %148 = vector.broadcast %146 : vector<1x128xf32> to vector<128x128xf32>
    %149 = arith.subf %147, %148 : vector<128x128xf32>
    %cst_40 = arith.constant 0.000000e+00 : f32
    %150 = vector.broadcast %cst_40 : f32 to vector<128x128xf32>
    %151 = arith.minimumf %149, %150 : vector<128x128xf32>
    %152 = math.exp %151 : vector<128x128xf32>
    %153 = arith.mulf %152, %85 : vector<128x128xf32>
    %154 = arith.mulf %153, %105 : vector<128x128xf32>
    %155 = arith.truncf %154 : vector<128x128xf32> to vector<128x128xbf16>
    %156 = vector.extract_strided_slice %102 {offsets = [0, 96], sizes = [128, 32], strides = [1, 1]} : vector<128x128xbf16> to vector<128x32xbf16>
    %cst_41 = arith.constant dense<0.000000e+00> : vector<128x32xf32>
    %157 = tpu.matmul %155, %156, %cst_41 {dimension_numbers = #tpu.dot_dimension_numbers<[1], [0], [0], [1], [0, 0, 1, 1], [], []>} : vector<128x128xbf16>, vector<128x32xbf16>, vector<128x32xf32> -> vector<128x32xf32>
    %158 = tpu.concatenate %118, %131, %144, %157 in 1 : vector<128x32xf32>, vector<128x32xf32>, vector<128x32xf32>, vector<128x32xf32> -> vector<128x128xf32>
    %c0_42 = arith.constant 0 : index
    %c0_43 = arith.constant 0 : index
    %159 = vector.load %arg10[%c0_42, %c0_43] : memref<1x128xf32, #tpu.memory_space<vmem>>, vector<1x128xf32>
    %160 = vector.broadcast %159 : vector<1x128xf32> to vector<128x128xf32>
    %161 = arith.mulf %160, %58 : vector<128x128xf32>
    %162 = arith.addf %158, %161 : vector<128x128xf32>
    %cst_44 = arith.constant dense<0.000000e+00> : vector<4xf32>
    %163 = vector.multi_reduction <add>, %80, %cst_44 [0] : vector<128x4xf32> to vector<4xf32>
    %164 = vector.shape_cast %163 : vector<4xf32> to vector<1x4xf32>
    %165 = math.exp %86 : vector<128x4xf32>
    %166 = vector.broadcast %164 : vector<1x4xf32> to vector<128x4xf32>
    %167 = arith.subf %166, %86 : vector<128x4xf32>
    %168 = math.exp %167 : vector<128x4xf32>
    %169 = math.exp %164 : vector<1x4xf32>
    %c0_45 = arith.constant 0 : index
    %c0_46 = arith.constant 0 : index
    %170 = vector.load %arg19[%c0_45, %c0_46] : memref<16x128xf32, #tpu.memory_space<vmem>>, vector<16x128xf32>
    %171 = vector.extract_strided_slice %165 {offsets = [0, 0], sizes = [128, 1], strides = [1, 1]} : vector<128x4xf32> to vector<128x1xf32>
    %172 = vector.shape_cast %171 : vector<128x1xf32> to vector<128x1xf32>
    %173 = vector.broadcast %172 : vector<128x1xf32> to vector<128x32xf32>
    %174 = vector.extract_strided_slice %165 {offsets = [0, 1], sizes = [128, 1], strides = [1, 1]} : vector<128x4xf32> to vector<128x1xf32>
    %175 = vector.shape_cast %174 : vector<128x1xf32> to vector<128x1xf32>
    %176 = vector.broadcast %175 : vector<128x1xf32> to vector<128x32xf32>
    %177 = vector.extract_strided_slice %165 {offsets = [0, 2], sizes = [128, 1], strides = [1, 1]} : vector<128x4xf32> to vector<128x1xf32>
    %178 = vector.shape_cast %177 : vector<128x1xf32> to vector<128x1xf32>
    %179 = vector.broadcast %178 : vector<128x1xf32> to vector<128x32xf32>
    %180 = vector.extract_strided_slice %165 {offsets = [0, 3], sizes = [128, 1], strides = [1, 1]} : vector<128x4xf32> to vector<128x1xf32>
    %181 = vector.shape_cast %180 : vector<128x1xf32> to vector<128x1xf32>
    %182 = vector.broadcast %181 : vector<128x1xf32> to vector<128x32xf32>
    %183 = tpu.concatenate %173, %176, %179, %182 in 1 : vector<128x32xf32>, vector<128x32xf32>, vector<128x32xf32>, vector<128x32xf32> -> vector<128x128xf32>
    %184 = arith.truncf %170 : vector<16x128xf32> to vector<16x128xbf16>
    %cst_47 = arith.constant dense<0.000000e+00> : vector<128x128xf32>
    %185 = tpu.matmul %104, %184, %cst_47 {dimension_numbers = #tpu.dot_dimension_numbers<[1], [0], [0], [1], [0, 0, 1, 1], [], []>} : vector<128x16xbf16>, vector<16x128xbf16>, vector<128x128xf32> -> vector<128x128xf32>
    %186 = arith.mulf %183, %185 : vector<128x128xf32>
    %187 = arith.addf %162, %186 : vector<128x128xf32>
    %188 = vector.extract_strided_slice %168 {offsets = [0, 0], sizes = [128, 1], strides = [1, 1]} : vector<128x4xf32> to vector<128x1xf32>
    %189 = vector.shape_cast %188 : vector<128x1xf32> to vector<128x1xf32>
    %190 = vector.broadcast %189 : vector<128x1xf32> to vector<128x32xf32>
    %191 = vector.extract_strided_slice %168 {offsets = [0, 1], sizes = [128, 1], strides = [1, 1]} : vector<128x4xf32> to vector<128x1xf32>
    %192 = vector.shape_cast %191 : vector<128x1xf32> to vector<128x1xf32>
    %193 = vector.broadcast %192 : vector<128x1xf32> to vector<128x32xf32>
    %194 = vector.extract_strided_slice %168 {offsets = [0, 2], sizes = [128, 1], strides = [1, 1]} : vector<128x4xf32> to vector<128x1xf32>
    %195 = vector.shape_cast %194 : vector<128x1xf32> to vector<128x1xf32>
    %196 = vector.broadcast %195 : vector<128x1xf32> to vector<128x32xf32>
    %197 = vector.extract_strided_slice %168 {offsets = [0, 3], sizes = [128, 1], strides = [1, 1]} : vector<128x4xf32> to vector<128x1xf32>
    %198 = vector.shape_cast %197 : vector<128x1xf32> to vector<128x1xf32>
    %199 = vector.broadcast %198 : vector<128x1xf32> to vector<128x32xf32>
    %200 = tpu.concatenate %190, %193, %196, %199 in 1 : vector<128x32xf32>, vector<128x32xf32>, vector<128x32xf32>, vector<128x32xf32> -> vector<128x128xf32>
    %201 = arith.mulf %200, %101 : vector<128x128xf32>
    %202 = arith.truncf %201 : vector<128x128xf32> to vector<128x128xbf16>
    %203 = vector.extract_strided_slice %169 {offsets = [0, 0], sizes = [1, 1], strides = [1, 1]} : vector<1x4xf32> to vector<1x1xf32>
    %204 = vector.shape_cast %203 : vector<1x1xf32> to vector<1x1xf32>
    %205 = vector.broadcast %204 : vector<1x1xf32> to vector<1x32xf32>
    %206 = vector.extract_strided_slice %169 {offsets = [0, 1], sizes = [1, 1], strides = [1, 1]} : vector<1x4xf32> to vector<1x1xf32>
    %207 = vector.shape_cast %206 : vector<1x1xf32> to vector<1x1xf32>
    %208 = vector.broadcast %207 : vector<1x1xf32> to vector<1x32xf32>
    %209 = vector.extract_strided_slice %169 {offsets = [0, 2], sizes = [1, 1], strides = [1, 1]} : vector<1x4xf32> to vector<1x1xf32>
    %210 = vector.shape_cast %209 : vector<1x1xf32> to vector<1x1xf32>
    %211 = vector.broadcast %210 : vector<1x1xf32> to vector<1x32xf32>
    %212 = vector.extract_strided_slice %169 {offsets = [0, 3], sizes = [1, 1], strides = [1, 1]} : vector<1x4xf32> to vector<1x1xf32>
    %213 = vector.shape_cast %212 : vector<1x1xf32> to vector<1x1xf32>
    %214 = vector.broadcast %213 : vector<1x1xf32> to vector<1x32xf32>
    %215 = tpu.concatenate %205, %208, %211, %214 in 1 : vector<1x32xf32>, vector<1x32xf32>, vector<1x32xf32>, vector<1x32xf32> -> vector<1x128xf32>
    %216 = vector.broadcast %215 : vector<1x128xf32> to vector<16x128xf32>
    %217 = arith.mulf %216, %170 : vector<16x128xf32>
    %cst_48 = arith.constant dense<0.000000e+00> : vector<16x128xf32>
    %218 = tpu.matmul %103, %202, %cst_48 {dimension_numbers = #tpu.dot_dimension_numbers<[0], [0], [1], [1], [0, 1, 1, 1], [], []>} : vector<128x16xbf16>, vector<128x128xbf16>, vector<16x128xf32> -> vector<16x128xf32>
    %219 = arith.addf %217, %218 : vector<16x128xf32>
    %c0_49 = arith.constant 0 : index
    %c0_50 = arith.constant 0 : index
    %220 = vector.load %arg19[%c0_49, %c0_50] : memref<16x128xf32, #tpu.memory_space<vmem>>, vector<16x128xf32>
    tpu.vector_store %arg19[%c0_49, %c0_50], %219 {strides = array<i32>} : memref<16x128xf32, #tpu.memory_space<vmem>>, vector<16x128xf32>,
    %221 = arith.negf %20 : vector<128x128xf32>
    %222 = math.exp %221 : vector<128x128xf32>
    %cst_51 = arith.constant 1.000000e+00 : f32
    %223 = vector.broadcast %cst_51 : f32 to vector<128x128xf32>
    %224 = arith.addf %223, %222 : vector<128x128xf32>
    %225 = arith.divf %223, %224 : vector<128x128xf32>
    %226 = arith.mulf %20, %225 : vector<128x128xf32>
    %227 = arith.mulf %187, %226 : vector<128x128xf32>
    %228 = arith.mulf %227, %227 : vector<128x128xf32>
    %cst_52 = arith.constant dense<0.000000e+00> : vector<128xf32>
    %229 = vector.multi_reduction <add>, %228, %cst_52 [1] : vector<128x128xf32> to vector<128xf32>
    %230 = vector.shape_cast %229 : vector<128xf32> to vector<128x1xf32>
    %cst_53 = arith.constant 1.280000e+02 : f32
    %231 = vector.broadcast %cst_53 : f32 to vector<128x1xf32>
    %232 = arith.divf %230, %231 : vector<128x1xf32>
    %cst_54 = arith.constant 9.99999974E-6 : f32
    %233 = vector.broadcast %cst_54 : f32 to vector<128x1xf32>
    %234 = arith.addf %232, %233 : vector<128x1xf32>
    %235 = math.rsqrt %234 : vector<128x1xf32>
    %236 = vector.broadcast %235 : vector<128x1xf32> to vector<128x128xf32>
    %237 = arith.mulf %227, %236 : vector<128x128xf32>
    %c0_55 = arith.constant 0 : index
    %c0_56 = arith.constant 0 : index
    %238 = vector.load %arg11[%c0_55, %c0_56] : memref<1x128xf32, #tpu.memory_space<vmem>>, vector<1x128xf32>
    %239 = vector.broadcast %238 : vector<1x128xf32> to vector<128x128xf32>
    %240 = arith.mulf %237, %239 : vector<128x128xf32>
    %241 = arith.truncf %240 : vector<128x128xf32> to vector<128x128xbf16>
    %c0_57 = arith.constant 0 : index
    %c0_58 = arith.constant 0 : index
    %242 = vector.load %arg12[%c0_57, %c0_58] : memref<128x64xbf16, #tpu.memory_space<vmem>>, vector<128x64xbf16>
    %cst_59 = arith.constant dense<0.000000e+00> : vector<128x64xf32>
    %243 = tpu.matmul %241, %242, %cst_59 {dimension_numbers = #tpu.dot_dimension_numbers<[1], [0], [0], [1], [0, 0, 1, 1], [], []>} : vector<128x128xbf16>, vector<128x64xbf16>, vector<128x64xf32> -> vector<128x64xf32>
    %244 = arith.addf %4, %243 : vector<128x64xf32>
    %245 = arith.mulf %244, %244 : vector<128x64xf32>
    %cst_60 = arith.constant dense<0.000000e+00> : vector<128xf32>
    %246 = vector.multi_reduction <add>, %245, %cst_60 [1] : vector<128x64xf32> to vector<128xf32>
    %247 = vector.shape_cast %246 : vector<128xf32> to vector<128x1xf32>
    %cst_61 = arith.constant 6.400000e+01 : f32
    %248 = vector.broadcast %cst_61 : f32 to vector<128x1xf32>
    %249 = arith.divf %247, %248 : vector<128x1xf32>
    %cst_62 = arith.constant 9.99999997E-7 : f32
    %250 = vector.broadcast %cst_62 : f32 to vector<128x1xf32>
    %251 = arith.addf %249, %250 : vector<128x1xf32>
    %252 = math.rsqrt %251 : vector<128x1xf32>
    %253 = vector.broadcast %252 : vector<128x1xf32> to vector<128x64xf32>
    %254 = arith.mulf %244, %253 : vector<128x64xf32>
    %c0_63 = arith.constant 0 : index
    %c0_64 = arith.constant 0 : index
    %255 = vector.load %arg13[%c0_63, %c0_64] : memref<1x64xf32, #tpu.memory_space<vmem>>, vector<1x64xf32>
    %256 = vector.broadcast %255 : vector<1x64xf32> to vector<128x64xf32>
    %257 = arith.mulf %254, %256 : vector<128x64xf32>
    %258 = arith.truncf %257 : vector<128x64xf32> to vector<128x64xbf16>
    %c0_65 = arith.constant 0 : index
    %c0_66 = arith.constant 0 : index
    %259 = vector.load %arg14[%c0_65, %c0_66] : memref<64x256xbf16, #tpu.memory_space<vmem>>, vector<64x256xbf16>
    %cst_67 = arith.constant dense<0.000000e+00> : vector<128x256xf32>
    %260 = tpu.matmul %258, %259, %cst_67 {dimension_numbers = #tpu.dot_dimension_numbers<[1], [0], [0], [1], [0, 0, 1, 1], [], []>} : vector<128x64xbf16>, vector<64x256xbf16>, vector<128x256xf32> -> vector<128x256xf32>
    %c0_68 = arith.constant 0 : index
    %c0_69 = arith.constant 0 : index
    %261 = vector.load %arg15[%c0_68, %c0_69] : memref<1x256xf32, #tpu.memory_space<vmem>>, vector<1x256xf32>
    %262 = vector.broadcast %261 : vector<1x256xf32> to vector<128x256xf32>
    %263 = arith.addf %260, %262 : vector<128x256xf32>
    %264 = arith.negf %263 : vector<128x256xf32>
    %265 = math.exp %264 : vector<128x256xf32>
    %cst_70 = arith.constant 1.000000e+00 : f32
    %266 = vector.broadcast %cst_70 : f32 to vector<128x256xf32>
    %267 = arith.addf %266, %265 : vector<128x256xf32>
    %268 = arith.divf %266, %267 : vector<128x256xf32>
    %269 = arith.mulf %263, %268 : vector<128x256xf32>
    %270 = arith.truncf %269 : vector<128x256xf32> to vector<128x256xbf16>
    %c0_71 = arith.constant 0 : index
    %c0_72 = arith.constant 0 : index
    %271 = vector.load %arg16[%c0_71, %c0_72] : memref<256x64xbf16, #tpu.memory_space<vmem>>, vector<256x64xbf16>
    %cst_73 = arith.constant dense<0.000000e+00> : vector<128x64xf32>
    %272 = tpu.matmul %270, %271, %cst_73 {dimension_numbers = #tpu.dot_dimension_numbers<[1], [0], [0], [1], [0, 0, 1, 1], [], []>} : vector<128x256xbf16>, vector<256x64xbf16>, vector<128x64xf32> -> vector<128x64xf32>
    %273 = arith.addf %244, %272 : vector<128x64xf32>
    %c0_74 = arith.constant 0 : index
    %c0_75 = arith.constant 0 : index
    %274 = vector.load %arg17[%c0_74, %c0_75] : memref<1x64xf32, #tpu.memory_space<vmem>>, vector<1x64xf32>
    %275 = vector.broadcast %274 : vector<1x64xf32> to vector<128x64xf32>
    %276 = arith.addf %273, %275 : vector<128x64xf32>
    %c0_76 = arith.constant 0 : index
    %c0_77 = arith.constant 0 : index
    %c0_78 = arith.constant 0 : index
    %277 = vector.load %arg18[%c0_76, %c0_77, %c0_78] : memref<1x128x64xf32, #tpu.memory_space<vmem>>, vector<1x128x64xf32>
    %278 = vector.shape_cast %277 : vector<1x128x64xf32> to vector<128x64xf32>
    %279 = vector.shape_cast %276 : vector<128x64xf32> to vector<1x128x64xf32>
    tpu.vector_store %arg18[%c0_76, %c0_77, %c0_78], %279 {strides = array<i32>} : memref<1x128x64xf32, #tpu.memory_space<vmem>>, vector<1x128x64xf32>,
    return
  }
  func.func @transform_0(%arg0: i32, %arg1: i32) -> (i32, i32, i32) {
    %c0_i32 = arith.constant 0 : i32
    %c0_i32_0 = arith.constant 0 : i32
    return %arg0, %arg1, %c0_i32 : i32, i32, i32
  }
  func.func @transform_1(%arg0: i32, %arg1: i32) -> (i32, i32) {
    %c0_i32 = arith.constant 0 : i32
    %c0_i32_0 = arith.constant 0 : i32
    %c0_i32_1 = arith.constant 0 : i32
    return %c0_i32, %c0_i32_0 : i32, i32
  }
  func.func @transform_2(%arg0: i32, %arg1: i32) -> (i32, i32) {
    %c0_i32 = arith.constant 0 : i32
    %c0_i32_0 = arith.constant 0 : i32
    %c0_i32_1 = arith.constant 0 : i32
    return %c0_i32, %c0_i32_0 : i32, i32
  }
  func.func @transform_3(%arg0: i32, %arg1: i32) -> (i32, i32) {
    %c0_i32 = arith.constant 0 : i32
    %c0_i32_0 = arith.constant 0 : i32
    %c0_i32_1 = arith.constant 0 : i32
    return %c0_i32, %c0_i32_0 : i32, i32
  }
  func.func @transform_4(%arg0: i32, %arg1: i32) -> (i32, i32) {
    %c0_i32 = arith.constant 0 : i32
    %c0_i32_0 = arith.constant 0 : i32
    %c0_i32_1 = arith.constant 0 : i32
    return %c0_i32, %c0_i32_0 : i32, i32
  }
  func.func @transform_5(%arg0: i32, %arg1: i32) -> (i32, i32) {
    %c0_i32 = arith.constant 0 : i32
    %c0_i32_0 = arith.constant 0 : i32
    %c0_i32_1 = arith.constant 0 : i32
    return %c0_i32, %c0_i32_0 : i32, i32
  }
  func.func @transform_6(%arg0: i32, %arg1: i32) -> (i32, i32) {
    %c0_i32 = arith.constant 0 : i32
    %c0_i32_0 = arith.constant 0 : i32
    %c0_i32_1 = arith.constant 0 : i32
    return %c0_i32, %c0_i32_0 : i32, i32
  }
  func.func @transform_7(%arg0: i32, %arg1: i32) -> (i32, i32) {
    %c0_i32 = arith.constant 0 : i32
    %c0_i32_0 = arith.constant 0 : i32
    %c0_i32_1 = arith.constant 0 : i32
    return %c0_i32, %c0_i32_0 : i32, i32
  }
  func.func @transform_8(%arg0: i32, %arg1: i32) -> (i32, i32) {
    %c0_i32 = arith.constant 0 : i32
    %c0_i32_0 = arith.constant 0 : i32
    %c0_i32_1 = arith.constant 0 : i32
    return %c0_i32, %c0_i32_0 : i32, i32
  }
  func.func @transform_9(%arg0: i32, %arg1: i32) -> (i32, i32) {
    %c0_i32 = arith.constant 0 : i32
    %c0_i32_0 = arith.constant 0 : i32
    %c0_i32_1 = arith.constant 0 : i32
    return %c0_i32, %c0_i32_0 : i32, i32
  }
  func.func @transform_10(%arg0: i32, %arg1: i32) -> (i32, i32) {
    %c0_i32 = arith.constant 0 : i32
    %c0_i32_0 = arith.constant 0 : i32
    %c0_i32_1 = arith.constant 0 : i32
    return %c0_i32, %c0_i32_0 : i32, i32
  }
  func.func @transform_11(%arg0: i32, %arg1: i32) -> (i32, i32) {
    %c0_i32 = arith.constant 0 : i32
    %c0_i32_0 = arith.constant 0 : i32
    %c0_i32_1 = arith.constant 0 : i32
    return %c0_i32, %c0_i32_0 : i32, i32
  }
  func.func @transform_12(%arg0: i32, %arg1: i32) -> (i32, i32) {
    %c0_i32 = arith.constant 0 : i32
    %c0_i32_0 = arith.constant 0 : i32
    %c0_i32_1 = arith.constant 0 : i32
    return %c0_i32, %c0_i32_0 : i32, i32
  }
  func.func @transform_13(%arg0: i32, %arg1: i32) -> (i32, i32) {
    %c0_i32 = arith.constant 0 : i32
    %c0_i32_0 = arith.constant 0 : i32
    %c0_i32_1 = arith.constant 0 : i32
    return %c0_i32, %c0_i32_0 : i32, i32
  }
  func.func @transform_14(%arg0: i32, %arg1: i32) -> (i32, i32) {
    %c0_i32 = arith.constant 0 : i32
    %c0_i32_0 = arith.constant 0 : i32
    %c0_i32_1 = arith.constant 0 : i32
    return %c0_i32, %c0_i32_0 : i32, i32
  }
  func.func @transform_15(%arg0: i32, %arg1: i32) -> (i32, i32) {
    %c0_i32 = arith.constant 0 : i32
    %c0_i32_0 = arith.constant 0 : i32
    %c0_i32_1 = arith.constant 0 : i32
    return %c0_i32, %c0_i32_0 : i32, i32
  }
  func.func @transform_16(%arg0: i32, %arg1: i32) -> (i32, i32, i32) {
    %c0_i32 = arith.constant 0 : i32
    %c0_i32_0 = arith.constant 0 : i32
    return %arg0, %arg1, %c0_i32 : i32, i32, i32
  }
}

</mosaic_0001>

<bundles_post_ra>
// kernel: mpts_block_forward.1
= control target key start
LH: loop header
LB: loop body
LE: loop exit
PB: predicated region body
PF: predicated region fallthrough
CT: control target
= control target key end

     0   :  { %s9942_s21 = smov 0   ;;  %s9944_s22 = smov 0   ;;  %s17509_s0 = inlined_call_operand.vmem [shape: f32[2,256,64], index: 0, kind: input, shape index: {}]   ;;  %s17510_s1 = inlined_call_operand.vmem [shape: f32[1,64], index: 1, kind: input, shape index: {}]   ;;  %s17511_s2 = inlined_call_operand.vmem [shape: bf16[64,128], index: 2, kind: input, shape index: {}]   ;;  %s17512_s3 = inlined_call_operand.vmem [shape: bf16[64,164], index: 3, kind: input, shape index: {}]   ;;  %s17513_s4 = inlined_call_operand.vmem [shape: f32[4,160], index: 4, kind: input, shape index: {}]   ;;  %s17514_s5 = inlined_call_operand.vmem [shape: f32[1,160], index: 5, kind: input, shape index: {}]   ;;  %s17515_s6 = inlined_call_operand.vmem [shape: f32[1,4], index: 6, kind: input, shape index: {}]   ;;  %s17516_s7 = inlined_call_operand.vmem [shape: f32[1,4], index: 7, kind: input, shape index: {}]   ;;  %s17517_s8 = inlined_call_operand.vmem [shape: f32[1,128], index: 8, kind: input, shape index: {}]   ;;  %s17518_s9 = inlined_call_operand.vmem [shape: f32[1,128], index: 9, kind: input, shape index: {}]   ;;  %s17519_s10 = inlined_call_operand.vmem [shape: bf16[128,64], index: 10, kind: input, shape index: {}]   ;;  %s17520_s11 = inlined_call_operand.vmem [shape: f32[1,64], index: 11, kind: input, shape index: {}]   ;;  %s17521_s12 = inlined_call_operand.vmem [shape: bf16[64,256], index: 12, kind: input, shape index: {}]   ;;  %s17522_s13 = inlined_call_operand.vmem [shape: f32[1,256], index: 13, kind: input, shape index: {}]   ;;  %s17523_s14 = inlined_call_operand.vmem [shape: bf16[256,64], index: 14, kind: input, shape index: {}]   ;;  %s17524_s15 = inlined_call_operand.vmem [shape: f32[1,64], index: 15, kind: input, shape index: {}]   ;;  %s17525_s16 = inlined_call_operand.vmem [shape: f32[2,256,64], index: 16, kind: output, shape index: {}]  }
   0x1   :  { %17793 = sst [smem:[#allocation150_spill]] %s17509_s0  ;;  %s9946_s23 = smov 0  }
   0x2   :  { %s9948_s24 = smov 0   ;;  %s9950_s25 = smov 0  }
   0x3 LB: > { %17794 = sst [smem:[#allocation4_spill]] %s9828_s23  ;;  %s35_s26 = sadd.s32 1, %s9828_s23  ;;  %s9836_s25 = sphi %s9950_s25, %s26_s25   ;;  %s9832_s24 = sphi %s9948_s24, %s19027_s24   ;;  %s9828_s23 = sphi %s9946_s23, %s19026_s23   ;;  %s9824_s22 = sphi %s9944_s22, %s19025_s22   ;;  %s9820_s21 = sphi %s9942_s21, %s19024_s21  }
   0x4   : > { %17795 = sst [smem:[#allocation5_spill]] %s9832_s24  ;;  %s38_s27 = sadd.s32 1, %s9832_s24 }
   0x5   : > { %p36_p0 = scmp.ge.s32.totalorder %s35_s26, 2  ;;  %p8329_p1 = scmp.ge.s32.totalorder %s9836_s25, 1 }
   0x6   : > { %p483_p2 = scmp.lt.s32.totalorder %s9836_s25, 5 }
   0x7   : > { %s19029_s26 = smov (%p36_p0, %s35_s26), 0  ;;  %s19031_s27 = smov (!%p36_p0, %s38_s27), %s9832_s24 }
   0x8   : > { %17796 = sst [smem:[#allocation6_spill]] %s19029_s26  ;;  %p484_p3 = pnand %p8329_p1, %p483_p2 }
   0x9   : > { %p40_p4 = scmp.ge.s32.totalorder %s19031_s27, 2 }
   0xa   : > { %487 = sbr.rel (%p484_p3) target bundleno = 2696 (0xa88), region = 84 }
   0xb   : > { %s19033_s27 = smov (%p40_p4, %s19031_s27), 0 }
   0xf   : > { %s8330_s28 = sshll.u32 %s9820_s21, 4  ;;  %p542_p5 = scmp.lt.s32.totalorder %s9824_s22, 1 }
  0x10   : > { %p544_p6 = scmp.lt.s32.totalorder %s8330_s28, 31  ;;  %s17797_s19 = sld [smem:[#allocation150_spill]] }
  0x11   : > { %s19035_s22 = smov (!%p542_p5, %s9824_s22), 1  ;;  %p8336_p7 = scmp.ne.s32.totalorder %s9820_s21, 0 }
  0x12   : > { %s19037_s28 = smov (!%p544_p6, %s8330_s28), 31  ;;  %s8331_s29 = sshll.u32 %s19035_s22, 5 }
  0x13   : > { %s547_s30 = sadd.s32 %s8331_s29, %s19037_s28  ;;  %565 = sbr.rel (%p8336_p7) target bundleno = 29 (0x1d), region = 88 }
  0x14   : > { %s8332_s0 = sshll.u32 %s547_s30, 3 }
  0x15   : > { %s9980_s23 = scalar_lea.vmem %s17525_s16, %s8332_s0 }
  0x16   : > { %s9975_s20 = scalar_lea.vmem %s17797_s19, %s8332_s0 }
  0x18   : > { %v9838_v0 = vmov 0.0   ;;  %vm569_vm0 = vcmask 261120  }
  0x19   : > { %566 = vst [vmem:[#allocation2] sm:$0xff] %v9838_v0 }
  0x1a   : > { %567 = vst [vmem:[#allocation2 + $0x8] sm:$0xff] %v9838_v0 }
  0x1b   : > { %568 = vst [vmem:[#allocation3] sm:$0xff] %v9838_v0 }
  0x1c   : > { %570 = vst.msk [vmem:[#allocation3 + $0x8] sm:$0xff] %vm569_vm0, %v9838_v0 }
  0x1d PF: > { %v9983_v1 = vld [vmem:[%s9975_s20] sm:$0xff]  ;;  %vm17711_vm1 = vcmask 523264   ;;  %v9986_v2 = vld [vmem:[%s9975_s20 + $0x10] sm:$0xff]  ;;  %v9996_v6 = vld [vmem:[%s9975_s20 + $0x8] sm:$0xff]  ;;  %v9839_v49 = vmov 64.0   ;;  %s9840_s18 = smov 32  }
  0x1e   : > { %v587_v3 = vmul.f32 %v9983_v1, %v9983_v1  ;;  %v589_v4 = vmul.f32 %v9986_v2, %v9986_v2  ;;  %v9993_v5 = vld [vmem:[%s9975_s20 + $0x20] sm:$0xff]  ;;  %v9999_v7 = vld [vmem:[%s9975_s20 + $0x18] sm:$0xff]  ;;  %v10006_v11 = vld [vmem:[%s9975_s20 + $0x28] sm:$0xff]  ;;  %v588_v13 = vmul.f32 %v9996_v6, %v9996_v6  ;;  %9092 = vrcp.f32 %v9839_v49  ;;  %s9844_s26 = smov 96   ;;  %s9846_s28 = smov 112  }
  0x1f   : > { %v591_v8 = vmul.f32 %v9993_v5, %v9993_v5  ;;  %v590_v14 = vmul.f32 %v9999_v7, %v9999_v7  ;;  %v592_v15 = vmul.f32 %v10006_v11, %v10006_v11  ;;  %v10019_v19 = vld [vmem:[%s9975_s20 + $0x30] sm:$0xff]  ;;  %v10022_v20 = vld [vmem:[%s9975_s20 + $0x38] sm:$0xff]  ;;  %v10025_v21 = vld [vmem:[%s9975_s20 + $0x40] sm:$0xff]  ;;  %s9847_s0 = smov 64  }
  0x20   : > { %v604_v9 = vsel %vm17711_vm1, %v587_v3, 0.0  ;;  %v610_v10 = vsel %vm17711_vm1, %v589_v4, 0.0  ;;  %v607_v16 = vsel %vm17711_vm1, %v588_v13, 0.0  ;;  %v593_v22 = vmul.f32 %v10019_v19, %v10019_v19  ;;  %v10037_v28 = vld [vmem:[%s9975_s20 + $0x48] sm:$0xff]  ;;  %v10040_v29 = vld [vmem:[%s9975_s20 + $0x50] sm:$0xff]  ;;  %v10043_v30 = vld [vmem:[%s9975_s20 + $0x58] sm:$0xff] }
  0x21   : > { %605 = vadd.xlane.f32.xlu0 %v604_v9  ;;  %611 = vadd.xlane.f32.xlu1 %v610_v10  ;;  %v616_v12 = vsel %vm17711_vm1, %v591_v8, 0.0  ;;  %v613_v17 = vsel %vm17711_vm1, %v590_v14, 0.0  ;;  %v619_v18 = vsel %vm17711_vm1, %v592_v15, 0.0  ;;  %v594_v23 = vmul.f32 %v10022_v20, %v10022_v20  ;;  %v10055_v37 = vld [vmem:[%s9975_s20 + $0x68] sm:$0xff]  ;;  %v10058_v38 = vld [vmem:[%s9975_s20 + $0x60] sm:$0xff]  ;;  %v10067_v43 = vld [vmem:[%s9975_s20 + $0x70] sm:$0xff] }
  0x22   : > { %617 = vadd.xlane.f32.xlu2 %v616_v12  ;;  %v595_v24 = vmul.f32 %v10025_v21, %v10025_v21  ;;  %v622_v25 = vsel %vm17711_vm1, %v593_v22, 0.0  ;;  %v596_v31 = vmul.f32 %v10037_v28, %v10037_v28  ;;  %v597_v32 = vmul.f32 %v10040_v29, %v10040_v29  ;;  %v10070_v44 = vld [vmem:[%s9975_s20 + $0x78] sm:$0xff]  ;;  %v8387_v53 = vld [vmem:[%s17512_s3 + $0x30] sm:$0xf]  ;;  %v8714_v55 = vld [vmem:[%s17512_s3 + $0x34] sm:$0xf] }
  0x23   : > { %v625_v26 = vsel %vm17711_vm1, %v594_v23, 0.0  ;;  %v598_v33 = vmul.f32 %v10043_v30, %v10043_v30  ;;  %v600_v39 = vmul.f32 %v10055_v37, %v10055_v37  ;;  %v599_v40 = vmul.f32 %v10058_v38, %v10058_v38  ;;  %v8715_v54 = vld [vmem:[%s17512_s3 + $0x34] sm:$0xf0]  ;;  %v8389_v58 = vld [vmem:[%s17512_s3 + $0x38] sm:$0xf0]  ;;  %v8706_v0 = vld [vmem:[%s17511_s2 + $0x10] sm:$0xff] }
  0x24   : > { %v628_v27 = vsel %vm17711_vm1, %v595_v24, 0.0  ;;  %v631_v34 = vsel %vm17711_vm1, %v596_v31, 0.0  ;;  %v634_v35 = vsel %vm17711_vm1, %v597_v32, 0.0  ;;  %v601_v45 = vmul.f32 %v10067_v43, %v10067_v43  ;;  %v9093_v50 = vpop.eup %9092  ;;  %v8707_v56 = vld [vmem:[%s17511_s2 + $0x18] sm:$0xff]  ;;  %v8379_v61 = vld [vmem:[%s17512_s3 + $0x20] sm:$0xf] }
  0x25   : > { %v637_v36 = vsel %vm17711_vm1, %v598_v33, 0.0  ;;  %v643_v41 = vsel %vm17711_vm1, %v600_v39, 0.0  ;;  %v640_v42 = vsel %vm17711_vm1, %v599_v40, 0.0  ;;  %v602_v46 = vmul.f32 %v10070_v44, %v10070_v44  ;;  %955 = vmatpush.bf16.msra.mxu0 %v8707_v56  ;;  %v8713_v62 = vld [vmem:[%s17512_s3 + $0x24] sm:$0xf0]  ;;  %8748 = vmatpush.bf16.msra.mxu3 %v8707_v56  ;;  %v8704_v24 = vld [vmem:[%s17511_s2] sm:$0xff] }
  0x26   : > { %v646_v47 = vsel %vm17711_vm1, %v601_v45, 0.0  ;;  %v653_v51 = vmul.f32 64.0, %v9093_v50  ;;  %v8388_v57 = vor.u32 %v8715_v54, %v8387_v53  ;;  %v8392_v59 = vor.u32 %v8714_v55, %v8389_v58  ;;  %v8712_v63 = vld [vmem:[%s17512_s3 + $0x24] sm:$0xf]  ;;  %v8381_v4 = vld [vmem:[%s17512_s3 + $0x28] sm:$0xf0] }
  0x27   : > { %v649_v48 = vsel %vm17711_vm1, %v602_v46, 0.0  ;;  %v8380_v3 = vor.u32 %v8713_v62, %v8379_v61  ;;  %v8384_v8 = vor.u32 %v8712_v63, %v8381_v4  ;;  %vm657_vm2 = vweird.f32 %v9093_v50  ;;  %v8371_v10 = vld [vmem:[%s17512_s3 + $0x10] sm:$0xf]  ;;  %v8711_v12 = vld [vmem:[%s17512_s3 + $0x14] sm:$0xf0]  ;;  %v8705_v14 = vld [vmem:[%s17511_s2 + $0x8] sm:$0xff] }
  0x28   : > { %v654_v52 = vsub.f32 1.0, %v653_v51  ;;  %1052 = vmatpush.bf16.msra.mxu1 %v8388_v57  ;;  %1101 = vmatpush.bf16.msra.mxu2 %v8392_v59  ;;  %v8710_v13 = vld [vmem:[%s17512_s3 + $0x14] sm:$0xf]  ;;  %v8372_v15 = vor.u32 %v8711_v12, %v8371_v10  ;;  %v8709_v22 = vld [vmem:[%s17512_s3 + $0x4] sm:$0xf0] }
  0x29   : > { %608 = vadd.xlane.f32.xlu0 %v607_v16  ;;  %614 = vadd.xlane.f32.xlu1 %v613_v17  ;;  %v8373_v16 = vld [vmem:[%s17512_s3 + $0x18] sm:$0xf0]  ;;  %v9086_v63 = vld [vmem:[%s17516_s7] ss:$0 sm:$0xff] }
  0x2a   : > { %620 = vadd.xlane.f32.xlu2 %v619_v18  ;;  %v655_v60 = vmul.f32 %v9093_v50, %v654_v52  ;;  %956 = vmatpush.bf16.msra.mxu0 %v8706_v0  ;;  %v8376_v17 = vor.u32 %v8710_v13, %v8373_v16  ;;  %v8363_v18 = vld [vmem:[%s17512_s3] sm:$0xf] }
  0x2b   : > { %8749 = vmatpush.bf16.msra.mxu3 %v8706_v0 }
  0x2c   : > { %v656_v9 = vadd.f32 %v9093_v50, %v655_v60  ;;  %1053 = vmatpush.bf16.msra.mxu1 %v8380_v3  ;;  %1102 = vmatpush.bf16.msra.mxu2 %v8384_v8 }
  0x2e   : > { %v10129_v23 = vsel %vm657_vm2, %v9093_v50, %v656_v9  ;;  %957 = vmatpush.bf16.msra.mxu0 %v8705_v14 }
  0x2f   : > { %17798 = vst [vmem:[#allocation7_spill] sm:$0xff] %v10129_v23  ;;  %8750 = vmatpush.bf16.msra.mxu3 %v8705_v14 }
  0x30   : > { %1054 = vmatpush.bf16.msra.mxu1 %v8372_v15  ;;  %1103 = vmatpush.bf16.msra.mxu2 %v8376_v17 }
  0x31   : > { %623 = vadd.xlane.f32.xlu0 %v622_v25  ;;  %626 = vadd.xlane.f32.xlu1 %v625_v26  ;;  %v8364_v25 = vor.u32 %v8709_v22, %v8363_v18  ;;  %v8708_v26 = vld [vmem:[%s17512_s3 + $0x4] sm:$0xf] }
  0x32   : > { %629 = vadd.xlane.f32.xlu2 %v628_v27  ;;  %v8365_v27 = vld [vmem:[%s17512_s3 + $0x8] sm:$0xf0]  ;;  %958 = vmatpush.bf16.msra.mxu0 %v8704_v24 }
  0x33   : > { %v8368_v31 = vor.u32 %v8708_v26, %v8365_v27  ;;  %8751 = vmatpush.bf16.msra.mxu3 %v8704_v24  ;;  %v10179_v27 = vld [vmem:[%s17510_s1] ss:$0 sm:$0xff] }
  0x34   : > { %1055 = vmatpush.bf16.msra.mxu1 %v8364_v25 }
  0x35   : > { %1104 = vmatpush.bf16.msra.mxu2 %v8368_v31 }
  0x39   : > { %632 = vadd.xlane.f32.xlu0 %v631_v34  ;;  %635 = vadd.xlane.f32.xlu1 %v634_v35 }
  0x3a   : > { %638 = vadd.xlane.f32.xlu2 %v637_v36 }
  0x41   : > { %644 = vadd.xlane.f32.xlu1 %v643_v41  ;;  %641 = vadd.xlane.f32.xlu0 %v640_v42 }
  0x42   : > { %647 = vadd.xlane.f32.xlu2 %v646_v47 }
  0x49   : > { %650 = vadd.xlane.f32.xlu0 %v649_v48 }
  0x5a   : > { %2536 = vrot.lane.b32.xlu1 %v9086_v63, %s9840_s18 }
  0x94   : > { %v606_v32 = vpop.xlane.xlu0 %605  ;;  %v612_v33 = vpop.xlane.xlu1 %611 }
  0x95   : > { %v659_v34 = vmul.f32 %v10129_v23, %v606_v32  ;;  %v661_v36 = vmul.f32 %v10129_v23, %v612_v33  ;;  %v618_v39 = vpop.xlane.xlu2 %617 }
  0x96   : > { %v663_v56 = vmul.f32 %v10129_v23, %v618_v39 }
  0x97   : > { %v675_v35 = vadd.f32 1e-06, %v659_v34  ;;  %v10142_v40 = vadd.f32 1e-06, %v661_v36 }
  0x98   : > { %v10163_v4 = vadd.f32 1e-06, %v663_v56 }
  0x99   : > { %9094 = vrsqrt.f32 %v675_v35  ;;  %vm697_vm4 = vweird.f32 %v675_v35  ;;  %vm717_vm9 = vweird.f32 %v10142_v40 }
  0x9a   : > { %9096 = vrsqrt.f32 %v10142_v40 }
  0x9c   : > { %v609_v41 = vpop.xlane.xlu0 %608  ;;  %v615_v42 = vpop.xlane.xlu1 %614 }
  0x9d   : > { %v660_v45 = vmul.f32 %v10129_v23, %v609_v41  ;;  %v662_v46 = vmul.f32 %v10129_v23, %v615_v42  ;;  %v621_v52 = vpop.xlane.xlu2 %620 }
  0x9e   : > { %v664_v58 = vmul.f32 %v10129_v23, %v621_v52 }
  0x9f   : > { %v9095_v47 = vpop.eup %9094  ;;  %v676_v48 = vadd.f32 1e-06, %v660_v45  ;;  %v10147_v49 = vadd.f32 1e-06, %v662_v46 }
  0xa0   : > { %v692_v50 = vmul.f32 %v9095_v47, %v675_v35  ;;  %v10150_v54 = vpop.eup %9096  ;;  %vm698_vm3 = vweird.f32 %v9095_v47  ;;  %v10165_v9 = vadd.f32 1e-06, %v664_v58 }
  0xa1   : > { %9098 = vrsqrt.f32 %v676_v48  ;;  %v712_v60 = vmul.f32 %v10150_v54, %v10142_v40  ;;  %vm699_vm5 = vmor %vm697_vm4, %vm698_vm3  ;;  %vm707_vm7 = vweird.f32 %v676_v48  ;;  %vm718_vm10 = vweird.f32 %v10150_v54 }
  0xa2   : > { %v693_v51 = vmul.f32 %v9095_v47, %v692_v50  ;;  %9100 = vrsqrt.f32 %v10147_v49  ;;  %vm727_vm11 = vweird.f32 %v10147_v49  ;;  %vm10205_vm13 = vmor %vm717_vm9, %vm718_vm10 }
  0xa3   : > { %v713_v12 = vmul.f32 %v10150_v54, %v712_v60  ;;  %9102 = vrsqrt.f32 %v10163_v4 }
  0xa4   : > { %v694_v53 = vmul.f32 0.5, %v693_v51  ;;  %v624_v8 = vpop.xlane.xlu0 %623  ;;  %9104 = vrsqrt.f32 %v10165_v9  ;;  %v627_v32 = vpop.xlane.xlu1 %626 }
  0xa5   : > { %v630_v10 = vpop.xlane.xlu2 %629  ;;  %v714_v18 = vmul.f32 0.5, %v713_v12  ;;  %v665_v41 = vmul.f32 %v10129_v23, %v624_v8 }
  0xa6   : > { %v695_v55 = vsub.f32 1.5, %v694_v53  ;;  %v667_v15 = vmul.f32 %v10129_v23, %v630_v10 }
  0xa7   : > { %v9099_v57 = vpop.eup %9098  ;;  %v715_v39 = vsub.f32 1.5, %v714_v18  ;;  %v10212_v56 = vadd.f32 1e-06, %v665_v41 }
  0xa8   : > { %v10154_v59 = vpop.eup %9100  ;;  %v702_v61 = vmul.f32 %v9099_v57, %v676_v48  ;;  %v696_v0 = vmul.f32 %v9095_v47, %v695_v55  ;;  %vm708_vm6 = vweird.f32 %v9099_v57  ;;  %v10173_v25 = vadd.f32 1e-06, %v667_v15 }
  0xa9   : > { %v722_v62 = vmul.f32 %v10154_v59, %v10147_v49  ;;  %vm709_vm8 = vmor %vm707_vm7, %vm708_vm6  ;;  %v10185_v36 = vpop.eup %9102  ;;  %vm728_vm12 = vweird.f32 %v10154_v59  ;;  %v716_v52 = vmul.f32 %v10150_v54, %v715_v39  ;;  %vm747_vm7 = vweird.f32 %v10165_v9 }
  0xaa   : > { %v703_v3 = vmul.f32 %v9099_v57, %v702_v61  ;;  %v700_v17 = vsel %vm699_vm5, %v9095_v47, %v696_v0  ;;  %9106 = vrsqrt.f32 %v10173_v25  ;;  %v10189_v42 = vpop.eup %9104  ;;  %v666_v47 = vmul.f32 %v10129_v23, %v627_v32  ;;  %vm10214_vm14 = vmor %vm727_vm11, %vm728_vm12 }
  0xab   : > { %v723_v14 = vmul.f32 %v10154_v59, %v722_v62  ;;  %v851_v26 = vmul.f32 %v700_v17, %v9983_v1  ;;  %v742_v55 = vmul.f32 %v10189_v42, %v10165_v9  ;;  %v720_v10 = vsel %vm10205_vm13, %v10150_v54, %v716_v52 }
  0xac   : > { %v704_v13 = vmul.f32 0.5, %v703_v3  ;;  %v633_v33 = vpop.xlane.xlu0 %632  ;;  %v10220_v40 = vadd.f32 1e-06, %v666_v47  ;;  %v636_v61 = vpop.xlane.xlu1 %635  ;;  %vm777_vm15 = vweird.f32 %v10173_v25  ;;  %vm737_vm5 = vweird.f32 %v10163_v4 }
  0xad   : > { %v724_v24 = vmul.f32 0.5, %v723_v14  ;;  %v668_v35 = vmul.f32 %v10129_v23, %v633_v33  ;;  %v871_v45 = vmul.f32 %v10179_v27, %v851_v26  ;;  %v639_v60 = vpop.xlane.xlu2 %638  ;;  %v669_v3 = vmul.f32 %v10129_v23, %v636_v61 }
  0xae   : > { %v705_v16 = vsub.f32 1.5, %v704_v13  ;;  %v670_v0 = vmul.f32 %v10129_v23, %v639_v60  ;;  %v743_v8 = vmul.f32 %v10189_v42, %v742_v55  ;;  %vm738_vm6 = vweird.f32 %v10185_v36 }
  0xaf   : > { %v725_v1 = vsub.f32 1.5, %v724_v24  ;;  %v684_v48 = vadd.f32 1e-06, %v668_v35  ;;  %vm10281_vm10 = vmor %vm737_vm5, %vm738_vm6 }
  0xb0   : > { %v706_v22 = vmul.f32 %v9099_v57, %v705_v16  ;;  %v10198_v51 = vpop.eup %9106  ;;  %v10238_v15 = vadd.f32 1e-06, %v670_v0  ;;  %v10240_v16 = vadd.f32 1e-06, %v669_v3  ;;  %v744_v24 = vmul.f32 0.5, %v743_v8 }
  0xb1   : > { %9108 = vrsqrt.f32 %v684_v48  ;;  %v726_v49 = vmul.f32 %v10154_v59, %v725_v1  ;;  %v772_v58 = vmul.f32 %v10198_v51, %v10173_v25  ;;  %vm778_vm0 = vweird.f32 %v10198_v51 }
  0xb2   : > { %v710_v31 = vsel %vm709_vm8, %v9099_v57, %v706_v22  ;;  %9110 = vrsqrt.f32 %v10212_v56  ;;  %v853_v22 = vmul.f32 %v720_v10, %v9986_v2  ;;  %vm787_vm2 = vweird.f32 %v684_v48  ;;  %vm10255_vm4 = vmor %vm777_vm15, %vm778_vm0 }
  0xb3   : > { %v852_v34 = vmul.f32 %v710_v31, %v9996_v6  ;;  %v732_v6 = vmul.f32 %v10185_v36, %v10163_v4  ;;  %v773_v63 = vmul.f32 %v10198_v51, %v772_v58  ;;  %v730_v12 = vsel %vm10214_vm14, %v10154_v59, %v726_v49 }
  0xb4   : > { %9112 = vrsqrt.f32 %v10220_v40  ;;  %v854_v54 = vmul.f32 %v730_v12, %v9999_v7  ;;  %v873_v7 = vmul.f32 %v10179_v27, %v853_v22  ;;  %v745_v35 = vsub.f32 1.5, %v744_v24  ;;  %v645_v3 = vpop.xlane.xlu1 %644  ;;  %v642_v8 = vpop.xlane.xlu0 %641 }
  0xb5   : > { %v872_v46 = vmul.f32 %v10179_v27, %v852_v34  ;;  %v733_v62 = vmul.f32 %v10185_v36, %v732_v6  ;;  %v774_v14 = vmul.f32 0.5, %v773_v63  ;;  %9114 = vrsqrt.f32 %v10238_v15 }
  0xb6   : > { %9116 = vrsqrt.f32 %v10240_v16  ;;  %v874_v34 = vmul.f32 %v10179_v27, %v854_v54  ;;  %vm748_vm8 = vweird.f32 %v10189_v42  ;;  %v746_v55 = vmul.f32 %v10189_v42, %v745_v35 }
  0xb7   : > { %v887_v50 = vpack.c.bf16 %v872_v46, %v871_v45  ;;  %v9109_v13 = vpop.eup %9108  ;;  %v734_v18 = vmul.f32 0.5, %v733_v62  ;;  %v775_v59 = vsub.f32 1.5, %v774_v14  ;;  %vm10296_vm11 = vmor %vm747_vm7, %vm748_vm8  ;;  %vm807_vm12 = vweird.f32 %v10238_v15 }
  0xb8   : > { %v782_v17 = vmul.f32 %v9109_v13, %v684_v48  ;;  %v10248_v31 = vpop.eup %9110  ;;  %vm788_vm3 = vweird.f32 %v9109_v13  ;;  %v888_v53 = vpack.c.bf16 %v874_v34, %v873_v7  ;;  %vm797_vm14 = vweird.f32 %v10240_v16 }
  0xb9   : > { %8353 = vmatmul.msk.bf16.vlgmr.msra.gmra.mxu0 %vm17711_vm1, %v887_v50  ;;  %8393 = vmatmul.msk.bf16.vlgmr.msra.gmra.mxu1 %vm17711_vm1, %v887_v50  ;;  %v735_v2 = vsub.f32 1.5, %v734_v18  ;;  %v776_v39 = vmul.f32 %v10198_v51, %v775_v59  ;;  %vm10266_vm9 = vmor %vm787_vm2, %vm788_vm3  ;;  %v752_v47 = vmul.f32 %v10248_v31, %v10212_v56  ;;  %v671_v18 = vmul.f32 %v10129_v23, %v642_v8 }
  0xba   : > { %8401 = vmatmul.msk.bf16.vlgmr.msra.gmra.mxu2 %vm17711_vm1, %v887_v50  ;;  %v783_v26 = vmul.f32 %v9109_v13, %v782_v17  ;;  %v10250_v33 = vpop.eup %9112  ;;  %vm757_vm0 = vweird.f32 %v10212_v56  ;;  %vm758_vm2 = vweird.f32 %v10248_v31  ;;  %vm767_vm3 = vweird.f32 %v10220_v40 }
  0xbb   : > { %v10259_v41 = vpop.eup %9114  ;;  %v762_v6 = vmul.f32 %v10250_v33, %v10220_v40  ;;  %v736_v52 = vmul.f32 %v10185_v36, %v735_v2  ;;  %v780_v58 = vsel %vm10255_vm4, %v10198_v51, %v776_v39  ;;  %v753_v0 = vmul.f32 %v10248_v31, %v752_v47  ;;  %vm10347_vm7 = vmor %vm757_vm0, %vm758_vm2 }
  0xbc   : > { %v784_v32 = vmul.f32 0.5, %v783_v26  ;;  %v10270_v46 = vpop.eup %9116  ;;  %v802_v50 = vmul.f32 %v10259_v41, %v10238_v15  ;;  %v859_v63 = vmul.f32 %v780_v58, %v10025_v21  ;;  %v672_v21 = vmul.f32 %v10129_v23, %v645_v3 }
  0xbd   : > { %v792_v48 = vmul.f32 %v10270_v46, %v10240_v16  ;;  %v763_v9 = vmul.f32 %v10250_v33, %v762_v6  ;;  %v740_v10 = vsel %vm10281_vm10, %v10185_v36, %v736_v52  ;;  %v754_v24 = vmul.f32 0.5, %v753_v0 }
  0xbe   : > { %v785_v25 = vsub.f32 1.5, %v784_v32  ;;  %v803_v57 = vmul.f32 %v10259_v41, %v802_v50  ;;  %v879_v12 = vmul.f32 %v10179_v27, %v859_v63  ;;  %v10320_v54 = vadd.f32 1e-06, %v672_v21 }
  0xbf   : > { %v793_v62 = vmul.f32 %v10270_v46, %v792_v48  ;;  %v764_v36 = vmul.f32 0.5, %v763_v9  ;;  %v10322_v59 = vadd.f32 1e-06, %v671_v18  ;;  %v855_v26 = vmul.f32 %v740_v10, %v9993_v5 }
  0xc0   : > { %v786_v4 = vmul.f32 %v9109_v13, %v785_v25  ;;  %v804_v14 = vmul.f32 0.5, %v803_v57  ;;  %9118 = vrsqrt.f32 %v10320_v54  ;;  %vm808_vm13 = vweird.f32 %v10259_v41 }
  0xc1   : > { %v794_v17 = vmul.f32 0.5, %v793_v62  ;;  %9120 = vrsqrt.f32 %v10322_v59  ;;  %v755_v7 = vsub.f32 1.5, %v754_v24  ;;  %v765_v34 = vsub.f32 1.5, %v764_v36  ;;  %vm10341_vm5 = vmor %vm807_vm12, %vm808_vm13 }
  0xc2   : > { %v790_v60 = vsel %vm10266_vm9, %v9109_v13, %v786_v4  ;;  %vm798_vm15 = vweird.f32 %v10270_v46  ;;  %v875_v5 = vmul.f32 %v10179_v27, %v855_v26  ;;  %vm768_vm4 = vweird.f32 %v10250_v33 }
  0xc3   : > { %v860_v51 = vmul.f32 %v790_v60, %v10037_v28  ;;  %v750_v28 = vsel %vm10296_vm11, %v10189_v42, %v746_v55  ;;  %v805_v42 = vsub.f32 1.5, %v804_v14  ;;  %v795_v2 = vsub.f32 1.5, %v794_v17  ;;  %vm799_vm6 = vmor %vm797_vm14, %vm798_vm15  ;;  %v651_v14 = vpop.xlane.xlu0 %650 }
  0xc4   : > { %v856_v32 = vmul.f32 %v750_v28, %v10006_v11  ;;  %v756_v1 = vmul.f32 %v10248_v31, %v755_v7  ;;  %v766_v40 = vmul.f32 %v10250_v33, %v765_v34  ;;  %vm10353_vm8 = vmor %vm767_vm3, %vm768_vm4  ;;  %vm827_vm9 = vweird.f32 %v10320_v54  ;;  %v648_v28 = vpop.xlane.xlu2 %647 }
  0xc5   : > { %v880_v13 = vmul.f32 %v10179_v27, %v860_v51  ;;  %v806_v15 = vmul.f32 %v10259_v41, %v805_v42  ;;  %v796_v16 = vmul.f32 %v10270_v46, %v795_v2  ;;  %vm817_vm11 = vweird.f32 %v10322_v59 }
  0xc6   : > { %v876_v11 = vmul.f32 %v10179_v27, %v856_v32  ;;  %v9119_v39 = vpop.eup %9118  ;;  %v760_v57 = vsel %vm10347_vm7, %v10248_v31, %v756_v1  ;;  %v673_v17 = vmul.f32 %v10129_v23, %v648_v28  ;;  %v674_v18 = vmul.f32 %v10129_v23, %v651_v14 }
  0xc7   : > { %v10318_v22 = vpack.c.bf16 %v880_v13, %v879_v12  ;;  %v9121_v56 = vpop.eup %9120  ;;  %v822_v45 = vmul.f32 %v9119_v39, %v10320_v54  ;;  %v800_v52 = vsel %vm799_vm6, %v10270_v46, %v796_v16  ;;  %v770_v46 = vsel %vm10353_vm8, %v10250_v33, %v766_v40 }
  0xc8   : > { %v889_v6 = vpack.c.bf16 %v876_v11, %v875_v5  ;;  %v812_v4 = vmul.f32 %v9121_v56, %v10322_v59  ;;  %v861_v49 = vmul.f32 %v800_v52, %v10040_v29  ;;  %v857_v61 = vmul.f32 %v760_v57, %v10019_v19  ;;  %v10440_v57 = vld [vmem:[%s17513_s4] ss:$4 sm:$0x3] }
  0xc9   : > { %8354 = vmatmul.msk.bf16.gmra.mxu0 %vm17711_vm1, %v888_v53  ;;  %8394 = vmatmul.msk.bf16.gmra.mxu1 %vm17711_vm1, %v888_v53  ;;  %v823_v50 = vmul.f32 %v9119_v39, %v822_v45  ;;  %v858_v31 = vmul.f32 %v770_v46, %v10022_v20  ;;  %vm828_vm10 = vweird.f32 %v9119_v39  ;;  %vm818_vm12 = vweird.f32 %v9121_v56 }
  0xca   : > { %8402 = vmatmul.msk.bf16.gmra.mxu2 %vm17711_vm1, %v888_v53  ;;  %8357 = vmatmul.msk.bf16.vlgmr.msra.gmra.mxu3 %vm17711_vm1, %v10318_v22  ;;  %v810_v53 = vsel %vm10341_vm5, %v10259_v41, %v806_v15  ;;  %v813_v48 = vmul.f32 %v9121_v56, %v812_v4  ;;  %v9087_v41 = vld [vmem:[%s17515_s6] ss:$0 sm:$0xff]  ;;  %v881_v58 = vmul.f32 %v10179_v27, %v861_v49  ;;  %vm829_vm13 = vmor %vm827_vm9, %vm828_vm10  ;;  %v689_v24 = vadd.f32 1e-06, %v673_v17 }
  0xcb   : > { %v862_v55 = vmul.f32 %v810_v53, %v10043_v30  ;;  %v824_v60 = vmul.f32 0.5, %v823_v50  ;;  %2846 = vrot.lane.b32.xlu2 %v9087_v41, %s9840_s18  ;;  %v877_v51 = vmul.f32 %v10179_v27, %v857_v61  ;;  %v878_v0 = vmul.f32 %v10179_v27, %v858_v31  ;;  %vm819_vm14 = vmor %vm817_vm11, %vm818_vm12  ;;  %v10463_v61 = vld [vmem:[%s17514_s5] sm:$0x3] }
  0xcc   : > { %v814_v30 = vmul.f32 0.5, %v813_v48  ;;  %v690_v36 = vadd.f32 1e-06, %v674_v18  ;;  %9122 = vrsqrt.f32 %v689_v24  ;;  %vm837_vm15 = vweird.f32 %v689_v24  ;;  %v10434_v48 = vld [vmem:[%s17513_s4 + $0x1] ss:$4 sm:$0x3] }
  0xcd   : > { %v882_v29 = vmul.f32 %v10179_v27, %v862_v55  ;;  %v825_v33 = vsub.f32 1.5, %v824_v60  ;;  %v890_v3 = vpack.c.bf16 %v878_v0, %v877_v51  ;;  %v17546_v53 = vmov 34   ;;  %v10454_v60 = vld [vmem:[%s17513_s4 + $0x2] ss:$4 sm:$0x3] }
  0xce   : > { %v815_v63 = vsub.f32 1.5, %v814_v30  ;;  %9124 = vrsqrt.f32 %v690_v36  ;;  %vm847_vm2 = vweird.f32 %v690_v36  ;;  %8850 = vset.pattern.permute.xlu1 %v17546_v53  ;;  %v10443_v46 = vperm.slane %v10434_v48, 1  ;;  %v10471_v51 = vld [vmem:[%s17513_s4 + $0x3] ss:$4 sm:$0x3] }
  0xcf   : > { %v892_v62 = vpack.c.bf16 %v882_v29, %v881_v58  ;;  %v826_v9 = vmul.f32 %v9119_v39, %v825_v33  ;;  %v17544_v41 = vmov 33   ;;  %v10447_v58 = vperm.slane %v10440_v57, 1 }
  0xd0   : > { %v816_v19 = vmul.f32 %v9121_v56, %v815_v63  ;;  %17817 = vst [vmem:[#allocation8_spill] sm:$0xff] %v10443_v46  ;;  %8849 = vset.pattern.permute.xlu0 %v17544_v41  ;;  %v17541_v33 = vmov 32   ;;  %v10474_v0 = vperm.slane %v10454_v60, 1  ;;  %vm1306_vm6 = vcmask 1046528  }
  0xd1   : > { %v830_v8 = vsel %vm829_vm13, %v9119_v39, %v826_v9  ;;  %8848 = vset.pattern.permute.xlu2 %v17541_v33  ;;  %vm17703_vm7 = vcmask 1045504   ;;  %vm1722_vm8 = vcmask 1044480   ;;  %vm5088_vm13 = vcmask 294144  }
  0xd2   : > { %v820_v20 = vsel %vm819_vm14, %v9121_v56, %v816_v19  ;;  %v864_v12 = vmul.f32 %v830_v8, %v10055_v37  ;;  %v9123_v37 = vpop.eup %9122  ;;  %17818 = vst [vmem:[#allocation9_spill] sm:$0xff] %v10474_v0 }
  0xd3   : > { %v863_v10 = vmul.f32 %v820_v20, %v10058_v38  ;;  %v832_v59 = vmul.f32 %v9123_v37, %v689_v24  ;;  %vm838_vm0 = vweird.f32 %v9123_v37  ;;  %v10484_v20 = vperm.slane %v10471_v51, 1 }
  0xd4   : > { %v884_v21 = vmul.f32 %v10179_v27, %v864_v12  ;;  %v9125_v38 = vpop.eup %9124  ;;  %vm839_vm4 = vmor %vm837_vm15, %vm838_vm0 }
  0xd5   : > { %v883_v13 = vmul.f32 %v10179_v27, %v863_v10  ;;  %v842_v26 = vmul.f32 %v9125_v38, %v690_v36  ;;  %v833_v32 = vmul.f32 %v9123_v37, %v832_v59  ;;  %vm848_vm3 = vweird.f32 %v9125_v38  ;;  %17820 = vst [vmem:[#allocation11_spill] sm:$0xff] %v10484_v20 }
  0xd6   : > { %vm849_vm5 = vmor %vm847_vm2, %vm848_vm3 }
  0xd7   : > { %v893_v54 = vpack.c.bf16 %v884_v21, %v883_v13  ;;  %v843_v42 = vmul.f32 %v9125_v38, %v842_v26  ;;  %v834_v2 = vmul.f32 0.5, %v833_v32 }
  0xd9   : > { %8355 = vmatmul.msk.bf16.gmra.mxu0 %vm17711_vm1, %v889_v6  ;;  %8395 = vmatmul.msk.bf16.gmra.mxu1 %vm17711_vm1, %v889_v6  ;;  %v844_v7 = vmul.f32 0.5, %v843_v42  ;;  %v835_v34 = vsub.f32 1.5, %v834_v2 }
  0xda   : > { %8403 = vmatmul.msk.bf16.gmra.mxu2 %vm17711_vm1, %v889_v6  ;;  %8358 = vmatmul.msk.bf16.gmra.mxu3 %vm17711_vm1, %v892_v62 }
  0xdb   : > { %v845_v5 = vsub.f32 1.5, %v844_v7  ;;  %v836_v11 = vmul.f32 %v9123_v37, %v835_v34 }
  0xdd   : > { %v846_v15 = vmul.f32 %v9125_v38, %v845_v5  ;;  %v840_v35 = vsel %vm839_vm4, %v9123_v37, %v836_v11 }
  0xde   : > { %v865_v39 = vmul.f32 %v840_v35, %v10067_v43 }
  0xdf   : > { %v850_v16 = vsel %vm849_vm5, %v9125_v38, %v846_v15 }
  0xe0   : > { %v885_v56 = vmul.f32 %v10179_v27, %v865_v39 }
  0xe9   : > { %8356 = vmatmul.msk.bf16.gmra.mxu0 %vm17711_vm1, %v890_v3  ;;  %8396 = vmatmul.msk.bf16.gmra.mxu1 %vm17711_vm1, %v890_v3 }
  0xea   : > { %8404 = vmatmul.msk.bf16.gmra.mxu2 %vm17711_vm1, %v890_v3  ;;  %8359 = vmatmul.msk.bf16.gmra.mxu3 %vm17711_vm1, %v893_v54  ;;  %v10481_v3 = vperm.slane %v10463_v61, 1 }
  0xf9   : > { %8397 = vmatmul.msk.bf16.gmra.mxu1 %vm17711_vm1, %v10318_v22 }
  0xfa   : > { %8405 = vmatmul.msk.bf16.gmra.mxu2 %vm17711_vm1, %v10318_v22  ;;  %v866_v22 = vmul.f32 %v850_v16, %v10070_v44 }
  0xfc   : > { %v886_v1 = vmul.f32 %v10179_v27, %v866_v22  ;;  %v10415_v27 = vpop.permute.xlu1 %2536 }
  0xfe   : > { %v894_v25 = vpack.c.bf16 %v886_v1, %v885_v56 }
 0x100   : > { %8360 = vmatmul.msk.bf16.gmra.mxu3 %vm17711_vm1, %v894_v25 }
 0x109   : > { %8398 = vmatmul.msk.bf16.gmra.mxu1 %vm17711_vm1, %v892_v62 }
 0x10a   : > { %8406 = vmatmul.msk.bf16.gmra.mxu2 %vm17711_vm1, %v892_v62 }
 0x119   : > { %8399 = vmatmul.msk.bf16.gmra.mxu1 %vm17711_vm1, %v893_v54 }
 0x11a   : > { %8407 = vmatmul.msk.bf16.gmra.mxu2 %vm17711_vm1, %v893_v54 }
 0x125   : > { %v10530_v56 = vpop.permute.xlu2 %2846 }
 0x126   : > { %17826 = vst [vmem:[#allocation17_spill] sm:$0xff] %v10530_v56 }
 0x129   : > { %8400 = vmatmul.msk.bf16.gmra.mxu1 %vm17711_vm1, %v894_v25 }
 0x12a   : > { %8408 = vmatmul.msk.bf16.gmra.mxu2 %vm17711_vm1, %v894_v25 }
 0x13d   : > { %v10411_v43 = vpop.f32.mrf.mxu2 }
 0x13e   : > { %v10419_v40 = vadd.f32 %v10415_v27, %v10411_v43 }
 0x140   : > { %v2603_v47 = vand.u32 2147483647, %v10419_v40  ;;  %v2555_v34 = vmax.f32 %v10419_v40, 0.0  ;;  %vm2571_vm10 = vcmp.ne.f32.partialorder %v10419_v40, %v10419_v40 }
 0x142   : > { %v2619_v6 = vsub.f32 0.0, %v2603_v47 }
 0x144   : > { %v2635_v4 = vmul.f32 1.442695, %v2619_v6 }
 0x145   : > { %v10413_v44 = vpop.f32.mrf.mxu2 }
 0x146   : > { %9126 = vpow2.f32 %v2635_v4  ;;  %v10428_v52 = vadd.f32 %v10415_v27, %v10413_v44 }
 0x148   : > { %v2604_v49 = vand.u32 2147483647, %v10428_v52  ;;  %vm2572_vm12 = vcmp.ne.f32.partialorder %v10428_v52, %v10428_v52 }
 0x14a   : > { %v2620_v31 = vsub.f32 0.0, %v2604_v49  ;;  %v10542_v49 = vperm.slane %v10434_v48, 0 }
 0x14c   : > { %v9127_v55 = vpop.eup %9126  ;;  %v2637_v21 = vmul.f32 1.442695, %v2620_v31  ;;  %17827 = vst [vmem:[#allocation18_spill] sm:$0xff] %v10542_v49  ;;  %v1146_v31 = vld [vmem:[#allocation3] sm:$0xff] }
 0x14d   : > { %v10421_v45 = vpop.f32.mrf.mxu2  ;;  %v2667_v63 = vadd.f32 1.0, %v9127_v55  ;;  %v2670_v9 = vmul.f32 -0.5, %v9127_v55  ;;  %v2673_v54 = vand.u32 2147483647, %v9127_v55 }
 0x14e   : > { %v10536_v6 = vadd.f32 %v10415_v27, %v10421_v45 }
 0x14f   : > { %9128 = vlog2.f32 %v2667_v63  ;;  %v2671_v17 = vadd.f32 1.0, %v2670_v9  ;;  %vm2674_vm9 = vcmp.lt.f32.partialorder %v2673_v54, 0.0004427343  ;;  %v17548_v63 = vmov 35  }
 0x150   : > { %9130 = vpow2.f32 %v2637_v21  ;;  %v2605_v48 = vand.u32 2147483647, %v10536_v6  ;;  %vm2573_vm15 = vcmp.ne.f32.partialorder %v10536_v6, %v10536_v6 }
 0x151   : > { %v2672_v42 = vmul.f32 %v9127_v55, %v2671_v17  ;;  %v10547_v55 = vpop.f32.mrf.mxu1  ;;  %v1238_v17 = vmul.f32 %v10542_v49, %v1146_v31 }
 0x155   : > { %v10424_v50 = vpop.f32.mrf.mxu2  ;;  %v9129_v59 = vpop.eup %9128 }
 0x156   : > { %v10458_v30 = vmul.f32 %v10443_v46, %v10424_v50  ;;  %v1172_v62 = vmul.f32 %v10447_v58, %v10424_v50  ;;  %v10489_v10 = vmul.f32 %v10474_v0, %v10424_v50  ;;  %v10499_v14 = vmul.f32 %v10484_v20, %v10424_v50  ;;  %v9131_v39 = vpop.eup %9130 }
 0x157   : > { %v2669_v32 = vmul.f32 0.6931472, %v9129_v59  ;;  %v2676_v1 = vadd.f32 1.0, %v9131_v39  ;;  %v2679_v47 = vmul.f32 -0.5, %v9131_v39  ;;  %v2682_v9 = vand.u32 2147483647, %v9131_v39 }
 0x158   : > { %v17539_v8 = vrot.slane %v10458_v30, 1  ;;  %17821 = vst [vmem:[#allocation12_spill] sm:$0xff] %v10489_v10  ;;  %v1206_v28 = vadd.f32 %v1172_v62, %v10481_v3  ;;  %v17538_v36 = vrot.slane %v10489_v10, 2  ;;  %v17529_v26 = vrot.slane %v10499_v14, 3 }
 0x159   : > { %17823 = vst [vmem:[#allocation14_spill] sm:$0xff] %v10499_v14  ;;  %v2675_v11 = vsel %vm2674_vm9, %v2672_v42, %v2669_v32  ;;  %9132 = vlog2.f32 %v2676_v1  ;;  %v10550_v62 = vperm.slane %v10440_v57, 0  ;;  %v2556_v32 = vmax.f32 %v10428_v52, 0.0 }
 0x15a   : > { %v2811_v35 = vadd.f32 %v2675_v11, %v2555_v34  ;;  %vm2683_vm11 = vcmp.lt.f32.partialorder %v2682_v9, 0.0004427343 }
 0x15b   : > { %17828 = vst [vmem:[#allocation19_spill] sm:$0xff] %v10550_v62  ;;  %v1163_v59 = vmul.f32 %v10550_v62, %v1146_v31 }
 0x15c   : > { %v2827_v22 = vsel %vm2571_vm10, %v10419_v40, %v2811_v35  ;;  %v2680_v40 = vadd.f32 1.0, %v2679_v47 }
 0x15d   : > { %v10449_v29 = vpop.f32.mrf.mxu2  ;;  %3258 = vperm.xlu1 %8850, %v2827_v22   ;;  %3194 = vperm.xlu0 %8849, %v2827_v22   ;;  %v10539_v4 = vmul.f32 %v10530_v56, %v2827_v22 }
 0x15e   : > { %v10478_v19 = vmul.f32 %v10443_v46, %v10449_v29  ;;  %v10494_v13 = vmul.f32 %v10474_v0, %v10449_v29  ;;  %v10510_v38 = vmul.f32 %v10484_v20, %v10449_v29  ;;  %3115 = vperm.xlu2 %8848, %v2827_v22   ;;  %v2681_v54 = vmul.f32 %v9131_v39, %v2680_v40 }
 0x15f   : > { %v9133_v21 = vpop.eup %9132 }
 0x160   : > { %17819 = vst [vmem:[#allocation10_spill] sm:$0xff] %v10478_v19  ;;  %v17536_v12 = vrot.slane %v10478_v19, 1  ;;  %v17531_v37 = vrot.slane %v10494_v13, 2  ;;  %v17528_v7 = vrot.slane %v10510_v38, 3  ;;  %v2678_v57 = vmul.f32 0.6931472, %v9133_v21 }
 0x161   : > { %17822 = vst [vmem:[#allocation13_spill] sm:$0xff] %v10494_v13 }
 0x162   : > { %v1328_v18 = vsel %vm1306_vm6, %v17539_v8, %v17536_v12  ;;  %17824 = vst [vmem:[#allocation15_spill] sm:$0xff] %v10510_v38  ;;  %v1538_v2 = vsel %vm17703_vm7, %v17538_v36, %v17531_v37  ;;  %v1740_v15 = vsel %vm1722_vm8, %v17529_v26, %v17528_v7 }
 0x163   : > { %v1416_v24 = vadd.f32 %v1328_v18, %v1206_v28  ;;  %v10556_v28 = vperm.slane %v10454_v60, 0  ;;  %v10561_v18 = vmul.f32 %v10542_v49, %v10547_v55  ;;  %v2621_v60 = vsub.f32 0.0, %v2605_v48 }
 0x165   : > { %v1626_v5 = vadd.f32 %v1538_v2, %v1416_v24  ;;  %v10532_v25 = vpop.f32.mrf.mxu2  ;;  %8852 = vset.pattern.permute.xlu1 %v17541_v33  ;;  %2948 = vrot.lane.b32.xlu0 %v10539_v4, %s9844_s26  ;;  %v10564_v24 = vperm.slane %v10463_v61, 0  ;;  %v2684_v2 = vsel %vm2683_vm11, %v2681_v54, %v2678_v57  ;;  %v17550_v61 = vrot.slane %v10561_v18, 1 }
 0x166   : > { %8851 = vset.pattern.permute.xlu2 %v17548_v63  ;;  %8854 = vset.pattern.permute.xlu0 %v17546_v53  ;;  %v10572_v34 = vmul.f32 %v10443_v46, %v10532_v25  ;;  %v1176_v11 = vmul.f32 %v10447_v58, %v10532_v25  ;;  %v10588_v47 = vmul.f32 %v10474_v0, %v10532_v25  ;;  %v2639_v9 = vmul.f32 1.442695, %v2621_v60 }
 0x167   : > { %v10525_v16 = vadd.f32 %v1740_v15, %v1626_v5  ;;  %3322 = vperm.xlu2 %8851, %v2827_v22   ;;  %17829 = vst [vmem:[#allocation20_spill] sm:$0xff] %v10564_v24  ;;  %v2812_v5 = vadd.f32 %v2684_v2, %v2556_v32  ;;  %v1307_v15 = vrot.slane %v1238_v17, 1  ;;  %v1197_v39 = vadd.f32 %v1163_v59, %v10564_v24 }
 0x168   : > { %17831 = vst [vmem:[#allocation22_spill] sm:$0xff] %v10572_v34  ;;  %v1448_v22 = vmul.f32 %v10556_v28, %v1146_v31  ;;  %v10592_v40 = vmul.f32 %v10556_v28, %v10547_v55  ;;  %v17537_v48 = vrot.slane %v10572_v34, 1  ;;  %v1210_v17 = vadd.f32 %v1176_v11, %v10481_v3 }
 0x169   : > { %17825 = vst [vmem:[#allocation16_spill] sm:$0xff] %v10525_v16  ;;  %v2828_v1 = vsel %vm2572_vm12, %v10428_v52, %v2812_v5  ;;  %v10599_v52 = vmul.f32 %v10484_v20, %v10532_v25  ;;  %v1309_v54 = vsel %vm1306_vm6, %v1307_v15, %v17550_v61  ;;  %v10614_v59 = vperm.slane %v10471_v51, 0 }
 0x16a   : > { %17833 = vst [vmem:[#allocation24_spill] sm:$0xff] %v10588_v47  ;;  %3120 = vperm.xlu1 %8852, %v2828_v1   ;;  %v17535_v60 = vrot.slane %v10588_v47, 2  ;;  %v1517_v7 = vrot.slane %v1448_v22, 2  ;;  %v17543_v15 = vrot.slane %v10592_v40, 2  ;;  %9134 = vpow2.f32 %v2639_v9 }
 0x16b   : > { %17834 = vst [vmem:[#allocation25_spill] sm:$0xff] %v10599_v52  ;;  %v1407_v51 = vadd.f32 %v1309_v54, %v1197_v39  ;;  %v17533_v26 = vrot.slane %v10599_v52, 3  ;;  %v17846_v52 = vrot.slane %v10592_v40, 2 }
 0x16c   : > { %17837 = vst [vmem:[#allocation28_spill] sm:$0xff] %v10614_v59  ;;  %v1519_v22 = vsel %vm17703_vm7, %v1517_v7, %v17543_v15 }
 0x16d   : > { %v10568_v42 = vpop.f32.mrf.mxu2  ;;  %3262 = vperm.xlu0 %8854, %v2828_v1  }
 0x16e   : > { %17830 = vst [vmem:[#allocation21_spill] sm:$0xff] %v10568_v42  ;;  %v10581_v35 = vmul.f32 %v10443_v46, %v10568_v42  ;;  %v10604_v31 = vmul.f32 %v10474_v0, %v10568_v42  ;;  %v10608_v57 = vmul.f32 %v10484_v20, %v10568_v42 }
 0x16f   : > { %8853 = vset.pattern.permute.xlu2 %v17544_v41 }
 0x170   : > { %17832 = vst [vmem:[#allocation23_spill] sm:$0xff] %v10581_v35  ;;  %v17530_v21 = vrot.slane %v10581_v35, 1  ;;  %3198 = vperm.xlu2 %8853, %v2828_v1   ;;  %v17534_v5 = vrot.slane %v10604_v31, 2  ;;  %v17532_v11 = vrot.slane %v10608_v57, 3  ;;  %v9135_v54 = vpop.eup %9134  ;;  %v17847_v35 = vmov 32  }
 0x171   : > { %17835 = vst [vmem:[#allocation26_spill] sm:$0xff] %v10604_v31  ;;  %v2688_v7 = vmul.f32 -0.5, %v9135_v54  ;;  %v2691_v12 = vand.u32 2147483647, %v9135_v54 }
 0x172   : > { %17836 = vst [vmem:[#allocation27_spill] sm:$0xff] %v10608_v57  ;;  %v1336_v32 = vsel %vm1306_vm6, %v17537_v48, %v17530_v21  ;;  %v1546_v21 = vsel %vm17703_vm7, %v17535_v60, %v17534_v5  ;;  %v1748_v39 = vsel %vm1722_vm8, %v17533_v26, %v17532_v11  ;;  %8855 = vset.pattern.permute.xlu1 %v17548_v63  ;;  %v2685_v26 = vadd.f32 1.0, %v9135_v54  ;;  %v1147_v5 = vld [vmem:[#allocation3 + $0x8] sm:$0xff] }
 0x173   : > { %v1420_v2 = vadd.f32 %v1336_v32, %v1210_v17  ;;  %v10633_v17 = vmul.f32 %v10614_v59, %v10547_v55  ;;  %v10635_v32 = vpop.f32.mrf.mxu1  ;;  %3326 = vperm.xlu1 %8855, %v2828_v1   ;;  %v2689_v60 = vadd.f32 1.0, %v2688_v7  ;;  %v1449_v8 = vmul.f32 %v10474_v0, %v1147_v5 }
 0x174   : > { %9136 = vlog2.f32 %v2685_v26  ;;  %vm2692_vm14 = vcmp.lt.f32.partialorder %v2691_v12, 0.0004427343  ;;  %v10684_v12 = vmul.f32 %v10542_v49, %v10635_v32 }
 0x175   : > { %v1630_v37 = vadd.f32 %v1546_v21, %v1420_v2  ;;  %8856 = vset.pattern.permute.xlu0 %v17541_v33  ;;  %v1617_v21 = vadd.f32 %v1519_v22, %v1407_v51  ;;  %v17540_v2 = vrot.slane %v10633_v17, 3  ;;  %v10659_v51 = vmul.f32 %v10443_v46, %v10411_v43 }
 0x176   : > { %v2690_v15 = vmul.f32 %v9135_v54, %v2689_v60  ;;  %v1520_v60 = vrot.slane %v1449_v8, 2  ;;  %v10699_v8 = vmul.f32 %v10484_v20, %v10411_v43 }
 0x177   : > { %v10646_v9 = vadd.f32 %v1748_v39, %v1630_v37  ;;  %v10653_v11 = vadd.f32 %v17540_v2, %v1617_v21  ;;  %v1239_v39 = vmul.f32 %v10443_v46, %v1147_v5  ;;  %v1164_v21 = vmul.f32 %v10447_v58, %v1147_v5 }
 0x178   : > { %8858 = vset.pattern.permute.xlu2 %v17546_v53  ;;  %v17553_v36 = vrot.slane %v10659_v51, 1  ;;  %v10669_v2 = vmul.f32 %v10474_v0, %v10411_v43  ;;  %v2557_v53 = vmax.f32 %v10536_v6, 0.0  ;;  %v5089_v5 = vsel %vm5088_vm13, %v10539_v4, 0.0  ;;  %17839 = vst [vmem:[#allocation30_spill] sm:$0xff] %v10699_v8 }
 0x179   : > { %17838 = vst [vmem:[#allocation29_spill] sm:$0xff] %v10646_v9  ;;  %v8412_v37 = vmul.f32 -1.442695, %v10653_v11  ;;  %v1310_v26 = vrot.slane %v1239_v39, 1  ;;  %v1198_v7 = vadd.f32 %v1164_v21, %v10481_v3  ;;  %v10690_v4 = vadd.f32 %v10415_v27, %v10424_v50 }
 0x17a   : > { %v9137_v48 = vpop.eup %9136  ;;  %v17551_v21 = vrot.slane %v10669_v2, 2  ;;  %v1313_v50 = vrot.slane %v10684_v12, 1 }
 0x17b   : > { %v10661_v22 = vpop.f32.mrf.mxu1  ;;  %8857 = vset.pattern.permute.xlu1 %v17544_v41  ;;  %9138 = vpow2.f32 %v8412_v37  ;;  %v2687_v33 = vmul.f32 0.6931472, %v9137_v48  ;;  %v2850_v41 = vmul.f32 %v10530_v56, %v2828_v1  ;;  %v1312_v37 = vsel %vm1306_vm6, %v1310_v26, %v17553_v36 }
 0x17c   : > { %v2606_v26 = vand.u32 2147483647, %v10690_v4  ;;  %v10747_v36 = vmul.f32 %v10443_v46, %v10413_v44  ;;  %vm2574_vm9 = vcmp.ne.f32.partialorder %v10690_v4, %v10690_v4 }
 0x17d   : > { %v2693_v39 = vsel %vm2692_vm14, %v2690_v15, %v2687_v33  ;;  %2950 = vrot.lane.b32.xlu2 %v2850_v41, %s9844_s26  ;;  %v5090_v48 = vsel %vm5088_vm13, %v2850_v41, 0.0  ;;  %v1408_v41 = vadd.f32 %v1312_v37, %v1198_v7  ;;  %v1522_v15 = vsel %vm17703_vm7, %v1520_v60, %v17551_v21 }
 0x17e   : > { %v2813_v54 = vadd.f32 %v2693_v39, %v2557_v53  ;;  %v5091_v1 = vadd.f32 %v5090_v48, %v5089_v5  ;;  %v1165_v7 = vmul.f32 %v10550_v62, %v10547_v55  ;;  %v17552_v37 = vrot.slane %v10699_v8, 3 }
 0x17f   : > { %v10716_v5 = vmul.f32 %v10614_v59, %v10635_v32  ;;  %v17840_v39 = vrot.slane %v10561_v18, 1  ;;  %v2622_v60 = vsub.f32 0.0, %v2606_v26  ;;  %v10734_v18 = vmul.f32 %v10542_v49, %v10661_v22 }
 0x180   : > { %v2829_v53 = vsel %vm2573_vm15, %v10536_v6, %v2813_v54  ;;  %v1618_v6 = vadd.f32 %v1522_v15, %v1408_v41  ;;  %v1199_v55 = vadd.f32 %v1165_v7, %v10564_v24  ;;  %v1166_v41 = vmul.f32 %v10447_v58, %v10411_v43 }
 0x181   : > { %v9139_v63 = vpop.eup %9138  ;;  %3125 = vperm.xlu0 %8856, %v2829_v53   ;;  %3202 = vperm.xlu1 %8857, %v2829_v53   ;;  %v1314_v48 = vsel %vm1306_vm6, %v17840_v39, %v1313_v50  ;;  %v2851_v12 = vmul.f32 %v10530_v56, %v2829_v53  ;;  %v1167_v15 = vmul.f32 %v10550_v62, %v10635_v32  ;;  %v17842_v7 = vmov 35  }
 0x182   : > { %v10695_v33 = vadd.f32 1.0, %v9139_v63  ;;  %v10710_v63 = vmul.f32 %v10556_v28, %v10635_v32  ;;  %v10724_v54 = vadd.f32 %v17552_v37, %v1618_v6  ;;  %v17843_v6 = vmov 34  }
 0x183   : > { %v10686_v61 = vpop.f32.mrf.mxu1  ;;  %v1409_v39 = vadd.f32 %v1314_v48, %v1199_v55  ;;  %v1168_v43 = vmul.f32 %v10447_v58, %v10413_v44  ;;  %v5092_v32 = vsel %vm5088_vm13, %v2851_v12, 0.0  ;;  %v10751_v21 = vmul.f32 %v10443_v46, %v10421_v45 }
 0x184   : > { %9140 = vrcp.f32 %v10695_v33  ;;  %17841 = vst [vmem:[#allocation31_spill] sm:$0xff] %v10724_v54  ;;  %v2641_v23 = vmul.f32 1.442695, %v2622_v60  ;;  %v8413_v55 = vmul.f32 -1.442695, %v10724_v54  ;;  %v10764_v37 = vadd.f32 %v5092_v32, %v5091_v1 }
 0x185   : > { %3266 = vperm.xlu2 %8858, %v2829_v53   ;;  %v10767_v57 = vadd.f32 %v1166_v41, %v10481_v3  ;;  %v1201_v38 = vadd.f32 %v1167_v15, %v10564_v24  ;;  %v17845_v60 = vrot.slane %v10710_v63, 2  ;;  %v17563_v31 = vrot.slane %v10734_v18, 1 }
 0x186   : > { %v17848_v14 = vrot.slane %v10716_v5, 3  ;;  %v17849_v1 = vrot.slane %v10633_v17, 3  ;;  %v1202_v32 = vadd.f32 %v1168_v43, %v10481_v3  ;;  %v10785_v15 = vmul.f32 %v10542_v49, %v10686_v61 }
 0x187   : > { %v1524_v54 = vsel %vm17703_vm7, %v17846_v52, %v17845_v60  ;;  %v10791_v52 = vmul.f32 %v10556_v28, %v10661_v22  ;;  %9142 = vpow2.f32 %v2641_v23  ;;  %v1315_v17 = vrot.slane %v10747_v36, 1 }
 0x188   : > { %v1726_v41 = vsel %vm1722_vm8, %v17849_v1, %v17848_v14  ;;  %9144 = vpow2.f32 %v8413_v55  ;;  %v1998_v43 = vand.u32 2147483647, %v10695_v33  ;;  %v1318_v60 = vsel %vm1306_vm6, %v1313_v50, %v17563_v31 }
 0x189   : > { %8859 = vset.pattern.permute.xlu0 %v17842_v7  ;;  %8862 = vset.pattern.permute.xlu1 %v17843_v6  ;;  %v1619_v6 = vadd.f32 %v1524_v54, %v1409_v39  ;;  %v10803_v1 = vmul.f32 %v10474_v0, %v10421_v45  ;;  %v1171_v23 = vmul.f32 %v10550_v62, %v10686_v61  ;;  %v2000_v55 = vand.u32 2147483648, %v10695_v33 }
 0x18a   : > { %3330 = vperm.xlu0 %8859, %v2829_v53   ;;  %2952 = vrot.lane.b32.xlu1 %v2851_v12, %s9844_s26  ;;  %v10753_v48 = vpop.eup %9140  ;;  %v10758_v53 = vmul.f32 %v10474_v0, %v10413_v44  ;;  %v17851_v54 = vmov 33   ;;  %v10819_v0 = vmul.f32 %v10614_v59, %v10661_v22  ;;  %v17853_v8 = vrot.slane %v10751_v21, 1 }
 0x18b   : > { %v10736_v26 = vpop.f32.mrf.mxu1  ;;  %v1990_v40 = vmul.f32 %v10753_v48, %v10695_v33  ;;  %v10808_v36 = vadd.f32 %v1726_v41, %v1619_v6  ;;  %v10828_v14 = vmul.f32 %v10484_v20, %v10413_v44  ;;  %v1411_v46 = vadd.f32 %v1318_v60, %v1201_v38 }
 0x18c   : > { %v10762_v12 = vmul.f32 %v10542_v49, %v10736_v26  ;;  %v10813_v39 = vmul.f32 %v10556_v28, %v10736_v26  ;;  %17852 = vst [vmem:[#allocation34_spill] sm:$0xff] %v10819_v0  ;;  %v1320_v6 = vsel %vm1306_vm6, %v1315_v17, %v17853_v8  ;;  %v17855_v13 = vrot.slane %v10785_v15, 1 }
 0x18d   : > { %8860 = vset.pattern.permute.xlu2 %v17847_v35  ;;  %17850 = vst [vmem:[#allocation33_spill] sm:$0xff] %v10808_v36  ;;  %v1991_v50 = vsub.f32 1.0, %v1990_v40  ;;  %v10832_v40 = vmul.f32 %v10556_v28, %v10686_v61  ;;  %v9143_v9 = vpop.eup %9142  ;;  %v10842_v7 = vmul.f32 %v10484_v20, %v10421_v45  ;;  %v1205_v44 = vadd.f32 %v1171_v23, %v10564_v24 }
 0x18e   : > { %17844 = vst [vmem:[#allocation32_spill] sm:$0xff] %v10762_v12  ;;  %v17854_v31 = vrot.slane %v10762_v12, 1  ;;  %v10847_v38 = vadd.f32 %v10415_v27, %v10532_v25  ;;  %v9145_v60 = vpop.eup %9144  ;;  %vm1994_vm0 = vweird.f32 %v10695_v33  ;;  %v8414_v19 = vmul.f32 -1.442695, %v10808_v36 }
 0x18f   : > { %v1412_v34 = vadd.f32 %v1320_v6, %v1202_v32  ;;  %v1992_v8 = vmul.f32 %v10753_v48, %v1991_v50  ;;  %v17858_v23 = vrot.slane %v10791_v52, 2  ;;  %v17859_v20 = vrot.slane %v10710_v63, 2 }
 0x190   : > { %v1326_v47 = vsel %vm1306_vm6, %v17855_v13, %v17854_v31  ;;  %17856 = vst [vmem:[#allocation35_spill] sm:$0xff] %v10847_v38  ;;  %v10854_v31 = vmul.f32 %v10614_v59, %v10736_v26  ;;  %v1531_v32 = vrot.slane %v10832_v40, 2  ;;  %v10866_v6 = vmul.f32 %v10614_v59, %v10686_v61 }
 0x191   : > { %v1528_v25 = vsel %vm17703_vm7, %v17859_v20, %v17858_v23  ;;  %v1415_v10 = vadd.f32 %v1326_v47, %v1205_v44  ;;  %v2694_v13 = vadd.f32 1.0, %v9143_v9  ;;  %v17861_v36 = vrot.slane %v10803_v1, 2 }
 0x192   : > { %8869 = vset.pattern.permute.xlu0 %v17851_v54  ;;  %17857 = vst [vmem:[#allocation36_spill] sm:$0xff] %v10854_v31  ;;  %v1621_v42 = vadd.f32 %v1528_v25, %v1411_v46  ;;  %v17862_v50 = vrot.slane %v10758_v53, 2  ;;  %v2608_v20 = vand.u32 2147483647, %v10847_v38  ;;  %v2697_v23 = vmul.f32 -0.5, %v9143_v9 }
 0x193   : > { %v10824_v41 = vpop.f32.mrf.mxu1  ;;  %17860 = vst [vmem:[#allocation37_spill] sm:$0xff] %v10866_v6  ;;  %v17863_v46 = vrot.slane %v10813_v39, 2  ;;  %v17583_v44 = vrot.slane %v10854_v31, 3  ;;  %9146 = vlog2.f32 %v2694_v13  ;;  %v17864_v25 = vrot.slane %v10659_v51, 1 }
 0x194   : > { %v1530_v54 = vsel %vm17703_vm7, %v17862_v50, %v17861_v36  ;;  %v17585_v36 = vrot.slane %v10828_v14, 3  ;;  %v17865_v50 = vrot.slane %v10819_v0, 3  ;;  %v1993_v38 = vadd.f32 %v10753_v48, %v1992_v8 }
 0x195   : > { %v1622_v47 = vadd.f32 %v1530_v54, %v1412_v34  ;;  %v1536_v61 = vsel %vm17703_vm7, %v1531_v32, %v17863_v46  ;;  %v10884_v12 = vsel %vm1306_vm6, %v17864_v25, %v1315_v17  ;;  %v17866_v34 = vrot.slane %v10716_v5, 3 }
 0x196   : > { %v1625_v63 = vadd.f32 %v1536_v61, %v1415_v10  ;;  %vm1995_vm2 = vweird.f32 %v10753_v48  ;;  %v17584_v51 = vrot.slane %v10866_v6, 3  ;;  %v17868_v17 = vrot.slane %v10842_v7, 3  ;;  %v17920_v6 = vld [vmem:[#allocation13_spill] sm:$0xff] }
 0x197   : > { %v1730_v54 = vsel %vm1722_vm8, %v17866_v34, %v17865_v50  ;;  %v10904_v5 = vadd.f32 %v10415_v27, %v10449_v29  ;;  %v2624_v25 = vsub.f32 0.0, %v2608_v20  ;;  %v2698_v8 = vadd.f32 1.0, %v2697_v23  ;;  %vm10917_vm3 = vmor %vm1994_vm0, %vm1995_vm2 }
 0x198   : > { %v10894_v46 = vadd.f32 %v1730_v54, %v1621_v42  ;;  %v1732_v13 = vsel %vm1722_vm8, %v17585_v36, %v17868_v17  ;;  %9148 = vpow2.f32 %v8414_v19  ;;  %v1738_v42 = vsel %vm1722_vm8, %v17584_v51, %v17583_v44 }
 0x199   : > { %v10908_v61 = vadd.f32 %v1732_v13, %v1622_v47  ;;  %v2700_v50 = vand.u32 2147483647, %v9143_v9  ;;  %vm10921_vm4 = vcmp.eq.f32.partialorder %v1998_v43, 8.507059e+37  ;;  %v2001_v19 = vor.u32 1.1754944e-38, %v2000_v55  ;;  %v9147_v13 = vpop.eup %9146 }
 0x19a   : > { %17867 = vst [vmem:[#allocation38_spill] sm:$0xff] %v10894_v46  ;;  %v17873_v23 = vrot.slane %v10758_v53, 2  ;;  %v17874_v47 = vrot.slane %v10669_v2, 2  ;;  %v10932_v17 = vadd.f32 %v1738_v42, %v1625_v63  ;;  %v1997_v33 = vsel %vm10917_vm3, %v10753_v48, %v1993_v38 }
 0x19b   : > { %v10906_v10 = vpop.f32.mrf.mxu1  ;;  %v10937_v44 = vadd.f32 1.0, %v9145_v60  ;;  %v8416_v43 = vmul.f32 -1.442695, %v10894_v46  ;;  %v2607_v2 = vand.u32 2147483647, %v10904_v5  ;;  %v10948_v42 = vmul.f32 %v10542_v49, %v10824_v41  ;;  %v17898_v46 = vld [vmem:[#allocation32_spill] sm:$0xff] }
 0x19c   : > { %v10930_v54 = vsel %vm17703_vm7, %v17874_v47, %v17873_v23  ;;  %17875 = vst [vmem:[#allocation39_spill] sm:$0xff] %v10932_v17  ;;  %v10942_v55 = vmul.f32 %v10542_v49, %v10906_v10  ;;  %v2645_v53 = vmul.f32 1.442695, %v2624_v25  ;;  %v2696_v23 = vmul.f32 0.6931472, %v9147_v13 }
 0x19d   : > { %v2699_v47 = vmul.f32 %v9143_v9, %v2698_v8  ;;  %v8417_v63 = vmul.f32 -1.442695, %v10908_v61  ;;  %v2558_v48 = vmax.f32 %v10690_v4, 0.0  ;;  %vm2701_vm5 = vcmp.lt.f32.partialorder %v2700_v50, 0.0004427343 }
 0x19e   : > { %v2002_v38 = vsel %vm10921_vm4, %v2001_v19, %v1997_v33  ;;  %v1169_v60 = vmul.f32 %v10550_v62, %v10661_v22  ;;  %v8420_v34 = vmul.f32 -1.442695, %v10932_v17  ;;  %v9149_v13 = vpop.eup %9148  ;;  %9150 = vpow2.f32 %v8416_v43 }
 0x19f   : > { %v2702_v25 = vsel %vm2701_vm5, %v2699_v47, %v2696_v23  ;;  %v8421_v9 = vmul.f32 -1.442695, %v10525_v16  ;;  %v17586_v8 = vrot.slane %v10942_v55, 1  ;;  %v2623_v36 = vsub.f32 0.0, %v2607_v2 }
 0x1a0   : > { %v2814_v51 = vadd.f32 %v2702_v25, %v2558_v48  ;;  %v1175_v50 = vmul.f32 %v10550_v62, %v10824_v41  ;;  %9152 = vpow2.f32 %v2645_v53  ;;  %v17587_v22 = vrot.slane %v10948_v42, 1 }
 0x1a1   : > { %9154 = vpow2.f32 %v8417_v63  ;;  %v10965_v20 = vmul.f32 %v10556_v28, %v10906_v10  ;;  %v10970_v33 = vadd.f32 1.0, %v9149_v13  ;;  %v1170_v43 = vmul.f32 %v10447_v58, %v10421_v45 }
 0x1a2   : > { %v10968_v19 = vsel %vm2574_vm9, %v10690_v4, %v2814_v51  ;;  %9156 = vpow2.f32 %v8420_v34  ;;  %v10979_v53 = vmul.f32 %v2002_v38, %v10653_v11  ;;  %v10983_v4 = vmul.f32 %v10556_v28, %v10824_v41 }
 0x1a3   : > { %17876 = vst [vmem:[#allocation40_spill] sm:$0xff] %v10970_v33  ;;  %v2852_v2 = vmul.f32 %v10530_v56, %v10968_v19  ;;  %3270 = vperm.xlu1 %8862, %v10968_v19   ;;  %3130 = vperm.xlu2 %8860, %v10968_v19   ;;  %9158 = vpow2.f32 %v8421_v9  ;;  %v1334_v45 = vsel %vm1306_vm6, %v17587_v22, %v17586_v8  ;;  %v2643_v23 = vmul.f32 1.442695, %v2623_v36  ;;  %v11003_v34 = vpop.f32.mrf.mxu1 }
 0x1a4   : > { %17877 = vst [vmem:[#allocation41_spill] sm:$0xff] %v10979_v53  ;;  %v10992_v51 = vadd.f32 %v10884_v12, %v10767_v57  ;;  %v1209_v47 = vadd.f32 %v1175_v50, %v10564_v24  ;;  %v9151_v63 = vpop.eup %9150  ;;  %9160 = vrcp.f32 %v10937_v44  ;;  %v11001_v38 = vmul.f32 %v10614_v59, %v10906_v10 }
 0x1a5   : > { %2954 = vrot.lane.b32.xlu0 %v2852_v2, %s9844_s26  ;;  %v5094_v11 = vsel %vm5088_vm13, %v2852_v2, 0.0  ;;  %9162 = vrcp.f32 %v10970_v33  ;;  %v1203_v36 = vadd.f32 %v1169_v60, %v10564_v24  ;;  %v1204_v25 = vadd.f32 %v1170_v43, %v10481_v3 }
 0x1a6   : > { %17878 = vst [vmem:[#allocation42_spill] sm:$0xff] %v11001_v38  ;;  %v11006_v57 = vadd.f32 %v5094_v11, %v10764_v37  ;;  %v11008_v12 = vpop.eup %9152  ;;  %v1419_v13 = vadd.f32 %v1334_v45, %v1209_v47  ;;  %v17879_v2 = vrot.slane %v10785_v15, 1  ;;  %v17880_v8 = vrot.slane %v10734_v18, 1 }
 0x1a7   : > { %v9155_v9 = vpop.eup %9154  ;;  %v1539_v37 = vrot.slane %v10983_v4, 2  ;;  %v11022_v11 = vmul.f32 %v10614_v59, %v10824_v41  ;;  %v11024_v60 = vadd.f32 1.0, %v9151_v63  ;;  %v17883_v43 = vrot.slane %v10791_v52, 2 }
 0x1a8   : > { %v1322_v22 = vsel %vm1306_vm6, %v17880_v8, %v17879_v2  ;;  %v9157_v48 = vpop.eup %9156  ;;  %v17885_v18 = vrot.slane %v10458_v30, 1  ;;  %v17886_v15 = vrot.slane %v10751_v21, 1  ;;  %9164 = vpow2.f32 %v2643_v23 }
 0x1a9   : > { %17881 = vst [vmem:[#allocation43_spill] sm:$0xff] %v11022_v11  ;;  %v11031_v45 = vsel %vm17703_vm7, %v17883_v43, %v1531_v32  ;;  %v9159_v4 = vpop.eup %9158  ;;  %v1173_v41 = vmul.f32 %v10550_v62, %v10736_v26  ;;  %v17887_v47 = vrot.slane %v10965_v20, 2  ;;  %v2712_v32 = vadd.f32 1.0, %v11008_v12 }
 0x1aa   : > { %17882 = vst [vmem:[#allocation44_spill] sm:$0xff] %v11024_v60  ;;  %v1324_v8 = vsel %vm1306_vm6, %v17886_v15, %v17885_v18  ;;  %v11045_v63 = vadd.f32 1.0, %v9155_v9  ;;  %v1174_v30 = vmul.f32 %v10447_v58, %v10449_v29  ;;  %v2715_v23 = vmul.f32 -0.5, %v11008_v12  ;;  %v11052_v26 = vpop.eup %9160  ;;  %v17890_v15 = vld [vmem:[#allocation21_spill] sm:$0xff] }
 0x1ab   : > { %17884 = vst [vmem:[#allocation45_spill] sm:$0xff] %v11031_v45  ;;  %v1544_v40 = vsel %vm17703_vm7, %v1539_v37, %v17887_v47  ;;  %8864 = vset.pattern.permute.xlu1 %v17847_v35  ;;  %v17888_v2 = vmov 33   ;;  %v11054_v43 = vadd.f32 1.0, %v9157_v48  ;;  %v11059_v9 = vadd.f32 %v10415_v27, %v17890_v15  ;;  %v11062_v29 = vpop.eup %9162  ;;  %v17894_v48 = vld [vmem:[#allocation12_spill] sm:$0xff] }
 0x1ac   : > { %v1629_v21 = vadd.f32 %v1544_v40, %v1419_v13  ;;  %8861 = vset.pattern.permute.xlu2 %v17888_v2  ;;  %9166 = vlog2.f32 %v2712_v32  ;;  %17891 = vst [vmem:[#allocation21_spill] sm:$0xff] %v11062_v29  ;;  %v11065_v13 = vadd.f32 %v1322_v22, %v1203_v36  ;;  %v11067_v47 = vadd.f32 %v1324_v8, %v1204_v25 }
 0x1ad   : > { %17889 = vst [vmem:[#allocation46_spill] sm:$0xff] %v11054_v43  ;;  %3206 = vperm.xlu2 %8861, %v10968_v19   ;;  %9168 = vrcp.f32 %v11024_v60  ;;  %v11069_v40 = vadd.f32 1.0, %v9159_v4  ;;  %v17895_v50 = vrot.slane %v17894_v48, 2  ;;  %v17896_v18 = vrot.slane %v10803_v1, 2  ;;  %v11089_v4 = vpop.f32.mrf.mxu2 }
 0x1ae   : > { %17892 = vst [vmem:[#allocation47_spill] sm:$0xff] %v11065_v13  ;;  %v1207_v32 = vadd.f32 %v1173_v41, %v10564_v24  ;;  %v17897_v53 = vrot.slane %v10948_v42, 1  ;;  %v17899_v31 = vrot.slane %v17898_v46, 1  ;;  %v17900_v36 = vrot.slane %v11001_v38, 3  ;;  %v11091_v1 = vpop.eup %9164 }
 0x1af   : > { %17893 = vst [vmem:[#allocation48_spill] sm:$0xff] %v11069_v40  ;;  %v11076_v52 = vsel %vm17703_vm7, %v17896_v18, %v17895_v50  ;;  %v17901_v25 = vrot.slane %v11022_v11, 3  ;;  %9170 = vrcp.f32 %v11045_v63  ;;  %v17902_v50 = vld [vmem:[#allocation22_spill] sm:$0xff]  ;;  %v2718_v38 = vand.u32 2147483647, %v11008_v12 }
 0x1b0   : > { %v1330_v22 = vsel %vm1306_vm6, %v17899_v31, %v17897_v53  ;;  %v17903_v41 = vrot.slane %v17902_v50, 1  ;;  %v17904_v18 = vld [vmem:[#allocation10_spill] sm:$0xff]  ;;  %v2716_v31 = vadd.f32 1.0, %v2715_v23  ;;  %9172 = vrcp.f32 %v11054_v43  ;;  %v17918_v43 = vld [vmem:[#allocation24_spill] sm:$0xff] }
 0x1b1   : > { %v1746_v8 = vsel %vm1722_vm8, %v17901_v25, %v17900_v36  ;;  %v17905_v42 = vrot.slane %v17904_v18, 1  ;;  %v1208_v53 = vadd.f32 %v1174_v30, %v10481_v3  ;;  %v2609_v36 = vand.u32 2147483647, %v11059_v9  ;;  %v11104_v25 = vpop.f32.mrf.mxu1 }
 0x1b2   : > { %v11099_v48 = vadd.f32 %v1746_v8, %v1629_v21  ;;  %9174 = vrcp.f32 %v11069_v40  ;;  %v11108_v50 = vadd.f32 %v1330_v22, %v1207_v32  ;;  %v17908_v18 = vrot.slane %v10813_v39, 2  ;;  %v9167_v8 = vpop.eup %9166 }
 0x1b3   : > { %v1332_v46 = vsel %vm1306_vm6, %v17905_v42, %v17903_v41  ;;  %v1177_v23 = vmul.f32 %v10550_v62, %v10906_v10  ;;  %v1178_v41 = vmul.f32 %v10447_v58, %v17890_v15  ;;  %v1254_v42 = vmul.f32 %v10542_v49, %v11003_v34  ;;  %v11124_v22 = vpop.eup %9168 }
 0x1b4   : > { %17906 = vst [vmem:[#allocation12_spill] sm:$0xff] %v11099_v48  ;;  %v11113_v21 = vsel %vm17703_vm7, %v17908_v18, %v1539_v37  ;;  %v11117_v30 = vadd.f32 %v1332_v46, %v1208_v53  ;;  %v2703_v32 = vadd.f32 1.0, %v11091_v1  ;;  %v8424_v39 = vmul.f32 -1.442695, %v11099_v48  ;;  %v17912_v46 = vld [vmem:[#allocation35_spill] sm:$0xff] }
 0x1b5   : > { %17907 = vst [vmem:[#allocation32_spill] sm:$0xff] %v11108_v50  ;;  %v2714_v37 = vmul.f32 0.6931472, %v9167_v8  ;;  %v2717_v18 = vmul.f32 %v11008_v12, %v2716_v31  ;;  %v2706_v10 = vmul.f32 -0.5, %v11091_v1  ;;  %v2625_v11 = vsub.f32 0.0, %v2609_v36  ;;  %v11131_v60 = vpop.eup %9170  ;;  %v17915_v36 = vld [vmem:[#allocation29_spill] sm:$0xff] }
 0x1b6   : > { %17909 = vst [vmem:[#allocation22_spill] sm:$0xff] %v11113_v21  ;;  %v2560_v53 = vmax.f32 %v17912_v46, 0.0  ;;  %vm2719_vm10 = vcmp.lt.f32.partialorder %v2718_v38, 0.0004427343  ;;  %9176 = vlog2.f32 %v2703_v32  ;;  %v17913_v15 = vmov 35   ;;  %v11144_v38 = vpop.eup %9172 }
 0x1b7   : > { %17910 = vst [vmem:[#allocation10_spill] sm:$0xff] %v11117_v30  ;;  %8863 = vset.pattern.permute.xlu2 %v17913_v15  ;;  %v1179_v21 = vmul.f32 %v10550_v62, %v11003_v34  ;;  %v11137_v48 = vmul.f32 %v10556_v28, %v11003_v34  ;;  %v11141_v12 = vmul.f32 %v10542_v49, %v11104_v25  ;;  %v8425_v8 = vmul.f32 -1.442695, %v17915_v36 }
 0x1b8   : > { %17911 = vst [vmem:[#allocation49_spill] sm:$0xff] %v11124_v22  ;;  %v2720_v31 = vsel %vm2719_vm10, %v2717_v18, %v2714_v37  ;;  %3334 = vperm.xlu2 %8863, %v10968_v19   ;;  %v1337_v32 = vrot.slane %v1254_v42, 1  ;;  %v11149_v22 = vmul.f32 %v10614_v59, %v11003_v34  ;;  %v11151_v17 = vpop.eup %9174  ;;  %v17919_v0 = vrot.slane %v17918_v43, 2  ;;  %v11166_v18 = vpop.f32.mrf.mxu2 }
 0x1b9   : > { %17914 = vst [vmem:[#allocation35_spill] sm:$0xff] %v11144_v38  ;;  %v2816_v50 = vadd.f32 %v2720_v31, %v2560_v53  ;;  %v17921_v16 = vrot.slane %v17920_v6, 2  ;;  %v1211_v19 = vadd.f32 %v1177_v23, %v10564_v24  ;;  %vm2576_vm11 = vcmp.ne.f32.partialorder %v17912_v46, %v17912_v46 }
 0x1ba   : > { %17916 = vst [vmem:[#allocation50_spill] sm:$0xff] %v11149_v22  ;;  %v2707_v42 = vadd.f32 1.0, %v2706_v10  ;;  %9178 = vpow2.f32 %v8424_v39  ;;  %v11164_v34 = vadd.f32 %v1178_v41, %v10481_v3  ;;  %v2709_v6 = vand.u32 2147483647, %v11091_v1 }
 0x1bb   : > { %17917 = vst [vmem:[#allocation51_spill] sm:$0xff] %v11151_v17  ;;  %v11158_v37 = vsel %vm17703_vm7, %v17921_v16, %v17919_v0  ;;  %v11169_v53 = vsel %vm2576_vm11, %v17912_v46, %v2816_v50  ;;  %v2647_v43 = vmul.f32 1.442695, %v2625_v11  ;;  %v1213_v0 = vadd.f32 %v1179_v21, %v10564_v24  ;;  %v11184_v11 = vpop.f32.mrf.mxu1  ;;  %v17924_v21 = vld [vmem:[#allocation8_spill] sm:$0xff] }
 0x1bc   : > { %17922 = vst [vmem:[#allocation24_spill] sm:$0xff] %v11158_v37  ;;  %3214 = vperm.xlu0 %8869, %v11169_v53   ;;  %v9177_v39 = vpop.eup %9176  ;;  %9180 = vpow2.f32 %v8425_v8  ;;  %v17923_v41 = vrot.slane %v10942_v55, 1  ;;  %v11182_v46 = vmul.f32 %v10556_v28, %v11104_v25  ;;  %v11188_v31 = vmul.f32 %v17924_v21, %v11166_v18 }
 0x1bd   : > { %v2705_v16 = vmul.f32 0.6931472, %v9177_v39  ;;  %v2708_v23 = vmul.f32 %v11091_v1, %v2707_v42  ;;  %v1620_v55 = vadd.f32 %v10930_v54, %v10992_v51  ;;  %v1255_v8 = vmul.f32 %v17924_v21, %v11089_v4  ;;  %v17927_v1 = vld [vmem:[#allocation30_spill] sm:$0xff] }
 0x1be   : > { %v1338_v10 = vsel %vm1306_vm6, %v17923_v41, %v1337_v32  ;;  %v2559_v41 = vmax.f32 %v10904_v5, 0.0  ;;  %vm2710_vm12 = vcmp.lt.f32.partialorder %v2709_v6, 0.0004427343  ;;  %v1624_v50 = vadd.f32 %v11076_v52, %v11067_v47  ;;  %v17929_v51 = vld [vmem:[#allocation14_spill] sm:$0xff] }
 0x1bf   : > { %v17925_v36 = vrot.slane %v11141_v12, 1  ;;  %v2711_v45 = vsel %vm2710_vm12, %v2708_v23, %v2705_v16  ;;  %v17926_v39 = vrot.slane %v10828_v14, 3  ;;  %v17928_v42 = vrot.slane %v17927_v1, 3 }
 0x1c0   : > { %v17930_v13 = vrot.slane %v17929_v51, 3  ;;  %v17931_v17 = vrot.slane %v10842_v7, 3  ;;  %v17932_v40 = vmov 34   ;;  %v9179_v52 = vpop.eup %9178  ;;  %v11214_v47 = vadd.f32 %v10415_v27, %v11089_v4 }
 0x1c1   : > { %v1342_v38 = vsel %vm1306_vm6, %v1337_v32, %v17925_v36  ;;  %v1728_v54 = vsel %vm1722_vm8, %v17928_v42, %v17926_v39  ;;  %8866 = vset.pattern.permute.xlu2 %v17932_v40  ;;  %v2815_v36 = vadd.f32 %v2711_v45, %v2559_v41  ;;  %v17611_v16 = vrot.slane %v11182_v46, 2  ;;  %v17934_v39 = vld [vmem:[#allocation9_spill] sm:$0xff] }
 0x1c2   : > { %v1736_v6 = vsel %vm1722_vm8, %v17931_v17, %v17930_v13  ;;  %v11216_v32 = vadd.f32 %v1728_v54, %v1620_v55  ;;  %v11223_v23 = vmul.f32 %v10614_v59, %v11104_v25  ;;  %v17612_v7 = vrot.slane %v11188_v31, 1  ;;  %v9181_v17 = vpop.eup %9180 }
 0x1c3   : > { %v11218_v14 = vadd.f32 %v1736_v6, %v1624_v50  ;;  %vm2575_vm14 = vcmp.ne.f32.partialorder %v10904_v5, %v10904_v5  ;;  %v1180_v13 = vmul.f32 %v10447_v58, %v11089_v4  ;;  %v1423_v45 = vadd.f32 %v1342_v38, %v1213_v0  ;;  %v11269_v29 = vpop.f32.mrf.mxu1 }
 0x1c4   : > { %17933 = vst [vmem:[#allocation13_spill] sm:$0xff] %v11223_v23  ;;  %v11231_v55 = vsel %vm2575_vm14, %v10904_v5, %v2815_v36  ;;  %v8415_v50 = vmul.f32 -1.442695, %v11216_v32  ;;  %v1339_v41 = vrot.slane %v1255_v8, 1  ;;  %v11236_v1 = vmul.f32 %v17934_v39, %v11166_v18  ;;  %8874 = vset.pattern.permute.xlu0 %v17932_v40 }
 0x1c5   : > { %v11240_v42 = vadd.f32 %v10415_v27, %v11166_v18  ;;  %3135 = vperm.xlu1 %8864, %v11231_v55   ;;  %v8419_v54 = vmul.f32 -1.442695, %v11218_v14  ;;  %v11245_v38 = vadd.f32 1.0, %v9179_v52  ;;  %9182 = vpow2.f32 %v2647_v43  ;;  %3274 = vperm.xlu2 %8866, %v11231_v55  }
 0x1c6   : > { %17935 = vst [vmem:[#allocation30_spill] sm:$0xff] %v11236_v1  ;;  %v11247_v5 = vadd.f32 %v1338_v10, %v1211_v19  ;;  %v2610_v0 = vand.u32 2147483647, %v11214_v47  ;;  %v11253_v8 = vmul.f32 %v17934_v39, %v11089_v4  ;;  %v17939_v51 = vrot.slane %v11137_v48, 2 }
 0x1c7   : > { %17936 = vst [vmem:[#allocation14_spill] sm:$0xff] %v11240_v42  ;;  %v1344_v19 = vsel %vm1306_vm6, %v1339_v41, %v17612_v7  ;;  %v11264_v43 = vadd.f32 1.0, %v9181_v17  ;;  %v1214_v10 = vadd.f32 %v1180_v13, %v10481_v3  ;;  %9184 = vpow2.f32 %v8415_v50 }
 0x1c8   : > { %17937 = vst [vmem:[#allocation52_spill] sm:$0xff] %v11245_v38  ;;  %v1552_v6 = vsel %vm17703_vm7, %v17939_v51, %v17611_v16  ;;  %v17941_v51 = vld [vmem:[#allocation11_spill] sm:$0xff]  ;;  %v2611_v52 = vand.u32 2147483647, %v11240_v42  ;;  %9186 = vpow2.f32 %v8419_v54  ;;  %v2626_v13 = vsub.f32 0.0, %v2610_v0 }
 0x1c9   : > { %17938 = vst [vmem:[#allocation53_spill] sm:$0xff] %v11247_v5  ;;  %v1633_v36 = vadd.f32 %v1552_v6, %v1423_v45  ;;  %v11267_v5 = vpop.f32.mrf.mxu2  ;;  %v11274_v16 = vmul.f32 %v17941_v51, %v11166_v18  ;;  %9188 = vrcp.f32 %v11245_v38  ;;  %v11280_v17 = vmul.f32 %v17941_v51, %v11089_v4 }
 0x1ca   : > { %17940 = vst [vmem:[#allocation54_spill] sm:$0xff] %v11264_v43  ;;  %v1424_v45 = vadd.f32 %v1344_v19, %v1214_v10  ;;  %v1549_v6 = vrot.slane %v11253_v8, 2  ;;  %v17944_v50 = vrot.slane %v11223_v23, 3  ;;  %v17945_v7 = vrot.slane %v11149_v22, 3  ;;  %v17949_v19 = vld [vmem:[#allocation23_spill] sm:$0xff] }
 0x1cb   : > { %17942 = vst [vmem:[#allocation11_spill] sm:$0xff] %v11274_v16  ;;  %v2005_v37 = vmul.f32 %v11052_v26, %v10937_v44  ;;  %v2065_v54 = vmul.f32 %v11131_v60, %v11045_v63  ;;  %v11292_v38 = vpop.eup %9182  ;;  %9190 = vrcp.f32 %v11264_v43  ;;  %v17946_v4 = vrot.slane %v11137_v48, 2 }
 0x1cc   : > { %17943 = vst [vmem:[#allocation55_spill] sm:$0xff] %v11280_v17  ;;  %v1754_v33 = vsel %vm1722_vm8, %v17945_v7, %v17944_v50  ;;  %v17947_v0 = vrot.slane %v10965_v20, 2  ;;  %v17950_v10 = vrot.slane %v17949_v19, 1  ;;  %v17952_v23 = vrot.slane %v11236_v1, 2 }
 0x1cd   : > { %v11305_v50 = vadd.f32 %v1754_v33, %v1633_v36  ;;  %v2627_v43 = vsub.f32 0.0, %v2611_v52  ;;  %v11313_v48 = vmul.f32 %v10542_v49, %v11184_v11  ;;  %8865 = vset.pattern.permute.xlu1 %v17888_v2  ;;  %v9185_v20 = vpop.eup %9184  ;;  %v1181_v33 = vmul.f32 %v10550_v62, %v11104_v25  ;;  %8868 = vset.pattern.permute.xlu2 %v17847_v35 }
 0x1ce   : > { %v11300_v8 = vsel %vm17703_vm7, %v17947_v0, %v17946_v4  ;;  %v1340_v7 = vsel %vm1306_vm6, %v17950_v10, %v1339_v41  ;;  %v1554_v22 = vsel %vm17703_vm7, %v1549_v6, %v17952_v23  ;;  %v2649_v0 = vmul.f32 1.442695, %v2626_v13  ;;  %3210 = vperm.xlu1 %8865, %v11231_v55   ;;  %v9187_v23 = vpop.eup %9186 }
 0x1cf   : > { %17948 = vst [vmem:[#allocation56_spill] sm:$0xff] %v11300_v8  ;;  %v1634_v41 = vadd.f32 %v1554_v22, %v1424_v45  ;;  %v11323_v52 = vmul.f32 %v10556_v28, %v11184_v11  ;;  %v11325_v36 = vadd.f32 1.0, %v9185_v20  ;;  %v2006_v19 = vsub.f32 1.0, %v2005_v37  ;;  %v11327_v30 = vpop.eup %9188 }
 0x1d0   : > { %17951 = vst [vmem:[#allocation23_spill] sm:$0xff] %v11305_v50  ;;  %v2066_v10 = vsub.f32 1.0, %v2065_v54  ;;  %v8428_v13 = vmul.f32 -1.442695, %v11305_v50  ;;  %v1182_v25 = vmul.f32 %v10447_v58, %v11166_v18  ;;  %v1183_v22 = vmul.f32 %v10550_v62, %v11184_v11 }
 0x1d1   : > { %17953 = vst [vmem:[#allocation57_spill] sm:$0xff] %v11327_v30  ;;  %v11334_v45 = vadd.f32 1.0, %v9187_v23  ;;  %v17954_v4 = vrot.slane %v11274_v16, 3  ;;  %v17955_v8 = vrot.slane %v11280_v17, 3  ;;  %v2651_v37 = vmul.f32 1.442695, %v2627_v43  ;;  %v11343_v30 = vpop.eup %9190  ;;  %v11354_v16 = vpop.f32.mrf.mxu2 }
 0x1d2   : > { %v17623_v54 = vrot.slane %v11313_v48, 1  ;;  %9192 = vrcp.f32 %v11325_v36  ;;  %17956 = vst [vmem:[#allocation58_spill] sm:$0xff] %v11343_v30  ;;  %v11346_v18 = vadd.f32 %v1340_v7, %v11164_v34  ;;  %v11352_v23 = vmul.f32 %v10614_v59, %v11184_v11  ;;  %v11356_v17 = vpop.f32.mrf.mxu1  ;;  %v17960_v7 = vld [vmem:[#allocation26_spill] sm:$0xff] }
 0x1d3   : > { %v1756_v20 = vsel %vm1722_vm8, %v17955_v8, %v17954_v4  ;;  %9194 = vrcp.f32 %v11334_v45  ;;  %v17624_v43 = vrot.slane %v11323_v52, 2  ;;  %v2007_v8 = vmul.f32 %v11052_v26, %v2006_v19 }
 0x1d4   : > { %17957 = vst [vmem:[#allocation59_spill] sm:$0xff] %v11346_v18  ;;  %v11348_v50 = vadd.f32 %v1756_v20, %v1634_v41  ;;  %9196 = vpow2.f32 %v2649_v0  ;;  %v2067_v34 = vmul.f32 %v11131_v60, %v2066_v10  ;;  %v17961_v4 = vrot.slane %v17960_v7, 2 }
 0x1d5   : > { %17959 = vst [vmem:[#allocation61_spill] sm:$0xff] %v11352_v23  ;;  %v1215_v11 = vadd.f32 %v1181_v33, %v10564_v24  ;;  %9198 = vpow2.f32 %v8428_v13  ;;  %v11369_v20 = vadd.f32 %v1182_v25, %v10481_v3  ;;  %v11372_v0 = vadd.f32 %v1183_v22, %v10564_v24 }
 0x1d6   : > { %17958 = vst [vmem:[#allocation60_spill] sm:$0xff] %v11348_v50  ;;  %v11365_v41 = vsel %vm17703_vm7, %v17961_v4, %v1549_v6  ;;  %9200 = vpow2.f32 %v2651_v37  ;;  %v17964_v19 = vrot.slane %v11141_v12, 1  ;;  %v2013_v7 = vand.u32 2147483647, %v10937_v44  ;;  %8867 = vset.pattern.permute.xlu1 %v17913_v15 }
 0x1d7   : > { %17962 = vst [vmem:[#allocation26_spill] sm:$0xff] %v11365_v41  ;;  %v11381_v6 = vmul.f32 -1.442695, %v11348_v50  ;;  %vm2010_vm15 = vweird.f32 %v11052_v26  ;;  %v2015_v13 = vand.u32 2147483648, %v10937_v44  ;;  %v17965_v12 = vrot.slane %v11182_v46, 2  ;;  %3338 = vperm.xlu1 %8867, %v11231_v55  }
 0x1d8   : > { %17963 = vst [vmem:[#allocation62_spill] sm:$0xff] %v11369_v20  ;;  %v1346_v10 = vsel %vm1306_vm6, %v17964_v19, %v17623_v54  ;;  %v9193_v25 = vpop.eup %9192  ;;  %v2008_v37 = vadd.f32 %v11052_v26, %v2007_v8  ;;  %v2068_v4 = vadd.f32 %v11131_v60, %v2067_v34  ;;  %vm2070_vm0 = vweird.f32 %v11131_v60 }
 0x1d9   : > { %v11392_v22 = vsel %vm17703_vm7, %v17965_v12, %v17624_v43  ;;  %v9195_v19 = vpop.eup %9194  ;;  %v11398_v33 = vadd.f32 %v1346_v10, %v1215_v11  ;;  %v11402_v54 = vmul.f32 %v10447_v58, %v11267_v5  ;;  %vm2009_vm2 = vweird.f32 %v10937_v44  ;;  %v11441_v20 = vpop.f32.mrf.mxu2 }
 0x1da   : > { %17966 = vst [vmem:[#allocation63_spill] sm:$0xff] %v11392_v22  ;;  %v2035_v46 = vmul.f32 %v9193_v25, %v11325_v36  ;;  %v11406_v12 = vpop.eup %9196  ;;  %v11410_v8 = vmul.f32 %v10542_v49, %v11269_v29  ;;  %vm11414_vm3 = vmor %vm2009_vm2, %vm2010_vm15  ;;  %vm11418_vm4 = vcmp.eq.f32.partialorder %v2013_v7, 8.507059e+37  ;;  %vm2069_vm5 = vweird.f32 %v11045_v63  ;;  %v11445_v2 = vpop.f32.mrf.mxu1 }
 0x1db   : > { %17967 = vst [vmem:[#allocation64_spill] sm:$0xff] %v11398_v33  ;;  %v2095_v44 = vmul.f32 %v9195_v19, %v11334_v45  ;;  %v9199_v10 = vpop.eup %9198  ;;  %v2016_v43 = vor.u32 1.1754944e-38, %v2015_v13  ;;  %vm11426_vm9 = vmor %vm2069_vm5, %vm2070_vm0  ;;  %v2073_v50 = vand.u32 2147483647, %v11045_v63  ;;  %v2075_v7 = vand.u32 2147483648, %v11045_v63 }
 0x1dc   : > { %v2036_v22 = vsub.f32 1.0, %v2035_v46  ;;  %v11432_v30 = vpop.eup %9200  ;;  %v2012_v41 = vsel %vm11414_vm3, %v11052_v26, %v2008_v37  ;;  %v2045_v18 = vand.u32 2147483648, %v11325_v36  ;;  %v2072_v13 = vsel %vm11426_vm9, %v11131_v60, %v2068_v4 }
 0x1dd   : > { %17974 = vst [vmem:[#allocation65_spill] sm:$0xff] %v11432_v30  ;;  %v2096_v46 = vsub.f32 1.0, %v2095_v44  ;;  %vm2040_vm10 = vweird.f32 %v9193_v25  ;;  %v2043_v42 = vand.u32 2147483647, %v11325_v36  ;;  %v2105_v63 = vand.u32 2147483648, %v11334_v45 }
 0x1de   : > { %v2037_v1 = vmul.f32 %v9193_v25, %v2036_v22  ;;  %vm2100_vm11 = vweird.f32 %v9195_v19  ;;  %v2103_v26 = vand.u32 2147483647, %v11334_v45  ;;  %v2721_v37 = vadd.f32 1.0, %v11292_v38 }
 0x1df   : > { %v2097_v30 = vmul.f32 %v9195_v19, %v2096_v46  ;;  %vm2039_vm12 = vweird.f32 %v11325_v36  ;;  %vm2074_vm14 = vcmp.eq.f32.partialorder %v2073_v50, 8.507059e+37  ;;  %v2076_v60 = vor.u32 1.1754944e-38, %v2075_v7  ;;  %8870 = vset.pattern.permute.xlu1 %v17932_v40 }
 0x1e0   : > { %v2038_v34 = vadd.f32 %v9193_v25, %v2037_v1  ;;  %v2017_v33 = vsel %vm11418_vm4, %v2016_v43, %v2012_v41  ;;  %vm2041_vm15 = vmor %vm2039_vm12, %vm2040_vm10  ;;  %v2046_v22 = vor.u32 1.1754944e-38, %v2045_v18  ;;  %vm2099_vm0 = vweird.f32 %v11334_v45  ;;  %3278 = vperm.xlu1 %8870, %v11169_v53  }
 0x1e1   : > { %v2098_v4 = vadd.f32 %v9195_v19, %v2097_v30  ;;  %vm2044_vm2 = vcmp.eq.f32.partialorder %v2043_v42, 8.507059e+37  ;;  %v2077_v46 = vsel %vm2074_vm14, %v2076_v60, %v2072_v13  ;;  %vm2101_vm3 = vmor %vm2099_vm0, %vm2100_vm11  ;;  %v2106_v1 = vor.u32 1.1754944e-38, %v2105_v63  ;;  %v17975_v30 = vld [vmem:[#allocation31_spill] sm:$0xff]  ;;  %v11488_v60 = vpop.f32.mrf.mxu2 }
 0x1e2   : > { %v2042_v44 = vsel %vm2041_vm15, %v9193_v25, %v2038_v34  ;;  %vm2104_vm5 = vcmp.eq.f32.partialorder %v2103_v26, 8.507059e+37  ;;  %9202 = vlog2.f32 %v2721_v37  ;;  %v11456_v43 = vadd.f32 1.0, %v9199_v10 }
 0x1e3   : > { %v2047_v50 = vsel %vm2044_vm2, %v2046_v22, %v2042_v44  ;;  %v2102_v36 = vsel %vm2101_vm3, %v9195_v19, %v2098_v4  ;;  %v2500_v41 = vmul.f32 %v2017_v33, %v17975_v30  ;;  %v11462_v42 = vmul.f32 %v17924_v21, %v11267_v5  ;;  %v11490_v33 = vpop.f32.mrf.mxu1 }
 0x1e4   : > { %v2107_v18 = vsel %vm2104_vm5, %v2106_v1, %v2102_v36  ;;  %v2502_v45 = vmul.f32 %v2047_v50, %v11216_v32  ;;  %v11466_v25 = vmul.f32 %v10556_v28, %v11269_v29  ;;  %v2504_v11 = vmul.f32 %v2077_v46, %v10908_v61  ;;  %17976 = vst [vmem:[#allocation31_spill] sm:$0xff] %v11490_v33 }
 0x1e5   : > { %v2506_v19 = vmul.f32 %v2107_v18, %v11218_v14  ;;  %v11472_v10 = vmul.f32 %v17934_v39, %v11267_v5  ;;  %v17632_v7 = vrot.slane %v11410_v8, 1  ;;  %v2724_v32 = vmul.f32 -0.5, %v11292_v38 }
 0x1e6   : > { %v3533_v13 = vpack.c.bf16 %v2502_v45, %v2500_v41  ;;  %9204 = vpow2.f32 %v11381_v6  ;;  %v1218_v63 = vadd.f32 %v11402_v54, %v10481_v3  ;;  %v11481_v26 = vadd.f32 %v10415_v27, %v11267_v5 }
 0x1e7   : > { %v3534_v61 = vpack.c.bf16 %v2506_v19, %v2504_v11  ;;  %9206 = vrcp.f32 %v11456_v43  ;;  %v11486_v14 = vmul.f32 %v17924_v21, %v11354_v16  ;;  %v17635_v54 = vrot.slane %v11466_v25, 2 }
 0x1e8   : > { %v3544_v37 = vshrl.u32 %v3533_v13, 16  ;;  %v3547_v34 = vshll.u32 %v3533_v13, 16  ;;  %v9203_v6 = vpop.eup %9202  ;;  %v11495_v22 = vmul.f32 %v10614_v59, %v11269_v29  ;;  %v17977_v46 = vrot.slane %v11313_v48, 1  ;;  %8872 = vset.pattern.permute.xlu1 %v17847_v35 }
 0x1e9   : > { %v3552_v4 = vshrl.u32 %v3534_v61, 16  ;;  %v3555_v44 = vshll.u32 %v3534_v61, 16  ;;  %v2725_v18 = vadd.f32 1.0, %v2724_v32  ;;  %v11505_v30 = vmul.f32 %v17934_v39, %v11354_v16 }
 0x1ea   : > { %v1350_v1 = vsel %vm1306_vm6, %v17977_v46, %v17632_v7  ;;  %v3546_v50 = vrot.slane %v3544_v37, 2  ;;  %v3549_v36 = vrot.slane %v3547_v34, 3  ;;  %v2727_v11 = vand.u32 2147483647, %v11292_v38 }
 0x1eb   : > { %v3554_v41 = vrot.slane %v3552_v4, 2  ;;  %v3557_v45 = vrot.slane %v3555_v44, 3  ;;  %v11511_v48 = vmul.f32 %v10542_v49, %v11356_v17  ;;  %vm3542_vm4 = vsmask.f32 5376 }
 0x1ec   : > { %v2723_v13 = vmul.f32 0.6931472, %v9203_v6  ;;  %v11513_v61 = vpop.eup %9204  ;;  %v17634_v32 = vrot.slane %v11462_v42, 1  ;;  %v1427_v37 = vadd.f32 %v1350_v1, %v11372_v0  ;;  %v3550_v34 = vor.u32 %v3549_v36, %v3546_v50 }
 0x1ed   : > { %v11517_v46 = vor.u32 %v3557_v45, %v3554_v41  ;;  %v11519_v4 = vpop.eup %9206  ;;  %v2612_v44 = vand.u32 2147483647, %v11481_v26  ;;  %v17979_v7 = vrot.slane %v11323_v52, 2  ;;  %v17640_v6 = vrot.slane %v11495_v22, 3 }
 0x1ee   : > { %v2726_v33 = vmul.f32 %v11292_v38, %v2725_v18  ;;  %v1185_v0 = vmul.f32 %v10550_v62, %v11269_v29  ;;  %vm11536_vm9 = vcmp.lt.f32.partialorder %v2727_v11, 0.0004427343  ;;  %v17983_v52 = vrot.slane %v11486_v14, 1 }
 0x1ef   : > { %17978 = vst [vmem:[#allocation66_spill] sm:$0xff] %v11517_v46  ;;  %v1560_v19 = vsel %vm17703_vm7, %v17979_v7, %v17635_v54  ;;  %v11534_v50 = vsel %vm3542_vm4, %v3550_v34, %v11517_v46  ;;  %v11548_v29 = vmul.f32 %v10556_v28, %v11356_v17  ;;  %v2230_v41 = vmul.f32 %v11519_v4, %v11456_v43 }
 0x1f0   : > { %17980 = vst [vmem:[#allocation67_spill] sm:$0xff] %v11534_v50  ;;  %v1352_v7 = vsel %vm1306_vm6, %v17634_v32, %v17983_v52  ;;  %3623 = vrot.lane.b32.xlu0 %v11534_v50, %s9846_s28  ;;  %v2729_v18 = vsel %vm11536_vm9, %v2726_v33, %v2723_v13  ;;  %v1637_v45 = vadd.f32 %v1560_v19, %v1427_v37  ;;  %v2561_v34 = vmax.f32 %v11059_v9, 0.0  ;;  %v11572_v13 = vpop.f32.mrf.mxu2  ;;  %v11574_v37 = vpop.f32.mrf.mxu1 }
 0x1f1   : > { %v11558_v11 = vmul.f32 %v17941_v51, %v11354_v16  ;;  %v11565_v54 = vmul.f32 %v17941_v51, %v11267_v5  ;;  %v17986_v33 = vrot.slane %v11352_v23, 3  ;;  %17987 = vst [vmem:[#allocation70_spill] sm:$0xff] %v11574_v37  ;;  %v2628_v36 = vsub.f32 0.0, %v2612_v44 }
 0x1f2   : > { %v1219_v38 = vadd.f32 %v1185_v0, %v10564_v24  ;;  %v1428_v52 = vadd.f32 %v1352_v7, %v1218_v63  ;;  %v2817_v1 = vadd.f32 %v2729_v18, %v2561_v34  ;;  %v17988_v32 = vrot.slane %v11505_v30, 2 }
 0x1f3   : > { %17984 = vst [vmem:[#allocation68_spill] sm:$0xff] %v11558_v11  ;;  %v1762_v19 = vsel %vm1722_vm8, %v17986_v33, %v17640_v6  ;;  %v17989_v5 = vrot.slane %v11472_v10, 2  ;;  %v17990_v46 = vrot.slane %v11511_v48, 1  ;;  %v17991_v23 = vrot.slane %v11410_v8, 1 }
 0x1f4   : > { %17985 = vst [vmem:[#allocation69_spill] sm:$0xff] %v11565_v54  ;;  %v17641_v6 = vrot.slane %v11548_v29, 2  ;;  %v11590_v44 = vmul.f32 %v10614_v59, %v11356_v17  ;;  %v2231_v63 = vsub.f32 1.0, %v2230_v41  ;;  %v2240_v0 = vand.u32 2147483648, %v11456_v43 }
 0x1f5   : > { %v1562_v50 = vsel %vm17703_vm7, %v17989_v5, %v17988_v32  ;;  %v1354_v33 = vsel %vm1306_vm6, %v17991_v23, %v17990_v46  ;;  %v11593_v7 = vadd.f32 %v1762_v19, %v1637_v45  ;;  %v17642_v18 = vrot.slane %v11558_v11, 3 }
 0x1f6   : > { %v11599_v8 = vadd.f32 %v10415_v27, %v11354_v16  ;;  %vm2577_vm10 = vcmp.ne.f32.partialorder %v11059_v9, %v11059_v9  ;;  %v2853_v23 = vmul.f32 %v10530_v56, %v11231_v55  ;;  %v2653_v46 = vmul.f32 1.442695, %v2628_v36 }
 0x1f7   : > { %17992 = vst [vmem:[#allocation71_spill] sm:$0xff] %v11593_v7  ;;  %v1638_v41 = vadd.f32 %v1562_v50, %v1428_v52  ;;  %v1429_v34 = vadd.f32 %v1354_v33, %v1219_v38  ;;  %v11606_v45 = vsel %vm2577_vm10, %v11059_v9, %v2817_v1  ;;  %v17994_v19 = vrot.slane %v11466_v25, 2 }
 0x1f8   : > { %17993 = vst [vmem:[#allocation72_spill] sm:$0xff] %v11599_v8  ;;  %v17644_v32 = vrot.slane %v11590_v44, 3  ;;  %3282 = vperm.xlu0 %8874, %v11606_v45   ;;  %2956 = vrot.lane.b32.xlu2 %v2853_v23, %s9844_s26  ;;  %v5096_v55 = vsel %vm5088_vm13, %v2853_v23, 0.0  ;;  %v2730_v50 = vadd.f32 1.0, %v11406_v12  ;;  %v2232_v38 = vmul.f32 %v11519_v4, %v2231_v63 }
 0x1f9   : > { %v1564_v5 = vsel %vm17703_vm7, %v17994_v19, %v17641_v6  ;;  %v8432_v9 = vmul.f32 -1.442695, %v11593_v7  ;;  %v17995_v25 = vrot.slane %v11565_v54, 3  ;;  %v11626_v52 = vadd.f32 %v5096_v55, %v11006_v57  ;;  %v11652_v7 = vpop.f32.mrf.mxu2 }
 0x1fa   : > { %v2613_v36 = vand.u32 2147483647, %v11599_v8  ;;  %v11631_v33 = vmul.f32 %v10542_v49, %v11445_v2  ;;  %9208 = vlog2.f32 %v2730_v50  ;;  %v2733_v63 = vmul.f32 -0.5, %v11406_v12  ;;  %18001 = vst [vmem:[#allocation75_spill] sm:$0xff] %v11652_v7 }
 0x1fb   : > { %v1764_v1 = vsel %vm1722_vm8, %v17995_v25, %v17642_v18  ;;  %v11634_v23 = vor.u32 1.1754944e-38, %v2240_v0  ;;  %v17997_v19 = vrot.slane %v11462_v42, 1  ;;  %v17998_v6 = vrot.slane %v11188_v31, 1  ;;  %v11654_v42 = vpop.f32.mrf.mxu1 }
 0x1fc   : > { %17996 = vst [vmem:[#allocation73_spill] sm:$0xff] %v11631_v33  ;;  %v1187_v57 = vmul.f32 %v10550_v62, %v11356_v17  ;;  %v1639_v55 = vadd.f32 %v1564_v5, %v1429_v34  ;;  %9210 = vpow2.f32 %v2653_v46  ;;  %v11645_v18 = vadd.f32 %v1764_v1, %v1638_v41 }
 0x1fd   : > { %v11641_v25 = vsel %vm1306_vm6, %v17998_v6, %v17997_v19  ;;  %v18000_v50 = vrot.slane %v11495_v22, 3  ;;  %18002 = vst [vmem:[#allocation76_spill] sm:$0xff] %v11654_v42  ;;  %v2854_v31 = vmul.f32 %v10530_v56, %v11169_v53  ;;  %v11659_v6 = vadd.f32 %v11519_v4, %v2232_v38 }
 0x1fe   : > { %17999 = vst [vmem:[#allocation74_spill] sm:$0xff] %v11645_v18  ;;  %v11662_v17 = vadd.f32 1.0, %v11513_v61  ;;  %9212 = vpow2.f32 %v8432_v9  ;;  %v2734_v46 = vadd.f32 1.0, %v2733_v63  ;;  %v11665_v22 = vsub.f32 0.0, %v2613_v36 }
 0x1ff   : > { %v1766_v0 = vsel %vm1722_vm8, %v18000_v50, %v17644_v32  ;;  %1148 = vst [vmem:[#allocation3] sm:$0xff] %v11654_v42  ;;  %v11670_v34 = vmul.f32 %v10530_v56, %v11606_v45  ;;  %v2736_v5 = vand.u32 2147483647, %v11406_v12  ;;  %2958 = vrot.lane.b32.xlu1 %v2854_v31, %s9844_s26  ;;  %v1221_v38 = vadd.f32 %v1187_v57, %v10564_v24 }
 0x200   : > { %18003 = vst [vmem:[#allocation77_spill] sm:$0xff] %v11662_v17  ;;  %v11675_v61 = vadd.f32 %v1766_v0, %v1639_v55  ;;  %v1188_v9 = vmul.f32 %v10447_v58, %v11441_v20  ;;  %v11681_v1 = vmul.f32 %v10556_v28, %v11445_v2  ;;  %v9209_v36 = vpop.eup %9208  ;;  %v11684_v63 = vmul.f32 -1.442695, %v11645_v18  ;;  %3140 = vperm.xlu2 %8868, %v11169_v53  }
 0x201   : > { %v11688_v19 = vmul.f32 %v17924_v21, %v11441_v20  ;;  %v11692_v57 = vmul.f32 %v17934_v39, %v11441_v20  ;;  %2960 = vrot.lane.b32.xlu0 %v11670_v34, %s9844_s26  ;;  %v11698_v55 = vmul.f32 %v17924_v21, %v11652_v7  ;;  %v11703_v50 = vmul.f32 %v10614_v59, %v11445_v2 }
 0x202   : > { %18004 = vst [vmem:[#allocation78_spill] sm:$0xff] %v11675_v61  ;;  %v11707_v0 = vmul.f32 %v17924_v21, %v11488_v60  ;;  %8876 = vset.pattern.permute.xlu0 %v17847_v35  ;;  %v2732_v32 = vmul.f32 0.6931472, %v9209_v36  ;;  %v2735_v41 = vmul.f32 %v11406_v12, %v2734_v46  ;;  %v11711_v18 = vpop.eup %9210  ;;  %v18009_v54 = vrot.slane %v11631_v33, 1  ;;  %v11735_v33 = vpop.f32.mrf.mxu2 }
 0x203   : > { %18005 = vst [vmem:[#allocation79_spill] sm:$0xff] %v11681_v1  ;;  %v18010_v42 = vrot.slane %v11511_v48, 1  ;;  %v11720_v8 = vmul.f32 %v17924_v21, %v11572_v13  ;;  %v2562_v37 = vmax.f32 %v11214_v47, 0.0  ;;  %vm2737_vm11 = vcmp.lt.f32.partialorder %v2736_v5, 0.0004427343 }
 0x204   : > { %18006 = vst [vmem:[#allocation80_spill] sm:$0xff] %v11698_v55  ;;  %v11723_v24 = vpop.eup %9212  ;;  %v1192_v12 = vmul.f32 %v10447_v58, %v11572_v13  ;;  %v2738_v46 = vsel %vm2737_vm11, %v2735_v41, %v2732_v32  ;;  %vm17744_vm12 = vcmask 261120   ;;  %vm2235_vm14 = vweird.f32 %v11519_v4 }
 0x205   : > { %18007 = vst [vmem:[#allocation81_spill] sm:$0xff] %v11703_v50  ;;  %v1358_v11 = vsel %vm1306_vm6, %v18010_v42, %v18009_v54  ;;  %v11732_v48 = vmul.f32 %v17934_v39, %v11652_v7  ;;  %v2818_v42 = vadd.f32 %v2738_v46, %v2562_v37  ;;  %v5098_v5 = vsel %vm5088_vm13, %v2854_v31, 0.0 }
 0x206   : > { %18008 = vst [vmem:[#allocation82_spill] sm:$0xff] %v11707_v0  ;;  %v11742_v41 = vmul.f32 %v17934_v39, %v11488_v60  ;;  %vm2234_vm15 = vweird.f32 %v11456_v43  ;;  %v11750_v31 = vmul.f32 %v17934_v39, %v11572_v13  ;;  %vm2578_vm0 = vcmp.ne.f32.partialorder %v11214_v47, %v11214_v47 }
 0x207   : > { %18011 = vst [vmem:[#allocation83_spill] sm:$0xff] %v11720_v8  ;;  %v11755_v46 = vadd.f32 %v5098_v5, %v11626_v52  ;;  %3145 = vperm.xlu1 %8872, %v11606_v45   ;;  %v1431_v21 = vadd.f32 %v1358_v11, %v1221_v38  ;;  %v18013_v36 = vrot.slane %v11681_v1, 2  ;;  %v18014_v32 = vrot.slane %v11548_v29, 2  ;;  %v18017_v29 = vld [vmem:[#allocation65_spill] sm:$0xff]  ;;  %vm11830_vm2 = vmor %vm2234_vm15, %vm2235_vm14 }
 0x208   : > { %18012 = vst [vmem:[#allocation84_spill] sm:$0xff] %v11735_v33  ;;  %v1226_v37 = vadd.f32 %v1192_v12, %v10481_v3  ;;  %v11765_v39 = vsel %vm2578_vm0, %v11214_v47, %v2818_v42  ;;  %v18016_v35 = vrot.slane %v11720_v8, 1  ;;  %v11775_v11 = vmul.f32 %v17941_v51, %v11652_v7  ;;  %8871 = vset.pattern.permute.xlu2 %v17913_v15 }
 0x209   : > { %1150 = vst.msk [vmem:[#allocation3 + $0x8] sm:$0xff] %vm17744_vm12, %v11735_v33  ;;  %v1568_v54 = vsel %vm17703_vm7, %v18014_v32, %v18013_v36  ;;  %v18015_v33 = vrot.slane %v11698_v55, 1  ;;  %3150 = vperm.xlu0 %8876, %v11765_v39   ;;  %v2739_v38 = vadd.f32 1.0, %v18017_v29  ;;  %v1222_v47 = vadd.f32 %v1188_v9, %v10481_v3  ;;  %3342 = vperm.xlu2 %8871, %v11169_v53  }
 0x20a   : > { %v11784_v12 = vmul.f32 %v17941_v51, %v11441_v20  ;;  %v18019_v42 = vrot.slane %v11688_v19, 1  ;;  %v17666_v36 = vrot.slane %v11750_v31, 2  ;;  %v11800_v5 = vmul.f32 %v17941_v51, %v11572_v13 }
 0x20b   : > { %v1368_v52 = vsel %vm1306_vm6, %v18016_v35, %v18015_v33  ;;  %v11788_v35 = vmul.f32 %v17941_v51, %v11488_v60  ;;  %v18018_v33 = vrot.slane %v11707_v0, 1  ;;  %v1641_v55 = vadd.f32 %v1568_v54, %v1431_v21 }
 0x20c   : > { %v18020_v8 = vrot.slane %v11703_v50, 3  ;;  %v18021_v1 = vrot.slane %v11590_v44, 3  ;;  %v1436_v0 = vadd.f32 %v1368_v52, %v1226_v37  ;;  %v2742_v7 = vmul.f32 -0.5, %v18017_v29 }
 0x20d   : > { %v1360_v32 = vsel %vm1306_vm6, %v18019_v42, %v18018_v33  ;;  %v18022_v33 = vrot.slane %v11732_v48, 2  ;;  %v17668_v9 = vrot.slane %v11775_v11, 3  ;;  %9214 = vlog2.f32 %v2739_v38 }
 0x20e   : > { %v1770_v53 = vsel %vm1722_vm8, %v18021_v1, %v18020_v8  ;;  %v2748_v21 = vadd.f32 1.0, %v11711_v18  ;;  %9216 = vrcp.f32 %v11662_v17  ;;  %v2655_v44 = vmul.f32 1.442695, %v11665_v22 }
 0x20f   : > { %v1578_v42 = vsel %vm17703_vm7, %v17666_v36, %v18022_v33  ;;  %v8434_v8 = vmul.f32 -1.442695, %v11675_v61  ;;  %v1432_v1 = vadd.f32 %v1360_v32, %v1222_v47  ;;  %v18023_v54 = vrot.slane %v11742_v41, 2  ;;  %8875 = vset.pattern.permute.xlu1 %v17913_v15 }
 0x210   : > { %v18024_v37 = vrot.slane %v11692_v57, 2  ;;  %v17667_v36 = vrot.slane %v11800_v5, 3  ;;  %9218 = vlog2.f32 %v2748_v21  ;;  %v11835_v38 = vadd.f32 %v1770_v53, %v1641_v55  ;;  %3346 = vperm.xlu1 %8875, %v11606_v45  }
 0x211   : > { %9220 = vpow2.f32 %v11684_v63  ;;  %v1646_v47 = vadd.f32 %v1578_v42, %v1436_v0  ;;  %v2743_v32 = vadd.f32 1.0, %v2742_v7  ;;  %v2237_v21 = vsel %vm11830_vm2, %v11519_v4, %v11659_v6  ;;  %8879 = vset.pattern.permute.xlu0 %v17913_v15 }
 0x212   : > { %v1570_v52 = vsel %vm17703_vm7, %v18024_v37, %v18023_v54  ;;  %18027 = vst [vmem:[#allocation65_spill] sm:$0xff] %v11835_v38  ;;  %v18028_v54 = vand.u32 2147483647, %v11456_v43  ;;  %v17669_v33 = vrot.slane %v11784_v12, 3  ;;  %v1780_v7 = vsel %vm1722_vm8, %v17667_v36, %v17668_v9  ;;  %3350 = vperm.xlu0 %8879, %v11765_v39   ;;  %v18035_v36 = vld [vmem:[#allocation14_spill] sm:$0xff] }
 0x213   : > { %v2745_v63 = vand.u32 2147483647, %v18017_v29  ;;  %9222 = vpow2.f32 %v2655_v44  ;;  %v1642_v4 = vadd.f32 %v1570_v52, %v1432_v1  ;;  %v5100_v43 = vsel %vm5088_vm13, %v11670_v34, 0.0  ;;  %v9215_v0 = vpop.eup %9214  ;;  %v18041_v37 = vld [vmem:[#allocation30_spill] sm:$0xff] }
 0x214   : > { %vm11844_vm3 = vcmp.eq.f32.partialorder %v18028_v54, 8.507059e+37  ;;  %v18031_v6 = vmov 33   ;;  %v2751_v55 = vmul.f32 -0.5, %v11711_v18  ;;  %9224 = vpow2.f32 %v8434_v8  ;;  %v11875_v1 = vpop.eup %9216 }
 0x215   : > { %8873 = vset.pattern.permute.xlu2 %v18031_v6  ;;  %v11863_v53 = vadd.f32 %v10415_v27, %v11441_v20  ;;  %v18032_v42 = vrot.slane %v11788_v35, 3  ;;  %v11872_v34 = vadd.f32 %v10415_v27, %v11488_v60  ;;  %18034 = vst [vmem:[#allocation86_spill] sm:$0xff] %v11875_v1  ;;  %v8436_v8 = vmul.f32 -1.442695, %v11835_v38 }
 0x216   : > { %3218 = vperm.xlu2 %8873, %v11606_v45   ;;  %v11878_v52 = vadd.f32 %v1780_v7, %v1646_v47  ;;  %v2741_v20 = vmul.f32 0.6931472, %v9215_v0  ;;  %v2744_v22 = vmul.f32 %v18017_v29, %v2743_v32  ;;  %v9219_v54 = vpop.eup %9218  ;;  %v2563_v9 = vmax.f32 %v18035_v36, 0.0 }
 0x217   : > { %v1772_v44 = vsel %vm1722_vm8, %v17669_v33, %v18032_v42  ;;  %18033 = vst [vmem:[#allocation85_spill] sm:$0xff] %v11872_v34  ;;  %vm2746_vm5 = vcmp.lt.f32.partialorder %v2745_v63, 0.0004427343  ;;  %v11884_v42 = vmul.f32 %v10530_v56, %v11765_v39  ;;  %v5101_v33 = vadd.f32 %v5100_v43, %v11755_v46  ;;  %v9221_v45 = vpop.eup %9220 }
 0x218   : > { %v11888_v61 = vadd.f32 1.0, %v11723_v24  ;;  %v11890_v38 = vadd.f32 %v1772_v44, %v1642_v4  ;;  %v2747_v47 = vsel %vm2746_vm5, %v2744_v22, %v2741_v20  ;;  %v2752_v7 = vadd.f32 1.0, %v2751_v55  ;;  %8877 = vset.pattern.permute.xlu1 %v18031_v6 }
 0x219   : > { %v2614_v29 = vand.u32 2147483647, %v11863_v53  ;;  %v2819_v32 = vadd.f32 %v2747_v47, %v2563_v9  ;;  %v2754_v0 = vand.u32 2147483647, %v11711_v18  ;;  %v5102_v63 = vsel %vm5088_vm13, %v11884_v42, 0.0  ;;  %v11896_v50 = vpop.eup %9222  ;;  %3222 = vperm.xlu1 %8877, %v11765_v39  }
 0x21a   : > { %18036 = vst [vmem:[#allocation14_spill] sm:$0xff] %v11888_v61  ;;  %9226 = vpow2.f32 %v8436_v8  ;;  %v8441_v46 = vmul.f32 -1.442695, %v11878_v52  ;;  %v2750_v43 = vmul.f32 0.6931472, %v9219_v54  ;;  %v11900_v24 = vadd.f32 %v5102_v63, %v5101_v33  ;;  %v9225_v4 = vpop.eup %9224  ;;  %8881 = vset.pattern.permute.xlu0 %v18031_v6  ;;  %v18047_v63 = vld [vmem:[#allocation23_spill] sm:$0xff] }
 0x21b   : > { %18037 = vst [vmem:[#allocation87_spill] sm:$0xff] %v11890_v38  ;;  %v1186_v55 = vmul.f32 %v10447_v58, %v11354_v16  ;;  %v11904_v9 = vadd.f32 1.0, %v9221_v45  ;;  %v2615_v44 = vand.u32 2147483647, %v11872_v34  ;;  %vm2579_vm9 = vcmp.ne.f32.partialorder %v18035_v36, %v18035_v36 }
 0x21c   : > { %v2242_v8 = vsel %vm11844_vm3, %v11634_v23, %v2237_v21  ;;  %v8437_v33 = vmul.f32 -1.442695, %v11890_v38  ;;  %v11916_v20 = vsel %vm2579_vm9, %v18035_v36, %v2819_v32  ;;  %v2753_v16 = vmul.f32 %v11711_v18, %v2752_v7  ;;  %v18045_v7 = vld [vmem:[#allocation62_spill] sm:$0xff] }
 0x21d   : > { %9228 = vrcp.f32 %v11888_v61  ;;  %v2630_v22 = vsub.f32 0.0, %v2614_v29  ;;  %3226 = vperm.xlu0 %8881, %v11916_v20   ;;  %vm11921_vm10 = vcmp.lt.f32.partialorder %v2754_v0, 0.0004427343  ;;  %v2757_v23 = vadd.f32 1.0, %v11896_v50 }
 0x21e   : > { %8878 = vset.pattern.permute.xlu2 %v17932_v40  ;;  %v18040_v21 = vrot.slane %v11472_v10, 2  ;;  %v18042_v36 = vrot.slane %v18041_v37, 2  ;;  %v11934_v18 = vadd.f32 1.0, %v9225_v4  ;;  %9230 = vpow2.f32 %v8441_v46  ;;  %v18049_v4 = vld [vmem:[#allocation10_spill] sm:$0xff] }
 0x21f   : > { %v2756_v47 = vsel %vm11921_vm10, %v2753_v16, %v2750_v43  ;;  %3286 = vperm.xlu2 %8878, %v11765_v39   ;;  %v11941_v29 = vadd.f32 %v11641_v25, %v18045_v7  ;;  %9232 = vrcp.f32 %v11904_v9  ;;  %v2631_v10 = vsub.f32 0.0, %v2615_v44  ;;  %v18050_v43 = vld [vmem:[#allocation24_spill] sm:$0xff]  ;;  %v18051_v25 = vld [vmem:[#allocation25_spill] sm:$0xff] }
 0x220   : > { %v11932_v45 = vsel %vm17703_vm7, %v18042_v36, %v18040_v21  ;;  %18044 = vst [vmem:[#allocation88_spill] sm:$0xff] %v11934_v18  ;;  %v2564_v32 = vmax.f32 %v11481_v26, 0.0  ;;  %v9227_v0 = vpop.eup %9226  ;;  %v11946_v21 = vmul.f32 %v2242_v8, %v18047_v63  ;;  %v1220_v46 = vadd.f32 %v1186_v55, %v10481_v3  ;;  %v18053_v36 = vld [vmem:[#allocation15_spill] sm:$0xff] }
 0x221   : > { %18043 = vst [vmem:[#allocation30_spill] sm:$0xff] %v11932_v45  ;;  %9234 = vpow2.f32 %v8437_v33  ;;  %v1628_v16 = vadd.f32 %v18050_v43, %v18049_v4  ;;  %v2657_v39 = vmul.f32 1.442695, %v2630_v22  ;;  %v18052_v37 = vrot.slane %v18051_v25, 3  ;;  %v18059_v43 = vld [vmem:[#allocation31_spill] sm:$0xff]  ;;  %8882 = vset.pattern.permute.xlu1 %v17932_v40 }
 0x222   : > { %18046 = vst [vmem:[#allocation62_spill] sm:$0xff] %v11941_v29  ;;  %v2820_v54 = vadd.f32 %v2756_v47, %v2564_v32  ;;  %9236 = vlog2.f32 %v2757_v23  ;;  %v18054_v7 = vrot.slane %v18053_v36, 3  ;;  %v18055_v8 = vrot.slane %v11688_v19, 1  ;;  %3290 = vperm.xlu1 %8882, %v11916_v20  }
 0x223   : > { %18048 = vst [vmem:[#allocation23_spill] sm:$0xff] %v11946_v21  ;;  %9238 = vrcp.f32 %v11934_v18  ;;  %v18056_v63 = vrot.slane %v11486_v14, 1  ;;  %v1189_v33 = vmul.f32 %v10550_v62, %v11445_v2  ;;  %v11966_v23 = vpop.eup %9228  ;;  %v11968_v47 = vadd.f32 1.0, %v9227_v0  ;;  %v18069_v21 = vld [vmem:[#allocation51_spill] sm:$0xff] }
 0x224   : > { %v1744_v44 = vsel %vm1722_vm8, %v18054_v7, %v18052_v37  ;;  %18057 = vst [vmem:[#allocation10_spill] sm:$0xff] %v11966_v23  ;;  %v1190_v32 = vmul.f32 %v10447_v58, %v11488_v60  ;;  %v2659_v4 = vmul.f32 1.442695, %v2631_v10  ;;  %v1191_v19 = vmul.f32 %v10550_v62, %v18059_v43  ;;  %v9231_v14 = vpop.eup %9230 }
 0x225   : > { %v1356_v55 = vsel %vm1306_vm6, %v18056_v63, %v18055_v8  ;;  %v11964_v22 = vadd.f32 %v1744_v44, %v1628_v16  ;;  %18058 = vst [vmem:[#allocation24_spill] sm:$0xff] %v11968_v47  ;;  %v11977_v25 = vmul.f32 %v10542_v49, %v18059_v43  ;;  %vm2580_vm11 = vcmp.ne.f32.partialorder %v11481_v26, %v11481_v26  ;;  %v11984_v10 = vpop.eup %9232  ;;  %v18062_v63 = vld [vmem:[#allocation40_spill] sm:$0xff] }
 0x226   : > { %v2760_v2 = vmul.f32 -0.5, %v11896_v50  ;;  %9240 = vpow2.f32 %v2657_v39  ;;  %v11988_v0 = vmul.f32 %v10556_v28, %v18059_v43  ;;  %v11992_v16 = vmul.f32 %v10614_v59, %v18059_v43  ;;  %8886 = vset.pattern.permute.xlu0 %v17932_v40  ;;  %v18063_v43 = vld [vmem:[#allocation21_spill] sm:$0xff] }
 0x227   : > { %v8423_v60 = vmul.f32 -1.442695, %v11964_v22  ;;  %v11996_v37 = vsel %vm2580_vm11, %v11481_v26, %v2820_v54  ;;  %v9235_v36 = vpop.eup %9234  ;;  %v11998_v7 = vadd.f32 %v1356_v55, %v1220_v46  ;;  %v18060_v44 = vrot.slane %v11692_v57, 2  ;;  %2962 = vrot.lane.b32.xlu2 %v11884_v42, %s9844_s26  ;;  %v18065_v46 = vld [vmem:[#allocation20_spill] sm:$0xff]  ;;  %v12043_v42 = vpop.permute.xlu2 %3115 }
 0x228   : > { %v18061_v39 = vrot.slane %v11505_v30, 2  ;;  %3294 = vperm.xlu0 %8886, %v11996_v37   ;;  %v12010_v18 = vmul.f32 %v18063_v43, %v18062_v63  ;;  %v9237_v26 = vpop.eup %9236  ;;  %v12015_v54 = vadd.f32 %v1189_v33, %v18065_v46  ;;  %v12018_v57 = vadd.f32 %v1190_v32, %v10481_v3  ;;  %v18073_v32 = vld [vmem:[#allocation8_spill] sm:$0xff] }
 0x229   : > { %9242 = vpow2.f32 %v8423_v60  ;;  %v12020_v30 = vadd.f32 1.0, %v9231_v14  ;;  %v18066_v55 = vmov 32   ;;  %v2761_v60 = vadd.f32 1.0, %v2760_v2  ;;  %v18068_v14 = vld [vmem:[#allocation48_spill] sm:$0xff] }
 0x22a   : > { %v12005_v8 = vsel %vm17703_vm7, %v18061_v39, %v18060_v44  ;;  %18064 = vst [vmem:[#allocation25_spill] sm:$0xff] %v12010_v18  ;;  %9244 = vpow2.f32 %v2659_v4  ;;  %8880 = vset.pattern.permute.xlu2 %v18066_v55  ;;  %v12023_v44 = vpop.eup %9238  ;;  %v12027_v39 = vadd.f32 %v1191_v19, %v18065_v46  ;;  %v2763_v4 = vand.u32 2147483647, %v11896_v50  ;;  %v18071_v19 = vld [vmem:[#allocation84_spill] sm:$0xff]  ;;  %v18075_v18 = vld [vmem:[#allocation70_spill] sm:$0xff]  ;;  %8884 = vset.pattern.permute.xlu1 %v18066_v55 }
 0x22b   : > { %18067 = vst [vmem:[#allocation15_spill] sm:$0xff] %v12023_v44  ;;  %9246 = vrcp.f32 %v11968_v47  ;;  %v2125_v23 = vmul.f32 %v18069_v21, %v18068_v14  ;;  %v12035_v61 = vadd.f32 1.0, %v9235_v36  ;;  %v12039_v47 = vadd.f32 %v10415_v27, %v11572_v13  ;;  %v18074_v36 = vld [vmem:[#allocation9_spill] sm:$0xff] }
 0x22c   : > { %v1196_v44 = vmul.f32 %v10447_v58, %v18071_v19  ;;  %18072 = vst [vmem:[#allocation48_spill] sm:$0xff] %v12043_v42  ;;  %v2759_v2 = vmul.f32 0.6931472, %v9237_v26  ;;  %v12045_v33 = vpop.eup %9240  ;;  %9248 = vrcp.f32 %v12020_v30  ;;  %v1271_v34 = vmul.f32 %v18073_v32, %v18071_v19  ;;  %v18076_v42 = vld [vmem:[#allocation75_spill] sm:$0xff] }
 0x22d   : > { %18070 = vst [vmem:[#allocation31_spill] sm:$0xff] %v12039_v47  ;;  %v1481_v63 = vmul.f32 %v18074_v36, %v18071_v19  ;;  %v2857_v13 = vmul.f32 %v10530_v56, %v11916_v20  ;;  %v12056_v1 = vmul.f32 %v10542_v49, %v18075_v18  ;;  %v1194_v26 = vmul.f32 %v10447_v58, %v18076_v42 }
 0x22e   : > { %v12062_v17 = vmul.f32 %v10530_v56, %v11996_v37  ;;  %v2762_v32 = vmul.f32 %v11896_v50, %v2761_v60  ;;  %vm12068_vm14 = vcmp.lt.f32.partialorder %v2763_v4, 0.0004427343  ;;  %v2126_v38 = vsub.f32 1.0, %v2125_v23 }
 0x22f   : > { %v9243_v43 = vpop.eup %9242  ;;  %2964 = vrot.lane.b32.xlu1 %v2857_v13, %s9844_s26  ;;  %v5104_v58 = vsel %vm5088_vm13, %v2857_v13, 0.0  ;;  %v1230_v56 = vadd.f32 %v1196_v44, %v10481_v3  ;;  %v1689_v50 = vmul.f32 %v17941_v51, %v18071_v19  ;;  %v1371_v23 = vrot.slane %v1271_v34, 1  ;;  %v18083_v13 = vld [vmem:[#allocation72_spill] sm:$0xff]  ;;  %v18085_v44 = vld [vmem:[#allocation73_spill] sm:$0xff] }
 0x230   : > { %18077 = vst [vmem:[#allocation51_spill] sm:$0xff] %v12062_v17  ;;  %v12066_v36 = vpop.eup %9244  ;;  %v12072_v29 = vadd.f32 1.0, %v9243_v43  ;;  %2966 = vrot.lane.b32.xlu0 %v12062_v17, %s9844_s26  ;;  %v2765_v60 = vsel %vm12068_vm14, %v2762_v32, %v2759_v2  ;;  %v12086_v43 = vadd.f32 %v5104_v58, %v11900_v24  ;;  %v1581_v4 = vrot.slane %v1481_v63, 2  ;;  %v18088_v2 = vld [vmem:[#allocation79_spill] sm:$0xff]  ;;  %v18093_v17 = vld [vmem:[#allocation82_spill] sm:$0xff] }
 0x231   : > { %18078 = vst [vmem:[#allocation8_spill] sm:$0xff] %v12066_v36  ;;  %v12076_v49 = vpop.eup %9246  ;;  %8888 = vset.pattern.permute.xlu0 %v18066_v55  ;;  %v18084_v51 = vrot.slane %v11977_v25, 1  ;;  %v18086_v19 = vrot.slane %v18085_v44, 1  ;;  %v18087_v24 = vrot.slane %v11988_v0, 2  ;;  %v18089_v34 = vrot.slane %v18088_v2, 2 }
 0x232   : > { %18081 = vst [vmem:[#allocation9_spill] sm:$0xff] %v12076_v49  ;;  %v2565_v49 = vmax.f32 %v18083_v13, 0.0  ;;  %9250 = vrcp.f32 %v12072_v29  ;;  %v1228_v32 = vadd.f32 %v1194_v26, %v10481_v3  ;;  %v12107_v58 = vpop.eup %9248  ;;  %v18094_v55 = vrot.slane %v18093_v17, 1  ;;  %v18097_v17 = vld [vmem:[#allocation80_spill] sm:$0xff] }
 0x233   : > { %18082 = vst [vmem:[#allocation70_spill] sm:$0xff] %v12086_v43  ;;  %9252 = vrcp.f32 %v12035_v61  ;;  %v12097_v45 = vsel %vm1306_vm6, %v18086_v19, %v18084_v51  ;;  %v12104_v63 = vsel %vm17703_vm7, %v18089_v34, %v18087_v24  ;;  %v18091_v43 = vld [vmem:[#allocation83_spill] sm:$0xff]  ;;  %v12118_v19 = vmul.f32 %v10556_v28, %v18075_v18  ;;  %v12135_v34 = vpop.permute.xlu2 %3322 }
 0x234   : > { %18090 = vst [vmem:[#allocation75_spill] sm:$0xff] %v12104_v63  ;;  %v18092_v36 = vrot.slane %v18091_v43, 1  ;;  %v2821_v51 = vadd.f32 %v2765_v60, %v2565_v49  ;;  %v2127_v2 = vmul.f32 %v18069_v21, %v2126_v38  ;;  %v2616_v24 = vand.u32 2147483647, %v12039_v47 }
 0x235   : > { %18095 = vst [vmem:[#allocation72_spill] sm:$0xff] %v12118_v19  ;;  %v12125_v26 = vmul.f32 %v10614_v59, %v18075_v18  ;;  %vm2581_vm15 = vcmp.ne.f32.partialorder %v18083_v13, %v18083_v13  ;;  %v1440_v43 = vadd.f32 %v1371_v23, %v1230_v56  ;;  %v18099_v49 = vrot.slane %v11732_v48, 2 }
 0x236   : > { %v12114_v44 = vsel %vm1306_vm6, %v18094_v55, %v18092_v36  ;;  %v18098_v55 = vrot.slane %v18097_v17, 1  ;;  %v1783_v60 = vrot.slane %v1689_v50, 3  ;;  %vm2130_vm0 = vweird.f32 %v18069_v21 }
 0x237   : > { %18096 = vst [vmem:[#allocation73_spill] sm:$0xff] %v12125_v26  ;;  %v1582_v38 = vsel %vm17703_vm7, %v18099_v49, %v1581_v4  ;;  %v2135_v3 = vand.u32 2147483648, %v18068_v14  ;;  %v2425_v47 = vmul.f32 %v12107_v58, %v12020_v30  ;;  %v12142_v17 = vsel %vm2581_vm15, %v18083_v13, %v2821_v51  ;;  %3160 = vperm.xlu1 %8884, %v11996_v37  }
 0x238   : > { %v1372_v36 = vsel %vm1306_vm6, %v18098_v55, %v1371_v23  ;;  %v9251_v59 = vpop.eup %9250  ;;  %v2128_v56 = vadd.f32 %v18069_v21, %v2127_v2  ;;  %v1650_v48 = vadd.f32 %v1581_v4, %v1440_v43  ;;  %v18100_v50 = vrot.slane %v11775_v11, 3  ;;  %3165 = vperm.xlu0 %8888, %v12142_v17  }
 0x239   : > { %v1438_v63 = vadd.f32 %v1372_v36, %v1228_v32  ;;  %v12149_v55 = vpop.eup %9252  ;;  %v2155_v13 = vmul.f32 %v9251_v59, %v12072_v29  ;;  %vm2129_vm2 = vweird.f32 %v18068_v14  ;;  %v2133_v2 = vand.u32 2147483647, %v18068_v14 }
 0x23a   : > { %v1784_v23 = vsel %vm1722_vm8, %v18100_v50, %v1783_v60  ;;  %v12157_v4 = vadd.f32 %v1783_v60, %v1650_v48  ;;  %v2426_v11 = vsub.f32 1.0, %v2425_v47  ;;  %v18101_v43 = vrot.slane %v12056_v1, 1  ;;  %vm12166_vm3 = vmor %vm2129_vm2, %vm2130_vm0 }
 0x23b   : > { %v1648_v51 = vadd.f32 %v1582_v38, %v1438_v63  ;;  %v18102_v49 = vrot.slane %v11977_v25, 1  ;;  %v2136_v63 = vor.u32 1.1754944e-38, %v2135_v3  ;;  %v2156_v38 = vsub.f32 1.0, %v2155_v13 }
 0x23c   : > { %v2132_v47 = vsel %vm12166_vm3, %v18069_v21, %v2128_v56  ;;  %v2163_v14 = vand.u32 2147483647, %v12072_v29  ;;  %v2165_v25 = vand.u32 2147483648, %v12072_v29  ;;  %v8445_v60 = vmul.f32 -1.442695, %v12157_v4 }
 0x23d   : > { %v1366_v50 = vsel %vm1306_vm6, %v18102_v49, %v18101_v43  ;;  %v12170_v32 = vadd.f32 %v1784_v23, %v1648_v51  ;;  %v2157_v48 = vmul.f32 %v9251_v59, %v2156_v38  ;;  %vm2160_vm5 = vweird.f32 %v9251_v59 }
 0x23e   : > { %v2427_v49 = vmul.f32 %v12107_v58, %v2426_v11  ;;  %v1435_v3 = vadd.f32 %v1366_v50, %v12027_v39  ;;  %v18105_v23 = vrot.slane %v12118_v19, 2  ;;  %v18106_v13 = vrot.slane %v11988_v0, 2  ;;  %v18109_v0 = vld [vmem:[#allocation47_spill] sm:$0xff] }
 0x23f   : > { %v8443_v43 = vmul.f32 -1.442695, %v12170_v32  ;;  %vm2134_vm9 = vcmp.eq.f32.partialorder %v2133_v2, 8.507059e+37  ;;  %9254 = vpow2.f32 %v8445_v60  ;;  %v2158_v36 = vadd.f32 %v9251_v59, %v2157_v48  ;;  %8887 = vset.pattern.permute.xlu1 %v17913_v15  ;;  %v12195_v60 = vpop.permute.xlu2 %3198 }
 0x240   : > { %v1576_v21 = vsel %vm17703_vm7, %v18106_v13, %v18105_v23  ;;  %v2137_v56 = vsel %vm2134_vm9, %v2136_v63, %v2132_v47  ;;  %vm2159_vm10 = vweird.f32 %v12072_v29  ;;  %v2632_v51 = vsub.f32 0.0, %v2616_v24  ;;  %v18110_v23 = vld [vmem:[#allocation45_spill] sm:$0xff]  ;;  %8891 = vset.pattern.permute.xlu0 %v17913_v15  ;;  %3358 = vperm.xlu1 %8887, %v11996_v37  }
 0x241   : > { %9256 = vpow2.f32 %v8443_v43  ;;  %v18107_v38 = vrot.slane %v12125_v26, 3  ;;  %v18108_v11 = vrot.slane %v11992_v16, 3  ;;  %vm2161_vm11 = vmor %vm2159_vm10, %vm2160_vm5  ;;  %v2166_v50 = vor.u32 1.1754944e-38, %v2165_v25  ;;  %v18111_v25 = vld [vmem:[#allocation16_spill] sm:$0xff]  ;;  %3362 = vperm.xlu0 %8891, %v12142_v17  }
 0x242   : > { %v1623_v2 = vadd.f32 %v18110_v23, %v18109_v0  ;;  %v2162_v63 = vsel %vm2161_vm11, %v9251_v59, %v2158_v36  ;;  %vm2164_vm14 = vcmp.eq.f32.partialorder %v2163_v14, 8.507059e+37  ;;  %v2428_v29 = vadd.f32 %v12107_v58, %v2427_v49  ;;  %v18112_v14 = vld [vmem:[#allocation37_spill] sm:$0xff]  ;;  %v18114_v36 = vld [vmem:[#allocation34_spill] sm:$0xff] }
 0x243   : > { %v1778_v39 = vsel %vm1722_vm8, %v18108_v11, %v18107_v38  ;;  %vm2430_vm15 = vweird.f32 %v12107_v58  ;;  %v1645_v24 = vadd.f32 %v1576_v21, %v1435_v3  ;;  %v2167_v47 = vsel %vm2164_vm14, %v2166_v50, %v2162_v63 }
 0x244   : > { %v2508_v48 = vmul.f32 %v2137_v56, %v18111_v25  ;;  %v2435_v43 = vand.u32 2147483648, %v12020_v30  ;;  %v2510_v13 = vmul.f32 %v2167_v47, %v11964_v22  ;;  %vm2429_vm0 = vweird.f32 %v12020_v30 }
 0x245   : > { %v2433_v59 = vand.u32 2147483647, %v12020_v30  ;;  %v18113_v49 = vrot.slane %v18112_v14, 3  ;;  %v18115_v38 = vrot.slane %v18114_v36, 3  ;;  %v9255_v3 = vpop.eup %9254  ;;  %v1434_v21 = vadd.f32 %v12114_v44, %v12018_v57  ;;  %vm12225_vm2 = vmor %vm2429_vm0, %vm2430_vm15 }
 0x246   : > { %v18116_v56 = vrot.slane %v11750_v31, 2  ;;  %v18117_v50 = vrot.slane %v11742_v41, 2  ;;  %v12221_v0 = vmul.f32 %v10550_v62, %v18075_v18  ;;  %v12231_v57 = vmul.f32 1.442695, %v2632_v51 }
 0x247   : > { %v1734_v11 = vsel %vm1722_vm8, %v18115_v38, %v18113_v49  ;;  %v9257_v63 = vpop.eup %9256  ;;  %v3535_v31 = vpack.c.bf16 %v2510_v13, %v2508_v48  ;;  %v12233_v44 = vadd.f32 1.0, %v9255_v3  ;;  %v2432_v41 = vsel %vm12225_vm2, %v12107_v58, %v2428_v29  ;;  %v12243_v49 = vpop.permute.xlu1 %3258 }
 0x248   : > { %v1574_v22 = vsel %vm17703_vm7, %v18117_v50, %v18116_v56  ;;  %v12229_v23 = vadd.f32 %v1734_v11, %v1623_v2  ;;  %v12238_v18 = vadd.f32 %v1778_v39, %v1645_v24  ;;  %v12240_v47 = vadd.f32 1.0, %v9257_v63  ;;  %8889 = vset.pattern.permute.xlu1 %v18031_v6  ;;  %v12261_v38 = vpop.permute.xlu2 %2950 }
 0x249   : > { %v2436_v25 = vor.u32 1.1754944e-38, %v2435_v43  ;;  %v2766_v14 = vadd.f32 1.0, %v12045_v33  ;;  %v3561_v2 = vshrl.u32 %v3535_v31, 16  ;;  %v3564_v36 = vshll.u32 %v3535_v31, 16  ;;  %8893 = vset.pattern.permute.xlu0 %v18031_v6  ;;  %18121 = vst [vmem:[#allocation83_spill] sm:$0xff] %v12261_v38 }
 0x24a   : > { %18120 = vst [vmem:[#allocation79_spill] sm:$0xff] %v12238_v18  ;;  %vm2434_vm3 = vcmp.eq.f32.partialorder %v2433_v59, 8.507059e+37  ;;  %9258 = vrcp.f32 %v12233_v44  ;;  %v12248_v51 = vadd.f32 %v10415_v27, %v18076_v42  ;;  %v8418_v58 = vmul.f32 -1.442695, %v12229_v23 }
 0x24b   : > { %v12250_v48 = vsel %vm2434_vm3, %v2436_v25, %v2432_v41  ;;  %9260 = vrcp.f32 %v12240_v47  ;;  %v3563_v39 = vrot.slane %v3561_v2, 2  ;;  %v3566_v29 = vrot.slane %v3564_v36, 3 }
 0x24c   : > { %v2465_v24 = vand.u32 2147483648, %v12240_v47  ;;  %v2493_v43 = vand.u32 2147483647, %v12233_v44  ;;  %v2495_v13 = vand.u32 2147483648, %v12233_v44  ;;  %v2566_v42 = vmax.f32 %v11863_v53, 0.0 }
 0x24d   : > { %9262 = vlog2.f32 %v2766_v14  ;;  %v2769_v59 = vmul.f32 -0.5, %v12045_v33  ;;  %v12263_v11 = vor.u32 %v3566_v29, %v3563_v39  ;;  %vm2459_vm5 = vweird.f32 %v12240_v47  ;;  %v18124_v14 = vld [vmem:[#allocation66_spill] sm:$0xff] }
 0x24e   : > { %vm2489_vm9 = vweird.f32 %v12233_v44  ;;  %v2772_v3 = vand.u32 2147483647, %v12045_v33  ;;  %v1644_v50 = vadd.f32 %v1574_v22, %v1434_v21  ;;  %v18122_v30 = vrot.slane %v11800_v5, 3 }
 0x24f   : > { %v2770_v56 = vadd.f32 1.0, %v2769_v59  ;;  %v18123_v63 = vrot.slane %v11788_v35, 3  ;;  %v2365_v41 = vmul.f32 %v12149_v55, %v12035_v61  ;;  %v12278_v2 = vsel %vm3542_vm4, %v18124_v14, %v12263_v11 }
 0x250   : > { %v9259_v25 = vpop.eup %9258  ;;  %v2463_v36 = vand.u32 2147483647, %v12240_v47  ;;  %v2466_v39 = vor.u32 1.1754944e-38, %v2465_v24  ;;  %vm12281_vm10 = vcmp.eq.f32.partialorder %v2493_v43, 8.507059e+37  ;;  %3625 = vrot.lane.b32.xlu2 %v12278_v2, %s9846_s28  ;;  %v2496_v22 = vor.u32 1.1754944e-38, %v2495_v13  ;;  %v12329_v29 = vpop.permute.xlu2 %3266 }
 0x251   : > { %v1776_v31 = vsel %vm1722_vm8, %v18123_v63, %v18122_v30  ;;  %v9261_v5 = vpop.eup %9260  ;;  %v2485_v35 = vmul.f32 %v9259_v25, %v12233_v44  ;;  %vm12288_vm11 = vcmp.lt.f32.partialorder %v2772_v3, 0.0004427343  ;;  %v2366_v24 = vsub.f32 1.0, %v2365_v41  ;;  %v12299_v3 = vpop.permute.xlu1 %3120  ;;  %18136 = vst [vmem:[#allocation82_spill] sm:$0xff] %v12329_v29 }
 0x252   : > { %v12292_v59 = vadd.f32 %v1776_v31, %v1644_v50  ;;  %v2455_v30 = vmul.f32 %v9261_v5, %v12240_v47  ;;  %vm2369_vm14 = vweird.f32 %v12035_v61  ;;  %vm2370_vm15 = vweird.f32 %v12149_v55 }
 0x253   : > { %v9263_v43 = vpop.eup %9262  ;;  %v2486_v63 = vsub.f32 1.0, %v2485_v35  ;;  %vm2490_vm0 = vweird.f32 %v9259_v25  ;;  %v2771_v14 = vmul.f32 %v12045_v33, %v2770_v56  ;;  %vm2460_vm2 = vweird.f32 %v9261_v5  ;;  %v12305_v35 = vpop.permute.xlu0 %3194 }
 0x254   : > { %v8439_v13 = vmul.f32 -1.442695, %v12292_v59  ;;  %v2456_v38 = vsub.f32 1.0, %v2455_v30  ;;  %v2768_v50 = vmul.f32 0.6931472, %v9263_v43  ;;  %v2367_v31 = vmul.f32 %v12149_v55, %v2366_v24  ;;  %vm12309_vm3 = vmor %vm2489_vm9, %vm2490_vm0  ;;  %v18132_v24 = vld [vmem:[#allocation68_spill] sm:$0xff] }
 0x255   : > { %v2487_v62 = vmul.f32 %v9259_v25, %v2486_v63  ;;  %v2373_v41 = vand.u32 2147483647, %v12035_v61  ;;  %v1640_v26 = vadd.f32 %v12005_v8, %v11998_v7  ;;  %v18131_v30 = vrot.slane %v11784_v12, 3  ;;  %vm12322_vm7 = vmor %vm2459_vm5, %vm2460_vm2 }
 0x256   : > { %9264 = vpow2.f32 %v8439_v13  ;;  %v2457_v19 = vmul.f32 %v9261_v5, %v2456_v38  ;;  %v2774_v56 = vsel %vm12288_vm11, %v2771_v14, %v2768_v50  ;;  %v18133_v43 = vrot.slane %v18132_v24, 3  ;;  %vm12346_vm5 = vmor %vm2369_vm14, %vm2370_vm15 }
 0x257   : > { %9266 = vpow2.f32 %v8418_v58  ;;  %v2488_v8 = vadd.f32 %v9259_v25, %v2487_v62  ;;  %v2822_v44 = vadd.f32 %v2774_v56, %v2566_v42  ;;  %v2375_v38 = vand.u32 2147483648, %v12035_v61 }
 0x258   : > { %v1768_v63 = vsel %vm1722_vm8, %v18133_v43, %v18131_v30  ;;  %v2458_v12 = vadd.f32 %v9261_v5, %v2457_v19  ;;  %vm2464_vm9 = vcmp.eq.f32.partialorder %v2463_v36, 8.507059e+37  ;;  %vm2582_vm11 = vcmp.ne.f32.partialorder %v11863_v53, %v11863_v53  ;;  %3155 = vperm.xlu2 %8880, %v11916_v20  }
 0x259   : > { %v12327_v13 = vadd.f32 %v1768_v63, %v1640_v26  ;;  %v2368_v58 = vadd.f32 %v12149_v55, %v2367_v31  ;;  %v2492_v47 = vsel %vm12309_vm3, %v9259_v25, %v2488_v8  ;;  %v2528_v62 = vmul.f32 %v12250_v48, %v11878_v52  ;;  %v12380_v30 = vpop.permute.xlu1 %3326 }
 0x25a   : > { %v12340_v26 = vsel %vm2582_vm11, %v11863_v53, %v2822_v44  ;;  %v2462_v36 = vsel %vm12322_vm7, %v9261_v5, %v2458_v12  ;;  %v2497_v25 = vsel %vm12281_vm10, %v2496_v22, %v2492_v47  ;;  %vm12356_vm0 = vcmp.eq.f32.partialorder %v2373_v41, 8.507059e+37  ;;  %v18144_v53 = vld [vmem:[#allocation18_spill] sm:$0xff] }
 0x25b   : > { %v8435_v42 = vmul.f32 -1.442695, %v12327_v13  ;;  %3238 = vperm.xlu0 %8893, %v12340_v26   ;;  %v2305_v61 = vmul.f32 %v11984_v10, %v11904_v9  ;;  %v2467_v48 = vsel %vm2464_vm9, %v2466_v39, %v2462_v36  ;;  %v2532_v14 = vmul.f32 %v2497_v25, %v12157_v4  ;;  %v18143_v25 = vld [vmem:[#allocation76_spill] sm:$0xff] }
 0x25c   : > { %v9265_v52 = vpop.eup %9264  ;;  %v2376_v50 = vor.u32 1.1754944e-38, %v2375_v38  ;;  %v2530_v5 = vmul.f32 %v2467_v48, %v12170_v32  ;;  %v2372_v22 = vsel %vm12346_vm5, %v12149_v55, %v2368_v58  ;;  %v12371_v33 = vadd.f32 %v12097_v45, %v12015_v54  ;;  %v12394_v58 = vpop.permute.xlu2 %3130 }
 0x25d   : > { %9268 = vpow2.f32 %v8435_v42  ;;  %v9267_v31 = vpop.eup %9266  ;;  %v12364_v21 = vadd.f32 1.0, %v9265_v52  ;;  %v2306_v41 = vsub.f32 1.0, %v2305_v61  ;;  %v12376_v4 = vadd.f32 %v12221_v0, %v18065_v46  ;;  %18142 = vst [vmem:[#allocation47_spill] sm:$0xff] %v12394_v58 }
 0x25e   : > { %9270 = vpow2.f32 %v12231_v57  ;;  %v3541_v39 = vpack.c.bf16 %v2532_v14, %v2532_v14  ;;  %v8440_v32 = vmul.f32 -1.442695, %v12238_v18  ;;  %v3540_v24 = vpack.c.bf16 %v2530_v5, %v2528_v62  ;;  %v12387_v57 = vpop.permute.xlu0 %2948 }
 0x25f   : > { %9272 = vrcp.f32 %v12364_v21  ;;  %v2377_v54 = vsel %vm12356_vm0, %v2376_v50, %v2372_v22  ;;  %v12385_v45 = vadd.f32 1.0, %v9267_v31  ;;  %18141 = vst [vmem:[#allocation80_spill] sm:$0xff] %v12387_v57  ;;  %v2307_v7 = vmul.f32 %v11984_v10, %v2306_v41  ;;  %v18146_v22 = vld [vmem:[#allocation87_spill] sm:$0xff] }
 0x260   : > { %v3615_v55 = vshrl.u32 %v3541_v39, 16  ;;  %v3618_v43 = vshll.u32 %v3541_v39, 16  ;;  %v3606_v0 = vshrl.u32 %v3540_v24, 16  ;;  %v3609_v63 = vshll.u32 %v3540_v24, 16  ;;  %8883 = vset.pattern.permute.xlu2 %v17913_v15 }
 0x261   : > { %vm2309_vm7 = vweird.f32 %v11904_v9  ;;  %vm2310_vm10 = vweird.f32 %v11984_v10  ;;  %v2313_v12 = vand.u32 2147483647, %v11904_v9  ;;  %v2403_v19 = vand.u32 2147483647, %v12364_v21  ;;  %3354 = vperm.xlu2 %8883, %v11916_v20  }
 0x262   : > { %v3617_v44 = vrot.slane %v3615_v55, 2  ;;  %v3620_v38 = vrot.slane %v3618_v43, 3  ;;  %v3608_v47 = vrot.slane %v3606_v0, 2  ;;  %v3611_v62 = vrot.slane %v3609_v63, 3  ;;  %vm12422_vm15 = vmor %vm2309_vm7, %vm2310_vm10  ;;  %v12442_v0 = vpop.permute.xlu1 %3202 }
 0x263   : > { %v9269_v8 = vpop.eup %9268  ;;  %8898 = vset.pattern.permute.xlu0 %v17932_v40  ;;  %v12405_v61 = vmul.f32 %v18144_v53, %v18143_v25  ;;  %v2405_v48 = vand.u32 2147483648, %v12364_v21  ;;  %9274 = vrcp.f32 %v12385_v45  ;;  %v12412_v20 = vadd.f32 %v11984_v10, %v2307_v7  ;;  %18154 = vst [vmem:[#allocation37_spill] sm:$0xff] %v12442_v0  ;;  %v18159_v53 = vld [vmem:[#allocation55_spill] sm:$0xff] }
 0x264   : > { %v12398_v42 = vadd.f32 1.0, %v9269_v8  ;;  %v12401_v36 = vpop.eup %9270  ;;  %v3621_v52 = vor.u32 %v3620_v38, %v3617_v44  ;;  %v12409_v50 = vor.u32 %v3611_v62, %v3608_v47  ;;  %v2315_v31 = vand.u32 2147483648, %v11904_v9  ;;  %v18155_v8 = vld [vmem:[#allocation59_spill] sm:$0xff]  ;;  %v18156_v44 = vld [vmem:[#allocation26_spill] sm:$0xff] }
 0x265   : > { %18145 = vst [vmem:[#allocation45_spill] sm:$0xff] %v12405_v61  ;;  %v9273_v14 = vpop.eup %9272  ;;  %vm17712_vm14 = vcmask 130048   ;;  %v2524_v41 = vmul.f32 %v2377_v54, %v18146_v22  ;;  %vm2399_vm2 = vweird.f32 %v12364_v21  ;;  %vm12431_vm3 = vcmp.eq.f32.partialorder %v2403_v19, 8.507059e+37  ;;  %v18157_v62 = vld [vmem:[#allocation62_spill] sm:$0xff] }
 0x266   : > { %9276 = vrcp.f32 %v12398_v42  ;;  %v2395_v5 = vmul.f32 %v9273_v14, %v12364_v21  ;;  %v12428_v24 = vsel %vm3542_vm4, %v12409_v50, %v3621_v52  ;;  %vm12435_vm9 = vcmp.eq.f32.partialorder %v2313_v12, 8.507059e+37  ;;  %v18158_v19 = vld [vmem:[#allocation30_spill] sm:$0xff] }
 0x267   : > { %9278 = vpow2.f32 %v8440_v32  ;;  %18149 = vst [vmem:[#allocation16_spill] sm:$0xff] %v12428_v24  ;;  %8780 = vmatpush.lsf.bf16.msrb.mxu3 %v12428_v24  ;;  %v3686_v9 = vsel %vm17712_vm14, %v12428_v24, 0  ;;  %vm2400_vm11 = vweird.f32 %v9273_v14  ;;  %v2406_v54 = vor.u32 1.1754944e-38, %v2405_v48  ;;  %v18161_v48 = vld [vmem:[#allocation27_spill] sm:$0xff] }
 0x268   : > { %v2396_v43 = vsub.f32 1.0, %v2395_v5  ;;  %3688 = vmatpush.bf16.xpose.msrb.mxu1 %v3686_v9  ;;  %v2312_v63 = vsel %vm12422_vm15, %v11984_v10, %v12412_v20  ;;  %v2316_v7 = vor.u32 1.1754944e-38, %v2315_v31  ;;  %vm2084_vm5 = vweird.f32 %v12385_v45  ;;  %v12461_v31 = vpop.permute.xlu0 %3262  ;;  %vm12466_vm7 = vmor %vm2399_vm2, %vm2400_vm11 }
 0x269   : > { %v1632_v38 = vadd.f32 %v18156_v44, %v18155_v8  ;;  %v12451_v12 = vpop.eup %9274  ;;  %vm2339_vm0 = vweird.f32 %v12398_v42  ;;  %v1636_v25 = vadd.f32 %v18158_v19, %v18157_v62  ;;  %v18160_v52 = vrot.slane %v18159_v53, 3  ;;  %v18167_v44 = vld [vmem:[#allocation11_spill] sm:$0xff]  ;;  %8885 = vset.pattern.permute.xlu2 %v18031_v6 }
 0x26a   : > { %v2397_v47 = vmul.f32 %v9273_v14, %v2396_v43  ;;  %v18162_v5 = vrot.slane %v18161_v48, 3  ;;  %v2343_v39 = vand.u32 2147483647, %v12398_v42  ;;  %v2080_v9 = vmul.f32 %v12451_v12, %v12385_v45  ;;  %v18165_v43 = vld [vmem:[#allocation69_spill] sm:$0xff]  ;;  %3230 = vperm.xlu2 %8885, %v11996_v37  }
 0x26b   : > { %v18166_v8 = vrot.slane %v18165_v43, 3  ;;  %v18168_v62 = vrot.slane %v18167_v44, 3  ;;  %v12488_v43 = vpop.permute.xlu2 %3206  ;;  %vm2085_vm10 = vweird.f32 %v12451_v12  ;;  %v2088_v29 = vand.u32 2147483647, %v12385_v45 }
 0x26c   : > { %v1752_v10 = vsel %vm1722_vm8, %v18162_v5, %v18160_v52  ;;  %v9277_v20 = vpop.eup %9276  ;;  %v2398_v52 = vadd.f32 %v9273_v14, %v2397_v47  ;;  %v2345_v5 = vand.u32 2147483648, %v12398_v42  ;;  %v2081_v44 = vsub.f32 1.0, %v2080_v9  ;;  %vm12518_vm11 = vmor %vm2084_vm5, %vm2085_vm10 }
 0x26d   : > { %v1760_v19 = vsel %vm1722_vm8, %v18168_v62, %v18166_v8  ;;  %v12478_v53 = vadd.f32 %v1752_v10, %v1632_v38  ;;  %v12481_v21 = vpop.eup %9278  ;;  %v2335_v48 = vmul.f32 %v9277_v20, %v12398_v42  ;;  %v18169_v10 = vld [vmem:[#allocation54_spill] sm:$0xff]  ;;  %vm2340_vm15 = vweird.f32 %v9277_v20 }
 0x26e   : > { %v12485_v56 = vadd.f32 %v1760_v19, %v1636_v25  ;;  %v18170_v8 = vld [vmem:[#allocation58_spill] sm:$0xff]  ;;  %v2402_v47 = vsel %vm12466_vm7, %v9273_v14, %v2398_v52  ;;  %v2082_v19 = vmul.f32 %v12451_v12, %v2081_v44  ;;  %vm12504_vm2 = vmor %vm2339_vm0, %vm2340_vm15  ;;  %v2346_v22 = vor.u32 1.1754944e-38, %v2345_v5  ;;  %v18173_v52 = vld [vmem:[#allocation77_spill] sm:$0xff] }
 0x26f   : > { %v8427_v38 = vmul.f32 -1.442695, %v12478_v53  ;;  %v2185_v62 = vmul.f32 %v18170_v8, %v18169_v10  ;;  %v2336_v57 = vsub.f32 1.0, %v2335_v48  ;;  %v2407_v37 = vsel %vm12431_vm3, %v2406_v54, %v2402_v47  ;;  %v18174_v48 = vld [vmem:[#allocation86_spill] sm:$0xff] }
 0x270   : > { %v8431_v25 = vmul.f32 -1.442695, %v12485_v56  ;;  %v2526_v24 = vmul.f32 %v2407_v37, %v12292_v59  ;;  %v2083_v32 = vadd.f32 %v12451_v12, %v2082_v19  ;;  %v2090_v54 = vand.u32 2147483648, %v12385_v45  ;;  %v18180_v19 = vld [vmem:[#allocation74_spill] sm:$0xff] }
 0x271   : > { %9280 = vpow2.f32 %v8427_v38  ;;  %v2186_v9 = vsub.f32 1.0, %v2185_v62  ;;  %v2337_v18 = vmul.f32 %v9277_v20, %v2336_v57  ;;  %v2245_v44 = vmul.f32 %v18174_v48, %v18173_v52 }
 0x272   : > { %9282 = vpow2.f32 %v8431_v25  ;;  %v3539_v38 = vpack.c.bf16 %v2526_v24, %v2524_v41  ;;  %v2317_v59 = vsel %vm12435_vm9, %v2316_v7, %v2312_v63  ;;  %vm2344_vm3 = vcmp.eq.f32.partialorder %v2343_v39, 8.507059e+37  ;;  %v12528_v24 = vpop.permute.xlu1 %2952  ;;  %8890 = vset.pattern.permute.xlu2 %v17932_v40  ;;  %v12534_v25 = vpop.permute.xlu0 %3125 }
 0x273   : > { %v2338_v57 = vadd.f32 %v9277_v20, %v2337_v18  ;;  %v18177_v5 = vand.u32 2147483647, %v12248_v51  ;;  %v2087_v41 = vsel %vm12518_vm11, %v12451_v12, %v2083_v32  ;;  %18178 = vst [vmem:[#allocation34_spill] sm:$0xff] %v12528_v24  ;;  %v2187_v18 = vmul.f32 %v18170_v8, %v2186_v9  ;;  %3298 = vperm.xlu2 %8890, %v12142_v17  }
 0x274   : > { %v3597_v55 = vshrl.u32 %v3539_v38, 16  ;;  %v3600_v63 = vshll.u32 %v3539_v38, 16  ;;  %v2246_v7 = vsub.f32 1.0, %v2245_v44  ;;  %18179 = vst [vmem:[#allocation66_spill] sm:$0xff] %v12534_v25  ;;  %vm2089_vm9 = vcmp.eq.f32.partialorder %v2088_v29, 8.507059e+37  ;;  %v18201_v25 = vld [vmem:[#allocation8_spill] sm:$0xff] }
 0x275   : > { %v2633_v62 = vsub.f32 0.0, %v18177_v5  ;;  %v2342_v45 = vsel %vm12504_vm2, %v9277_v20, %v2338_v57  ;;  %v2520_v5 = vmul.f32 %v2317_v59, %v18180_v19  ;;  %v2091_v12 = vor.u32 1.1754944e-38, %v2090_v54  ;;  %v12541_v20 = vld [vmem:[#allocation3] sm:$0xff]  ;;  %v12547_v57 = vpop.permute.xlu2 %3334 }
 0x276   : > { %v2347_v37 = vsel %vm2344_vm3, %v2346_v22, %v2342_v45  ;;  %v3599_v9 = vrot.slane %v3597_v55, 2  ;;  %v3602_v42 = vrot.slane %v3600_v63, 3  ;;  %18181 = vst [vmem:[#allocation68_spill] sm:$0xff] %v12541_v20  ;;  %v12545_v44 = vmul.f32 %v12541_v20, %v10556_v28  ;;  %v18183_v63 = vld [vmem:[#allocation28_spill] sm:$0xff] }
 0x277   : > { %v9281_v39 = vpop.eup %9280  ;;  %v2522_v38 = vmul.f32 %v2347_v37, %v12327_v13  ;;  %v2092_v22 = vsel %vm2089_vm9, %v2091_v12, %v2087_v41  ;;  %18182 = vst [vmem:[#allocation76_spill] sm:$0xff] %v12547_v57  ;;  %v2188_v29 = vadd.f32 %v18170_v8, %v2187_v18  ;;  %vm2190_vm5 = vweird.f32 %v18170_v8  ;;  %v18189_v12 = vld [vmem:[#allocation35_spill] sm:$0xff] }
 0x278   : > { %v9283_v32 = vpop.eup %9282  ;;  %v12539_v14 = vadd.f32 1.0, %v9281_v39  ;;  %v3603_v54 = vor.u32 %v3602_v42, %v3599_v9  ;;  %v2247_v13 = vmul.f32 %v18174_v48, %v2246_v7  ;;  %v12553_v55 = vmul.f32 1.442695, %v2633_v62 }
 0x279   : > { %v3538_v59 = vpack.c.bf16 %v2522_v38, %v2520_v5  ;;  %v12557_v45 = vmul.f32 %v12541_v20, %v18183_v63  ;;  %v12559_v28 = vadd.f32 1.0, %v9283_v32  ;;  %vm2189_vm0 = vweird.f32 %v18169_v10  ;;  %v18188_v5 = vld [vmem:[#allocation46_spill] sm:$0xff] }
 0x27a   : > { %9284 = vrcp.f32 %v12539_v14  ;;  %v12564_v41 = vsel %vm3542_vm4, %v3603_v54, %v12409_v50  ;;  %v2195_v37 = vand.u32 2147483648, %v18169_v10  ;;  %v12569_v62 = vmul.f32 %v2092_v22, %v12229_v23  ;;  %vm12575_vm7 = vmor %vm2189_vm0, %vm2190_vm5  ;;  %v12601_v19 = vpop.permute.xlu0 %3330 }
 0x27b   : > { %18184 = vst [vmem:[#allocation18_spill] sm:$0xff] %v12564_v41  ;;  %v3588_v18 = vshrl.u32 %v3538_v59, 16  ;;  %v3591_v39 = vshll.u32 %v3538_v59, 16  ;;  %8781 = vmatpush.lsf.bf16.msrb.mxu3 %v12564_v41  ;;  %v3683_v7 = vsel %vm17712_vm14, %v12564_v41, 0  ;;  %v2193_v50 = vand.u32 2147483647, %v18169_v10  ;;  %v12592_v10 = vpop.permute.xlu1 %3270 }
 0x27c   : > { %18185 = vst [vmem:[#allocation87_spill] sm:$0xff] %v12569_v62  ;;  %v2110_v32 = vmul.f32 %v18189_v12, %v18188_v5  ;;  %3689 = vmatpush.bf16.xpose.msrb.mxu1 %v3683_v7  ;;  %v2192_v23 = vsel %vm12575_vm7, %v18170_v8, %v2188_v29  ;;  %v12586_v38 = vadd.f32 %v18174_v48, %v2247_v13  ;;  %v2223_v22 = vand.u32 2147483647, %v12539_v14 }
 0x27d   : > { %v3590_v9 = vrot.slane %v3588_v18, 2  ;;  %v3593_v42 = vrot.slane %v3591_v39, 3  ;;  %v2225_v59 = vand.u32 2147483648, %v12539_v14  ;;  %vm2250_vm10 = vweird.f32 %v18174_v48  ;;  %18190 = vst [vmem:[#allocation59_spill] sm:$0xff] %v12592_v10  ;;  %v18192_v39 = vld [vmem:[#allocation51_spill] sm:$0xff] }
 0x27e   : > { %9286 = vrcp.f32 %v12559_v28  ;;  %v18191_v63 = vmov 32   ;;  %v5106_v7 = vsel %vm5088_vm13, %v18192_v39, 0.0  ;;  %v2196_v29 = vor.u32 1.1754944e-38, %v2195_v37  ;;  %18193 = vst [vmem:[#allocation26_spill] sm:$0xff] %v12601_v19  ;;  %v18202_v10 = vld [vmem:[#allocation39_spill] sm:$0xff] }
 0x27f   : > { %8892 = vset.pattern.permute.xlu2 %v18191_v63  ;;  %v12597_v8 = vor.u32 %v3593_v42, %v3590_v9  ;;  %vm2114_vm15 = vweird.f32 %v18188_v5  ;;  %vm2194_vm2 = vcmp.eq.f32.partialorder %v2193_v50, 8.507059e+37  ;;  %vm2249_vm3 = vweird.f32 %v18173_v52  ;;  %v18209_v42 = vld [vmem:[#allocation17_spill] sm:$0xff] }
 0x280   : > { %v9285_v18 = vpop.eup %9284  ;;  %v2197_v41 = vsel %vm2194_vm2, %v2196_v29, %v2192_v23  ;;  %vm2219_vm11 = vweird.f32 %v12539_v14  ;;  %vm12612_vm9 = vmor %vm2249_vm3, %vm2250_vm10  ;;  %v2111_v9 = vsub.f32 1.0, %v2110_v32  ;;  %vm12617_vm5 = vcmp.eq.f32.partialorder %v2223_v22, 8.507059e+37  ;;  %v12625_v23 = vpop.permute.xlu2 %3274 }
 0x281   : > { %v2215_v47 = vmul.f32 %v9285_v18, %v12539_v14  ;;  %v12607_v24 = vsel %vm3542_vm4, %v12597_v8, %v3603_v54  ;;  %v2226_v39 = vor.u32 1.1754944e-38, %v2225_v59  ;;  %v2252_v54 = vsel %vm12612_vm9, %v18174_v48, %v12586_v38  ;;  %18199 = vst [vmem:[#allocation30_spill] sm:$0xff] %v12625_v23 }
 0x282   : > { %18194 = vst [vmem:[#allocation62_spill] sm:$0xff] %v12607_v24  ;;  %8782 = vmatpush.lsf.bf16.msrb.mxu3 %v12607_v24  ;;  %v2112_v29 = vmul.f32 %v18189_v12, %v2111_v9  ;;  %vm2115_vm0 = vweird.f32 %v18189_v12  ;;  %v2118_v32 = vand.u32 2147483647, %v18188_v5  ;;  %vm17742_vm7 = vcmask 1042432  }
 0x283   : > { %v2216_v50 = vsub.f32 1.0, %v2215_v47  ;;  %v2120_v47 = vand.u32 2147483648, %v18188_v5  ;;  %vm2220_vm10 = vweird.f32 %v9285_v18  ;;  %v2255_v59 = vand.u32 2147483648, %v18173_v52  ;;  %vm2116_vm3 = vmor %vm2114_vm15, %vm2115_vm0  ;;  %v12644_v46 = vpop.permute.xlu1 %3135 }
 0x284   : > { %v9287_v22 = vpop.eup %9286  ;;  %v3680_v37 = vsel %vm17712_vm14, %v12607_v24, 0  ;;  %v2253_v48 = vand.u32 2147483647, %v18173_v52  ;;  %v2285_v9 = vand.u32 2147483648, %v12559_v28  ;;  %v2113_v23 = vadd.f32 %v18189_v12, %v2112_v29  ;;  %18200 = vst [vmem:[#allocation55_spill] sm:$0xff] %v12644_v46  ;;  %vm2221_vm9 = vmor %vm2219_vm11, %vm2220_vm10 }
 0x285   : > { %v2217_v13 = vmul.f32 %v9285_v18, %v2216_v50  ;;  %v2275_v38 = vmul.f32 %v9287_v22, %v12559_v28  ;;  %3690 = vmatpush.bf16.xpose.msrb.mxu1 %v3680_v37  ;;  %vm2279_vm2 = vweird.f32 %v12559_v28  ;;  %v2283_v50 = vand.u32 2147483647, %v12559_v28 }
 0x286   : > { %v2121_v24 = vor.u32 1.1754944e-38, %v2120_v47  ;;  %vm2280_vm1 = vweird.f32 %v9287_v22  ;;  %v2117_v29 = vsel %vm2116_vm3, %v18189_v12, %v2113_v23  ;;  %vm2119_vm14 = vcmp.eq.f32.partialorder %v2118_v32, 8.507059e+37  ;;  %v18206_v12 = vld [vmem:[#allocation29_spill] sm:$0xff]  ;;  %v18210_v32 = vld [vmem:[#allocation70_spill] sm:$0xff] }
 0x287   : > { %v2218_v19 = vadd.f32 %v9285_v18, %v2217_v13  ;;  %v2276_v52 = vsub.f32 1.0, %v2275_v38  ;;  %v2256_v37 = vor.u32 1.1754944e-38, %v2255_v59  ;;  %v2775_v0 = vadd.f32 1.0, %v18201_v25  ;;  %vm12657_vm15 = vmor %vm2279_vm2, %vm2280_vm1 }
 0x288   : > { %v2122_v57 = vsel %vm2119_vm14, %v2121_v24, %v2117_v29  ;;  %v2286_v47 = vor.u32 1.1754944e-38, %v2285_v9  ;;  %v12665_v23 = vpop.permute.xlu2 %2956  ;;  %vm2254_vm14 = vcmp.eq.f32.partialorder %v2253_v48, 8.507059e+37  ;;  %vm2284_vm11 = vcmp.eq.f32.partialorder %v2283_v50, 8.507059e+37  ;;  %v18214_v48 = vld [vmem:[#allocation25_spill] sm:$0xff] }
 0x289   : > { %v2222_v13 = vsel %vm2221_vm9, %v9285_v18, %v2218_v19  ;;  %v2277_v20 = vmul.f32 %v9287_v22, %v2276_v52  ;;  %v12653_v46 = vmul.f32 %v2122_v57, %v18202_v10  ;;  %v2512_v18 = vmul.f32 %v2197_v41, %v18206_v12  ;;  %v12663_v19 = vpop.permute.xlu0 %2954  ;;  %18208 = vst [vmem:[#allocation11_spill] sm:$0xff] %v12665_v23 }
 0x28a   : > { %v2227_v5 = vsel %vm12617_vm5, %v2226_v39, %v2222_v13  ;;  %18207 = vst [vmem:[#allocation69_spill] sm:$0xff] %v12663_v19  ;;  %v2859_v39 = vmul.f32 %v18209_v42, %v12142_v17  ;;  %v5107_v57 = vadd.f32 %v5106_v7, %v18210_v32  ;;  %v2257_v59 = vsel %vm2254_vm14, %v2256_v37, %v2252_v54  ;;  %v18219_v32 = vld [vmem:[#allocation32_spill] sm:$0xff] }
 0x28b   : > { %18203 = vst [vmem:[#allocation27_spill] sm:$0xff] %v12653_v46  ;;  %v2514_v24 = vmul.f32 %v2227_v5, %v12478_v53  ;;  %v2278_v10 = vadd.f32 %v9287_v22, %v2277_v20  ;;  %v17714_v28 = vrot.slane %v12653_v46, 5  ;;  %9288 = vlog2.f32 %v2775_v0 }
 0x28c   : > { %2968 = vrot.lane.b32.xlu2 %v2859_v39, %s9844_s26  ;;  %v5108_v53 = vsel %vm5088_vm13, %v2859_v39, 0.0  ;;  %v12674_v41 = vadd.f32 1.0, %v12481_v21  ;;  %v18212_v20 = vrot.slane %v12569_v62, 5  ;;  %v2021_v0 = vsub.f32 1.0, %v18214_v48  ;;  %v18223_v48 = vld [vmem:[#allocation44_spill] sm:$0xff] }
 0x28d   : > { %v3536_v38 = vpack.c.bf16 %v2514_v24, %v2512_v18  ;;  %v2282_v9 = vsel %vm12657_vm15, %v9287_v22, %v2278_v10  ;;  %v5109_v54 = vadd.f32 %v5108_v53, %v5107_v57  ;;  %v18215_v13 = vrot.slane %v12405_v61, 1  ;;  %v18217_v22 = vld [vmem:[#allocation60_spill] sm:$0xff]  ;;  %v18220_v57 = vld [vmem:[#allocation22_spill] sm:$0xff] }
 0x28e   : > { %18211 = vst [vmem:[#allocation54_spill] sm:$0xff] %v12674_v41  ;;  %v12683_v7 = vsel %vm17742_vm7, %v18212_v20, %v17714_v28  ;;  %v2287_v50 = vsel %vm2284_vm11, %v2286_v47, %v2282_v9  ;;  %v18216_v21 = vrot.slane %v12056_v1, 1  ;;  %v2516_v5 = vmul.f32 %v2257_v59, %v18217_v22  ;;  %v12697_v47 = vpop.permute.xlu1 %3210  ;;  %v18222_v9 = vld [vmem:[#allocation40_spill] sm:$0xff] }
 0x28f   : > { %18213 = vst [vmem:[#allocation58_spill] sm:$0xff] %v12683_v7  ;;  %v3570_v52 = vshrl.u32 %v3536_v38, 16  ;;  %v3573_v29 = vshll.u32 %v3536_v38, 16  ;;  %v2518_v14 = vmul.f32 %v2287_v50, %v12485_v56  ;;  %v2778_v12 = vmul.f32 -0.5, %v18201_v25  ;;  %v18221_v38 = vld [vmem:[#allocation21_spill] sm:$0xff]  ;;  %v18228_v1 = vld [vmem:[#allocation36_spill] sm:$0xff] }
 0x290   : > { %v12691_v37 = vsel %vm1306_vm6, %v18216_v21, %v18215_v13  ;;  %18218 = vst [vmem:[#allocation77_spill] sm:$0xff] %v12697_v47  ;;  %v1627_v10 = vadd.f32 %v18220_v57, %v18219_v32  ;;  %9290 = vrcp.f32 %v12674_v41  ;;  %vm2025_vm1 = vweird.f32 %v18221_v38  ;;  %v18224_v50 = vld [vmem:[#allocation49_spill] sm:$0xff]  ;;  %v12708_v13 = vpop.permute.xlu2 %3140  ;;  %v18226_v57 = vld [vmem:[#allocation43_spill] sm:$0xff] }
 0x291   : > { %v3572_v24 = vrot.slane %v3570_v52, 2  ;;  %v3575_v39 = vrot.slane %v3573_v29, 3  ;;  %v3537_v59 = vpack.c.bf16 %v2518_v14, %v2516_v5  ;;  %v9289_v53 = vpop.eup %9288  ;;  %v2022_v56 = vmul.f32 %v18221_v38, %v2021_v0  ;;  %18225 = vst [vmem:[#allocation86_spill] sm:$0xff] %v12708_v13  ;;  %v12720_v19 = vpop.permute.xlu0 %3214  ;;  %v18232_v13 = vld [vmem:[#allocation57_spill] sm:$0xff] }
 0x292   : > { %v2030_v20 = vand.u32 2147483648, %v18222_v9  ;;  %v2050_v52 = vmul.f32 %v18224_v50, %v18223_v48  ;;  %v2779_v32 = vadd.f32 1.0, %v2778_v12  ;;  %v18227_v28 = vrot.slane %v18226_v57, 3  ;;  %18230 = vst [vmem:[#allocation74_spill] sm:$0xff] %v12720_v19  ;;  %v18252_v47 = vld [vmem:[#allocation13_spill] sm:$0xff] }
 0x293   : > { %v3576_v29 = vor.u32 %v3575_v39, %v3572_v24  ;;  %v3579_v21 = vshrl.u32 %v3537_v59, 16  ;;  %v3582_v22 = vshll.u32 %v3537_v59, 16  ;;  %v18229_v18 = vrot.slane %v18228_v1, 3 }
 0x294   : > { %v2781_v14 = vand.u32 2147483647, %v18201_v25  ;;  %3170 = vperm.xlu2 %8892, %v12340_v26   ;;  %v12725_v24 = vmul.f32 %v18209_v42, %v12340_v26  ;;  %v2051_v59 = vsub.f32 1.0, %v2050_v52  ;;  %vm2024_vm6 = vweird.f32 %v18222_v9  ;;  %v18242_v52 = vld [vmem:[#allocation53_spill] sm:$0xff] }
 0x295   : > { %v1742_v5 = vsel %vm1722_vm8, %v18229_v18, %v18227_v28  ;;  %v12717_v0 = vsel %vm3542_vm4, %v12263_v11, %v3576_v29  ;;  %v3581_v39 = vrot.slane %v3579_v21, 2  ;;  %v3584_v1 = vrot.slane %v3582_v22, 3  ;;  %vm12759_vm0 = vmor %vm2024_vm6, %vm2025_vm1 }
 0x296   : > { %v12727_v12 = vadd.f32 %v1742_v5, %v1627_v10  ;;  %3627 = vrot.lane.b32.xlu1 %v12717_v0, %s9846_s28  ;;  %v2777_v28 = vmul.f32 0.6931472, %v9289_v53  ;;  %v2784_v11 = vadd.f32 1.0, %v12401_v36  ;;  %v2023_v18 = vadd.f32 %v18221_v38, %v2022_v56  ;;  %v12736_v61 = vpop.eup %9290  ;;  %v18231_v5 = vld [vmem:[#allocation52_spill] sm:$0xff] }
 0x297   : > { %v5110_v57 = vsel %vm5088_vm13, %v12725_v24, 0.0  ;;  %v3585_v10 = vor.u32 %v3584_v1, %v3581_v39  ;;  %v2780_v21 = vmul.f32 %v18201_v25, %v2779_v32  ;;  %v2170_v53 = vmul.f32 %v18232_v13, %v18231_v5 }
 0x298   : > { %v8422_v23 = vmul.f32 -1.442695, %v12727_v12  ;;  %v12739_v22 = vadd.f32 %v5110_v57, %v5109_v54  ;;  %v2028_v56 = vand.u32 2147483647, %v18222_v9  ;;  %vm12745_vm5 = vcmp.lt.f32.partialorder %v2781_v14, 0.0004427343 }
 0x299   : > { %v3586_v19 = vsel %vm3542_vm4, %v3576_v29, %v3585_v10  ;;  %v12752_v39 = vsel %vm3542_vm4, %v3585_v10, %v12597_v8  ;;  %v2783_v25 = vsel %vm12745_vm5, %v2780_v21, %v2777_v28  ;;  %v18238_v8 = vld [vmem:[#allocation85_spill] sm:$0xff]  ;;  %vm18239_vm4 = vcmask 130048  }
 0x29a   : > { %9292 = vpow2.f32 %v8422_v23  ;;  %v18237_v23 = vld [vmem:[#allocation48_spill] sm:$0xff]  ;;  %3629 = vrot.lane.b32.xlu0 %v3586_v19, %s9846_s28  ;;  %8783 = vmatpush.lsf.bf16.msrb.mxu3 %v12752_v39  ;;  %v2567_v29 = vmax.f32 %v18238_v8, 0.0  ;;  %v3677_v32 = vsel %vm18239_vm4, %v12752_v39, 0  ;;  %v2027_v14 = vsel %vm12759_vm0, %v18221_v38, %v2023_v18  ;;  %v18244_v38 = vld [vmem:[#allocation50_spill] sm:$0xff]  ;;  %vm18258_vm11 = vmmov %vm18239_vm4 }
 0x29b   : > { %9294 = vlog2.f32 %v2784_v11  ;;  %v3385_v9 = vsel %vm17744_vm12, %v18237_v23, %v12305_v35  ;;  %v2031_v1 = vor.u32 1.1754944e-38, %v2030_v20  ;;  %v2052_v28 = vmul.f32 %v18224_v50, %v2051_v59  ;;  %3691 = vmatpush.bf16.xpose.msrb.mxu1 %v3677_v32  ;;  %v12777_v35 = vpop.permute.xlu2 %3342  ;;  %v18243_v23 = vld [vmem:[#allocation56_spill] sm:$0xff]  ;;  %v18246_v18 = vld [vmem:[#allocation42_spill] sm:$0xff] }
 0x29c   : > { %9296 = vpow2.f32 %v12553_v55  ;;  %v12771_v55 = vpop.permute.xlu1 %3338  ;;  %18241 = vst [vmem:[#allocation46_spill] sm:$0xff] %v12777_v35  ;;  %v2171_v11 = vsub.f32 1.0, %v2170_v53  ;;  %v12781_v57 = vmul.f32 %v12736_v61, %v12674_v41  ;;  %v2823_v10 = vadd.f32 %v2783_v25, %v2567_v29  ;;  %8895 = vset.pattern.permute.xlu2 %v17913_v15  ;;  %v18248_v32 = vld [vmem:[#allocation64_spill] sm:$0xff]  ;;  %v18249_v25 = vld [vmem:[#allocation63_spill] sm:$0xff]  ;;  %v18250_v35 = vld [vmem:[#allocation61_spill] sm:$0xff] }
 0x29d   : > { %18240 = vst [vmem:[#allocation28_spill] sm:$0xff] %v12771_v55  ;;  %v2787_v21 = vmul.f32 -0.5, %v12401_v36  ;;  %v1631_v54 = vadd.f32 %v18243_v23, %v18242_v52  ;;  %vm2029_vm10 = vcmp.eq.f32.partialorder %v2028_v56, 8.507059e+37  ;;  %3366 = vperm.xlu2 %8895, %v12340_v26   ;;  %v18245_v20 = vrot.slane %v18244_v38, 3  ;;  %v12808_v38 = vpop.permute.xlu0 %3623 }
 0x29e   : > { %3234 = vperm.xlu1 %8889, %v12142_v17   ;;  %v18247_v59 = vrot.slane %v18246_v18, 3  ;;  %v1635_v29 = vadd.f32 %v18249_v25, %v18248_v32  ;;  %v18251_v55 = vrot.slane %v18250_v35, 3  ;;  %v18253_v7 = vrot.slane %v18252_v47, 3  ;;  %8784 = vmatpush.lsf.bf16.msrb.mxu3 %v3586_v19  ;;  %18255 = vst [vmem:[#allocation35_spill] sm:$0xff] %v12808_v38 }
 0x29f   : > { %v12801_v23 = vsel %vm2029_vm10, %v2031_v1, %v2027_v14  ;;  %vm18254_vm2 = vcmask 523264   ;;  %vm2055_vm3 = vweird.f32 %v18224_v50  ;;  %v12813_v35 = vadd.f32 %v18224_v50, %v2052_v28  ;;  %vm18268_vm10 = vmmov %vm18258_vm11 }
 0x2a0   : > { %v1750_v53 = vsel %vm1722_vm8, %v18247_v59, %v18245_v20  ;;  %v1758_v52 = vsel %vm1722_vm8, %v18253_v7, %v18251_v55  ;;  %v9293_v56 = vpop.eup %9292  ;;  %v12805_v17 = vsel %vm18254_vm2, %v3385_v9, %v12243_v49  ;;  %v2172_v7 = vmul.f32 %v18232_v13, %v2171_v11 }
 0x2a1   : > { %v12810_v20 = vadd.f32 %v1750_v53, %v1631_v54  ;;  %v9295_v18 = vpop.eup %9294  ;;  %v12815_v47 = vadd.f32 1.0, %v9293_v56  ;;  %v12818_v55 = vadd.f32 %v1758_v52, %v1635_v29  ;;  %v2060_v49 = vand.u32 2147483648, %v18223_v48 }
 0x2a2   : > { %v12820_v14 = vpop.eup %9296  ;;  %vm2583_vm9 = vcmp.ne.f32.partialorder %v18238_v8, %v18238_v8  ;;  %v2788_v9 = vadd.f32 1.0, %v2787_v21  ;;  %vm2054_vm15 = vweird.f32 %v18223_v48  ;;  %v2790_v54 = vand.u32 2147483647, %v12401_v36  ;;  %8785 = vmatpush.lsf.bf16.msrb.mxu3 %v12717_v0 }
 0x2a3   : > { %v8426_v1 = vmul.f32 -1.442695, %v12810_v20  ;;  %v12828_v28 = vsel %vm2583_vm9, %v18238_v8, %v2823_v10  ;;  %9298 = vrcp.f32 %v12815_v47  ;;  %vm12834_vm14 = vmor %vm2054_vm15, %vm2055_vm3  ;;  %v3674_v21 = vsel %vm18258_vm11, %v3586_v19, 0 }
 0x2a4   : > { %3306 = vperm.xlu0 %8898, %v12828_v28   ;;  %v2786_v59 = vmul.f32 0.6931472, %v9295_v18  ;;  %v8430_v8 = vmul.f32 -1.442695, %v12818_v55  ;;  %3692 = vmatpush.bf16.xpose.msrb.mxu1 %v3674_v21  ;;  %v12847_v32 = vpop.permute.xlu1 %3278  ;;  %v2173_v25 = vadd.f32 %v18232_v13, %v2172_v7  ;;  %vm2175_vm1 = vweird.f32 %v18232_v13  ;;  %v12856_v18 = vpop.permute.xlu2 %3218  ;;  %vm18276_vm11 = vmmov %vm18268_vm10 }
 0x2a5   : > { %9300 = vpow2.f32 %v8426_v1  ;;  %18259 = vst [vmem:[#allocation51_spill] sm:$0xff] %v12847_v32  ;;  %v12851_v29 = vor.u32 1.1754944e-38, %v2060_v49  ;;  %v2789_v19 = vmul.f32 %v12401_v36, %v2788_v9  ;;  %v2180_v52 = vand.u32 2147483648, %v18231_v5  ;;  %v12861_v1 = vld [vmem:[%s17517_s8] ss:$0 sm:$0xff]  ;;  %8897 = vset.pattern.permute.xlu2 %v18031_v6  ;;  %v12899_v10 = vpop.permute.xlu0 %3282 }
 0x2a6   : > { %v2793_v56 = vadd.f32 1.0, %v12820_v14  ;;  %18260 = vst [vmem:[#allocation8_spill] sm:$0xff] %v12856_v18  ;;  %8894 = vset.pattern.permute.xlu1 %v17932_v40  ;;  %vm12864_vm6 = vcmp.lt.f32.partialorder %v2790_v54, 0.0004427343  ;;  %vm2174_vm5 = vweird.f32 %v18231_v5  ;;  %v2178_v36 = vand.u32 2147483647, %v18231_v5  ;;  %8786 = vmatpush.lsf.bf16.msrb.mxu3 %v12278_v2 }
 0x2a7   : > { %9302 = vpow2.f32 %v8430_v8  ;;  %3302 = vperm.xlu1 %8894, %v12340_v26   ;;  %v18263_v49 = vld [vmem:[#allocation31_spill] sm:$0xff]  ;;  %v2792_v21 = vsel %vm12864_vm6, %v2789_v19, %v2786_v59  ;;  %vm12878_vm0 = vmor %vm2174_vm5, %vm2175_vm1  ;;  %v12884_v5 = vmul.f32 %v12861_v1, %v12569_v62  ;;  %v2796_v59 = vmul.f32 -0.5, %v12820_v14  ;;  %3242 = vperm.xlu2 %8897, %v12828_v28   ;;  %18267 = vst [vmem:[#allocation29_spill] sm:$0xff] %v12899_v10 }
 0x2a8   : > { %v2568_v9 = vmax.f32 %v18263_v49, 0.0  ;;  %9304 = vlog2.f32 %v2793_v56  ;;  %vm2584_vm4 = vcmp.ne.f32.partialorder %v18263_v49, %v18263_v49  ;;  %v2177_v26 = vsel %vm12878_vm0, %v18232_v13, %v2173_v25  ;;  %vm18277_vm1 = vmmov %vm18268_vm10 }
 0x2a9   : > { %18266 = vst [vmem:[#allocation39_spill] sm:$0xff] %v12884_v5  ;;  %v9299_v8 = vpop.eup %9298  ;;  %v12895_v19 = vmul.f32 %v12861_v1, %v12653_v46  ;;  %v2861_v7 = vmul.f32 %v18209_v42, %v12828_v28  ;;  %v3671_v53 = vsel %vm18268_vm10, %v12717_v0, 0  ;;  %v2181_v13 = vor.u32 1.1754944e-38, %v2180_v52  ;;  %v18269_v46 = vld [vmem:[#allocation67_spill] sm:$0xff] }
 0x2aa   : > { %v2140_v54 = vmul.f32 %v9299_v8, %v12815_v47  ;;  %v2824_v25 = vadd.f32 %v2792_v21, %v2568_v9  ;;  %vm2179_vm2 = vcmp.eq.f32.partialorder %v2178_v36, 8.507059e+37  ;;  %8787 = vmatpush.lsf.bf16.msrb.mxu3 %v18269_v46  ;;  %v2148_v41 = vand.u32 2147483647, %v12815_v47 }
 0x2ab   : > { %v9301_v56 = vpop.eup %9300  ;;  %v2182_v10 = vsel %vm2179_vm2, %v2181_v13, %v2177_v26  ;;  %v17723_v58 = vrot.slane %v12884_v5, 5  ;;  %vm2145_vm3 = vweird.f32 %v9299_v8  ;;  %v2150_v52 = vand.u32 2147483648, %v12815_v47 }
 0x2ac   : > { %v12904_v18 = vadd.f32 1.0, %v9301_v56  ;;  %2972 = vrot.lane.b32.xlu0 %v2861_v7, %s9844_s26  ;;  %v2141_v62 = vsub.f32 1.0, %v2140_v54  ;;  %3693 = vmatpush.bf16.xpose.msrb.mxu1 %v3671_v53  ;;  %v2797_v36 = vadd.f32 1.0, %v2796_v59  ;;  %v12913_v9 = vpop.permute.xlu1 %2958  ;;  %v18271_v54 = vld [vmem:[#allocation84_spill] sm:$0xff]  ;;  %v18272_v13 = vrot.slane %v12895_v19, 5 }
 0x2ad   : > { %v9303_v0 = vpop.eup %9302  ;;  %8900 = vset.pattern.permute.xlu0 %v18191_v63  ;;  %18270 = vst [vmem:[#allocation17_spill] sm:$0xff] %v12913_v9  ;;  %v12918_v32 = vadd.f32 %v10415_v27, %v18271_v54  ;;  %8788 = vllmr.2.mxu3  ;;  %v5112_v59 = vsel %vm5088_vm13, %v2861_v7, 0.0  ;;  %v18274_v27 = vld [vmem:[#allocation12_spill] sm:$0xff]  ;;  %v12940_v9 = vpop.permute.xlu2 %3286  ;;  %vm2144_vm9 = vweird.f32 %v12815_v47  ;;  %vm2149_vm6 = vcmp.eq.f32.partialorder %v2148_v41, 8.507059e+37 }
 0x2ae   : > { %9306 = vrcp.f32 %v12904_v18  ;;  %v9305_v21 = vpop.eup %9304  ;;  %v2142_v56 = vmul.f32 %v9299_v8, %v2141_v62  ;;  %v12920_v26 = vadd.f32 1.0, %v9303_v0  ;;  %v12927_v53 = vsel %vm17742_vm7, %v17723_v58, %v18272_v13  ;;  %18275 = vst [vmem:[#allocation25_spill] sm:$0xff] %v12940_v9  ;;  %vm2146_vm15 = vmor %vm2144_vm9, %vm2145_vm3 }
 0x2af   : > { %18273 = vst [vmem:[#allocation70_spill] sm:$0xff] %v12927_v53  ;;  %v12934_v62 = vsel %vm2584_vm4, %v18263_v49, %v2824_v25  ;;  %v12937_v54 = vmul.f32 %v2182_v10, %v18274_v27  ;;  %v2799_v0 = vand.u32 2147483647, %v12820_v14  ;;  %2970 = vrot.lane.b32.xlu1 %v12725_v24, %s9844_s26  ;;  %v2795_v7 = vmul.f32 0.6931472, %v9305_v21  ;;  %8902 = vset.pattern.permute.xlu2 %v17932_v40 }
 0x2b0   : > { %v2143_v13 = vadd.f32 %v9299_v8, %v2142_v56  ;;  %v2618_v58 = vand.u32 2147483647, %v12918_v32  ;;  %v2151_v49 = vor.u32 1.1754944e-38, %v2150_v52  ;;  %8896 = vset.pattern.permute.xlu1 %v18191_v63  ;;  %v3668_v10 = vsel %vm18276_vm11, %v12278_v2, 0  ;;  %3310 = vperm.xlu2 %8902, %v12934_v62  }
 0x2b1   : > { %v3665_v25 = vsel %vm18277_vm1, %v18269_v46, 0  ;;  %9308 = vrcp.f32 %v12920_v26  ;;  %v2798_v47 = vmul.f32 %v12820_v14, %v2797_v36  ;;  %v2569_v2 = vmax.f32 %v12248_v51, 0.0  ;;  %v12968_v14 = vpop.permute.xlu0 %2960 }
 0x2b2   : > { %v2147_v24 = vsel %vm2146_vm15, %v9299_v8, %v2143_v13  ;;  %v2634_v21 = vsub.f32 0.0, %v2618_v58  ;;  %vm12960_vm5 = vcmp.lt.f32.partialorder %v2799_v0, 0.0004427343  ;;  %18280 = vst [vmem:[#allocation60_spill] sm:$0xff] %v12968_v14  ;;  %vm2204_vm0 = vweird.f32 %v12904_v18 }
 0x2b3   : > { %v2152_v56 = vsel %vm2149_vm6, %v2151_v49, %v2147_v24  ;;  %v2801_v58 = vsel %vm12960_vm5, %v2798_v47, %v2795_v7  ;;  %v2208_v0 = vand.u32 2147483647, %v12904_v18  ;;  %v2210_v49 = vand.u32 2147483648, %v12904_v18  ;;  %v18283_v24 = vld [vmem:[#allocation10_spill] sm:$0xff] }
 0x2b4   : > { %v12956_v52 = vpop.eup %9306  ;;  %3180 = vperm.xlu0 %8900, %v12934_v62   ;;  %v12966_v41 = vmul.f32 %v2152_v56, %v12727_v12  ;;  %v2665_v8 = vmul.f32 1.442695, %v2634_v21  ;;  %3694 = vmatpush.bf16.xpose.msrb.mxu1 %v3668_v10  ;;  %v12974_v13 = vpop.permute.xlu1 %3145  ;;  %v18282_v12 = vld [vmem:[#allocation14_spill] sm:$0xff]  ;;  %v2270_v47 = vand.u32 2147483648, %v12920_v26  ;;  %v2825_v10 = vadd.f32 %v2801_v58, %v2569_v2 }
 0x2b5   : > { %v2200_v36 = vmul.f32 %v12956_v52, %v12904_v18  ;;  %18281 = vst [vmem:[#allocation32_spill] sm:$0xff] %v12974_v13  ;;  %v2290_v56 = vmul.f32 %v18283_v24, %v18282_v12  ;;  %v12985_v46 = vpop.permute.xlu2 %2962  ;;  %v2862_v5 = vmul.f32 %v18209_v42, %v12934_v62  ;;  %v5113_v53 = vadd.f32 %v5112_v59, %v12739_v22 }
 0x2b6   : > { %v17726_v27 = vrot.slane %v12966_v41, 5  ;;  %9310 = vpow2.f32 %v2665_v8  ;;  %18284 = vst [vmem:[#allocation22_spill] sm:$0xff] %v12985_v46  ;;  %v18285_v13 = vrot.slane %v12937_v54, 5  ;;  %vm2205_vm4 = vweird.f32 %v12956_v52 }
 0x2b7   : > { %v2201_v7 = vsub.f32 1.0, %v2200_v36  ;;  %v12983_v21 = vpop.eup %9308  ;;  %v2291_v14 = vsub.f32 1.0, %v2290_v56  ;;  %3175 = vperm.xlu1 %8896, %v12828_v28   ;;  %v5114_v58 = vsel %vm5088_vm13, %v2862_v5, 0.0  ;;  %vm2264_vm10 = vweird.f32 %v12920_v26  ;;  %vm13013_vm9 = vmor %vm2204_vm0, %vm2205_vm4 }
 0x2b8   : > { %v12996_v8 = vsel %vm17742_vm7, %v17726_v27, %v18285_v13  ;;  %v2260_v2 = vmul.f32 %v12983_v21, %v12920_v26  ;;  %vm2265_vm2 = vweird.f32 %v12983_v21  ;;  %v2268_v22 = vand.u32 2147483647, %v12920_v26  ;;  %2974 = vrot.lane.b32.xlu2 %v2862_v5, %s9844_s26 }
 0x2b9   : > { %v2202_v36 = vmul.f32 %v12956_v52, %v2201_v7  ;;  %v5115_v59 = vadd.f32 %v5114_v58, %v5113_v53  ;;  %v2292_v7 = vmul.f32 %v18283_v24, %v2291_v14  ;;  %vm2585_vm3 = vcmp.ne.f32.partialorder %v12248_v51, %v12248_v51  ;;  %v18290_v53 = vld [vmem:[#allocation23_spill] sm:$0xff]  ;;  %8904 = vset.pattern.permute.xlu2 %v18191_v63  ;;  %vm13036_vm11 = vmor %vm2264_vm10, %vm2265_vm2 }
 0x2ba   : > { %v2261_v56 = vsub.f32 1.0, %v2260_v2  ;;  %vm13017_vm15 = vcmp.eq.f32.partialorder %v2208_v0, 8.507059e+37  ;;  %v2211_v5 = vor.u32 1.1754944e-38, %v2210_v49  ;;  %v13025_v14 = vsel %vm2585_vm3, %v12248_v51, %v2825_v10  ;;  %v13042_v51 = vpop.permute.xlu0 %3150 }
 0x2bb   : > { %v2203_v13 = vadd.f32 %v12956_v52, %v2202_v36  ;;  %v2271_v2 = vor.u32 1.1754944e-38, %v2270_v47  ;;  %vm2294_vm1 = vweird.f32 %v18282_v12  ;;  %vm2295_vm6 = vweird.f32 %v18283_v24 }
 0x2bc   : > { %v9311_v36 = vpop.eup %9310  ;;  %8903 = vset.pattern.permute.xlu0 %v17913_v15  ;;  %v2262_v0 = vmul.f32 %v12983_v21, %v2261_v56  ;;  %3695 = vmatpush.bf16.xpose.msrb.mxu1 %v3665_v25  ;;  %vm13047_vm5 = vcmp.eq.f32.partialorder %v2268_v22, 8.507059e+37  ;;  %v2293_v26 = vadd.f32 %v18283_v24, %v2292_v7  ;;  %v13052_v47 = vpop.permute.xlu1 %3346  ;;  %v13061_v46 = vmul.f32 %v18209_v42, %v13025_v14  ;;  %v18296_v22 = vld [vmem:[#allocation33_spill] sm:$0xff]  ;;  %vm13078_vm4 = vmor %vm2294_vm1, %vm2295_vm6 }
 0x2bd   : > { %v2207_v18 = vsel %vm13013_vm9, %v12956_v52, %v2203_v13  ;;  %3374 = vperm.xlu0 %8903, %v12934_v62   ;;  %v2802_v49 = vadd.f32 1.0, %v9311_v36  ;;  %v2805_v58 = vmul.f32 -0.5, %v9311_v36  ;;  %v13057_v13 = vpop.permute.xlu2 %3625  ;;  %v2298_v56 = vand.u32 2147483647, %v18282_v12 }
 0x2be   : > { %v2212_v52 = vsel %vm13017_vm15, %v2211_v5, %v2207_v18  ;;  %v2263_v25 = vadd.f32 %v12983_v21, %v2262_v0  ;;  %18295 = vst [vmem:[#allocation21_spill] sm:$0xff] %v13057_v13  ;;  %v13066_v5 = vmul.f32 %v12801_v23, %v18296_v22  ;;  %v18298_v7 = vand.u32 2147483647, %v18223_v48 }
 0x2bf   : > { %9312 = vlog2.f32 %v2802_v49  ;;  %v13055_v10 = vmul.f32 %v2212_v52, %v12810_v20  ;;  %8899 = vset.pattern.permute.xlu1 %v17913_v15  ;;  %v2806_v18 = vadd.f32 1.0, %v2805_v58  ;;  %v3386_v48 = vsel %vm17744_vm12, %v12299_v3, %v12195_v60 }
 0x2c0   : > { %18297 = vst [vmem:[#allocation40_spill] sm:$0xff] %v13066_v5  ;;  %vm2059_vm0 = vcmp.eq.f32.partialorder %v18298_v7, 8.507059e+37  ;;  %v2267_v20 = vsel %vm13036_vm11, %v12983_v21, %v2263_v25  ;;  %v18301_v23 = vsel %vm12834_vm14, %v18224_v50, %v12813_v35  ;;  %3370 = vperm.xlu1 %8899, %v12828_v28   ;;  %v5116_v58 = vsel %vm5088_vm13, %v13061_v46, 0.0  ;;  %3631 = vrot.lane.b32.xlu2 %v12752_v39, %s9846_s28  ;;  %v18302_v50 = vld [vmem:[#allocation88_spill] sm:$0xff]  ;;  %v18303_v35 = vld [vmem:[#allocation15_spill] sm:$0xff] }
 0x2c1   : > { %v2062_v9 = vsel %vm2059_vm0, %v12851_v29, %v18301_v23  ;;  %v17732_v21 = vrot.slane %v13055_v10, 5  ;;  %v13097_v49 = vadd.f32 %v5116_v58, %v5115_v59  ;;  %v2272_v60 = vsel %vm13047_vm5, %v2271_v2, %v2267_v20  ;;  %v18305_v59 = vld [vmem:[#allocation38_spill] sm:$0xff]  ;;  %v18309_v20 = vld [vmem:[#allocation9_spill] sm:$0xff] }
 0x2c2   : > { %v2300_v3 = vand.u32 2147483648, %v18282_v12  ;;  %v2320_v11 = vmul.f32 %v18303_v35, %v18302_v50  ;;  %v2808_v29 = vand.u32 2147483647, %v9311_v36  ;;  %v18304_v28 = vrot.slane %v18290_v53, 5 }
 0x2c3   : > { %v2297_v39 = vsel %vm13078_vm4, %v18283_v24, %v2293_v26  ;;  %vm2299_vm14 = vcmp.eq.f32.partialorder %v2298_v56, 8.507059e+37  ;;  %vm17743_vm10 = vcmask 785408   ;;  %v13115_v2 = vmul.f32 %v2062_v9, %v18305_v59  ;;  %v18310_v9 = vld [vmem:[#allocation71_spill] sm:$0xff] }
 0x2c4   : > { %v13109_v52 = vsel %vm17742_vm7, %v17732_v21, %v18304_v28  ;;  %v2807_v12 = vmul.f32 %v9311_v36, %v2806_v18  ;;  %vm18307_vm2 = vcmask 130048   ;;  %v2301_v25 = vor.u32 1.1754944e-38, %v2300_v3  ;;  %v18308_v18 = vld [vmem:[#allocation24_spill] sm:$0xff] }
 0x2c5   : > { %18306 = vst [vmem:[#allocation44_spill] sm:$0xff] %v13115_v2  ;;  %8494 = vmatmul.msk.bf16.vlgmr.msrb.gmra.mxu1 %vm18307_vm2, %v12808_v38  ;;  %v2321_v27 = vsub.f32 1.0, %v2320_v11  ;;  %v9313_v22 = vpop.eup %9312  ;;  %8905 = vset.pattern.permute.xlu0 %v18031_v6  ;;  %v13121_v7 = vmul.f32 %v2272_v60, %v12818_v55  ;;  %vm2324_vm3 = vweird.f32 %v18302_v50  ;;  %vm2325_vm9 = vweird.f32 %v18303_v35  ;;  %v13131_v55 = vpop.permute.xlu2 %3155 }
 0x2c6   : > { %v2328_v24 = vand.u32 2147483647, %v18302_v50  ;;  %3250 = vperm.xlu0 %8905, %v13025_v14   ;;  %v2804_v36 = vmul.f32 0.6931472, %v9313_v22  ;;  %v2302_v26 = vsel %vm2299_vm14, %v2301_v25, %v2297_v39  ;;  %v2330_v56 = vand.u32 2147483648, %v18302_v50  ;;  %v13142_v39 = vpop.permute.xlu0 %3350  ;;  %vm13148_vm6 = vmor %vm2324_vm3, %vm2325_vm9  ;;  %v13153_v25 = vpop.permute.xlu1 %3222 }
 0x2c7   : > { %v2350_v0 = vmul.f32 %v18309_v20, %v18308_v18  ;;  %v2570_v23 = vmax.f32 %v12918_v32, 0.0  ;;  %vm2809_vm15 = vcmp.lt.f32.partialorder %v2808_v29, 0.0004427343  ;;  %v13134_v58 = vmul.f32 %v2302_v26, %v18310_v9 }
 0x2c8   : > { %v2322_v60 = vmul.f32 %v18303_v35, %v2321_v27  ;;  %v3453_v3 = vrot.slane %v13066_v5, 5  ;;  %vm18311_vm11 = vcmask 523264   ;;  %vm2586_vm1 = vcmp.ne.f32.partialorder %v12918_v32, %v12918_v32  ;;  %8901 = vset.pattern.permute.xlu1 %v18031_v6  ;;  %3185 = vperm.xlu2 %8904, %v13025_v14  }
 0x2c9   : > { %v3402_v11 = vsel %vm18311_vm11, %v3386_v48, %v12461_v31  ;;  %v2810_v28 = vsel %vm2809_vm15, %v2807_v12, %v2804_v36  ;;  %v17729_v31 = vrot.slane %v13121_v7, 5  ;;  %v17728_v48 = vrot.slane %v13134_v58, 5  ;;  %3246 = vperm.xlu1 %8901, %v12934_v62  }
 0x2ca   : > { %v2826_v59 = vadd.f32 %v2810_v28, %v2570_v23  ;;  %v2323_v12 = vadd.f32 %v18303_v35, %v2322_v60  ;;  %vm2329_vm5 = vcmp.eq.f32.partialorder %v2328_v24, 8.507059e+37  ;;  %v2331_v50 = vor.u32 1.1754944e-38, %v2330_v56 }
 0x2cb   : > { %v2351_v27 = vsub.f32 1.0, %v2350_v0  ;;  %vm2354_vm0 = vweird.f32 %v18308_v18  ;;  %v17733_v22 = vrot.slane %v13115_v2, 5  ;;  %v13173_v62 = vsel %vm17742_vm7, %v17729_v31, %v17728_v48 }
 0x2cc   : > { %v13166_v36 = vsel %vm2586_vm1, %v12918_v32, %v2826_v59  ;;  %v2327_v24 = vsel %vm13148_vm6, %v18303_v35, %v2323_v12  ;;  %vm2355_vm4 = vweird.f32 %v18309_v20  ;;  %v18314_v32 = vld [vmem:[#allocation75_spill] sm:$0xff]  ;;  %v3419_v23 = vsel %vm17743_vm10, %v3402_v11, %v12380_v30  ;;  %v18318_v59 = vld [vmem:[#allocation81_spill] sm:$0xff] }
 0x2cd   : > { %v2864_v26 = vmul.f32 %v18209_v42, %v13166_v36  ;;  %v2352_v56 = vmul.f32 %v18309_v20, %v2351_v27  ;;  %v1643_v0 = vadd.f32 %v18314_v32, %v12371_v33  ;;  %v2332_v9 = vsel %vm2329_vm5, %v2331_v50, %v2327_v24  ;;  %vm13186_vm14 = vmor %vm2354_vm0, %vm2355_vm4 }
 0x2ce   : > { %v2358_v35 = vand.u32 2147483647, %v18308_v18  ;;  %v2360_v28 = vand.u32 2147483648, %v18308_v18  ;;  %8910 = vset.pattern.permute.xlu0 %v17932_v40  ;;  %v18317_v33 = vrot.slane %v11992_v16, 3  ;;  %v18319_v12 = vrot.slane %v18318_v59, 3  ;;  %v13212_v16 = vpop.permute.xlu2 %3354  ;;  %v18326_v59 = vld [vmem:[#allocation41_spill] sm:$0xff]  ;;  %v13233_v60 = vpop.permute.xlu0 %3226 }
 0x2cf   : > { %v5118_v42 = vsel %vm5088_vm13, %v2864_v26, 0.0  ;;  %v2353_v29 = vadd.f32 %v18309_v20, %v2352_v56  ;;  %v1437_v11 = vadd.f32 %v12691_v37, %v12376_v4  ;;  %v3418_v50 = vsel %vm17743_vm10, %v12805_v17, %v12135_v34  ;;  %3318 = vperm.xlu0 %8910, %v13166_v36   ;;  %v18321_v17 = vld [vmem:[#allocation78_spill] sm:$0xff] }
 0x2d0   : > { %v1774_v30 = vsel %vm1722_vm8, %v18319_v12, %v18317_v33  ;;  %v3456_v18 = vsel %vm17742_vm7, %v3453_v3, %v17733_v22  ;;  %v13210_v27 = vadd.f32 %v5118_v42, %v13097_v49  ;;  %vm2359_vm13 = vcmp.eq.f32.partialorder %v2358_v35, 8.507059e+37  ;;  %v18323_v33 = vld [vmem:[#allocation72_spill] sm:$0xff]  ;;  %8907 = vset.pattern.permute.xlu2 %v17913_v15  ;;  %v13241_v12 = vpop.permute.xlu1 %3290 }
 0x2d1   : > { %v13214_v24 = vmul.f32 %v3456_v18, %v3419_v23  ;;  %v2357_v4 = vsel %vm13186_vm14, %v18309_v20, %v2353_v29  ;;  %v2361_v37 = vor.u32 1.1754944e-38, %v2360_v28  ;;  %v13219_v34 = vadd.f32 %v1774_v30, %v1643_v0  ;;  %8906 = vset.pattern.permute.xlu1 %v17932_v40  ;;  %3378 = vperm.xlu2 %8907, %v13025_v14  }
 0x2d2   : > { %v13222_v56 = vmul.f32 %v2332_v9, %v18321_v17  ;;  %v18322_v32 = vrot.slane %v12545_v44, 2  ;;  %v18324_v49 = vrot.slane %v18323_v33, 2  ;;  %vm18325_vm2 = vcmask 1045504   ;;  %3314 = vperm.xlu1 %8906, %v13025_v14   ;;  %v18331_v17 = vld [vmem:[#allocation73_spill] sm:$0xff] }
 0x2d3   : > { %18320 = vst [vmem:[#allocation49_spill] sm:$0xff] %v13214_v24  ;;  %v18327_v35 = vrot.slane %v18326_v59, 5  ;;  %v2362_v20 = vsel %vm2359_vm13, %v2361_v37, %v2357_v4  ;;  %v8438_v0 = vmul.f32 -1.442695, %v13219_v34  ;;  %v2411_v28 = vsub.f32 1.0, %v12781_v57 }
 0x2d4   : > { %v1580_v42 = vsel %vm18325_vm2, %v18324_v49, %v18322_v32  ;;  %v18330_v18 = vrot.slane %v12557_v45, 3  ;;  %v18332_v4 = vrot.slane %v18331_v17, 3  ;;  %v3518_v57 = vpack.c.bf16 %v13214_v24, %v13214_v24 }
 0x2d5   : > { %v3454_v23 = vsel %vm17742_vm7, %v18327_v35, %v3453_v3  ;;  %v1647_v9 = vadd.f32 %v1580_v42, %v1437_v11  ;;  %v18329_v3 = vld [vmem:[#allocation65_spill] sm:$0xff]  ;;  %vm18333_vm3 = vcmask 130048   ;;  %9314 = vpow2.f32 %v8438_v0 }
 0x2d6   : > { %v13238_v29 = vmul.f32 %v3454_v23, %v3418_v50  ;;  %v13245_v30 = vmul.f32 %v2362_v20, %v18329_v3  ;;  %v1782_v37 = vsel %vm1722_vm8, %v18332_v4, %v18330_v18  ;;  %8495 = vmatmul.msk.bf16.gmra.mxu1 %vm18333_vm3, %v13057_v13  ;;  %v4994_v14 = vmul.f32 %v12861_v1, %v12966_v41  ;;  %vm18339_vm8 = vmmov %vm18311_vm11  ;;  %v13315_v21 = vpop.permute.xlu0 %3294  ;;  %v18379_v13 = vld [vmem:[#allocation79_spill] sm:$0xff] }
 0x2d7   : > { %v13256_v11 = vadd.f32 %v1782_v37, %v1647_v9  ;;  %v17731_v50 = vrot.slane %v13222_v56, 5  ;;  %v4995_v33 = vmul.f32 %v12861_v1, %v12937_v54  ;;  %v4996_v49 = vmul.f32 %v12861_v1, %v13055_v10  ;;  %2978 = vrot.lane.b32.xlu0 %v2864_v26, %s9844_s26  ;;  %v13273_v9 = vpop.permute.xlu2 %3230  ;;  %v18336_v26 = vld [vmem:[#allocation47_spill] sm:$0xff]  ;;  %vm18353_vm1 = vmmov %vm18339_vm8 }
 0x2d8   : > { %18328 = vst [vmem:[#allocation43_spill] sm:$0xff] %v13238_v29  ;;  %v17730_v32 = vrot.slane %v13245_v30, 5  ;;  %v5032_v35 = vrot.slane %v4994_v14, 5  ;;  %v4997_v23 = vmul.f32 %v12861_v1, %v18290_v53  ;;  %v2412_v20 = vmul.f32 %v12736_v61, %v2411_v28  ;;  %vm18366_vm5 = vmmov %vm18353_vm1 }
 0x2d9   : > { %v8442_v42 = vmul.f32 -1.442695, %v13256_v11  ;;  %v3517_v0 = vpack.c.bf16 %v13238_v29, %v13238_v29  ;;  %v5034_v18 = vrot.slane %v4995_v33, 5  ;;  %v18334_v17 = vrot.slane %v12895_v19, 5  ;;  %8909 = vset.pattern.permute.xlu2 %v18031_v6  ;;  %vm18371_vm0 = vmmov %vm18353_vm1 }
 0x2da   : > { %v13280_v3 = vsel %vm17742_vm7, %v17731_v50, %v17730_v32  ;;  %v5036_v4 = vrot.slane %v4996_v49, 5  ;;  %v5038_v37 = vrot.slane %v4997_v23, 5  ;;  %v3939_v14 = vunpack.c.l.b16 %v3518_v57  ;;  %v18342_v57 = vld [vmem:[#allocation19_spill] sm:$0xff]  ;;  %v18343_v23 = vld [vmem:[#allocation68_spill] sm:$0xff]  ;;  %2976 = vrot.lane.b32.xlu1 %v13061_v46, %s9844_s26  ;;  %3254 = vperm.xlu2 %8909, %v13166_v36   ;;  %vm18386_vm2 = vmmov %vm18371_vm0 }
 0x2db   : > { %9316 = vpow2.f32 %v8442_v42  ;;  %v13285_v28 = vsel %vm17742_vm7, %v18334_v17, %v5032_v35  ;;  %v3388_v48 = vsel %vm17744_vm12, %v18336_v26, %v12488_v43  ;;  %v13291_v31 = vsel %vm17742_vm7, %v5032_v35, %v5034_v18  ;;  %v9315_v33 = vpop.eup %9314  ;;  %v18338_v42 = vld [vmem:[#allocation59_spill] sm:$0xff]  ;;  %8908 = vset.pattern.permute.xlu1 %v18191_v63 }
 0x2dc   : > { %18335 = vst [vmem:[#allocation36_spill] sm:$0xff] %v13285_v28  ;;  %v4998_v32 = vmul.f32 %v12861_v1, %v13121_v7  ;;  %v3404_v19 = vsel %vm18339_vm8, %v3388_v48, %v18338_v42  ;;  %v13298_v17 = vsel %vm17742_vm7, %v5034_v18, %v5036_v4  ;;  %v13301_v49 = vsel %vm17742_vm7, %v5036_v4, %v5038_v37  ;;  %v18344_v18 = vld [vmem:[#allocation37_spill] sm:$0xff]  ;;  %v18345_v42 = vld [vmem:[#allocation66_spill] sm:$0xff]  ;;  %vm18392_vm8 = vmmov %vm18371_vm0 }
 0x2dd   : > { %18337 = vst [vmem:[#allocation52_spill] sm:$0xff] %v13291_v31  ;;  %v1195_v50 = vmul.f32 %v18343_v23, %v18342_v57  ;;  %v3938_v43 = vunpack.c.l.b16 %v3517_v0  ;;  %v13308_v35 = vadd.f32 1.0, %v9315_v33  ;;  %v2413_v48 = vadd.f32 %v12736_v61, %v2412_v20  ;;  %v18346_v0 = vld [vmem:[#allocation54_spill] sm:$0xff]  ;;  %v18347_v20 = vld [vmem:[#allocation76_spill] sm:$0xff]  ;;  %v13328_v23 = vpop.permute.xlu1 %2964 }
 0x2de   : > { %18340 = vst [vmem:[#allocation57_spill] sm:$0xff] %v13298_v17  ;;  %v5040_v26 = vrot.slane %v4998_v32, 5  ;;  %vm2415_vm9 = vweird.f32 %v12736_v61  ;;  %v3387_v4 = vsel %vm17744_vm12, %v18345_v42, %v18344_v18  ;;  %v13321_v46 = vmul.f32 %v12861_v1, %v13134_v58  ;;  %v18361_v31 = vld [vmem:[#allocation86_spill] sm:$0xff] }
 0x2df   : > { %18341 = vst [vmem:[#allocation48_spill] sm:$0xff] %v13301_v49  ;;  %v2420_v32 = vand.u32 2147483648, %v18346_v0  ;;  %v13324_v33 = vpack.c.b16 %v3939_v14, %v3938_v43  ;;  %v3421_v57 = vsel %vm17743_vm10, %v3404_v19, %v18347_v20  ;;  %9318 = vrcp.f32 %v13308_v35  ;;  %v18351_v19 = vld [vmem:[#allocation20_spill] sm:$0xff]  ;;  %v18352_v20 = vld [vmem:[#allocation82_spill] sm:$0xff]  ;;  %v13367_v14 = vpop.permute.xlu2 %3298 }
 0x2e0   : > { %vm2414_vm15 = vweird.f32 %v18346_v0  ;;  %v2418_v42 = vand.u32 2147483647, %v18346_v0  ;;  %v13334_v22 = vsel %vm17742_vm7, %v5038_v37, %v5040_v26  ;;  %v5042_v29 = vrot.slane %v13321_v46, 5  ;;  %v18354_v46 = vld [vmem:[#allocation26_spill] sm:$0xff] }
 0x2e1   : > { %v9317_v18 = vpop.eup %9316  ;;  %18348 = vst [vmem:[#allocation85_spill] sm:$0xff] %v13334_v22  ;;  %vm13339_vm11 = vmor %vm2414_vm15, %vm2415_vm9  ;;  %v1229_v43 = vadd.f32 %v1195_v50, %v18351_v19  ;;  %v3403_v24 = vsel %vm18353_vm1, %v3387_v4, %v18352_v20  ;;  %4188 = vrot.lane.b32.xlu0 %v13324_v33, %s9844_s26  ;;  %v18355_v22 = vld [vmem:[#allocation58_spill] sm:$0xff]  ;;  %v2421_v19 = vor.u32 1.1754944e-38, %v2420_v32  ;;  %v18358_v4 = vld [vmem:[#allocation77_spill] sm:$0xff]  ;;  %vm2384_vm4 = vweird.f32 %v13308_v35 }
 0x2e2   : > { %v13348_v0 = vadd.f32 1.0, %v9317_v18  ;;  %v2417_v37 = vsel %vm13339_vm11, %v12736_v61, %v2413_v48  ;;  %v3420_v49 = vsel %vm17743_vm10, %v3403_v24, %v18354_v46  ;;  %v13356_v28 = vmul.f32 %v18355_v22, %v3421_v57  ;;  %v18359_v20 = vld [vmem:[#allocation55_spill] sm:$0xff]  ;;  %v18360_v18 = vld [vmem:[#allocation74_spill] sm:$0xff]  ;;  %3190 = vperm.xlu1 %8908, %v13166_v36   ;;  %4430 = vrot.lane.b32.xlu2 %v13324_v33, %s9847_s0  ;;  %vm18398_vm9 = vmmov %vm18371_vm0 }
 0x2e3   : > { %v13359_v50 = vsel %vm17742_vm7, %v5040_v26, %v5042_v29  ;;  %v3389_v17 = vsel %vm17744_vm12, %v18359_v20, %v18358_v4  ;;  %v3390_v59 = vsel %vm17744_vm12, %v18361_v31, %v18360_v18  ;;  %vm2419_vm6 = vcmp.eq.f32.partialorder %v2418_v42, 8.507059e+37  ;;  %v18362_v61 = vld [vmem:[#allocation87_spill] sm:$0xff]  ;;  %v18367_v4 = vld [vmem:[#allocation45_spill] sm:$0xff]  ;;  %v18370_v18 = vld [vmem:[#allocation30_spill] sm:$0xff] }
 0x2e4   : > { %18356 = vst [vmem:[#allocation53_spill] sm:$0xff] %v13356_v28  ;;  %9320 = vrcp.f32 %v13348_v0  ;;  %v18363_v22 = vrot.slane %v18362_v61, 5  ;;  %v18364_v24 = vrot.slane %v13115_v2, 5  ;;  %v18365_v48 = vld [vmem:[#allocation51_spill] sm:$0xff]  ;;  %v2422_v46 = vsel %vm2419_vm6, %v2421_v19, %v2417_v37  ;;  %v18373_v19 = vld [vmem:[#allocation46_spill] sm:$0xff]  ;;  %vm18399_vm15 = vmmov %vm18371_vm0 }
 0x2e5   : > { %18357 = vst [vmem:[#allocation56_spill] sm:$0xff] %v13359_v50  ;;  %v3406_v32 = vsel %vm18366_vm5, %v3390_v59, %v18365_v48  ;;  %v9319_v57 = vpop.eup %9318  ;;  %v18368_v20 = vrot.slane %v18367_v4, 1  ;;  %v3520_v42 = vpack.c.bf16 %v13356_v28, %v13356_v28  ;;  %v3405_v61 = vsel %vm18371_vm0, %v3389_v17, %v18370_v18  ;;  %v13397_v17 = vpop.permute.xlu0 %2966  ;;  %v18377_v28 = vld [vmem:[#allocation18_spill] sm:$0xff] }
 0x2e6   : > { %v3458_v26 = vsel %vm17742_vm7, %v18364_v24, %v18363_v22  ;;  %v2380_v59 = vmul.f32 %v9319_v57, %v13308_v35  ;;  %v5000_v37 = vmul.f32 %v12861_v1, %v13222_v56  ;;  %v3423_v22 = vsel %vm17743_vm10, %v3406_v32, %v18373_v19  ;;  %v3161_v5 = vpop.permute.xlu1 %3160 }
 0x2e7   : > { %v1439_v50 = vadd.f32 %v18368_v20, %v1229_v43  ;;  %v13379_v31 = vmul.f32 %v3458_v26, %v3420_v49  ;;  %v18372_v43 = vld [vmem:[#allocation28_spill] sm:$0xff]  ;;  %v2390_v24 = vand.u32 2147483648, %v13308_v35  ;;  %vm2385_vm14 = vweird.f32 %v9319_v57 }
 0x2e8   : > { %v3422_v49 = vsel %vm17743_vm10, %v3405_v61, %v18372_v43  ;;  %v2381_v26 = vsub.f32 1.0, %v2380_v59  ;;  %v2388_v48 = vand.u32 2147483647, %v13308_v35  ;;  %v5044_v4 = vrot.slane %v5000_v37, 5  ;;  %v18375_v43 = vld [vmem:[#allocation27_spill] sm:$0xff]  ;;  %vm13427_vm13 = vmor %vm2384_vm4, %vm2385_vm14 }
 0x2e9   : > { %18369 = vst [vmem:[#allocation50_spill] sm:$0xff] %v13379_v31  ;;  %v3519_v18 = vpack.c.bf16 %v13379_v31, %v13379_v31  ;;  %v18374_v61 = vrot.slane %v12966_v41, 5  ;;  %v18376_v32 = vrot.slane %v18375_v43, 5  ;;  %3635 = vrot.lane.b32.xlu0 %v18377_v28, %s9846_s28  ;;  %v3392_v59 = vsel %vm17744_vm12, %v13042_v51, %v13153_v25  ;;  %vm18411_vm4 = vmmov %vm18386_vm2 }
 0x2ea   : > { %v13400_v20 = vpop.eup %9320  ;;  %v18378_v37 = vrot.slane %v12545_v44, 2  ;;  %v13417_v38 = vmul.f32 %v2422_v46, %v18379_v13  ;;  %v2382_v41 = vmul.f32 %v9319_v57, %v2381_v26  ;;  %v3941_v43 = vunpack.c.l.b16 %v3520_v42  ;;  %v18385_v13 = vld [vmem:[#allocation25_spill] sm:$0xff]  ;;  %v18387_v42 = vld [vmem:[#allocation8_spill] sm:$0xff]  ;;  %8911 = vset.pattern.permute.xlu1 %v17913_v15 }
 0x2eb   : > { %v3462_v19 = vsel %vm17742_vm7, %v18376_v32, %v18374_v61  ;;  %v13422_v61 = vmul.f32 %v12996_v8, %v3423_v22  ;;  %v2391_v51 = vor.u32 1.1754944e-38, %v2390_v24  ;;  %v13432_v44 = vsel %vm17742_vm7, %v5042_v29, %v5044_v4  ;;  %v13442_v22 = vpop.permute.xlu2 %2968  ;;  %3382 = vperm.xlu1 %8911, %v13166_v36  }
 0x2ec   : > { %v1649_v2 = vadd.f32 %v18378_v37, %v1439_v50  ;;  %v13419_v31 = vmul.f32 %v3462_v19, %v3422_v49  ;;  %18384 = vst [vmem:[#allocation63_spill] sm:$0xff] %v13432_v44  ;;  %v3408_v25 = vsel %vm18386_vm2, %v3392_v59, %v18385_v13  ;;  %v2383_v50 = vadd.f32 %v9319_v57, %v2382_v41  ;;  %v18388_v49 = vld [vmem:[#allocation32_spill] sm:$0xff] }
 0x2ed   : > { %18381 = vst [vmem:[#allocation64_spill] sm:$0xff] %v13422_v61  ;;  %vm2389_vm3 = vcmp.eq.f32.partialorder %v2388_v48, 8.507059e+37  ;;  %v2440_v8 = vmul.f32 %v13400_v20, %v13348_v0  ;;  %v3940_v46 = vunpack.c.l.b16 %v3519_v18  ;;  %v3391_v35 = vsel %vm17744_vm12, %v18388_v49, %v18387_v42  ;;  %v18390_v48 = vld [vmem:[#allocation16_spill] sm:$0xff] }
 0x2ee   : > { %18380 = vst [vmem:[#allocation42_spill] sm:$0xff] %v13419_v31  ;;  %v18389_v29 = vrot.slane %v12557_v45, 3  ;;  %v3521_v26 = vpack.c.bf16 %v13419_v31, %v13419_v31  ;;  %3637 = vrot.lane.b32.xlu2 %v18390_v48, %s9846_s28  ;;  %v2387_v18 = vsel %vm13427_vm13, %v9319_v57, %v2383_v50  ;;  %v5001_v32 = vmul.f32 %v12861_v1, %v13245_v30  ;;  %v18391_v57 = vld [vmem:[#allocation29_spill] sm:$0xff]  ;;  %v3359_v49 = vpop.permute.xlu1 %3358 }
 0x2ef   : > { %v3522_v19 = vpack.c.bf16 %v13422_v61, %v13422_v61  ;;  %v3425_v45 = vsel %vm17743_vm10, %v3408_v25, %v13142_v39  ;;  %v2392_v59 = vsel %vm2389_vm3, %v2391_v51, %v2387_v18  ;;  %v3479_v37 = vrot.slane %v13417_v38, 5 }
 0x2f0   : > { %v13446_v24 = vadd.f32 %v18389_v29, %v1649_v2  ;;  %v13461_v2 = vpack.c.b16 %v3941_v43, %v3940_v46  ;;  %v13464_v36 = vmul.f32 %v2392_v59, %v13219_v34  ;;  %v2441_v41 = vsub.f32 1.0, %v2440_v8  ;;  %v13474_v43 = vpop.permute.xlu0 %3165 }
 0x2f1   : > { %v5046_v28 = vrot.slane %v5001_v32, 5  ;;  %v3407_v13 = vsel %vm18392_vm8, %v3391_v35, %v18391_v57  ;;  %v3394_v34 = vsel %vm17744_vm12, %v3161_v5, %v13273_v9  ;;  %v3942_v8 = vunpack.c.l.b16 %v3521_v26 }
 0x2f2   : > { %4674 = vrot.lane.b32.xlu0 %v13461_v2, %s9840_s18  ;;  %v8444_v50 = vmul.f32 -1.442695, %v13446_v24  ;;  %v3424_v39 = vsel %vm17743_vm10, %v3407_v13, %v13052_v47  ;;  %v3477_v51 = vrot.slane %v13464_v36, 5  ;;  %v3943_v46 = vunpack.c.l.b16 %v3522_v19 }
 0x2f3   : > { %v13480_v25 = vsel %vm17742_vm7, %v5044_v4, %v5046_v28  ;;  %v13483_v42 = vmul.f32 %v13109_v52, %v3425_v45  ;;  %v18395_v35 = vrot.slane %v13055_v10, 5  ;;  %v18396_v47 = vrot.slane %v12937_v54, 5  ;;  %v13520_v48 = vpop.permute.xlu2 %3170 }
 0x2f4   : > { %18393 = vst [vmem:[#allocation61_spill] sm:$0xff] %v13480_v25  ;;  %v3393_v5 = vsel %vm17744_vm12, %v13131_v55, %v13233_v60  ;;  %v13498_v9 = vsel %vm17742_vm7, %v3477_v51, %v3479_v37  ;;  %v2442_v52 = vmul.f32 %v13400_v20, %v2441_v41  ;;  %v3410_v10 = vsel %vm18399_vm15, %v3394_v34, %v13315_v21  ;;  %v18400_v55 = vld [vmem:[#allocation62_spill] sm:$0xff] }
 0x2f5   : > { %18394 = vst [vmem:[#allocation13_spill] sm:$0xff] %v13483_v42  ;;  %v3466_v29 = vsel %vm17742_vm7, %v18396_v47, %v18395_v35  ;;  %v3409_v54 = vsel %vm18398_vm9, %v3393_v5, %v13241_v12  ;;  %9322 = vpow2.f32 %v8444_v50  ;;  %3633 = vrot.lane.b32.xlu1 %v18400_v55, %s9846_s28  ;;  %v3427_v60 = vsel %vm17743_vm10, %v3410_v10, %v3359_v49  ;;  %vm18416_vm9 = vmmov %vm18411_vm4 }
 0x2f6   : > { %v13501_v4 = vmul.f32 %v3466_v29, %v3424_v39  ;;  %4190 = vrot.lane.b32.xlu2 %v13461_v2, %s9844_s26  ;;  %vm2444_vm11 = vweird.f32 %v13348_v0  ;;  %vm2445_vm1 = vweird.f32 %v13400_v20  ;;  %v5002_v26 = vmul.f32 %v12861_v1, %v13464_v36 }
 0x2f7   : > { %v3524_v12 = vpack.c.bf16 %v13483_v42, %v13483_v42  ;;  %v13518_v21 = vpack.c.b16 %v3943_v46, %v3942_v8  ;;  %v2450_v18 = vand.u32 2147483648, %v13348_v0  ;;  %v3426_v32 = vsel %vm17743_vm10, %v3409_v54, %v13212_v16  ;;  %vm13534_vm6 = vmor %vm2444_vm11, %vm2445_vm1 }
 0x2f8   : > { %18397 = vst [vmem:[#allocation31_spill] sm:$0xff] %v13501_v4  ;;  %v2443_v19 = vadd.f32 %v13400_v20, %v2442_v52  ;;  %v2448_v45 = vand.u32 2147483647, %v13348_v0  ;;  %v5048_v59 = vrot.slane %v5002_v26, 5  ;;  %v3523_v41 = vpack.c.bf16 %v13501_v4, %v13501_v4  ;;  %vm18420_vm11 = vmmov %vm18411_vm4 }
 0x2f9   : > { %v13532_v57 = vmul.f32 %v13173_v62, %v3427_v60  ;;  %v18404_v16 = vrot.slane %v13121_v7, 5  ;;  %v18405_v50 = vrot.slane %v18290_v53, 5  ;;  %v3945_v46 = vunpack.c.l.b16 %v3524_v12  ;;  %v3363_v62 = vpop.permute.xlu0 %3362  ;;  %vm18423_vm1 = vmmov %vm18411_vm4 }
 0x2fa   : > { %4434 = vrot.lane.b32.xlu0 %v13518_v21, %s9847_s0  ;;  %v13544_v39 = vsel %vm17742_vm7, %v5046_v28, %v5048_v59  ;;  %v2451_v49 = vor.u32 1.1754944e-38, %v2450_v18  ;;  %v2447_v35 = vsel %vm13534_vm6, %v13400_v20, %v2443_v19  ;;  %vm2449_vm5 = vcmp.eq.f32.partialorder %v2448_v45, 8.507059e+37  ;;  %vm18425_vm6 = vmmov %vm18423_vm1 }
 0x2fb   : > { %18401 = vst [vmem:[#allocation67_spill] sm:$0xff] %v13532_v57  ;;  %v3470_v0 = vsel %vm17742_vm7, %v18405_v50, %v18404_v16  ;;  %v9323_v34 = vpop.eup %9322  ;;  %v3944_v47 = vunpack.c.l.b16 %v3523_v41  ;;  %v3526_v53 = vpack.c.bf16 %v13532_v57, %v13532_v57  ;;  %v5003_v28 = vmul.f32 %v12861_v1, %v13417_v38  ;;  %v3367_v10 = vpop.permute.xlu2 %3366 }
 0x2fc   : > { %18406 = vst [vmem:[#allocation84_spill] sm:$0xff] %v13544_v39  ;;  %v13546_v8 = vmul.f32 %v3470_v0, %v3426_v32  ;;  %v1987_v7 = vadd.f32 1.0, %v9323_v34  ;;  %v2452_v20 = vsel %vm2449_vm5, %v2451_v49, %v2447_v35  ;;  %vm18410_vm0 = vcmask 130048   ;;  %vm18428_vm5 = vmmov %vm18423_vm1 }
 0x2fd   : > { %4672 = vrot.lane.b32.xlu1 %v13324_v33, %s9840_s18  ;;  %v13561_v5 = vpack.c.b16 %v3945_v46, %v3944_v47  ;;  %v5050_v52 = vrot.slane %v5003_v28, 5  ;;  %v3947_v54 = vunpack.c.l.b16 %v3526_v53  ;;  %v13566_v55 = vmul.f32 %v2452_v20, %v13256_v11  ;;  %vm18415_vm8 = vmmov %vm18410_vm0 }
 0x2fe   : > { %18407 = vst [vmem:[#allocation12_spill] sm:$0xff] %v13546_v8  ;;  %4676 = vrot.lane.b32.xlu2 %v13518_v21, %s9840_s18  ;;  %v3525_v29 = vpack.c.bf16 %v13546_v8, %v13546_v8  ;;  %9324 = vrcp.f32 %v1987_v7  ;;  %vm2474_vm14 = vweird.f32 %v1987_v7  ;;  %v2480_v47 = vand.u32 2147483648, %v1987_v7  ;;  %vm18419_vm15 = vmmov %vm18410_vm0 }
 0x2ff   : > { %v13569_v60 = vsel %vm17742_vm7, %v5048_v59, %v5050_v52  ;;  %v5004_v32 = vmul.f32 %v12861_v1, %v13566_v55  ;;  %v2478_v28 = vand.u32 2147483647, %v1987_v7 }
 0x300   : > { %18408 = vst [vmem:[#allocation14_spill] sm:$0xff] %v13569_v60  ;;  %v3946_v26 = vunpack.c.l.b16 %v3525_v29 }
 0x301   : > { %v3239_v18 = vpop.permute.xlu0 %3238  ;;  %v5052_v11 = vrot.slane %v5004_v32, 5  ;;  %vm2479_vm3 = vcmp.eq.f32.partialorder %v2478_v28, 8.507059e+37 }
 0x302   : > { %4194 = vrot.lane.b32.xlu0 %v13561_v5, %s9844_s26  ;;  %v13571_v12 = vpack.c.b16 %v3947_v54, %v3946_v26 }
 0x303   : > { %v13582_v45 = vsel %vm17742_vm7, %v5050_v52, %v5052_v11  ;;  %v3243_v41 = vpop.permute.xlu2 %3242  ;;  %v18412_v52 = vrot.slane %v13222_v56, 5 }
 0x304   : > { %v9325_v19 = vpop.eup %9324  ;;  %18409 = vst [vmem:[#allocation10_spill] sm:$0xff] %v13582_v45 }
 0x305   : > { %4432 = vrot.lane.b32.xlu1 %v13461_v2, %s9847_s0  ;;  %v2470_v13 = vmul.f32 %v9325_v19, %v1987_v7  ;;  %vm2475_vm13 = vweird.f32 %v9325_v19 }
 0x306   : > { %4436 = vrot.lane.b32.xlu2 %v13561_v5, %s9847_s0  ;;  %vm2476_vm2 = vmor %vm2474_vm14, %vm2475_vm13 }
 0x307   : > { %v2471_v16 = vsub.f32 1.0, %v2470_v13  ;;  %v3396_v13 = vsel %vm17744_vm12, %v13520_v48, %v3239_v18 }
 0x308   : > { %v13584_v59 = vpop.permute.xlu1 %3627 }
 0x309   : > { %8496 = vmatmul.msk.bf16.gmra.mxu1 %vm18410_vm0, %v13584_v59  ;;  %v2472_v34 = vmul.f32 %v9325_v19, %v2471_v16 }
 0x30a   : > { %4680 = vrot.lane.b32.xlu0 %v13571_v12, %s9840_s18 }
 0x30b   : > { %v3311_v35 = vpop.permute.xlu2 %3310  ;;  %v2473_v53 = vadd.f32 %v9325_v19, %v2472_v34 }
 0x30c   : > { %v13592_v50 = vpop.permute.xlu0 %3629 }
 0x30d   : > { %4192 = vrot.lane.b32.xlu1 %v13518_v21, %s9844_s26  ;;  %v2477_v32 = vsel %vm2476_vm2, %v9325_v19, %v2473_v53 }
 0x30e   : > { %4196 = vrot.lane.b32.xlu2 %v13571_v12, %s9844_s26 }
 0x310   : > { %v3235_v0 = vpop.permute.xlu1 %3234 }
 0x311   : > { %v3395_v46 = vsel %vm17744_vm12, %v13474_v43, %v3235_v0  ;;  %v18413_v43 = vrot.slane %v13134_v58, 5 }
 0x312   : > { %v3411_v49 = vsel %vm18411_vm4, %v3395_v46, %v13367_v14  ;;  %v2481_v14 = vor.u32 1.1754944e-38, %v2480_v47 }
 0x313   : > { %v3428_v20 = vsel %vm17743_vm10, %v3411_v49, %v3363_v62  ;;  %v3474_v54 = vsel %vm17742_vm7, %v18413_v43, %v18412_v52  ;;  %v2975_v0 = vpop.permute.xlu2 %2974 }
 0x314   : > { %v13606_v26 = vmul.f32 %v3474_v54, %v3428_v20  ;;  %v2482_v58 = vsel %vm2479_vm3, %v2481_v14, %v2477_v32 }
 0x315   : > { %4678 = vrot.lane.b32.xlu1 %v13561_v5, %s9840_s18  ;;  %v13624_v34 = vmul.f32 %v2482_v58, %v13446_v24 }
 0x316   : > { %v3307_v29 = vpop.permute.xlu0 %3306  ;;  %18414 = vst [vmem:[#allocation23_spill] sm:$0xff] %v13606_v26  ;;  %v3527_v7 = vpack.c.bf16 %v13606_v26, %v13606_v26 }
 0x317   : > { %v5005_v53 = vmul.f32 %v12861_v1, %v13624_v34 }
 0x319   : > { %v3303_v16 = vpop.permute.xlu1 %3302  ;;  %8497 = vmatmul.msk.bf16.gmra.mxu1 %vm18415_vm8, %v13592_v50 }
 0x31a   : > { %v3412_v62 = vsel %vm18416_vm9, %v3396_v13, %v3303_v16  ;;  %v18421_v16 = vrot.slane %v13245_v30, 5  ;;  %vm18437_vm9 = vmmov %vm18410_vm0 }
 0x31b   : > { %v3429_v56 = vsel %vm17743_vm10, %v3412_v62, %v3367_v10  ;;  %v3948_v10 = vunpack.c.l.b16 %v3527_v7  ;;  %v13636_v24 = vpop.permute.xlu2 %3631 }
 0x31c   : > { %v13619_v19 = vmul.f32 %v13280_v3, %v3429_v56  ;;  %v5054_v3 = vrot.slane %v5005_v53, 5 }
 0x31d   : > { %4438 = vrot.lane.b32.xlu1 %v13571_v12, %s9847_s0 }
 0x31e   : > { %18417 = vst [vmem:[#allocation33_spill] sm:$0xff] %v13619_v19  ;;  %v2973_v48 = vpop.permute.xlu0 %2972  ;;  %v3528_v18 = vpack.c.bf16 %v13619_v19, %v13619_v19  ;;  %v13639_v20 = vsel %vm17742_vm7, %v5052_v11, %v5054_v3  ;;  %v3478_v11 = vsel %vm17742_vm7, %v18421_v16, %v3477_v51  ;;  %v18429_v16 = vld [vmem:[#allocation60_spill] sm:$0xff] }
 0x31f   : > { %18418 = vst [vmem:[#allocation88_spill] sm:$0xff] %v13639_v20 }
 0x320   : > { %v3949_v46 = vunpack.c.l.b16 %v3528_v18 }
 0x321   : > { %v2971_v49 = vpop.permute.xlu1 %2970 }
 0x322   : > { %v13626_v47 = vpack.c.b16 %v3949_v46, %v3948_v10 }
 0x323   : > { %v3186_v53 = vpop.permute.xlu2 %3185 }
 0x324   : > { %4440 = vrot.lane.b32.xlu0 %v13626_v47, %s9847_s0  ;;  %4682 = vrot.lane.b32.xlu2 %v13626_v47, %s9840_s18 }
 0x325   : > { %4198 = vrot.lane.b32.xlu1 %v13626_v47, %s9844_s26 }
 0x326   : > { %v3181_v28 = vpop.permute.xlu0 %3180 }
 0x329   : > { %v3176_v52 = vpop.permute.xlu1 %3175  ;;  %8498 = vmatmul.msk.bf16.gmra.mxu1 %vm18419_vm15, %v13636_v24 }
 0x32a   : > { %v3397_v54 = vsel %vm17744_vm12, %v3176_v52, %v3243_v41 }
 0x32b   : > { %v3413_v32 = vsel %vm18420_vm11, %v3397_v54, %v3307_v29  ;;  %v3481_v54 = vrot.slane %v13566_v55, 5 }
 0x32f   : > { %v3375_v1 = vpop.permute.xlu0 %3374 }
 0x332   : > { %v3371_v43 = vpop.permute.xlu1 %3370 }
 0x333   : > { %v3430_v13 = vsel %vm17743_vm10, %v3413_v32, %v3371_v43  ;;  %v18427_v32 = vld [vmem:[#allocation22_spill] sm:$0xff] }
 0x334   : > { %v13651_v62 = vmul.f32 %v3478_v11, %v3430_v13  ;;  %v18431_v11 = vld [vmem:[#allocation17_spill] sm:$0xff] }
 0x336   : > { %18422 = vst [vmem:[#allocation15_spill] sm:$0xff] %v13651_v62  ;;  %v3529_v29 = vpack.c.bf16 %v13651_v62, %v13651_v62 }
 0x338   : > { %v3251_v14 = vpop.permute.xlu0 %3250  ;;  %v3950_v51 = vunpack.c.l.b16 %v3529_v29 }
 0x339   : > { %v3399_v52 = vsel %vm17744_vm12, %v3186_v53, %v3251_v14  ;;  %v18434_v53 = vld [vmem:[#allocation34_spill] sm:$0xff] }
 0x33b   : > { %v3247_v56 = vpop.permute.xlu1 %3246 }
 0x33c   : > { %v3398_v58 = vsel %vm17744_vm12, %v3181_v28, %v3247_v56  ;;  %v3379_v28 = vpop.permute.xlu2 %3378  ;;  %v2865_v56 = vlaneseq }
 0x33d   : > { %v3414_v7 = vsel %vm18423_vm1, %v3398_v58, %v3311_v35 }
 0x33e   : > { %v3431_v41 = vsel %vm17743_vm10, %v3414_v7, %v3375_v1  ;;  %v18432_v7 = vld [vmem:[#allocation11_spill] sm:$0xff] }
 0x33f   : > { %v13659_v18 = vmul.f32 %v13498_v9, %v3431_v41 }
 0x341   : > { %18424 = vst [vmem:[#allocation38_spill] sm:$0xff] %v13659_v18  ;;  %v3319_v36 = vpop.permute.xlu0 %3318  ;;  %v3530_v30 = vpack.c.bf16 %v13659_v18, %v13659_v18  ;;  %v17762_v18 = vmov 3  }
 0x342   : > { %8915 = vset.pattern.permute.xlu0 %v17762_v18 }
 0x343   : > { %v3951_v46 = vunpack.c.l.b16 %v3530_v30  ;;  %v13707_v30 = vshrl.u32 %v2865_v56, 7 }
 0x344   : > { %v3315_v10 = vpop.permute.xlu1 %3314 }
 0x345   : > { %v13663_v3 = vpack.c.b16 %v3951_v46, %v3950_v51  ;;  %v3415_v43 = vsel %vm18425_vm6, %v3399_v52, %v3315_v10  ;;  %v13709_v51 = vand.u32 127, %v2865_v56  ;;  %v9848_v52 = vmov 1.0  }
 0x347   : > { %4684 = vrot.lane.b32.xlu1 %v13663_v3, %s9840_s18  ;;  %4442 = vrot.lane.b32.xlu2 %v13663_v3, %s9847_s0  ;;  %vm2884_vm4 = vcmp.le.s32.totalorder %v13709_v51, %v13707_v30 }
 0x348   : > { %4200 = vrot.lane.b32.xlu0 %v13663_v3, %s9844_s26 }
 0x349   : > { %v2979_v35 = vpop.permute.xlu0 %2978 }
 0x34a   : > { %2996 = vmatpush.msra.mxu3 %v2979_v35  ;;  %8759 = vmatpush.lsf.msrb.mxu0 %v2979_v35  ;;  %v13718_v35 = vadd.s32 120, %v13707_v30 }
 0x34c   : > { %v2977_v9 = vpop.permute.xlu1 %2976  ;;  %vm17745_vm14 = vcmp.le.s32.totalorder %v13709_v51, %v13718_v35 }
 0x34d   : > { %2997 = vmatpush.msra.mxu3 %v2977_v9  ;;  %8760 = vmatpush.lsf.msrb.mxu0 %v2977_v9  ;;  %v18435_v9 = vld [vmem:[#allocation83_spill] sm:$0xff] }
 0x34f   : > { %2998 = vmatpush.msra.mxu3 %v2975_v0  ;;  %8761 = vmatpush.lsf.msrb.mxu0 %v2975_v0  ;;  %v3432_v0 = vsel %vm17743_vm10, %v3415_v43, %v3379_v28  ;;  %v18436_v28 = vld [vmem:[#allocation80_spill] sm:$0xff]  ;;  %v13742_v43 = vadd.s32 8, %v13707_v30 }
 0x351   : > { %2999 = vmatpush.msra.mxu3 %v2973_v48  ;;  %8762 = vmatpush.lsf.msrb.mxu0 %v2973_v48  ;;  %v3255_v48 = vpop.permute.xlu2 %3254  ;;  %vm2885_vm2 = vcmp.le.s32.totalorder %v13709_v51, %v13742_v43 }
 0x353   : > { %3000 = vmatpush.msra.mxu3 %v2971_v49  ;;  %8763 = vmatpush.lsf.msrb.mxu0 %v2971_v49  ;;  %v3482_v49 = vsel %vm17742_vm7, %v3479_v37, %v3481_v54 }
 0x354   : > { %v3191_v1 = vpop.permute.xlu1 %3190  ;;  %v13686_v55 = vmul.f32 %v3482_v49, %v3432_v0  ;;  %v13749_v0 = vadd.s32 104, %v13707_v30 }
 0x355   : > { %3001 = vmatpush.msra.mxu3 %v13442_v22  ;;  %8764 = vmatpush.lsf.msrb.mxu0 %v13442_v22  ;;  %v3400_v14 = vsel %vm17744_vm12, %v3191_v1, %v3255_v48  ;;  %v3483_v22 = vrot.slane %v13624_v34, 5  ;;  %v13734_v1 = vpop.permute.xlu0 %4188  ;;  %v13770_v48 = vadd.s32 16, %v13707_v30 }
 0x356   : > { %18426 = vst [vmem:[#allocation24_spill] sm:$0xff] %v13686_v55  ;;  %v3416_v13 = vsel %vm18428_vm5, %v3400_v14, %v3319_v36  ;;  %v3531_v37 = vpack.c.bf16 %v13686_v55, %v13686_v55  ;;  %v18433_v36 = vld [vmem:[#allocation69_spill] sm:$0xff]  ;;  %vm2897_vm3 = vcmp.le.s32.totalorder %v13709_v51, %v13749_v0  ;;  %v13786_v14 = vadd.s32 88, %v13707_v30 }
 0x357   : > { %3002 = vmatpush.msra.mxu3 %v13397_v17  ;;  %8765 = vmatpush.lsf.msrb.mxu0 %v13397_v17  ;;  %vm2886_vm15 = vcmp.le.s32.totalorder %v13709_v51, %v13770_v48  ;;  %v17760_v55 = vmov 1  }
 0x358   : > { %v3952_v41 = vunpack.c.l.b16 %v3531_v37  ;;  %vm2895_vm11 = vcmp.le.s32.totalorder %v13709_v51, %v13786_v14  ;;  %8913 = vset.pattern.permute.xlu2 %v17760_v55 }
 0x359   : > { %3003 = vmatpush.msra.mxu3 %v13328_v23  ;;  %8766 = vmatpush.lsf.msrb.mxu0 %v13328_v23  ;;  %v3484_v23 = vsel %vm17742_vm7, %v3481_v54, %v3483_v22  ;;  %v13746_v54 = vadd.s32 112, %v13707_v30  ;;  %v13781_v49 = vpop.permute.xlu2 %4430  ;;  %v2875_v22 = vadd.s32 72, %v13707_v30 }
 0x35b   : > { %3004 = vmatpush.msra.mxu3 %v18427_v32  ;;  %8767 = vmatpush.lsf.msrb.mxu0 %v18427_v32  ;;  %vm2898_vm13 = vcmp.le.s32.totalorder %v13709_v51, %v13746_v54  ;;  %v13820_v32 = vadd.s32 24, %v13707_v30  ;;  %vm2893_vm6 = vcmp.le.s32.totalorder %v13709_v51, %v2875_v22 }
 0x35d   : > { %v3383_v17 = vpop.permute.xlu1 %3382  ;;  %3005 = vmatpush.msra.mxu3 %v18429_v16  ;;  %8768 = vmatpush.lsf.msrb.mxu0 %v18429_v16  ;;  %v2870_v16 = vadd.s32 32, %v13707_v30  ;;  %vm2887_vm5 = vcmp.le.s32.totalorder %v13709_v51, %v13820_v32 }
 0x35e   : > { %v3433_v38 = vsel %vm17743_vm10, %v3416_v13, %v3383_v17  ;;  %v2874_v17 = vadd.s32 64, %v13707_v30  ;;  %v2872_v13 = vadd.s32 48, %v13707_v30 }
 0x35f   : > { %v13697_v34 = vmul.f32 %v3484_v23, %v3433_v38  ;;  %3006 = vmatpush.msra.mxu3 %v18431_v11  ;;  %8769 = vmatpush.lsf.msrb.mxu0 %v18431_v11  ;;  %v2871_v38 = vadd.s32 40, %v13707_v30  ;;  %vm2888_vm10 = vcmp.le.s32.totalorder %v13709_v51, %v2870_v16 }
 0x360   : > { %vm2890_vm7 = vcmp.le.s32.totalorder %v13709_v51, %v2872_v13 }
 0x361   : > { %18430 = vst [vmem:[#allocation9_spill] sm:$0xff] %v13697_v34  ;;  %v3532_v58 = vpack.c.bf16 %v13697_v34, %v13697_v34  ;;  %3007 = vmatpush.msra.mxu3 %v18432_v7  ;;  %8770 = vmatpush.lsf.msrb.mxu0 %v18432_v7  ;;  %vm2889_vm12 = vcmp.le.s32.totalorder %v13709_v51, %v2871_v38  ;;  %v17772_v34 = vmov 0  }
 0x362   : > { %8912 = vset.pattern.permute.xlu1 %v17772_v34 }
 0x363   : > { %v3953_v29 = vunpack.c.l.b16 %v3532_v58  ;;  %3008 = vmatpush.msra.mxu3 %v18433_v36  ;;  %8771 = vmatpush.lsf.msrb.mxu0 %v18433_v36 }
 0x365   : > { %v3961_v46 = vpack.c.b16 %v3953_v29, %v3952_v41  ;;  %3009 = vmatpush.msra.mxu3 %v18434_v53  ;;  %8772 = vmatpush.lsf.msrb.mxu0 %v18434_v53 }
 0x367   : > { %v13711_v10 = vpop.permute.xlu1 %3633  ;;  %4686 = vrot.lane.b32.xlu0 %v3961_v46, %s9840_s18  ;;  %4444 = vrot.lane.b32.xlu1 %v3961_v46, %s9847_s0 }
 0x368   : > { %8499 = vmatmul.msk.bf16.gmra.mxu1 %vm18410_vm0, %v13711_v10  ;;  %4202 = vrot.lane.b32.xlu2 %v3961_v46, %s9844_s26  ;;  %vm2892_vm0 = vcmp.le.s32.totalorder %v13709_v51, %v2874_v17 }
 0x369   : > { %3010 = vmatpush.msra.mxu3 %v18435_v9  ;;  %8773 = vmatpush.lsf.msrb.mxu0 %v18435_v9  ;;  %v13903_v9 = vpop.f32.mrf.mxu3 }
 0x36a   : > { %3970 = vmatpush.bf16.msrb.mxu2 %v3961_v46  ;;  %18440 = vst [vmem:[#allocation75_spill] sm:$0xff] %v13903_v9 }
 0x36b   : > { %3011 = vmatpush.msra.mxu3 %v18436_v28  ;;  %8478 = vmatpush.xpose.msk.msra.mxu0 %vm17745_vm14, %v9848_v52  ;;  %vm18439_vm14 = vcmask 130048  }
 0x36c   : > { %8462 = vmatmul.msk.f32.vlgmr.msra.gmra.mxu3 %vm2884_vm4, %v9848_v52 }
 0x36e   : > { %3971 = vmatpush.bf16.msrb.mxu2 %v13663_v3  ;;  %v13763_v3 = vadd.s32 96, %v13707_v30 }
 0x36f   : > { %8774 = vmatpush.lsf.msrb.mxu0 %v18436_v28  ;;  %v13885_v29 = vpop.permute.xlu1 %4672 }
 0x370   : > { %8775 = vllmr.1.mxu0  ;;  %vm2896_vm8 = vcmp.le.s32.totalorder %v13709_v51, %v13763_v3 }
 0x371   : > { %8479 = vmatpush.xpose.msk.msra.mxu0 %vm2898_vm13, %v9848_v52  ;;  %v13916_v38 = vpop.f32.mrf.mxu3 }
 0x372   : > { %3972 = vmatpush.bf16.msrb.mxu2 %v13626_v47  ;;  %v13776_v47 = vpop.permute.xlu0 %3635  ;;  %18441 = vst [vmem:[#allocation81_spill] sm:$0xff] %v13916_v38 }
 0x374   : > { %8463 = vmatmul.msk.f32.gmra.mxu3 %vm2885_vm2, %v9848_v52 }
 0x375   : > { %8480 = vmatpush.xpose.msk.msra.mxu0 %vm2897_vm3, %v9848_v52 }
 0x376   : > { %3973 = vmatpush.bf16.msrb.mxu2 %v13571_v12  ;;  %v13798_v12 = vadd.s32 80, %v13707_v30 }
 0x377   : > { %v13901_v53 = vpop.permute.xlu1 %4432 }
 0x378   : > { %8500 = vmatmul.msk.bf16.gmra.mxu1 %vm18437_vm9, %v13776_v47  ;;  %vm2894_vm1 = vcmp.le.s32.totalorder %v13709_v51, %v13798_v12 }
 0x379   : > { %8481 = vmatpush.xpose.msk.msra.mxu0 %vm2896_vm8, %v9848_v52  ;;  %v13924_v61 = vpop.f32.mrf.mxu3 }
 0x37a   : > { %3974 = vmatpush.bf16.msrb.mxu2 %v13561_v5  ;;  %v13811_v5 = vpop.permute.xlu2 %3637  ;;  %v13888_v36 = vpop.permute.xlu0 %4674  ;;  %18442 = vst [vmem:[#allocation78_spill] sm:$0xff] %v13924_v61 }
 0x37b   : > { %18438 = vst [vmem:[#allocation71_spill] sm:$0xff] %v13811_v5 }
 0x37c   : > { %8464 = vmatmul.msk.f32.gmra.mxu3 %vm2886_vm15, %v9848_v52 }
 0x37d   : > { %8482 = vmatpush.xpose.msk.msra.mxu0 %vm2895_vm11, %v9848_v52 }
 0x37e   : > { %3975 = vmatpush.bf16.msrb.mxu2 %v13518_v21  ;;  %v2873_v21 = vadd.s32 56, %v13707_v30 }
 0x37f   : > { %v4193_v16 = vpop.permute.xlu1 %4192 }
 0x380   : > { %vm2891_vm9 = vcmp.le.s32.totalorder %v13709_v51, %v2873_v21 }
 0x381   : > { %8483 = vmatpush.xpose.msk.msra.mxu0 %vm2894_vm1, %v9848_v52  ;;  %v13930_v17 = vpop.f32.mrf.mxu3 }
 0x382   : > { %3976 = vmatpush.bf16.msrb.mxu2 %v13461_v2  ;;  %v17746_v2 = vmov 0.0   ;;  %v4435_v28 = vpop.permute.xlu0 %4434  ;;  %18443 = vst [vmem:[#allocation72_spill] sm:$0xff] %v13930_v17  ;;  %v14056_v17 = vpop.f32.mrf.mxu1 }
 0x383   : > { %v13835_v23 = vsel %vm2893_vm6, 1.0, %v17746_v2  ;;  %v13847_v37 = vsel %vm2892_vm0, 1.0, %v17746_v2  ;;  %v13852_v11 = vsel %vm2891_vm9, 1.0, %v17746_v2  ;;  %v13863_v56 = vsel %vm2890_vm7, 1.0, %v17746_v2 }
 0x384   : > { %8465 = vmatmul.msk.f32.gmra.mxu3 %vm2887_vm5, %v9848_v52  ;;  %v13866_v58 = vsel %vm2888_vm10, 1.0, %v17746_v2  ;;  %v13869_v7 = vsel %vm2889_vm12, 1.0, %v17746_v2 }
 0x385   : > { %8484 = vmatpush.xpose.msk.msra.mxu0 %vm2893_vm6, %v9848_v52 }
 0x386   : > { %3977 = vmatpush.bf16.msrb.mxu2 %v13324_v33  ;;  %v4191_v33 = vpop.permute.xlu2 %4190 }
 0x387   : > { %v4679_v21 = vpop.permute.xlu1 %4678 }
 0x388   : > { %8501 = vmatmul.msk.bf16.gmra.mxu1 %vm18439_vm14, %v13811_v5 }
 0x389   : > { %8485 = vmatpush.xpose.msk.msra.mxu0 %vm2892_vm0, %v9848_v52  ;;  %v13936_v62 = vpop.f32.mrf.mxu3 }
 0x38a   : > { %v4195_v2 = vpop.permute.xlu0 %4194  ;;  %18444 = vst [vmem:[#allocation65_spill] sm:$0xff] %v13936_v62 }
 0x38c   : > { %8466 = vmatmul.msk.f32.gmra.mxu3 %vm2888_vm10, %v9848_v52 }
 0x38d   : > { %8486 = vmatpush.xpose.msk.msra.mxu0 %vm2891_vm9, %v9848_v52 }
 0x38e   : > { %v13881_v41 = vpop.permute.xlu2 %4676 }
 0x38f   : > { %v4439_v57 = vpop.permute.xlu1 %4438 }
 0x391   : > { %8487 = vmatpush.xpose.msk.msra.mxu0 %vm2890_vm7, %v9848_v52 }
 0x392   : > { %v4681_v42 = vpop.permute.xlu0 %4680 }
 0x394   : > { %8467 = vmatmul.msk.f32.gmra.mxu3 %vm2889_vm12, %v9848_v52 }
 0x395   : > { %8488 = vmatpush.xpose.msk.msra.mxu0 %vm2889_vm12, %v9848_v52  ;;  %vm18447_vm12 = vcmp.le.s32.totalorder %v13709_v51, %v13718_v35 }
 0x396   : > { %v4437_v46 = vpop.permute.xlu2 %4436 }
 0x397   : > { %v4199_v26 = vpop.permute.xlu1 %4198 }
 0x399   : > { %8489 = vmatpush.xpose.msk.msra.mxu0 %vm2888_vm10, %v9848_v52  ;;  %vm18519_vm10 = vcmask 523264  }
 0x39a   : > { %v4441_v8 = vpop.permute.xlu0 %4440 }
 0x39c   : > { %8468 = vmatmul.msk.f32.gmra.mxu3 %vm2890_vm7, %v9848_v52  ;;  %vm18518_vm7 = vcmask 261120  }
 0x39d   : > { %8490 = vmatpush.xpose.msk.msra.mxu0 %vm2887_vm5, %v9848_v52 }
 0x39e   : > { %v4197_v13 = vpop.permute.xlu2 %4196 }
 0x3a1   : > { %8491 = vmatpush.xpose.msk.msra.mxu0 %vm2886_vm15, %v9848_v52 }
 0x3a4   : > { %8469 = vmatmul.msk.f32.gmra.mxu3 %vm2891_vm9, %v9848_v52 }
 0x3a5   : > { %8492 = vmatpush.xpose.msk.msra.mxu0 %vm2885_vm2, %v9848_v52 }
 0x3a6   : > { %v4683_v31 = vpop.permute.xlu2 %4682 }
 0x3a9   : > { %8493 = vmatpush.xpose.msk.msra.mxu0 %vm2884_vm4, %v9848_v52 }
 0x3ac   : > { %8776 = vmatmul.lmr.bf16.vlgmr.msra.gmra.1.mxu0  ;;  %8470 = vmatmul.msk.f32.gmra.mxu3 %vm2892_vm0, %v9848_v52  ;;  %vm18574_vm0 = vmmov %vm18518_vm7 }
 0x3ae   : > { %v4443_v4 = vpop.permute.xlu2 %4442 }
 0x3b4   : > { %8471 = vmatmul.msk.f32.gmra.mxu3 %vm2893_vm6, %v9848_v52 }
 0x3ba   : > { %v4201_v22 = vpop.permute.xlu0 %4200 }
 0x3bc   : > { %8472 = vmatmul.msk.f32.gmra.mxu3 %vm2894_vm1, %v9848_v52 }
 0x3c2   : > { %v4203_v19 = vpop.permute.xlu2 %4202 }
 0x3c3   : > { %4212 = vmatpush.bf16.msra.mxu3 %v4203_v19  ;;  %v4685_v19 = vpop.permute.xlu1 %4684 }
 0x3c4   : > { %8473 = vmatmul.msk.f32.gmra.mxu3 %vm2895_vm11, %v9848_v52 }
 0x3c7   : > { %4213 = vmatpush.bf16.msra.mxu3 %v4201_v22  ;;  %v13945_v22 = vpop.f32.mrf.mxu3 }
 0x3c8   : > { %18445 = vst [vmem:[#allocation73_spill] sm:$0xff] %v13945_v22 }
 0x3cb   : > { %4214 = vmatpush.bf16.msra.mxu3 %v4199_v26 }
 0x3cc   : > { %8474 = vmatmul.msk.f32.gmra.mxu3 %vm2896_vm8, %v9848_v52 }
 0x3cf   : > { %4215 = vmatpush.bf16.msra.mxu3 %v4197_v13  ;;  %v13951_v18 = vpop.f32.mrf.mxu3 }
 0x3d0   : > { %18446 = vst [vmem:[#allocation47_spill] sm:$0xff] %v13951_v18  ;;  %v18459_v18 = vmov 2  }
 0x3d3   : > { %4216 = vmatpush.bf16.msra.mxu3 %v4195_v2 }
 0x3d4   : > { %8475 = vmatmul.msk.f32.gmra.mxu3 %vm2897_vm3, %v9848_v52 }
 0x3d7   : > { %4217 = vmatpush.bf16.msra.mxu3 %v4193_v16 }
 0x3d9   : > { %v4445_v26 = vpop.permute.xlu1 %4444  ;;  %v4687_v55 = vpop.permute.xlu0 %4686 }
 0x3da   : > { %4454 = vmatpush.bf16.msra.mxu0 %v4445_v26  ;;  %4696 = vmatpush.bf16.msra.mxu1 %v4687_v55  ;;  %v13962_v55 = vpop.f32.mrf.mxu3 }
 0x3db   : > { %4218 = vmatpush.bf16.msra.mxu3 %v4191_v33  ;;  %18448 = vst [vmem:[#allocation59_spill] sm:$0xff] %v13962_v55 }
 0x3dc   : > { %8476 = vmatmul.msk.f32.gmra.mxu3 %vm2898_vm13, %v9848_v52 }
 0x3de   : > { %4455 = vmatpush.bf16.msra.mxu0 %v4443_v4  ;;  %4697 = vmatpush.bf16.msra.mxu1 %v4685_v19  ;;  %v18449_v4 = vmov 3  }
 0x3df   : > { %4219 = vmatpush.bf16.msra.mxu3 %v13734_v1  ;;  %v13975_v1 = vpop.f32.mrf.mxu0 }
 0x3e2   : > { %4456 = vmatpush.bf16.msra.mxu0 %v4441_v8  ;;  %4698 = vmatpush.bf16.msra.mxu1 %v4683_v31  ;;  %v18450_v8 = vmov 1  }
 0x3e4   : > { %8477 = vmatmul.msk.f32.gmra.mxu3 %vm18447_vm12, %v9848_v52 }
 0x3e6   : > { %4457 = vmatpush.bf16.msra.mxu0 %v4439_v57  ;;  %4699 = vmatpush.bf16.msra.mxu1 %v4681_v42  ;;  %v17764_v42 = vmov 2  }
 0x3e7   : > { %v13981_v33 = vpop.f32.mrf.mxu0 }
 0x3e8   : > { %18451 = vst [vmem:[#allocation19_spill] sm:$0xff] %v13981_v33 }
 0x3ea   : > { %4458 = vmatpush.bf16.msra.mxu0 %v4437_v46  ;;  %4700 = vmatpush.bf16.msra.mxu1 %v4679_v21 }
 0x3ee   : > { %4459 = vmatpush.bf16.msra.mxu0 %v4435_v28  ;;  %4701 = vmatpush.bf16.msra.mxu1 %v13881_v41 }
 0x3ef   : > { %v3013_v2 = vpop.f32.mrf.mxu3 }
 0x3f0   : > { %4504 = vperm.xlu0 %8915, %v3013_v2   ;;  %4020 = vperm.xlu2 %8913, %v3013_v2   ;;  %v5126_v57 = vmul.f32 1.442695, %v3013_v2 }
 0x3f1   : > { %3739 = vperm.xlu1 %8912, %v3013_v2  }
 0x3f2   : > { %4460 = vmatpush.bf16.msra.mxu0 %v13901_v53  ;;  %4702 = vmatpush.bf16.msra.mxu1 %v13888_v36  ;;  %9326 = vpow2.f32 %v5126_v57 }
 0x3f6   : > { %4461 = vmatpush.bf16.msra.mxu0 %v13781_v49  ;;  %4703 = vmatpush.bf16.msra.mxu1 %v13885_v29  ;;  %v13987_v29 = vpop.f32.mrf.mxu0 }
 0x3f7   : > { %v3016_v31 = vpop.f32.mrf.mxu3  ;;  %18452 = vst [vmem:[#allocation68_spill] sm:$0xff] %v13987_v29 }
 0x3f8   : > { %8916 = vset.pattern.permute.xlu0 %v17772_v34  ;;  %5158 = vrot.lane.b32.xlu2 %v3013_v2, %s9840_s18  ;;  %v9327_v52 = vpop.eup %9326  ;;  %v5128_v41 = vmul.f32 1.442695, %v3016_v31 }
 0x3f9   : > { %8914 = vset.pattern.permute.xlu1 %v17764_v42  ;;  %3744 = vperm.xlu0 %8916, %v3016_v31  }
 0x3fa   : > { %4262 = vperm.xlu1 %8914, %v3013_v2   ;;  %8919 = vset.pattern.permute.xlu2 %v18449_v4  ;;  %9328 = vpow2.f32 %v5128_v41 }
 0x3fe   : > { %v13990_v53 = vpop.f32.mrf.mxu0 }
 0x3ff   : > { %v3019_v49 = vpop.f32.mrf.mxu3  ;;  %18453 = vst [vmem:[#allocation37_spill] sm:$0xff] %v13990_v53 }
 0x400   : > { %4508 = vperm.xlu2 %8919, %v3016_v31   ;;  %v5130_v36 = vmul.f32 1.442695, %v3019_v49  ;;  %v9329_v46 = vpop.eup %9328 }
 0x401   : > { %8918 = vset.pattern.permute.xlu0 %v17764_v42 }
 0x402   : > { %8917 = vset.pattern.permute.xlu1 %v18450_v8  ;;  %4266 = vperm.xlu0 %8918, %v3016_v31   ;;  %9330 = vpow2.f32 %v5130_v36 }
 0x403   : > { %4024 = vperm.xlu1 %8917, %v3016_v31  }
 0x406   : > { %v13995_v21 = vpop.f32.mrf.mxu0 }
 0x407   : > { %v3022_v28 = vpop.f32.mrf.mxu3  ;;  %18454 = vst [vmem:[#allocation66_spill] sm:$0xff] %v13995_v21  ;;  %v3699_v21 = vpop.f32.mrf.mxu1 }
 0x408   : > { %8921 = vset.pattern.permute.xlu2 %v18450_v8  ;;  %v5132_v13 = vmul.f32 1.442695, %v3022_v28  ;;  %v9331_v16 = vpop.eup %9330 }
 0x409   : > { %5339 = vperm.xlu2 %8921, %v9327_v52  }
 0x40a   : > { %5403 = vperm.xlu0 %8918, %v9327_v52   ;;  %9332 = vpow2.f32 %v5132_v13 }
 0x40b   : > { %5160 = vrot.lane.b32.xlu1 %v3016_v31, %s9840_s18 }
 0x40c   : > { %8920 = vset.pattern.permute.xlu1 %v17772_v34 }
 0x40e   : > { %v14005_v2 = vpop.f32.mrf.mxu0 }
 0x40f   : > { %v13999_v26 = vpop.f32.mrf.mxu3  ;;  %18455 = vst [vmem:[#allocation54_spill] sm:$0xff] %v14005_v2 }
 0x410   : > { %v13997_v19 = vpop.eup %9332 }
 0x411   : > { %8923 = vset.pattern.permute.xlu2 %v17772_v34 }
 0x412   : > { %8924 = vset.pattern.permute.xlu0 %v18450_v8  ;;  %3749 = vperm.xlu2 %8923, %v3019_v49  }
 0x413   : > { %5260 = vperm.xlu1 %8920, %v9327_v52   ;;  %4028 = vperm.xlu0 %8924, %v3019_v49  }
 0x416   : > { %v14013_v57 = vpop.f32.mrf.mxu0 }
 0x417   : > { %v14008_v31 = vpop.f32.mrf.mxu3  ;;  %18456 = vst [vmem:[#allocation76_spill] sm:$0xff] %v14013_v57 }
 0x418   : > { %v5136_v45 = vmul.f32 1.442695, %v14008_v31 }
 0x41a   : > { %8925 = vset.pattern.permute.xlu2 %v17764_v42 }
 0x41b   : > { %8922 = vset.pattern.permute.xlu1 %v18449_v4  ;;  %5162 = vrot.lane.b32.xlu0 %v3019_v49, %s9840_s18 }
 0x41c   : > { %5467 = vperm.xlu1 %8922, %v9327_v52   ;;  %4270 = vperm.xlu2 %8925, %v3019_v49   ;;  %v5134_v52 = vmul.f32 1.442695, %v13999_v26 }
 0x41d   : > { %8926 = vset.pattern.permute.xlu0 %v17772_v34 }
 0x41e   : > { %9334 = vpow2.f32 %v5134_v52  ;;  %v14025_v36 = vpop.f32.mrf.mxu0 }
 0x41f   : > { %18457 = vst [vmem:[#allocation20_spill] sm:$0xff] %v14025_v36  ;;  %v14034_v52 = vpop.f32.mrf.mxu3  ;;  %9336 = vpow2.f32 %v5136_v45 }
 0x423   : > { %5265 = vperm.xlu0 %8926, %v9329_v46  }
 0x424   : > { %4512 = vperm.xlu1 %8922, %v3019_v49   ;;  %5407 = vperm.xlu2 %8925, %v9329_v46   ;;  %v14023_v41 = vpop.eup %9334 }
 0x425   : > { %v14060_v62 = vpop.eup %9336 }
 0x42b   : > { %8934 = vset.pattern.permute.xlu0 %v18450_v8 }
 0x42c   : > { %8927 = vset.pattern.permute.xlu1 %v18450_v8  ;;  %8928 = vset.pattern.permute.xlu2 %v18449_v4 }
 0x42d   : > { %5343 = vperm.xlu1 %8927, %v9329_v46   ;;  %5471 = vperm.xlu2 %8928, %v9329_v46  }
 0x42e   : > { %5347 = vperm.xlu0 %8934, %v9331_v16  }
 0x435   : > { %8929 = vset.pattern.permute.xlu1 %v17772_v34  ;;  %8930 = vset.pattern.permute.xlu2 %v18450_v8 }
 0x436   : > { %8942 = vset.pattern.permute.xlu0 %v17764_v42  ;;  %4032 = vperm.xlu2 %8930, %v3022_v28  }
 0x437   : > { %3754 = vperm.xlu1 %8929, %v3022_v28   ;;  %5415 = vperm.xlu0 %8942, %v13997_v19  }
 0x43e   : > { %8932 = vset.pattern.permute.xlu2 %v18449_v4 }
 0x43f   : > { %8931 = vset.pattern.permute.xlu1 %v17764_v42  ;;  %8946 = vset.pattern.permute.xlu0 %v18449_v4 }
 0x440   : > { %4516 = vperm.xlu2 %8932, %v3022_v28   ;;  %4274 = vperm.xlu1 %8931, %v3022_v28  }
 0x441   : > { %4524 = vperm.xlu0 %8946, %v14008_v31  }
 0x448   : > { %5164 = vrot.lane.b32.xlu2 %v3022_v28, %s9840_s18  ;;  %5411 = vperm.xlu1 %8931, %v9331_v16   ;;  %v3110_v28 = vpop.f32.mrf.mxu0 }
 0x449   : > { %5168 = vrot.lane.b32.xlu0 %v14008_v31, %s9840_s18  ;;  %8933 = vset.pattern.permute.xlu2 %v17772_v34  ;;  %v14032_v13 = vperm.slane %v3110_v28, 3  ;;  %v14043_v55 = vperm.slane %v3110_v28, 0  ;;  %v14058_v44 = vperm.slane %v3110_v28, 1  ;;  %v14062_v61 = vperm.slane %v3110_v28, 2 }
 0x44a   : > { %v14020_v49 = vpop.permute.xlu2 %4020  ;;  %8949 = vset.pattern.permute.xlu0 %v17764_v42 }
 0x44b   : > { %v4084_v28 = vsub.f32 %v14020_v49, %v14058_v44 }
 0x44d   : > { %v4100_v9 = vmin.f32 %v4084_v28, 0.0 }
 0x44f   : > { %v4116_v53 = vmul.f32 1.442695, %v4100_v9 }
 0x450   : > { %5270 = vperm.xlu2 %8933, %v9331_v16   ;;  %8937 = vset.pattern.permute.xlu1 %v18450_v8 }
 0x451   : > { %5419 = vperm.xlu0 %8949, %v14023_v41   ;;  %4036 = vperm.xlu1 %8937, %v13999_v26  }
 0x452   : > { %v14030_v46 = vpop.permute.xlu2 %5158 }
 0x453   : > { %18458 = vst [vmem:[#allocation82_spill] sm:$0xff] %v14030_v46 }
 0x458   : > { %8935 = vset.pattern.permute.xlu2 %v18449_v4 }
 0x459   : > { %8951 = vset.pattern.permute.xlu0 %v17772_v34  ;;  %5475 = vperm.xlu2 %8935, %v9331_v16  }
 0x45a   : > { %8939 = vset.pattern.permute.xlu1 %v18449_v4  ;;  %3769 = vperm.xlu0 %8951, %v14034_v52   ;;  %v4509_v42 = vpop.permute.xlu2 %4508 }
 0x45b   : > { %4520 = vperm.xlu1 %8939, %v13999_v26   ;;  %v4569_v20 = vsub.f32 %v4509_v42, %v14032_v13 }
 0x45d   : > { %v4585_v46 = vmin.f32 %v4569_v20, 0.0 }
 0x45f   : > { %v4602_v60 = vmul.f32 1.442695, %v4585_v46 }
 0x461   : > { %8936 = vset.pattern.permute.xlu2 %v17772_v34  ;;  %9338 = vpow2.f32 %v4602_v60 }
 0x462   : > { %8953 = vset.pattern.permute.xlu0 %v18459_v18  ;;  %3759 = vperm.xlu2 %8936, %v13999_v26   ;;  %v4505_v16 = vpop.permute.xlu0 %4504 }
 0x463   : > { %5166 = vrot.lane.b32.xlu1 %v13999_v26, %s9840_s18  ;;  %4286 = vperm.xlu0 %8953, %v14034_v52   ;;  %v3740_v42 = vpop.permute.xlu1 %3739  ;;  %v4568_v20 = vsub.f32 %v4505_v16, %v14032_v13  ;;  %v14052_v25 = vpop.permute.xlu2 %5339 }
 0x464   : > { %18460 = vst [vmem:[#allocation26_spill] sm:$0xff] %v14052_v25  ;;  %v3818_v46 = vsub.f32 %v3740_v42, %v14043_v55  ;;  %8940 = vset.pattern.permute.xlu1 %v17772_v34  ;;  %v18461_v42 = vmov 0.0  }
 0x465   : > { %v4584_v22 = vmin.f32 %v4568_v20, 0.0  ;;  %v14069_v60 = vsel %vm2885_vm2, 1.0, %v18461_v42  ;;  %v8446_v49 = vsel %vm2884_vm4, 1.0, %v18461_v42  ;;  %vm18528_vm4 = vmmov %vm18447_vm12  ;;  %vm18579_vm12 = vcmask 785408  }
 0x466   : > { %v3834_v39 = vmin.f32 %v3818_v46, 0.0 }
 0x467   : > { %v4600_v45 = vmul.f32 1.442695, %v4584_v22  ;;  %v9339_v25 = vpop.eup %9338 }
 0x468   : > { %v3850_v16 = vmul.f32 1.442695, %v3834_v39 }
 0x469   : > { %9340 = vpow2.f32 %v4600_v45  ;;  %v4633_v45 = vmul.f32 %v9339_v25, %v14069_v60 }
 0x46a   : > { %8938 = vset.pattern.permute.xlu2 %v18459_v18  ;;  %9342 = vpow2.f32 %v3850_v16  ;;  %v14089_v16 = vpop.f32.mrf.mxu3 }
 0x46b   : > { %5275 = vperm.xlu1 %8940, %v13997_v19   ;;  %8958 = vset.pattern.permute.xlu0 %v18449_v4  ;;  %v3745_v22 = vpop.permute.xlu0 %3744  ;;  %v4649_v2 = vmul.f32 %v4633_v45, %v3699_v21 }
 0x46c   : > { %4278 = vperm.xlu2 %8938, %v13999_v26   ;;  %5487 = vperm.xlu0 %8958, %v14060_v62   ;;  %v4263_v39 = vpop.permute.xlu1 %4262  ;;  %v3819_v20 = vsub.f32 %v3745_v22, %v14043_v55  ;;  %v14078_v46 = vpop.permute.xlu2 %3749  ;;  %v5138_v22 = vmul.f32 1.442695, %v14034_v52 }
 0x46d   : > { %v4326_v43 = vsub.f32 %v4263_v39, %v14062_v61 }
 0x46e   : > { %v3835_v34 = vmin.f32 %v3819_v20, 0.0 }
 0x46f   : > { %v9341_v38 = vpop.eup %9340  ;;  %v4342_v26 = vmin.f32 %v4326_v43, 0.0 }
 0x470   : > { %v4632_v36 = vmul.f32 %v9341_v38, %v8446_v49  ;;  %v3852_v57 = vmul.f32 1.442695, %v3835_v34  ;;  %v9343_v20 = vpop.eup %9342 }
 0x471   : > { %v4358_v25 = vmul.f32 1.442695, %v4342_v26  ;;  %v3882_v43 = vmul.f32 %v9343_v20, %v8446_v49 }
 0x472   : > { %v4648_v39 = vmul.f32 %v4632_v36, %v14056_v17  ;;  %9344 = vpow2.f32 %v3852_v57 }
 0x473   : > { %8943 = vset.pattern.permute.xlu1 %v18449_v4  ;;  %9346 = vpow2.f32 %v5138_v22  ;;  %v3898_v22 = vmul.f32 %v3882_v43, %v14056_v17 }
 0x474   : > { %5479 = vperm.xlu1 %8943, %v13997_v19   ;;  %8941 = vset.pattern.permute.xlu2 %v18450_v8  ;;  %v4267_v30 = vpop.permute.xlu0 %4266  ;;  %v4664_v34 = vpack.c.bf16 %v4649_v2, %v4648_v39  ;;  %9348 = vpow2.f32 %v4358_v25 }
 0x475   : > { %8960 = vset.pattern.permute.xlu0 %v18450_v8  ;;  %5351 = vperm.xlu2 %8941, %v13997_v19   ;;  %v4025_v38 = vpop.permute.xlu1 %4024  ;;  %v4327_v57 = vsub.f32 %v4267_v30, %v14062_v61  ;;  %9350 = vpow2.f32 %v4116_v53 }
 0x476   : > { %4048 = vperm.xlu0 %8960, %v14089_v16   ;;  %v4085_v36 = vsub.f32 %v4025_v38, %v14058_v44  ;;  %v14098_v28 = vpop.permute.xlu2 %4270  ;;  %4704 = vmatmul.bf16.vlgmr.msra.gmra.mxu1 %v4664_v34  ;;  %v18462_v38 = vmov 0  }
 0x477   : > { %v4343_v9 = vmin.f32 %v4327_v57, 0.0 }
 0x478   : > { %v9345_v45 = vpop.eup %9344  ;;  %v4101_v2 = vmin.f32 %v4085_v36, 0.0 }
 0x479   : > { %v4360_v26 = vmul.f32 1.442695, %v4343_v9  ;;  %v3883_v19 = vmul.f32 %v9345_v45, %v14069_v60  ;;  %v14102_v29 = vpop.eup %9346 }
 0x47a   : > { %v4118_v39 = vmul.f32 1.442695, %v4101_v2  ;;  %v9349_v25 = vpop.eup %9348 }
 0x47b   : > { %9352 = vpow2.f32 %v4360_v26  ;;  %v3899_v30 = vmul.f32 %v3883_v19, %v3699_v21  ;;  %v9351_v57 = vpop.eup %9350  ;;  %v4390_v9 = vmul.f32 %v9349_v25, %v8446_v49 }
 0x47c   : > { %9354 = vpow2.f32 %v4118_v39  ;;  %8944 = vset.pattern.permute.xlu1 %v18462_v38  ;;  %v14105_v34 = vpop.permute.xlu0 %5403  ;;  %v4148_v45 = vmul.f32 %v9351_v57, %v8446_v49  ;;  %v14117_v39 = vpop.f32.mrf.mxu3 }
 0x47d   : > { %18463 = vst [vmem:[#allocation58_spill] sm:$0xff] %v14105_v34  ;;  %4040 = vperm.xlu2 %8941, %v14008_v31   ;;  %3764 = vperm.xlu1 %8944, %v14008_v31   ;;  %v14109_v53 = vpop.permute.xlu1 %5160  ;;  %v3914_v20 = vpack.c.bf16 %v3899_v30, %v3898_v22  ;;  %v4406_v22 = vmul.f32 %v4390_v9, %v14056_v17 }
 0x47e   : > { %18464 = vst [vmem:[#allocation77_spill] sm:$0xff] %v14109_v53  ;;  %8963 = vset.pattern.permute.xlu0 %v18462_v38  ;;  %v14112_v36 = vpop.permute.xlu2 %5407  ;;  %v4164_v53 = vmul.f32 %v4148_v45, %v14056_v17 }
 0x47f   : > { %18465 = vst [vmem:[#allocation55_spill] sm:$0xff] %v14112_v36  ;;  %5290 = vperm.xlu0 %8963, %v14102_v29   ;;  %3978 = vmatmul.bf16.vlgmr.msrb.gmra.mxu2 %v3914_v20 }
 0x481   : > { %v9353_v43 = vpop.eup %9352 }
 0x482   : > { %v9355_v2 = vpop.eup %9354  ;;  %v4391_v26 = vmul.f32 %v9353_v43, %v14069_v60 }
 0x483   : > { %v4149_v19 = vmul.f32 %v9355_v2, %v14069_v60 }
 0x484   : > { %v4407_v30 = vmul.f32 %v4391_v26, %v3699_v21 }
 0x485   : > { %v4165_v34 = vmul.f32 %v4149_v19, %v3699_v21  ;;  %8947 = vset.pattern.permute.xlu2 %v18462_v38  ;;  %8945 = vset.pattern.permute.xlu1 %v18459_v18  ;;  %v14123_v25 = vpop.permute.xlu1 %5260  ;;  %v4029_v49 = vpop.permute.xlu0 %4028  ;;  %v5140_v21 = vmul.f32 1.442695, %v14089_v16 }
 0x486   : > { %18466 = vst [vmem:[#allocation74_spill] sm:$0xff] %v14123_v25  ;;  %5280 = vperm.xlu2 %8947, %v14023_v41   ;;  %4282 = vperm.xlu1 %8945, %v14008_v31   ;;  %v4422_v60 = vpack.c.bf16 %v4407_v30, %v4406_v22  ;;  %v4086_v20 = vsub.f32 %v4029_v49, %v14058_v44  ;;  %v14146_v19 = vpop.f32.mrf.mxu1 }
 0x487   : > { %8970 = vset.pattern.permute.xlu0 %v18449_v4  ;;  %v14129_v57 = vpop.permute.xlu2 %5471  ;;  %v4180_v17 = vpack.c.bf16 %v4165_v34, %v4164_v53  ;;  %9356 = vpow2.f32 %v5140_v21 }
 0x488   : > { %18467 = vst [vmem:[#allocation86_spill] sm:$0xff] %v14129_v57  ;;  %4536 = vperm.xlu0 %8970, %v14117_v39   ;;  %4462 = vmatmul.bf16.vlgmr.msra.gmra.mxu0 %v4422_v60  ;;  %v4102_v9 = vmin.f32 %v4086_v20, 0.0 }
 0x489   : > { %4220 = vmatmul.bf16.vlgmr.msra.gmra.mxu3 %v4180_v17 }
 0x48a   : > { %v4120_v45 = vmul.f32 1.442695, %v4102_v9  ;;  %v14161_v9 = vsel %vm2886_vm15, 1.0, %v18461_v42 }
 0x48c   : > { %9358 = vpow2.f32 %v4120_v45  ;;  %v14167_v45 = vsel %vm2887_vm5, 1.0, %v18461_v42 }
 0x48d   : > { %v14133_v43 = vpop.permute.xlu0 %5162  ;;  %v14144_v26 = vpop.eup %9356 }
 0x48e   : > { %18468 = vst [vmem:[#allocation87_spill] sm:$0xff] %v14133_v43  ;;  %8954 = vset.pattern.permute.xlu2 %v18449_v4  ;;  %8948 = vset.pattern.permute.xlu1 %v18450_v8  ;;  %v14137_v31 = vpop.permute.xlu1 %5467 }
 0x48f   : > { %18469 = vst [vmem:[#allocation51_spill] sm:$0xff] %v14137_v31  ;;  %5355 = vperm.xlu1 %8948, %v14023_v41   ;;  %4528 = vperm.xlu2 %8954, %v14034_v52   ;;  %v5142_v31 = vmul.f32 1.442695, %v14117_v39 }
 0x490   : > { %5174 = vrot.lane.b32.xlu0 %v14117_v39, %s9840_s18  ;;  %v4033_v34 = vpop.permute.xlu2 %4032 }
 0x491   : > { %v4087_v53 = vsub.f32 %v4033_v34, %v14058_v44 }
 0x492   : > { %v9359_v20 = vpop.eup %9358 }
 0x493   : > { %v4103_v2 = vmin.f32 %v4087_v53, 0.0  ;;  %v4150_v53 = vmul.f32 %v9359_v20, %v14161_v9 }
 0x495   : > { %v4122_v22 = vmul.f32 1.442695, %v4103_v2  ;;  %v14152_v60 = vpop.permute.xlu0 %5265  ;;  %v4166_v20 = vmul.f32 %v4150_v53, %v14146_v19 }
 0x496   : > { %v4513_v30 = vpop.permute.xlu1 %4512  ;;  %18470 = vst [vmem:[#allocation45_spill] sm:$0xff] %v14152_v60 }
 0x497   : > { %9360 = vpow2.f32 %v4122_v22  ;;  %8950 = vset.pattern.permute.xlu1 %v18449_v4  ;;  %5170 = vrot.lane.b32.xlu2 %v14034_v52, %s9840_s18  ;;  %v4570_v49 = vsub.f32 %v4513_v30, %v14032_v13  ;;  %v14171_v30 = vpop.f32.mrf.mxu3 }
 0x498   : > { %5495 = vperm.xlu0 %8970, %v14144_v26   ;;  %5483 = vperm.xlu1 %8950, %v14023_v41  }
 0x499   : > { %v4586_v17 = vmin.f32 %v4570_v49, 0.0  ;;  %8956 = vset.pattern.permute.xlu2 %v18450_v8  ;;  %v14174_v49 = vpop.f32.mrf.mxu1 }
 0x49a   : > { %v4517_v21 = vpop.permute.xlu2 %4516 }
 0x49b   : > { %v4604_v34 = vmul.f32 1.442695, %v4586_v17  ;;  %v4571_v41 = vsub.f32 %v4517_v21, %v14032_v13  ;;  %v3820_v17 = vsub.f32 %v14078_v46, %v14043_v55 }
 0x49d   : > { %v9361_v2 = vpop.eup %9360  ;;  %9362 = vpow2.f32 %v4604_v34  ;;  %v4587_v22 = vmin.f32 %v4571_v41, 0.0  ;;  %v3836_v46 = vmin.f32 %v3820_v17, 0.0 }
 0x49e   : > { %v4151_v48 = vmul.f32 %v9361_v2, %v14167_v45 }
 0x49f   : > { %v4606_v43 = vmul.f32 1.442695, %v4587_v22  ;;  %5359 = vperm.xlu2 %8956, %v14060_v62   ;;  %v14177_v32 = vpop.permute.xlu1 %5343 }
 0x4a0   : > { %18471 = vst [vmem:[#allocation30_spill] sm:$0xff] %v14177_v32  ;;  %8974 = vset.pattern.permute.xlu0 %v18462_v38  ;;  %8952 = vset.pattern.permute.xlu1 %v18450_v8  ;;  %v4167_v21 = vmul.f32 %v4151_v48, %v14174_v49  ;;  %v14187_v34 = vpop.permute.xlu0 %5347  ;;  %v4328_v48 = vsub.f32 %v14098_v28, %v14062_v61 }
 0x4a1   : > { %9364 = vpow2.f32 %v4606_v43  ;;  %3784 = vperm.xlu0 %8974, %v14171_v30   ;;  %4044 = vperm.xlu1 %8952, %v14034_v52   ;;  %18472 = vst [vmem:[#allocation28_spill] sm:$0xff] %v14187_v34  ;;  %v3854_v43 = vmul.f32 1.442695, %v3836_v46 }
 0x4a2   : > { %v14189_v41 = vpop.permute.xlu2 %5164  ;;  %v4181_v2 = vpack.c.bf16 %v4167_v21, %v4166_v20  ;;  %9366 = vpow2.f32 %v5142_v31 }
 0x4a3   : > { %18473 = vst [vmem:[#allocation46_spill] sm:$0xff] %v14189_v41  ;;  %v9363_v22 = vpop.eup %9362  ;;  %9368 = vpow2.f32 %v3854_v43  ;;  %v4344_v41 = vmin.f32 %v4328_v48, 0.0 }
 0x4a4   : > { %4225 = vmatmul.bf16.gmra.mxu3 %v4181_v2  ;;  %v4634_v25 = vmul.f32 %v9363_v22, %v14161_v9 }
 0x4a5   : > { %v4362_v31 = vmul.f32 1.442695, %v4344_v41 }
 0x4a6   : > { %v4650_v22 = vmul.f32 %v4634_v25, %v14146_v19 }
 0x4a7   : > { %v9365_v53 = vpop.eup %9364  ;;  %8957 = vset.pattern.permute.xlu2 %v18459_v18 }
 0x4a8   : > { %5423 = vperm.xlu2 %8957, %v14060_v62   ;;  %v4635_v52 = vmul.f32 %v9365_v53, %v14167_v45  ;;  %v14209_v57 = vpop.eup %9366 }
 0x4a9   : > { %8976 = vset.pattern.permute.xlu0 %v18459_v18  ;;  %8955 = vset.pattern.permute.xlu1 %v18462_v38  ;;  %v3755_v17 = vpop.permute.xlu1 %3754  ;;  %v14200_v20 = vpop.permute.xlu0 %5415 }
 0x4aa   : > { %18474 = vst [vmem:[#allocation27_spill] sm:$0xff] %v14200_v20  ;;  %4298 = vperm.xlu0 %8976, %v14171_v30   ;;  %v3821_v21 = vsub.f32 %v3755_v17, %v14043_v55  ;;  %5285 = vperm.xlu1 %8955, %v14060_v62   ;;  %v14205_v2 = vpop.permute.xlu2 %5270  ;;  %v4651_v28 = vmul.f32 %v4635_v52, %v14174_v49  ;;  %v9369_v62 = vpop.eup %9368 }
 0x4ab   : > { %18475 = vst [vmem:[#allocation18_spill] sm:$0xff] %v14205_v2  ;;  %v3884_v41 = vmul.f32 %v9369_v62, %v14161_v9 }
 0x4ac   : > { %v3837_v46 = vmin.f32 %v3821_v21, 0.0  ;;  %v4665_v53 = vpack.c.bf16 %v4651_v28, %v4650_v22 }
 0x4ad   : > { %v3900_v28 = vmul.f32 %v3884_v41, %v14146_v19 }
 0x4ae   : > { %v3856_v34 = vmul.f32 1.442695, %v3837_v46  ;;  %4709 = vmatmul.bf16.gmra.mxu1 %v4665_v53 }
 0x4b0   : > { %9370 = vpow2.f32 %v3856_v34  ;;  %8959 = vset.pattern.permute.xlu2 %v18462_v38 }
 0x4b1   : > { %3774 = vperm.xlu2 %8959, %v14089_v16   ;;  %9372 = vpow2.f32 %v4362_v31 }
 0x4b2   : > { %8979 = vset.pattern.permute.xlu0 %v18450_v8  ;;  %8962 = vset.pattern.permute.xlu1 %v18449_v4  ;;  %v4275_v25 = vpop.permute.xlu1 %4274 }
 0x4b3   : > { %5371 = vperm.xlu0 %8979, %v14209_v57   ;;  %v4329_v43 = vsub.f32 %v4275_v25, %v14062_v61  ;;  %4532 = vperm.xlu1 %8962, %v14089_v16   ;;  %v4525_v52 = vpop.permute.xlu0 %4524  ;;  %v14218_v48 = vpop.permute.xlu2 %5475 }
 0x4b4   : > { %18476 = vst [vmem:[#allocation79_spill] sm:$0xff] %v14218_v48 }
 0x4b5   : > { %v4345_v34 = vmin.f32 %v4329_v43, 0.0 }
 0x4b6   : > { %v9371_v17 = vpop.eup %9370 }
 0x4b7   : > { %v4364_v21 = vmul.f32 1.442695, %v4345_v34  ;;  %v3885_v22 = vmul.f32 %v9371_v17, %v14167_v45  ;;  %v9373_v25 = vpop.eup %9372 }
 0x4b8   : > { %v4392_v34 = vmul.f32 %v9373_v25, %v14161_v9  ;;  %v4573_v9 = vsub.f32 %v4525_v52, %v14032_v13 }
 0x4b9   : > { %9374 = vpow2.f32 %v4364_v21  ;;  %8961 = vset.pattern.permute.xlu2 %v18459_v18  ;;  %v3901_v46 = vmul.f32 %v3885_v22, %v14174_v49  ;;  %v5144_v21 = vmul.f32 1.442695, %v14171_v30 }
 0x4ba   : > { %4290 = vperm.xlu2 %8961, %v14089_v16   ;;  %v14226_v53 = vpop.permute.xlu1 %5411  ;;  %v4408_v22 = vmul.f32 %v4392_v34, %v14146_v19  ;;  %v4589_v19 = vmin.f32 %v4573_v9, 0.0  ;;  %v14268_v9 = vpop.f32.mrf.mxu1 }
 0x4bb   : > { %18477 = vst [vmem:[#allocation25_spill] sm:$0xff] %v14226_v53  ;;  %8980 = vset.pattern.permute.xlu0 %v18459_v18  ;;  %5172 = vrot.lane.b32.xlu1 %v14089_v16, %s9840_s18  ;;  %v14231_v31 = vpop.permute.xlu0 %5168  ;;  %v3915_v62 = vpack.c.bf16 %v3901_v46, %v3900_v28  ;;  %v14241_v16 = vpop.f32.mrf.mxu3  ;;  %9376 = vpow2.f32 %v5144_v21 }
 0x4bc   : > { %18478 = vst [vmem:[#allocation8_spill] sm:$0xff] %v14231_v31  ;;  %5435 = vperm.xlu0 %8980, %v14209_v57   ;;  %v14234_v43 = vpop.permute.xlu2 %3759  ;;  %8964 = vset.pattern.permute.xlu1 %v18450_v8  ;;  %v4610_v34 = vmul.f32 1.442695, %v4589_v19 }
 0x4bd   : > { %3983 = vmatmul.bf16.gmra.mxu2 %v3915_v62 }
 0x4be   : > { %9378 = vpow2.f32 %v4610_v34 }
 0x4bf   : > { %v9375_v41 = vpop.eup %9374 }
 0x4c0   : > { %v4393_v17 = vmul.f32 %v9375_v41, %v14167_v45 }
 0x4c2   : > { %8968 = vset.pattern.permute.xlu2 %v18450_v8  ;;  %v4409_v28 = vmul.f32 %v4393_v17, %v14174_v49  ;;  %v14254_v49 = vpop.eup %9376 }
 0x4c3   : > { %5363 = vperm.xlu1 %8964, %v14102_v29   ;;  %4052 = vperm.xlu2 %8968, %v14117_v39   ;;  %v4037_v46 = vpop.permute.xlu1 %4036  ;;  %v14247_v62 = vpop.permute.xlu0 %5419 }
 0x4c4   : > { %18479 = vst [vmem:[#allocation32_spill] sm:$0xff] %v14247_v62  ;;  %8983 = vset.pattern.permute.xlu0 %v18450_v8  ;;  %v4423_v45 = vpack.c.bf16 %v4409_v28, %v4408_v22  ;;  %v4088_v17 = vsub.f32 %v4037_v46, %v14058_v44  ;;  %v9379_v46 = vpop.eup %9378  ;;  %v14283_v62 = vpop.f32.mrf.mxu1 }
 0x4c5   : > { %4060 = vperm.xlu0 %8983, %v14241_v16  }
 0x4c6   : > { %v14252_v25 = vpop.permute.xlu2 %4278  ;;  %4467 = vmatmul.bf16.gmra.mxu0 %v4423_v45  ;;  %v4104_v45 = vmin.f32 %v4088_v17, 0.0 }
 0x4cb   : > { %8965 = vset.pattern.permute.xlu1 %v18459_v18  ;;  %8971 = vset.pattern.permute.xlu2 %v18462_v38 }
 0x4cc   : > { %5427 = vperm.xlu1 %8965, %v14102_v29   ;;  %5295 = vperm.xlu2 %8971, %v14144_v26   ;;  %v14261_v52 = vpop.permute.xlu0 %3769 }
 0x4cd   : > { %8985 = vset.pattern.permute.xlu0 %v18462_v38  ;;  %v4521_v41 = vpop.permute.xlu1 %4520 }
 0x4ce   : > { %v4572_v21 = vsub.f32 %v4521_v41, %v14032_v13  ;;  %5305 = vperm.xlu0 %8985, %v14254_v49   ;;  %v4124_v41 = vmul.f32 1.442695, %v4104_v45 }
 0x4cf   : > { %v14266_v22 = vpop.permute.xlu2 %5351 }
 0x4d0   : > { %18480 = vst [vmem:[#allocation16_spill] sm:$0xff] %v14266_v22  ;;  %v4588_v28 = vmin.f32 %v4572_v21, 0.0 }
 0x4d2   : > { %v4608_v19 = vmul.f32 1.442695, %v4588_v28  ;;  %v4637_v28 = vmul.f32 %v9379_v46, %v13869_v7 }
 0x4d4   : > { %9380 = vpow2.f32 %v4608_v19  ;;  %8966 = vset.pattern.permute.xlu1 %v18449_v4  ;;  %8972 = vset.pattern.permute.xlu2 %v18450_v8 }
 0x4d5   : > { %v14272_v31 = vpop.permute.xlu1 %5166  ;;  %5491 = vperm.xlu1 %8966, %v14102_v29   ;;  %5367 = vperm.xlu2 %8972, %v14144_v26   ;;  %v14277_v34 = vpop.permute.xlu0 %4286  ;;  %9382 = vpow2.f32 %v4124_v41 }
 0x4d6   : > { %18481 = vst [vmem:[#allocation29_spill] sm:$0xff] %v14272_v31  ;;  %8986 = vset.pattern.permute.xlu0 %v18450_v8 }
 0x4d7   : > { %5375 = vperm.xlu0 %8986, %v14254_v49   ;;  %v4041_v17 = vpop.permute.xlu2 %4040 }
 0x4d8   : > { %v4089_v21 = vsub.f32 %v4041_v17, %v14058_v44  ;;  %v4653_v17 = vmul.f32 %v4637_v28, %v14283_v62  ;;  %v14300_v28 = vpop.f32.mrf.mxu3 }
 0x4da   : > { %v9381_v19 = vpop.eup %9380  ;;  %v4105_v31 = vmin.f32 %v4089_v21, 0.0 }
 0x4db   : > { %v4636_v29 = vmul.f32 %v9381_v19, %v13866_v58  ;;  %v9383_v41 = vpop.eup %9382 }
 0x4dc   : > { %v4126_v48 = vmul.f32 1.442695, %v4105_v31  ;;  %v4152_v19 = vmul.f32 %v9383_v41, %v13866_v58 }
 0x4dd   : > { %v14285_v45 = vpop.permute.xlu1 %5275  ;;  %8967 = vset.pattern.permute.xlu1 %v18462_v38  ;;  %8973 = vset.pattern.permute.xlu2 %v18459_v18  ;;  %v4652_v53 = vmul.f32 %v4636_v29, %v14268_v9 }
 0x4de   : > { %18482 = vst [vmem:[#allocation62_spill] sm:$0xff] %v14285_v45  ;;  %9384 = vpow2.f32 %v4126_v48  ;;  %5431 = vperm.xlu2 %8973, %v14144_v26   ;;  %3779 = vperm.xlu1 %8967, %v14117_v39   ;;  %v14294_v46 = vpop.permute.xlu0 %5487  ;;  %v3822_v48 = vsub.f32 %v14234_v43, %v14043_v55  ;;  %v5256_v45 = vld [vmem:[#allocation2] sm:$0xff] }
 0x4df   : > { %8987 = vset.pattern.permute.xlu0 %v18449_v4  ;;  %18483 = vst [vmem:[#allocation22_spill] sm:$0xff] %v14294_v46  ;;  %v4666_v31 = vpack.c.bf16 %v4653_v17, %v4652_v53  ;;  %v4168_v53 = vmul.f32 %v4152_v19, %v14268_v9  ;;  %v4330_v46 = vsub.f32 %v14252_v25, %v14062_v61 }
 0x4e0   : > { %5503 = vperm.xlu0 %8987, %v14254_v49   ;;  %v14297_v21 = vpop.permute.xlu2 %5280 }
 0x4e1   : > { %18484 = vst [vmem:[#allocation60_spill] sm:$0xff] %v14297_v21  ;;  %4714 = vmatmul.bf16.gmra.mxu1 %v4666_v31 }
 0x4e4   : > { %v9385_v29 = vpop.eup %9384 }
 0x4e5   : > { %v4153_v26 = vmul.f32 %v9385_v29, %v13869_v7  ;;  %v3838_v29 = vmin.f32 %v3822_v48, 0.0 }
 0x4e6   : > { %v14305_v2 = vpop.permute.xlu1 %5479  ;;  %8977 = vset.pattern.permute.xlu2 %v18449_v4  ;;  %8969 = vset.pattern.permute.xlu1 %v18459_v18 }
 0x4e7   : > { %18485 = vst [vmem:[#allocation17_spill] sm:$0xff] %v14305_v2  ;;  %4294 = vperm.xlu1 %8969, %v14117_v39   ;;  %4540 = vperm.xlu2 %8977, %v14171_v30   ;;  %v4169_v17 = vmul.f32 %v4153_v26, %v14283_v62  ;;  %v3858_v21 = vmul.f32 1.442695, %v3838_v29  ;;  %v14333_v29 = vpop.f32.mrf.mxu3 }
 0x4e8   : > { %4548 = vperm.xlu0 %8987, %v14300_v28   ;;  %v14314_v31 = vpop.permute.xlu0 %4048 }
 0x4e9   : > { %v14316_v41 = vpop.permute.xlu2 %4528  ;;  %v4182_v43 = vpack.c.bf16 %v4169_v17, %v4168_v53  ;;  %9386 = vpow2.f32 %v3858_v21  ;;  %v4346_v53 = vmin.f32 %v4330_v46, 0.0 }
 0x4eb   : > { %4230 = vmatmul.bf16.gmra.mxu3 %v4182_v43  ;;  %v4366_v43 = vmul.f32 1.442695, %v4346_v53 }
 0x4ef   : > { %v3765_v39 = vpop.permute.xlu1 %3764  ;;  %8975 = vset.pattern.permute.xlu1 %v18450_v8  ;;  %5176 = vrot.lane.b32.xlu2 %v14171_v30, %s9840_s18 }
 0x4f0   : > { %v3823_v19 = vsub.f32 %v3765_v39, %v14043_v55  ;;  %5180 = vrot.lane.b32.xlu0 %v14300_v28, %s9840_s18  ;;  %4056 = vperm.xlu1 %8975, %v14171_v30   ;;  %v9387_v39 = vpop.eup %9386 }
 0x4f1   : > { %v14327_v26 = vpop.permute.xlu2 %5170  ;;  %v14329_v48 = vpop.permute.xlu0 %5290  ;;  %8982 = vset.pattern.permute.xlu2 %v18462_v38  ;;  %8995 = vset.pattern.permute.xlu0 %v18462_v38 }
 0x4f2   : > { %18486 = vst [vmem:[#allocation11_spill] sm:$0xff] %v14327_v26  ;;  %v3839_v25 = vmin.f32 %v3823_v19, 0.0 }
 0x4f3   : > { %18487 = vst [vmem:[#allocation69_spill] sm:$0xff] %v14329_v48 }
 0x4f4   : > { %v3860_v17 = vmul.f32 1.442695, %v3839_v25  ;;  %v3886_v25 = vmul.f32 %v9387_v39, %v13866_v58 }
 0x4f6   : > { %9388 = vpow2.f32 %v3860_v17  ;;  %v5148_v17 = vmul.f32 1.442695, %v14300_v28 }
 0x4f7   : > { %3789 = vperm.xlu2 %8982, %v14241_v16   ;;  %9390 = vpow2.f32 %v4366_v43 }
 0x4f8   : > { %3799 = vperm.xlu0 %8995, %v14333_v29   ;;  %v4283_v30 = vpop.permute.xlu1 %4282  ;;  %8978 = vset.pattern.permute.xlu1 %v18462_v38 }
 0x4f9   : > { %v4331_v26 = vsub.f32 %v4283_v30, %v14062_v61  ;;  %5300 = vperm.xlu1 %8978, %v14209_v57   ;;  %v14340_v21 = vpop.permute.xlu2 %5359  ;;  %v3902_v30 = vmul.f32 %v3886_v25, %v14268_v9 }
 0x4fa   : > { %18488 = vst [vmem:[#allocation34_spill] sm:$0xff] %v14340_v21  ;;  %v14342_v46 = vpop.permute.xlu0 %4536 }
 0x4fb   : > { %v4347_v19 = vmin.f32 %v4331_v26, 0.0 }
 0x4fc   : > { %v9389_v53 = vpop.eup %9388 }
 0x4fd   : > { %v4368_v48 = vmul.f32 1.442695, %v4347_v19  ;;  %v3887_v36 = vmul.f32 %v9389_v53, %v13869_v7  ;;  %v9391_v26 = vpop.eup %9390 }
 0x4ff   : > { %9392 = vpow2.f32 %v4368_v48  ;;  %8984 = vset.pattern.permute.xlu2 %v18459_v18  ;;  %v3903_v2 = vmul.f32 %v3887_v36, %v14283_v62  ;;  %v3824_v48 = vsub.f32 %v14261_v52, %v14043_v55  ;;  %v4394_v36 = vmul.f32 %v9391_v26, %v13866_v58 }
 0x500   : > { %8997 = vset.pattern.permute.xlu0 %v18459_v18  ;;  %4302 = vperm.xlu2 %8984, %v14241_v16   ;;  %9394 = vpow2.f32 %v5148_v17  ;;  %v4091_v26 = vsub.f32 %v14314_v31, %v14058_v44 }
 0x501   : > { %4310 = vperm.xlu0 %8997, %v14333_v29   ;;  %v14353_v43 = vpop.permute.xlu1 %5355  ;;  %8981 = vset.pattern.permute.xlu1 %v18449_v4  ;;  %v3916_v39 = vpack.c.bf16 %v3903_v2, %v3902_v30  ;;  %v3840_v17 = vmin.f32 %v3824_v48, 0.0  ;;  %v4410_v2 = vmul.f32 %v4394_v36, %v14268_v9  ;;  %v4332_v9 = vsub.f32 %v14277_v34, %v14062_v61  ;;  %v14388_v34 = vpop.f32.mrf.mxu3 }
 0x502   : > { %18489 = vst [vmem:[#allocation83_spill] sm:$0xff] %v14353_v43  ;;  %v14358_v19 = vpop.permute.xlu0 %5174  ;;  %v14360_v25 = vpop.permute.xlu2 %5423  ;;  %5499 = vperm.xlu1 %8981, %v14209_v57   ;;  %v4107_v48 = vmin.f32 %v4091_v26, 0.0  ;;  %v5150_v36 = vmul.f32 1.442695, %v14333_v29  ;;  %v5152_v60 = vmul.f32 1.442695, %v14388_v34 }
 0x503   : > { %18490 = vst [vmem:[#allocation80_spill] sm:$0xff] %v14358_v19  ;;  %3988 = vmatmul.bf16.gmra.mxu2 %v3916_v39  ;;  %v3862_v30 = vmul.f32 1.442695, %v3840_v17  ;;  %v4348_v17 = vmin.f32 %v4332_v9, 0.0 }
 0x504   : > { %18491 = vst [vmem:[#allocation89_spill] sm:$0xff] %v14360_v25  ;;  %v4130_v31 = vmul.f32 1.442695, %v4107_v48 }
 0x505   : > { %v9393_v53 = vpop.eup %9392  ;;  %9396 = vpow2.f32 %v3862_v30  ;;  %v4370_v26 = vmul.f32 1.442695, %v4348_v17 }
 0x506   : > { %v4395_v21 = vmul.f32 %v9393_v53, %v13869_v7  ;;  %v14365_v43 = vpop.eup %9394  ;;  %v14384_v53 = vpop.f32.mrf.mxu1 }
 0x508   : > { %5439 = vperm.xlu2 %8984, %v14254_v49   ;;  %v4411_v52 = vmul.f32 %v4395_v21, %v14283_v62  ;;  %v5146_v21 = vmul.f32 1.442695, %v14241_v16 }
 0x509   : > { %9002 = vset.pattern.permute.xlu0 %v18449_v4 }
 0x50a   : > { %5511 = vperm.xlu0 %9002, %v14365_v43   ;;  %v14372_v57 = vpop.permute.xlu1 %5483  ;;  %4544 = vperm.xlu1 %8981, %v14241_v16   ;;  %v14375_v58 = vpop.permute.xlu0 %5495  ;;  %v4424_v7 = vpack.c.bf16 %v4411_v52, %v4410_v2  ;;  %9398 = vpow2.f32 %v5146_v21 }
 0x50b   : > { %18492 = vst [vmem:[#allocation90_spill] sm:$0xff] %v14372_v57  ;;  %v3775_v49 = vpop.permute.xlu2 %3774 }
 0x50c   : > { %18493 = vst [vmem:[#allocation91_spill] sm:$0xff] %v14375_v58  ;;  %v3825_v62 = vsub.f32 %v3775_v49, %v14043_v55  ;;  %4472 = vmatmul.bf16.gmra.mxu0 %v4424_v7  ;;  %v9397_v7 = vpop.eup %9396 }
 0x50d   : > { %v3888_v48 = vmul.f32 %v9397_v7, %v13863_v56 }
 0x50e   : > { %v3841_v39 = vmin.f32 %v3825_v62, 0.0 }
 0x510   : > { %v3864_v2 = vmul.f32 1.442695, %v3841_v39  ;;  %8989 = vset.pattern.permute.xlu2 %v18450_v8  ;;  %v14399_v39 = vpop.eup %9398 }
 0x511   : > { %4064 = vperm.xlu2 %8989, %v14300_v28  }
 0x512   : > { %9400 = vpow2.f32 %v3864_v2  ;;  %9004 = vset.pattern.permute.xlu0 %v18450_v8  ;;  %5178 = vrot.lane.b32.xlu1 %v14241_v16, %s9840_s18 }
 0x513   : > { %9402 = vpow2.f32 %v5150_v36  ;;  %4072 = vperm.xlu0 %9004, %v14388_v34   ;;  %v14394_v52 = vpop.permute.xlu0 %3784  ;;  %v4045_v30 = vpop.permute.xlu1 %4044  ;;  %8988 = vset.pattern.permute.xlu1 %v18462_v38 }
 0x514   : > { %v4090_v49 = vsub.f32 %v4045_v30, %v14058_v44  ;;  %v4291_v9 = vpop.permute.xlu2 %4290  ;;  %9404 = vpow2.f32 %v4130_v31  ;;  %v14406_v30 = vpop.f32.mrf.mxu1  ;;  %v3904_v31 = vmul.f32 %v3888_v48, %v14384_v53 }
 0x515   : > { %v4333_v62 = vsub.f32 %v4291_v9, %v14062_v61  ;;  %9406 = vpow2.f32 %v4370_v26  ;;  %v4574_v26 = vsub.f32 %v14316_v41, %v14032_v13 }
 0x516   : > { %v4106_v21 = vmin.f32 %v4090_v49, 0.0 }
 0x517   : > { %v4349_v16 = vmin.f32 %v4333_v62, 0.0 }
 0x518   : > { %v9401_v36 = vpop.eup %9400  ;;  %v4128_v2 = vmul.f32 1.442695, %v4106_v21 }
 0x519   : > { %v14402_v19 = vpop.eup %9402  ;;  %v4372_v58 = vmul.f32 1.442695, %v4349_v16  ;;  %8991 = vset.pattern.permute.xlu2 %v18462_v38  ;;  %v3889_v17 = vmul.f32 %v9401_v36, %v13852_v11 }
 0x51a   : > { %5310 = vperm.xlu2 %8991, %v14399_v39   ;;  %3794 = vperm.xlu1 %8988, %v14300_v28   ;;  %9408 = vpow2.f32 %v4128_v2  ;;  %v9405_v9 = vpop.eup %9404  ;;  %v4590_v2 = vmin.f32 %v4574_v26, 0.0  ;;  %v14430_v26 = vpop.f32.mrf.mxu3 }
 0x51b   : > { %9007 = vset.pattern.permute.xlu0 %v18462_v38  ;;  %v3905_v7 = vmul.f32 %v3889_v17, %v14406_v30  ;;  %9410 = vpow2.f32 %v4372_v58  ;;  %v9407_v36 = vpop.eup %9406  ;;  %v4155_v48 = vmul.f32 %v9405_v9, %v13852_v11 }
 0x51c   : > { %5320 = vperm.xlu0 %9007, %v14402_v19   ;;  %v14416_v49 = vpop.permute.xlu1 %5285  ;;  %v14418_v62 = vpop.permute.xlu0 %4298  ;;  %v4396_v57 = vmul.f32 %v9407_v36, %v13863_v56 }
 0x51d   : > { %18494 = vst [vmem:[#allocation92_spill] sm:$0xff] %v14416_v49  ;;  %v14420_v21 = vpop.permute.xlu2 %4052  ;;  %v3917_v16 = vpack.c.bf16 %v3905_v7, %v3904_v31  ;;  %v4612_v7 = vmul.f32 1.442695, %v4590_v2 }
 0x51f   : > { %3993 = vmatmul.bf16.gmra.mxu2 %v3917_v16  ;;  %v4171_v16 = vmul.f32 %v4155_v48, %v14406_v30  ;;  %9412 = vpow2.f32 %v4612_v7 }
 0x520   : > { %v9409_v17 = vpop.eup %9408  ;;  %9414 = vpow2.f32 %v5152_v60 }
 0x521   : > { %v9411_v41 = vpop.eup %9410  ;;  %v4154_v58 = vmul.f32 %v9409_v17, %v13863_v56 }
 0x522   : > { %8998 = vset.pattern.permute.xlu2 %v18449_v4  ;;  %8990 = vset.pattern.permute.xlu1 %v18459_v18  ;;  %v4397_v31 = vmul.f32 %v9411_v41, %v13852_v11 }
 0x523   : > { %4306 = vperm.xlu1 %8990, %v14300_v28   ;;  %4552 = vperm.xlu2 %8998, %v14333_v29   ;;  %v4170_v9 = vmul.f32 %v4154_v58, %v14384_v53  ;;  %v4412_v28 = vmul.f32 %v4396_v57, %v14384_v53 }
 0x524   : > { %9011 = vset.pattern.permute.xlu0 %v18449_v4  ;;  %v4413_v17 = vmul.f32 %v4397_v31, %v14406_v30 }
 0x525   : > { %4560 = vperm.xlu0 %9011, %v14430_v26   ;;  %v4533_v36 = vpop.permute.xlu1 %4532  ;;  %v14436_v25 = vpop.permute.xlu0 %5371  ;;  %v4183_v2 = vpack.c.bf16 %v4171_v16, %v4170_v9 }
 0x526   : > { %18495 = vst [vmem:[#allocation93_spill] sm:$0xff] %v14436_v25  ;;  %v4575_v41 = vsub.f32 %v4533_v36, %v14032_v13  ;;  %v14441_v49 = vpop.permute.xlu2 %5295  ;;  %v4425_v32 = vpack.c.bf16 %v4413_v17, %v4412_v28  ;;  %v9413_v31 = vpop.eup %9412 }
 0x527   : > { %18496 = vst [vmem:[#allocation94_spill] sm:$0xff] %v14441_v49  ;;  %4235 = vmatmul.bf16.gmra.mxu3 %v4183_v2  ;;  %v4638_v9 = vmul.f32 %v9413_v31, %v13863_v56  ;;  %v4576_v56 = vsub.f32 %v14342_v46, %v14032_v13  ;;  %v14478_v31 = vpop.f32.mrf.mxu3 }
 0x528   : > { %v4591_v58 = vmin.f32 %v4575_v41, 0.0  ;;  %4477 = vmatmul.bf16.gmra.mxu0 %v4425_v32  ;;  %v14458_v32 = vpop.eup %9414 }
 0x529   : > { %v4654_v17 = vmul.f32 %v4638_v9, %v14384_v53 }
 0x52a   : > { %v4614_v48 = vmul.f32 1.442695, %v4591_v58 }
 0x52b   : > { %8992 = vset.pattern.permute.xlu1 %v18450_v8  ;;  %5182 = vrot.lane.b32.xlu2 %v14333_v29, %s9840_s18 }
 0x52c   : > { %9416 = vpow2.f32 %v4614_v48  ;;  %5379 = vperm.xlu1 %8992, %v14399_v39   ;;  %9003 = vset.pattern.permute.xlu2 %v18462_v38 }
 0x52d   : > { %5186 = vrot.lane.b32.xlu0 %v14430_v26, %s9840_s18  ;;  %v14451_v57 = vpop.permute.xlu1 %5172 }
 0x52e   : > { %18497 = vst [vmem:[#allocation95_spill] sm:$0xff] %v14451_v57  ;;  %v14453_v7 = vpop.permute.xlu0 %5435  ;;  %9013 = vset.pattern.permute.xlu0 %v18450_v8 }
 0x52f   : > { %18498 = vst [vmem:[#allocation96_spill] sm:$0xff] %v14453_v7  ;;  %v14456_v60 = vpop.permute.xlu2 %5367 }
 0x530   : > { %18499 = vst [vmem:[#allocation97_spill] sm:$0xff] %v14456_v60 }
 0x532   : > { %v9417_v16 = vpop.eup %9416 }
 0x533   : > { %3804 = vperm.xlu2 %9003, %v14388_v34   ;;  %v4639_v36 = vmul.f32 %v9417_v16, %v13852_v11  ;;  %v4592_v11 = vmin.f32 %v4576_v56, 0.0 }
 0x534   : > { %8993 = vset.pattern.permute.xlu1 %v18459_v18 }
 0x535   : > { %5391 = vperm.xlu0 %9013, %v14458_v32   ;;  %5443 = vperm.xlu1 %8993, %v14399_v39   ;;  %v14466_v28 = vpop.permute.xlu1 %5363  ;;  %v4655_v41 = vmul.f32 %v4639_v36, %v14406_v30  ;;  %v4616_v46 = vmul.f32 1.442695, %v4592_v11 }
 0x536   : > { %18500 = vst [vmem:[#allocation98_spill] sm:$0xff] %v14466_v28 }
 0x537   : > { %v4667_v2 = vpack.c.bf16 %v4655_v41, %v4654_v17  ;;  %v14472_v58 = vpop.permute.xlu0 %4060  ;;  %9418 = vpow2.f32 %v4616_v46  ;;  %v14490_v17 = vpop.f32.mrf.mxu1 }
 0x538   : > { %v14474_v48 = vpop.permute.xlu2 %5431 }
 0x539   : > { %18501 = vst [vmem:[#allocation99_spill] sm:$0xff] %v14474_v48  ;;  %4719 = vmatmul.bf16.gmra.mxu1 %v4667_v2 }
 0x53b   : > { %9005 = vset.pattern.permute.xlu2 %v18459_v18 }
 0x53c   : > { %4314 = vperm.xlu2 %9005, %v14388_v34  }
 0x53d   : > { %9014 = vset.pattern.permute.xlu0 %v18462_v38  ;;  %8994 = vset.pattern.permute.xlu1 %v18449_v4  ;;  %v9419_v46 = vpop.eup %9418 }
 0x53e   : > { %3814 = vperm.xlu0 %9014, %v14478_v31   ;;  %v14483_v53 = vpop.permute.xlu1 %5427  ;;  %5507 = vperm.xlu1 %8994, %v14399_v39   ;;  %v3827_v39 = vsub.f32 %v14394_v52, %v14043_v55 }
 0x53f   : > { %18502 = vst [vmem:[#allocation100_spill] sm:$0xff] %v14483_v53  ;;  %v14508_v57 = vpop.f32.mrf.mxu1 }
 0x540   : > { %v14486_v30 = vpop.permute.xlu0 %5305 }
 0x541   : > { %18503 = vst [vmem:[#allocation101_spill] sm:$0xff] %v14486_v30  ;;  %v4541_v9 = vpop.permute.xlu2 %4540 }
 0x542   : > { %v4577_v16 = vsub.f32 %v4541_v9, %v14032_v13  ;;  %v5156_v9 = vmul.f32 1.442695, %v14478_v31 }
 0x544   : > { %v4593_v36 = vmin.f32 %v4577_v16, 0.0  ;;  %9008 = vset.pattern.permute.xlu2 %v18450_v8  ;;  %v3843_v16 = vmin.f32 %v3827_v39, 0.0 }
 0x545   : > { %5387 = vperm.xlu2 %9008, %v14402_v19  }
 0x546   : > { %v4618_v41 = vmul.f32 1.442695, %v4593_v36  ;;  %9015 = vset.pattern.permute.xlu0 %v18459_v18  ;;  %8996 = vset.pattern.permute.xlu1 %v18450_v8  ;;  %v4640_v36 = vmul.f32 %v9419_v46, %v13847_v37  ;;  %v3868_v30 = vmul.f32 1.442695, %v3843_v16 }
 0x547   : > { %5451 = vperm.xlu0 %9015, %v14402_v19   ;;  %v14498_v2 = vpop.permute.xlu1 %5491  ;;  %4068 = vperm.xlu1 %8996, %v14333_v29  }
 0x548   : > { %18504 = vst [vmem:[#allocation102_spill] sm:$0xff] %v14498_v2  ;;  %9420 = vpow2.f32 %v4618_v41  ;;  %v4335_v41 = vsub.f32 %v14418_v62, %v14062_v61 }
 0x549   : > { %v14501_v56 = vpop.permute.xlu2 %5176  ;;  %v14503_v11 = vpop.permute.xlu0 %5375  ;;  %9422 = vpow2.f32 %v5156_v9 }
 0x54a   : > { %18505 = vst [vmem:[#allocation103_spill] sm:$0xff] %v14501_v56  ;;  %9424 = vpow2.f32 %v3868_v30  ;;  %v4351_v49 = vmin.f32 %v4335_v41, 0.0 }
 0x54b   : > { %18506 = vst [vmem:[#allocation104_spill] sm:$0xff] %v14503_v11  ;;  %v4656_v11 = vmul.f32 %v4640_v36, %v14490_v17 }
 0x54c   : > { %v4376_v30 = vmul.f32 1.442695, %v4351_v49 }
 0x54d   : > { %4076 = vperm.xlu2 %9008, %v14430_v26  }
 0x54e   : > { %v9421_v52 = vpop.eup %9420 }
 0x54f   : > { %4322 = vperm.xlu0 %9015, %v14478_v31   ;;  %8999 = vset.pattern.permute.xlu1 %v18462_v38  ;;  %v4641_v29 = vmul.f32 %v9421_v52, %v13835_v23  ;;  %v5154_v52 = vmul.f32 1.442695, %v14430_v26  ;;  %v14524_v62 = vpop.eup %9422 }
 0x550   : > { %v3780_v56 = vpop.permute.xlu1 %3779  ;;  %5315 = vperm.xlu1 %8999, %v14365_v43  }
 0x551   : > { %v3826_v39 = vsub.f32 %v3780_v56, %v14043_v55  ;;  %v14517_v46 = vpop.permute.xlu2 %3789  ;;  %v4657_v9 = vmul.f32 %v4641_v29, %v14508_v57  ;;  %v14528_v56 = vpop.f32.mrf.mxu1 }
 0x552   : > { %v14521_v16 = vpop.permute.xlu0 %5503 }
 0x553   : > { %18507 = vst [vmem:[#allocation105_spill] sm:$0xff] %v14521_v16  ;;  %v3842_v48 = vmin.f32 %v3826_v39, 0.0  ;;  %v4668_v7 = vpack.c.bf16 %v4657_v9, %v4656_v11  ;;  %v9425_v11 = vpop.eup %9424 }
 0x554   : > { %v3891_v49 = vmul.f32 %v9425_v11, %v13835_v23 }
 0x555   : > { %v3866_v60 = vmul.f32 1.442695, %v3842_v48  ;;  %9012 = vset.pattern.permute.xlu2 %v18462_v38  ;;  %4724 = vmatmul.bf16.gmra.mxu1 %v4668_v7  ;;  %v4092_v48 = vsub.f32 %v14420_v21, %v14058_v44 }
 0x556   : > { %5325 = vperm.xlu2 %9012, %v14458_v32   ;;  %v3907_v25 = vmul.f32 %v3891_v49, %v14508_v57 }
 0x557   : > { %9426 = vpow2.f32 %v3866_v60  ;;  %9023 = vset.pattern.permute.xlu0 %v18462_v38  ;;  %v4108_v9 = vmin.f32 %v4092_v48, 0.0 }
 0x558   : > { %9428 = vpow2.f32 %v5154_v52  ;;  %9000 = vset.pattern.permute.xlu1 %v18450_v8  ;;  %5335 = vperm.xlu0 %9023, %v14524_v62  }
 0x559   : > { %v4295_v36 = vpop.permute.xlu1 %4294  ;;  %5383 = vperm.xlu1 %9000, %v14365_v43   ;;  %9430 = vpow2.f32 %v4376_v30  ;;  %v14550_v30 = vpop.f32.mrf.mxu1  ;;  %v4132_v11 = vmul.f32 1.442695, %v4108_v9 }
 0x55a   : > { %v4334_v7 = vsub.f32 %v4295_v36, %v14062_v61  ;;  %v14537_v29 = vpop.permute.xlu0 %4548  ;;  %v14539_v60 = vpop.permute.xlu2 %4302 }
 0x55c   : > { %v4350_v41 = vmin.f32 %v4334_v7, 0.0 }
 0x55d   : > { %v9427_v39 = vpop.eup %9426 }
 0x55e   : > { %v14542_v52 = vpop.eup %9428  ;;  %v4374_v16 = vmul.f32 1.442695, %v4350_v41  ;;  %9016 = vset.pattern.permute.xlu2 %v18459_v18  ;;  %v3890_v21 = vmul.f32 %v9427_v39, %v13847_v37 }
 0x55f   : > { %5455 = vperm.xlu2 %9016, %v14458_v32   ;;  %v9431_v48 = vpop.eup %9430 }
 0x560   : > { %9432 = vpow2.f32 %v4374_v16  ;;  %v3906_v36 = vmul.f32 %v3890_v21, %v14490_v17  ;;  %9024 = vset.pattern.permute.xlu0 %v18449_v4  ;;  %v4399_v9 = vmul.f32 %v9431_v48, %v13835_v23 }
 0x561   : > { %9001 = vset.pattern.permute.xlu1 %v18459_v18  ;;  %5523 = vperm.xlu0 %9024, %v14542_v52   ;;  %9434 = vpow2.f32 %v4132_v11 }
 0x562   : > { %v14554_v7 = vpop.permute.xlu0 %5180  ;;  %v4057_v41 = vpop.permute.xlu1 %4056  ;;  %5447 = vperm.xlu1 %9001, %v14365_v43   ;;  %v3918_v16 = vpack.c.bf16 %v3907_v25, %v3906_v36  ;;  %v4094_v43 = vsub.f32 %v14472_v58, %v14058_v44  ;;  %v4415_v36 = vmul.f32 %v4399_v9, %v14508_v57  ;;  %v5120_v9 = vrot.slane %v13210_v27, 4 }
 0x563   : > { %v4093_v39 = vsub.f32 %v4057_v41, %v14058_v44  ;;  %v14558_v21 = vpop.permute.xlu2 %5439 }
 0x564   : > { %18508 = vst [vmem:[#allocation106_spill] sm:$0xff] %v14558_v21  ;;  %3998 = vmatmul.bf16.gmra.mxu2 %v3918_v16  ;;  %v14575_v16 = vpop.f32.mrf.mxu1 }
 0x565   : > { %v4109_v49 = vmin.f32 %v4093_v39, 0.0 }
 0x566   : > { %v9433_v2 = vpop.eup %9432 }
 0x567   : > { %v4134_v53 = vmul.f32 1.442695, %v4109_v49  ;;  %9017 = vset.pattern.permute.xlu2 %v18449_v4  ;;  %v4398_v28 = vmul.f32 %v9433_v2, %v13847_v37  ;;  %v9435_v48 = vpop.eup %9434 }
 0x568   : > { %5515 = vperm.xlu2 %9017, %v14402_v19   ;;  %v4156_v39 = vmul.f32 %v9435_v48, %v13847_v37 }
 0x569   : > { %9436 = vpow2.f32 %v4134_v53  ;;  %v4414_v25 = vmul.f32 %v4398_v28, %v14490_v17  ;;  %9038 = vset.pattern.permute.xlu0 %v17913_v15  ;;  %v4110_v28 = vmin.f32 %v4094_v43, 0.0  ;;  %v4579_v43 = vsub.f32 %v14537_v29, %v14032_v13 }
 0x56a   : > { %v14569_v11 = vpop.permute.xlu0 %3799  ;;  %9006 = vset.pattern.permute.xlu1 %v18449_v4 }
 0x56b   : > { %v14572_v41 = vpop.permute.xlu1 %5300  ;;  %v4065_v2 = vpop.permute.xlu2 %4064  ;;  %4556 = vperm.xlu1 %9006, %v14388_v34   ;;  %v4426_v19 = vpack.c.bf16 %v4415_v36, %v4414_v25  ;;  %v4136_v20 = vmul.f32 1.442695, %v4110_v28  ;;  %v4172_v25 = vmul.f32 %v4156_v39, %v14490_v17  ;;  %v4595_v17 = vmin.f32 %v4579_v43, 0.0 }
 0x56c   : > { %18509 = vst [vmem:[#allocation107_spill] sm:$0xff] %v14572_v41  ;;  %v4095_v58 = vsub.f32 %v4065_v2, %v14058_v44  ;;  %v5121_v2 = vadd.f32 %v5120_v9, %v13210_v27 }
 0x56d   : > { %4482 = vmatmul.bf16.gmra.mxu0 %v4426_v19 }
 0x56e   : > { %v4111_v53 = vmin.f32 %v4095_v58, 0.0  ;;  %v5122_v27 = vrot.slane %v5121_v2, 2  ;;  %v4622_v58 = vmul.f32 1.442695, %v4595_v17  ;;  %v3828_v17 = vsub.f32 %v14517_v46, %v14043_v55 }
 0x56f   : > { %v9437_v49 = vpop.eup %9436 }
 0x570   : > { %v4138_v21 = vmul.f32 1.442695, %v4111_v53  ;;  %4564 = vperm.xlu2 %9017, %v14478_v31   ;;  %v4157_v41 = vmul.f32 %v9437_v49, %v13835_v23 }
 0x572   : > { %v4173_v36 = vmul.f32 %v4157_v41, %v14508_v57  ;;  %9438 = vpow2.f32 %v4138_v21  ;;  %v14596_v57 = vpop.f32.mrf.mxu1  ;;  %v5123_v21 = vadd.f32 %v5122_v27, %v5121_v2  ;;  %v14605_v41 = vsel %vm2895_vm11, 1.0, %v18461_v42  ;;  %vm18555_vm11 = vmmov %vm18518_vm7 }
 0x573   : > { %v14587_v37 = vpop.permute.xlu0 %4310  ;;  %5184 = vrot.lane.b32.xlu1 %v14388_v34, %s9840_s18  ;;  %9440 = vpow2.f32 %v4136_v20  ;;  %v14611_v20 = vsel %vm2894_vm1, 1.0, %v18461_v42  ;;  %vm18556_vm1 = vmmov %vm18519_vm10 }
 0x574   : > { %v14591_v48 = vpop.permute.xlu1 %5499  ;;  %v14593_v19 = vpop.permute.xlu2 %5310  ;;  %v4184_v23 = vpack.c.bf16 %v4173_v36, %v4172_v25  ;;  %9009 = vset.pattern.permute.xlu1 %v18462_v38  ;;  %v5124_v25 = vrot.slane %v5123_v21, 1  ;;  %9442 = vpow2.f32 %v4622_v58  ;;  %vm18575_vm9 = vmmov %vm18556_vm1 }
 0x575   : > { %18510 = vst [vmem:[#allocation108_spill] sm:$0xff] %v14591_v48 }
 0x576   : > { %18511 = vst [vmem:[#allocation109_spill] sm:$0xff] %v14593_v19  ;;  %4240 = vmatmul.bf16.gmra.mxu3 %v4184_v23  ;;  %v14626_v27 = vadd.f32 %v5124_v25, %v5123_v21  ;;  %v3844_v21 = vmin.f32 %v3828_v17, 0.0 }
 0x578   : > { %5188 = vrot.lane.b32.xlu2 %v14478_v31, %s9840_s18  ;;  %v9439_v29 = vpop.eup %9438  ;;  %18513 = vst [vmem:[#allocation111_spill] sm:$0xff] %v14626_v27 }
 0x579   : > { %9026 = vset.pattern.permute.xlu2 %v18459_v18  ;;  %v9441_v34 = vpop.eup %9440  ;;  %v4159_v39 = vmul.f32 %v9439_v29, %v14605_v41 }
 0x57a   : > { %v4158_v14 = vmul.f32 %v9441_v34, %v14611_v20  ;;  %v14621_v12 = vpop.f32.mrf.mxu1  ;;  %v9443_v58 = vpop.eup %9442 }
 0x57b   : > { %3809 = vperm.xlu1 %9009, %v14430_v26   ;;  %v4175_v2 = vmul.f32 %v4159_v39, %v14550_v30  ;;  %v4643_v46 = vmul.f32 %v9443_v58, %v14605_v41 }
 0x57c   : > { %v4545_v28 = vpop.permute.xlu1 %4544  ;;  %v14614_v53 = vpop.permute.xlu0 %5511  ;;  %v4174_v23 = vmul.f32 %v4158_v14, %v14528_v56 }
 0x57d   : > { %18512 = vst [vmem:[#allocation110_spill] sm:$0xff] %v14614_v53  ;;  %v4578_v49 = vsub.f32 %v4545_v28, %v14032_v13  ;;  %v14618_v9 = vpop.permute.xlu2 %4552 }
 0x57e   : > { %v4185_v34 = vpack.c.bf16 %v4175_v2, %v4174_v23  ;;  %v3870_v23 = vmul.f32 1.442695, %v3844_v21 }
 0x57f   : > { %v4594_v36 = vmin.f32 %v4578_v49, 0.0 }
 0x580   : > { %5463 = vperm.xlu2 %9026, %v14524_v62  }
 0x581   : > { %v4620_v43 = vmul.f32 1.442695, %v4594_v36 }
 0x583   : > { %9444 = vpow2.f32 %v4620_v43  ;;  %9010 = vset.pattern.permute.xlu1 %v18459_v18 }
 0x584   : > { %v5179_v29 = vpop.permute.xlu1 %5178  ;;  %4318 = vperm.xlu1 %9010, %v14430_v26   ;;  %v14638_v26 = vpop.f32.mrf.mxu1 }
 0x585   : > { %v5216_v28 = vsub.f32 %v14626_v27, %v5179_v29  ;;  %v5183_v39 = vpop.permute.xlu2 %5182  ;;  %v14633_v49 = vpop.permute.xlu0 %4072  ;;  %v4336_v29 = vsub.f32 %v14539_v60, %v14062_v61 }
 0x586   : > { %v5218_v14 = vsub.f32 %v14626_v27, %v5183_v39  ;;  %4245 = vmatmul.bf16.gmra.mxu3 %v4185_v34  ;;  %v4659_v34 = vmul.f32 %v4643_v46, %v14550_v30 }
 0x587   : > { %v5242_v25 = vmul.f32 1.442695, %v5216_v28  ;;  %v4352_v53 = vmin.f32 %v4336_v29, 0.0 }
 0x588   : > { %v5246_v36 = vmul.f32 1.442695, %v5218_v14  ;;  %9028 = vset.pattern.permute.xlu2 %v18191_v63 }
 0x589   : > { %v9445_v43 = vpop.eup %9444  ;;  %9446 = vpow2.f32 %v5242_v25 }
 0x58a   : > { %9448 = vpow2.f32 %v5246_v36  ;;  %v4642_v2 = vmul.f32 %v9445_v43, %v14611_v20  ;;  %v14654_v43 = vpop.f32.mrf.mxu0 }
 0x58b   : > { %9450 = vpow2.f32 %v3870_v23  ;;  %v5217_v23 = vsub.f32 %v14626_v27, %v14554_v7  ;;  %v5257_v7 = vld [vmem:[#allocation2 + $0x8] sm:$0xff] }
 0x58c   : > { %v3795_v39 = vpop.permute.xlu1 %3794  ;;  %9018 = vset.pattern.permute.xlu1 %v18449_v4  ;;  %v4658_v17 = vmul.f32 %v4642_v2, %v14528_v56 }
 0x58d   : > { %v3829_v58 = vsub.f32 %v3795_v39, %v14043_v55  ;;  %5519 = vperm.xlu1 %9018, %v14458_v32   ;;  %v3805_v28 = vpop.permute.xlu2 %3804  ;;  %v4705_v32 = vpop.f32.mrf.mxu1 }
 0x58e   : > { %v14648_v14 = vpop.permute.xlu0 %5320  ;;  %v4669_v25 = vpack.c.bf16 %v4659_v34, %v4658_v17  ;;  %v3831_v2 = vsub.f32 %v3805_v28, %v14043_v55  ;;  %v14659_v39 = vpop.f32.mrf.mxu3  ;;  %v3830_v17 = vsub.f32 %v14569_v11, %v14043_v55  ;;  %v4378_v34 = vmul.f32 1.442695, %v4352_v53 }
 0x58f   : > { %v14650_v36 = vpop.eup %9446  ;;  %v3845_v21 = vmin.f32 %v3829_v58, 0.0 }
 0x590   : > { %v14652_v60 = vpop.eup %9448  ;;  %5712 = vperm.xlu2 %9028, %v14650_v36   ;;  %4729 = vmatmul.bf16.gmra.mxu1 %v4669_v25  ;;  %v3847_v58 = vmin.f32 %v3831_v2, 0.0  ;;  %v5244_v25 = vmul.f32 1.442695, %v5217_v23 }
 0x591   : > { %v3872_v46 = vmul.f32 1.442695, %v3845_v21  ;;  %5917 = vperm.xlu0 %9038, %v14652_v60   ;;  %v9451_v29 = vpop.eup %9450  ;;  %v3846_v21 = vmin.f32 %v3830_v17, 0.0 }
 0x592   : > { %v3892_v53 = vmul.f32 %v9451_v29, %v14611_v20  ;;  %v3876_v5 = vmul.f32 1.442695, %v3847_v58 }
 0x593   : > { %9452 = vpow2.f32 %v3872_v46  ;;  %v5578_v46 = vpack.c.bf16 %v5257_v7, %v5256_v45  ;;  %v3874_v17 = vmul.f32 1.442695, %v3846_v21 }
 0x594   : > { %9454 = vpow2.f32 %v4378_v34  ;;  %v3908_v45 = vmul.f32 %v3892_v53, %v14528_v56 }
 0x595   : > { %v4307_v19 = vpop.permute.xlu1 %4306  ;;  %9019 = vset.pattern.permute.xlu1 %v18450_v8  ;;  %5586 = vmatpush.bf16.msra.mxu2 %v5578_v46  ;;  %9456 = vpow2.f32 %v5244_v25 }
 0x596   : > { %v4337_v28 = vsub.f32 %v4307_v19, %v14062_v61  ;;  %4080 = vperm.xlu1 %9019, %v14478_v31   ;;  %v4315_v11 = vpop.permute.xlu2 %4314  ;;  %v4465_v31 = vpop.f32.mrf.mxu0 }
 0x597   : > { %v14668_v48 = vpop.permute.xlu0 %4560  ;;  %v4339_v34 = vsub.f32 %v4315_v11, %v14062_v61  ;;  %v14678_v33 = vpop.f32.mrf.mxu3 }
 0x598   : > { %v4353_v22 = vmin.f32 %v4337_v28, 0.0  ;;  %9029 = vset.pattern.permute.xlu2 %v18031_v6  ;;  %v14676_v28 = vpop.f32.mrf.mxu1 }
 0x599   : > { %v9453_v2 = vpop.eup %9452  ;;  %5781 = vperm.xlu2 %9029, %v14650_v36   ;;  %4889 = vrot.lane.b32.xlu0 %v4705_v32, %s9844_s26  ;;  %v4338_v32 = vsub.f32 %v14587_v37, %v14062_v61  ;;  %v4355_v21 = vmin.f32 %v4339_v34, 0.0 }
 0x59a   : > { %v4380_v19 = vmul.f32 1.442695, %v4353_v22  ;;  %v3893_v23 = vmul.f32 %v9453_v2, %v14605_v41  ;;  %v9455_v22 = vpop.eup %9454 }
 0x59b   : > { %v14690_v11 = vpop.eup %9456  ;;  %v4354_v53 = vmin.f32 %v4338_v32, 0.0  ;;  %v4384_v2 = vmul.f32 1.442695, %v4355_v21 }
 0x59c   : > { %9458 = vpow2.f32 %v4380_v19  ;;  %v3909_v29 = vmul.f32 %v3893_v23, %v14550_v30  ;;  %18514 = vst [vmem:[#allocation112_spill] sm:$0xff] %v14690_v11  ;;  %v14703_v23 = vsel %vm2897_vm3, 1.0, %v18461_v42 }
 0x59d   : > { %9460 = vpow2.f32 %v3876_v5  ;;  %v4400_v5 = vmul.f32 %v9455_v22, %v14611_v20  ;;  %v14711_v20 = vsel %vm2896_vm8, 1.0, %v18461_v42 }
 0x59e   : > { %v14684_v58 = vpop.permute.xlu1 %5379  ;;  %9020 = vset.pattern.permute.xlu1 %v18462_v38  ;;  %v3919_v25 = vpack.c.bf16 %v3909_v29, %v3908_v45  ;;  %9462 = vpow2.f32 %v3874_v17  ;;  %v14695_v46 = vpop.f32.mrf.mxu0  ;;  %v4382_v45 = vmul.f32 1.442695, %v4354_v53 }
 0x59f   : > { %v14687_v7 = vpop.permute.xlu0 %5186  ;;  %5330 = vperm.xlu1 %9020, %v14542_v52   ;;  %v4226_v17 = vpop.f32.mrf.mxu3  ;;  %v4416_v29 = vmul.f32 %v4400_v5, %v14528_v56  ;;  %9464 = vpow2.f32 %v4384_v2 }
 0x5a0   : > { %4003 = vmatmul.bf16.gmra.mxu2 %v3919_v25  ;;  %v14705_v34 = vpop.f32.mrf.mxu1  ;;  %9466 = vpow2.f32 %v4382_v45 }
 0x5a1   : > { %9033 = vset.pattern.permute.xlu2 %v17932_v40  ;;  %4827 = vrot.lane.b32.xlu0 %v4465_v31, %s9847_s0 }
 0x5a2   : > { %v9459_v37 = vpop.eup %9458  ;;  %5849 = vperm.xlu2 %9033, %v14690_v11  }
 0x5a3   : > { %v9461_v38 = vpop.eup %9460  ;;  %v4401_v19 = vmul.f32 %v9459_v37, %v14605_v41 }
 0x5a4   : > { %v9463_v31 = vpop.eup %9462  ;;  %v3895_v32 = vmul.f32 %v9461_v38, %v14703_v23 }
 0x5a5   : > { %v4417_v41 = vmul.f32 %v4401_v19, %v14550_v30  ;;  %v3894_v3 = vmul.f32 %v9463_v31, %v14711_v20  ;;  %v9465_v53 = vpop.eup %9464  ;;  %v5388_v19 = vpop.permute.xlu2 %5387 }
 0x5a6   : > { %v3911_v56 = vmul.f32 %v3895_v32, %v14596_v57  ;;  %v14727_v30 = vpop.f32.mrf.mxu0  ;;  %v9467_v2 = vpop.eup %9466 }
 0x5a7   : > { %v14716_v0 = vpop.permute.xlu1 %5443  ;;  %9021 = vset.pattern.permute.xlu1 %v18450_v8  ;;  %v4427_v22 = vpack.c.bf16 %v4417_v41, %v4416_v29  ;;  %v14719_v25 = vpop.permute.xlu0 %5391  ;;  %v3910_v21 = vmul.f32 %v3894_v3, %v14575_v16  ;;  %v4403_v29 = vmul.f32 %v9465_v53, %v14703_v23  ;;  %v4402_v41 = vmul.f32 %v9467_v2, %v14711_v20 }
 0x5a8   : > { %18515 = vst [vmem:[#allocation113_spill] sm:$0xff] %v14716_v0  ;;  %5395 = vperm.xlu1 %9021, %v14542_v52   ;;  %v14730_v5 = vpop.f32.mrf.mxu3  ;;  %v4712_v37 = vpop.f32.mrf.mxu1  ;;  %v5542_v53 = vsel %vm18518_vm7, %v14648_v14, %v5388_v19 }
 0x5a9   : > { %18516 = vst [vmem:[#allocation114_spill] sm:$0xff] %v14719_v25  ;;  %4765 = vrot.lane.b32.xlu0 %v4226_v17, %s9840_s18  ;;  %4487 = vmatmul.bf16.gmra.mxu0 %v4427_v22  ;;  %v3920_v38 = vpack.c.bf16 %v3911_v56, %v3910_v21  ;;  %v4097_v17 = vsub.f32 %v14633_v49, %v14058_v44 }
 0x5aa   : > { %9034 = vset.pattern.permute.xlu2 %v17913_v15  ;;  %v4419_v49 = vmul.f32 %v4403_v29, %v14596_v57  ;;  %v4418_v56 = vmul.f32 %v4402_v41, %v14575_v16 }
 0x5ab   : > { %5913 = vperm.xlu2 %9034, %v14690_v11   ;;  %v4113_v32 = vmin.f32 %v4097_v17, 0.0 }
 0x5ad   : > { %v4142_v21 = vmul.f32 1.442695, %v4113_v32  ;;  %v14755_v2 = vpop.permute.xlu2 %4076 }
 0x5ae   : > { %v4473_v22 = vpop.f32.mrf.mxu0 }
 0x5af   : > { %9468 = vpow2.f32 %v4142_v21 }
 0x5b0   : > { %v14734_v31 = vpop.permute.xlu0 %3814  ;;  %v14736_v45 = vpop.permute.xlu1 %5507  ;;  %9022 = vset.pattern.permute.xlu1 %v18459_v18  ;;  %4008 = vmatmul.bf16.gmra.mxu2 %v3920_v38 }
 0x5b1   : > { %18517 = vst [vmem:[#allocation115_spill] sm:$0xff] %v14736_v45  ;;  %5459 = vperm.xlu1 %9022, %v14542_v52   ;;  %4895 = vrot.lane.b32.xlu0 %v4712_v37, %s9844_s26  ;;  %v14746_v3 = vpop.f32.mrf.mxu1  ;;  %v14748_v18 = vpop.f32.mrf.mxu3  ;;  %v4428_v52 = vpack.c.bf16 %v4419_v49, %v4418_v56 }
 0x5b3   : > { %9035 = vset.pattern.permute.xlu2 %v18191_v63 }
 0x5b4   : > { %5722 = vperm.xlu2 %9035, %v14652_v60  }
 0x5b5   : > { %v14768_v49 = vpop.permute.xlu2 %5325 }
 0x5b6   : > { %v14763_v14 = vpop.f32.mrf.mxu0  ;;  %18521 = vst [vmem:[#allocation117_spill] sm:$0xff] %v14768_v49 }
 0x5b9   : > { %v5452_v37 = vpop.permute.xlu0 %5451  ;;  %v4069_v38 = vpop.permute.xlu1 %4068  ;;  %9025 = vset.pattern.permute.xlu1 %v18450_v8  ;;  %4833 = vrot.lane.b32.xlu0 %v4473_v22, %s9847_s0 }
 0x5ba   : > { %v14758_v17 = vsel %vm18519_vm10, %v5542_v53, %v5452_v37  ;;  %v4096_v29 = vsub.f32 %v4069_v38, %v14058_v44  ;;  %4492 = vmatmul.bf16.gmra.mxu0 %v4428_v52  ;;  %5399 = vperm.xlu1 %9025, %v14524_v62   ;;  %v14765_v8 = vpop.f32.mrf.mxu1  ;;  %v4233_v32 = vpop.f32.mrf.mxu3 }
 0x5bb   : > { %18520 = vst [vmem:[#allocation116_spill] sm:$0xff] %v14758_v17  ;;  %v9469_v22 = vpop.eup %9468 }
 0x5bc   : > { %v4112_v41 = vmin.f32 %v4096_v29, 0.0  ;;  %9039 = vset.pattern.permute.xlu2 %v18031_v6  ;;  %v4161_v21 = vmul.f32 %v9469_v22, %v14703_v23  ;;  %v4580_v22 = vsub.f32 %v14618_v9, %v14032_v13 }
 0x5be   : > { %v4140_v19 = vmul.f32 1.442695, %v4112_v41  ;;  %v14775_v53 = vpop.f32.mrf.mxu0  ;;  %v4177_v41 = vmul.f32 %v4161_v21, %v14596_v57 }
 0x5c0   : > { %9470 = vpow2.f32 %v4140_v19 }
 0x5c1   : > { %4771 = vrot.lane.b32.xlu0 %v4233_v32, %s9840_s18 }
 0x5c2   : > { %v14770_v56 = vpop.permute.xlu1 %5315  ;;  %9027 = vset.pattern.permute.xlu1 %v18449_v4  ;;  %v4720_v38 = vpop.f32.mrf.mxu1 }
 0x5c3   : > { %18522 = vst [vmem:[#allocation118_spill] sm:$0xff] %v14770_v56  ;;  %5527 = vperm.xlu1 %9027, %v14524_v62   ;;  %v14784_v62 = vpop.permute.xlu2 %5455 }
 0x5c4   : > { %18524 = vst [vmem:[#allocation120_spill] sm:$0xff] %v14784_v62 }
 0x5c6   : > { %v9471_v52 = vpop.eup %9470  ;;  %v4480_v32 = vpop.f32.mrf.mxu0 }
 0x5c7   : > { %v4160_v37 = vmul.f32 %v9471_v52, %v14711_v20 }
 0x5c9   : > { %4901 = vrot.lane.b32.xlu0 %v4720_v38, %s9844_s26  ;;  %v4176_v29 = vmul.f32 %v4160_v37, %v14575_v16  ;;  %v4596_v37 = vmin.f32 %v4580_v22, 0.0  ;;  %v4582_v22 = vsub.f32 %v14668_v48, %v14032_v13 }
 0x5cb   : > { %v14781_v19 = vpop.permute.xlu1 %5383  ;;  %9030 = vset.pattern.permute.xlu1 %v17932_v40  ;;  %v4186_v4 = vpack.c.bf16 %v4177_v41, %v4176_v29  ;;  %v14794_v21 = vpop.permute.xlu2 %5515  ;;  %v4624_v38 = vmul.f32 1.442695, %v4596_v37 }
 0x5cc   : > { %18523 = vst [vmem:[#allocation119_spill] sm:$0xff] %v14781_v19  ;;  %5845 = vperm.xlu1 %9030, %v14650_v36  }
 0x5cd   : > { %4250 = vmatmul.bf16.gmra.mxu3 %v4186_v4  ;;  %18526 = vst [vmem:[#allocation122_spill] sm:$0xff] %v14794_v21  ;;  %9472 = vpow2.f32 %v4624_v38 }
 0x5d1   : > { %4839 = vrot.lane.b32.xlu0 %v4480_v32, %s9847_s0 }
 0x5d3   : > { %v4565_v4 = vpop.permute.xlu2 %4564  ;;  %v9473_v49 = vpop.eup %9472 }
 0x5d4   : > { %v14790_v52 = vpop.permute.xlu1 %5447  ;;  %9031 = vset.pattern.permute.xlu1 %v17913_v15  ;;  %v4583_v62 = vsub.f32 %v4565_v4, %v14032_v13 }
 0x5d5   : > { %18525 = vst [vmem:[#allocation121_spill] sm:$0xff] %v14790_v52  ;;  %5909 = vperm.xlu1 %9031, %v14650_v36   ;;  %v3833_v36 = vsub.f32 %v14734_v31, %v14043_v55  ;;  %v4644_v31 = vmul.f32 %v9473_v49, %v14711_v20 }
 0x5d6   : > { %v4599_v38 = vmin.f32 %v4583_v62, 0.0 }
 0x5d7   : > { %v4660_v62 = vmul.f32 %v4644_v31, %v14575_v16 }
 0x5dd   : > { %v4557_v29 = vpop.permute.xlu1 %4556  ;;  %9032 = vset.pattern.permute.xlu1 %v18191_v63 }
 0x5de   : > { %v4581_v41 = vsub.f32 %v4557_v29, %v14032_v13  ;;  %5717 = vperm.xlu1 %9032, %v14690_v11   ;;  %v14806_v29 = vpop.f32.mrf.mxu3  ;;  %v4323_v11 = vpop.permute.xlu0 %4322  ;;  %v4630_v13 = vmul.f32 1.442695, %v4599_v38 }
 0x5df   : > { %v4341_v56 = vsub.f32 %v4323_v11, %v14062_v61 }
 0x5e0   : > { %v4597_v9 = vmin.f32 %v4581_v41, 0.0  ;;  %v3849_v41 = vmin.f32 %v3833_v36, 0.0  ;;  %v14815_v36 = vpop.f32.mrf.mxu1 }
 0x5e1   : > { %v4357_v16 = vmin.f32 %v4341_v56, 0.0  ;;  %v14836_v56 = vsel %vm2898_vm13, 1.0, %v18461_v42  ;;  %vm18537_vm13 = vmmov %vm18439_vm14 }
 0x5e2   : > { %v4626_v32 = vmul.f32 1.442695, %v4597_v9  ;;  %v4598_v9 = vmin.f32 %v4582_v22, 0.0  ;;  %v3880_v52 = vmul.f32 1.442695, %v3849_v41  ;;  %vm18542_vm2 = vmmov %vm18537_vm13 }
 0x5e3   : > { %vm18546_vm3 = vmmov %vm18542_vm2 }
 0x5e4   : > { %9474 = vpow2.f32 %v4626_v32  ;;  %vm18550_vm8 = vmmov %vm18542_vm2 }
 0x5e5   : > { %v5185_v37 = vpop.permute.xlu1 %5184  ;;  %vm18554_vm15 = vmmov %vm18542_vm2 }
 0x5e6   : > { %v5219_v25 = vsub.f32 %v14626_v27, %v5185_v37  ;;  %9036 = vset.pattern.permute.xlu1 %v18031_v6  ;;  %v4628_v37 = vmul.f32 1.442695, %v4598_v9  ;;  %v14821_v11 = vpop.f32.mrf.mxu3  ;;  %vm18562_vm6 = vmmov %vm18542_vm2 }
 0x5e7   : > { %5789 = vperm.xlu1 %9036, %v14652_v60   ;;  %vm18570_vm5 = vmmov %vm18542_vm2 }
 0x5e8   : > { %v5248_v4 = vmul.f32 1.442695, %v5219_v25  ;;  %v14838_v41 = vpop.f32.mrf.mxu1 }
 0x5ea   : > { %v9475_v32 = vpop.eup %9474  ;;  %9476 = vpow2.f32 %v5248_v4 }
 0x5eb   : > { %v4645_v48 = vmul.f32 %v9475_v32, %v14703_v23  ;;  %9478 = vpow2.f32 %v4630_v13 }
 0x5ec   : > { %9480 = vpow2.f32 %v3880_v52 }
 0x5ed   : > { %v3810_v19 = vpop.permute.xlu1 %3809  ;;  %v4661_v17 = vmul.f32 %v4645_v48, %v14596_v57  ;;  %9482 = vpow2.f32 %v4628_v37  ;;  %v5220_v57 = vsub.f32 %v14626_v27, %v14687_v7 }
 0x5ee   : > { %v3832_v25 = vsub.f32 %v3810_v19, %v14043_v55 }
 0x5ef   : > { %9037 = vset.pattern.permute.xlu1 %v17932_v40  ;;  %v4670_v20 = vpack.c.bf16 %v4661_v17, %v4660_v62  ;;  %v4388_v17 = vmul.f32 1.442695, %v4357_v16  ;;  %v5250_v4 = vmul.f32 1.442695, %v5220_v57  ;;  %v4098_v16 = vsub.f32 %v14755_v2, %v14058_v44  ;;  %v14866_v2 = vpop.f32.mrf.mxu2 }
 0x5f0   : > { %v14818_v49 = vpop.eup %9476  ;;  %v3848_v23 = vmin.f32 %v3832_v25, 0.0  ;;  %5853 = vperm.xlu1 %9037, %v14652_v60   ;;  %v14830_v60 = vsel %vm18528_vm4, 1.0, %v18461_v42  ;;  %v5189_v42 = vpop.permute.xlu2 %5188 }
 0x5f1   : > { %18527 = vst [vmem:[#allocation123_spill] sm:$0xff] %v14818_v49  ;;  %4734 = vmatmul.bf16.gmra.mxu1 %v4670_v20  ;;  %5793 = vperm.xlu2 %9039, %v14818_v49   ;;  %v9479_v19 = vpop.eup %9478  ;;  %v5221_v37 = vsub.f32 %v14626_v27, %v5189_v42 }
 0x5f2   : > { %v3878_v55 = vmul.f32 1.442695, %v3848_v23  ;;  %v9481_v22 = vpop.eup %9480  ;;  %v4647_v9 = vmul.f32 %v9479_v19, %v14830_v60 }
 0x5f3   : > { %v9483_v38 = vpop.eup %9482  ;;  %v3897_v51 = vmul.f32 %v9481_v22, %v14830_v60  ;;  %v4727_v22 = vpop.f32.mrf.mxu1 }
 0x5f4   : > { %9484 = vpow2.f32 %v3878_v55  ;;  %v4663_v48 = vmul.f32 %v4647_v9, %v14638_v26 }
 0x5f5   : > { %9486 = vpow2.f32 %v4388_v17  ;;  %v3913_v25 = vmul.f32 %v3897_v51, %v14638_v26  ;;  %v5252_v17 = vmul.f32 1.442695, %v5221_v37 }
 0x5f6   : > { %v4319_v52 = vpop.permute.xlu1 %4318  ;;  %9488 = vpow2.f32 %v5250_v4  ;;  %v4114_v4 = vmin.f32 %v4098_v16, 0.0 }
 0x5f7   : > { %v4340_v7 = vsub.f32 %v4319_v52, %v14062_v61  ;;  %v4646_v61 = vmul.f32 %v9483_v38, %v14836_v56  ;;  %v14875_v37 = vpop.f32.mrf.mxu2 }
 0x5f8   : > { %9041 = vset.pattern.permute.xlu1 %v17913_v15  ;;  %v4144_v51 = vmul.f32 1.442695, %v4114_v4 }
 0x5f9   : > { %v4356_v35 = vmin.f32 %v4340_v7, 0.0  ;;  %v4241_v31 = vpop.f32.mrf.mxu3  ;;  %9040 = vset.pattern.permute.xlu2 %v17932_v40  ;;  %5921 = vperm.xlu1 %9041, %v14818_v49   ;;  %v4662_v20 = vmul.f32 %v4646_v61, %v14621_v12 }
 0x5fa   : > { %v9485_v54 = vpop.eup %9484  ;;  %4777 = vrot.lane.b32.xlu0 %v4241_v31, %s9840_s18  ;;  %5857 = vperm.xlu2 %9040, %v14818_v49  }
 0x5fb   : > { %v4386_v32 = vmul.f32 1.442695, %v4356_v35  ;;  %v3896_v13 = vmul.f32 %v9485_v54, %v14836_v56  ;;  %v9487_v23 = vpop.eup %9486  ;;  %v4671_v19 = vpack.c.bf16 %v4663_v48, %v4662_v20 }
 0x5fc   : > { %v14860_v52 = vpop.eup %9488  ;;  %v4405_v38 = vmul.f32 %v9487_v23, %v14830_v60  ;;  %v14883_v23 = vpop.f32.mrf.mxu0 }
 0x5fd   : > { %9490 = vpow2.f32 %v4386_v32  ;;  %v3912_v62 = vmul.f32 %v3896_v13, %v14621_v12  ;;  %18530 = vst [vmem:[#allocation125_spill] sm:$0xff] %v14860_v52 }
 0x5fe   : > { %9492 = vpow2.f32 %v5252_v17  ;;  %v4421_v31 = vmul.f32 %v4405_v38, %v14638_v26 }
 0x5ff   : > { %v14857_v55 = vpop.permute.xlu1 %5519  ;;  %v3921_v57 = vpack.c.bf16 %v3913_v25, %v3912_v62  ;;  %9494 = vpow2.f32 %v4144_v51  ;;  %v14877_v25 = vpop.permute.xlu2 %5463 }
 0x600   : > { %18529 = vst [vmem:[#allocation124_spill] sm:$0xff] %v14857_v55 }
 0x601   : > { %9042 = vset.pattern.permute.xlu1 %v18191_v63  ;;  %4013 = vmatmul.bf16.gmra.mxu2 %v3921_v57  ;;  %18531 = vst [vmem:[#allocation126_spill] sm:$0xff] %v14877_v25 }
 0x602   : > { %4739 = vmatmul.bf16.gmra.mxu1 %v4671_v19  ;;  %4907 = vrot.lane.b32.xlu0 %v4727_v22, %s9844_s26  ;;  %v14888_v19 = vpop.f32.mrf.mxu2 }
 0x603   : > { %v9491_v7 = vpop.eup %9490  ;;  %5861 = vperm.xlu2 %9040, %v14860_v52   ;;  %5732 = vperm.xlu1 %9042, %v14860_v52  }
 0x604   : > { %v4404_v9 = vmul.f32 %v9491_v7, %v14836_v56  ;;  %v9493_v32 = vpop.eup %9492  ;;  %v14893_v7 = vpop.f32.mrf.mxu3 }
 0x605   : > { %v9495_v62 = vpop.eup %9494 }
 0x606   : > { %v4420_v35 = vmul.f32 %v4404_v9, %v14621_v12  ;;  %v4162_v16 = vmul.f32 %v9495_v62, %v14836_v56  ;;  %v14902_v56 = vpop.f32.mrf.mxu0 }
 0x608   : > { %v4081_v54 = vpop.permute.xlu1 %4080  ;;  %v4429_v42 = vpack.c.bf16 %v4421_v31, %v4420_v35  ;;  %v4178_v22 = vmul.f32 %v4162_v16, %v14621_v12  ;;  %v14897_v35 = vpop.permute.xlu2 %5712 }
 0x609   : > { %v4099_v61 = vsub.f32 %v4081_v54, %v14058_v44  ;;  %v18533_v44 = vld [vmem:[#allocation35_spill] sm:$0xff]  ;;  %18535 = vst [vmem:[#allocation128_spill] sm:$0xff] %v14897_v35  ;;  %v15002_v16 = vpop.permute.xlu0 %5335 }
 0x60a   : > { %4497 = vmatmul.bf16.gmra.mxu0 %v4429_v42  ;;  %v14905_v12 = vpop.f32.mrf.mxu2  ;;  %18559 = vst [vmem:[#allocation143_spill] sm:$0xff] %v15002_v16 }
 0x60b   : > { %v4115_v13 = vmin.f32 %v4099_v61, 0.0  ;;  %9043 = vset.pattern.permute.xlu2 %v17913_v15  ;;  %9045 = vset.pattern.permute.xlu1 %v18031_v6 }
 0x60c   : > { %5925 = vperm.xlu2 %9043, %v14860_v52   ;;  %5801 = vperm.xlu1 %9045, %v9493_v32   ;;  %v14911_v31 = vpop.f32.mrf.mxu3 }
 0x60d   : > { %v4146_v48 = vmul.f32 1.442695, %v4115_v13 }
 0x60f   : > { %9496 = vpow2.f32 %v4146_v48 }
 0x610   : > { %v14913_v51 = vpop.permute.xlu2 %5781 }
 0x611   : > { %v14879_v20 = vpop.permute.xlu1 %5330  ;;  %8502 = vmatmul.msk.bf16.vlgmr.msra.gmra.mxu2 %vm18439_vm14, %v18533_v44  ;;  %18539 = vst [vmem:[#allocation129_spill] sm:$0xff] %v14913_v51 }
 0x612   : > { %18532 = vst [vmem:[#allocation127_spill] sm:$0xff] %v14879_v20  ;;  %v14921_v54 = vpop.f32.mrf.mxu2 }
 0x614   : > { %9044 = vset.pattern.permute.xlu2 %v18191_v63  ;;  %9046 = vset.pattern.permute.xlu1 %v17932_v40  ;;  %v4248_v61 = vpop.f32.mrf.mxu3 }
 0x615   : > { %v9497_v57 = vpop.eup %9496  ;;  %5737 = vperm.xlu2 %9044, %v9493_v32   ;;  %5865 = vperm.xlu1 %9046, %v9493_v32  }
 0x616   : > { %v4163_v17 = vmul.f32 %v9497_v57, %v14830_v60 }
 0x618   : > { %v4179_v38 = vmul.f32 %v4163_v17, %v14638_v26  ;;  %v18536_v26 = vld [vmem:[#allocation21_spill] sm:$0xff] }
 0x61a   : > { %v14895_v4 = vpop.permute.xlu1 %5395  ;;  %v4187_v9 = vpack.c.bf16 %v4179_v38, %v4178_v22  ;;  %v15016_v38 = vpop.permute.xlu0 %5523 }
 0x61b   : > { %18534 = vst [vmem:[#allocation35_spill] sm:$0xff] %v14895_v4 }
 0x61c   : > { %4255 = vmatmul.bf16.gmra.mxu3 %v4187_v9  ;;  %18564 = vst [vmem:[#allocation147_spill] sm:$0xff] %v15016_v38 }
 0x61d   : > { %4761 = vrot.lane.b32.xlu2 %v14659_v39, %s9840_s18  ;;  %9047 = vset.pattern.permute.xlu1 %v17913_v15 }
 0x61e   : > { %5929 = vperm.xlu1 %9047, %v9493_v32   ;;  %9049 = vset.pattern.permute.xlu2 %v18031_v6 }
 0x621   : > { %8503 = vmatmul.msk.bf16.gmra.mxu2 %vm18537_vm13, %v18536_v26 }
 0x623   : > { %v14909_v60 = vpop.permute.xlu1 %5459 }
 0x624   : > { %18538 = vst [vmem:[#allocation21_spill] sm:$0xff] %v14909_v60 }
 0x625   : > { %4891 = vrot.lane.b32.xlu2 %v14676_v28, %s9844_s26  ;;  %v14929_v28 = vpop.permute.xlu2 %5849 }
 0x626   : > { %4825 = vrot.lane.b32.xlu1 %v14654_v43, %s9847_s0  ;;  %v4488_v39 = vpop.f32.mrf.mxu0  ;;  %18541 = vst [vmem:[#allocation131_spill] sm:$0xff] %v14929_v28  ;;  %v14934_v43 = vpop.f32.mrf.mxu2  ;;  %v18573_v28 = vld [vmem:[#allocation37_spill] sm:$0xff] }
 0x627   : > { %4845 = vrot.lane.b32.xlu0 %v4488_v39, %s9847_s0  ;;  %9048 = vset.pattern.permute.xlu1 %v18191_v63  ;;  %v15025_v39 = vpop.permute.xlu0 %5917 }
 0x628   : > { %18566 = vst [vmem:[#allocation149_spill] sm:$0xff] %v15025_v39  ;;  %v18576_v39 = vld [vmem:[#allocation54_spill] sm:$0xff] }
 0x62c   : > { %v14923_v42 = vpop.permute.xlu1 %5399 }
 0x62d   : > { %18540 = vst [vmem:[#allocation130_spill] sm:$0xff] %v14923_v42  ;;  %4829 = vrot.lane.b32.xlu2 %v14695_v46, %s9847_s0  ;;  %v14942_v46 = vpop.permute.xlu2 %5913  ;;  %v18581_v42 = vld [vmem:[#allocation76_spill] sm:$0xff] }
 0x62e   : > { %4763 = vrot.lane.b32.xlu1 %v14678_v33, %s9840_s18  ;;  %18544 = vst [vmem:[#allocation133_spill] sm:$0xff] %v14942_v46  ;;  %v14944_v33 = vpop.f32.mrf.mxu2 }
 0x62f   : > { %4783 = vrot.lane.b32.xlu0 %v4248_v61, %s9840_s18 }
 0x631   : > { %8504 = vmatmul.msk.bf16.gmra.mxu2 %vm18542_vm2, %v13584_v59 }
 0x635   : > { %4767 = vrot.lane.b32.xlu2 %v14730_v5, %s9840_s18  ;;  %v14938_v32 = vpop.permute.xlu1 %5527  ;;  %v5723_v5 = vpop.permute.xlu2 %5722 }
 0x636   : > { %18543 = vst [vmem:[#allocation132_spill] sm:$0xff] %v14938_v32  ;;  %4893 = vrot.lane.b32.xlu1 %v14705_v34, %s9844_s26  ;;  %v14954_v13 = vpop.f32.mrf.mxu2 }
 0x63d   : > { %4897 = vrot.lane.b32.xlu2 %v14746_v3, %s9844_s26 }
 0x63e   : > { %4831 = vrot.lane.b32.xlu1 %v14727_v30, %s9847_s0  ;;  %v14950_v59 = vpop.permute.xlu1 %5845  ;;  %v14964_v48 = vpop.f32.mrf.mxu2 }
 0x63f   : > { %18545 = vst [vmem:[#allocation134_spill] sm:$0xff] %v14950_v59 }
 0x641   : > { %8505 = vmatmul.msk.bf16.gmra.mxu2 %vm18546_vm3, %v13592_v50 }
 0x645   : > { %4835 = vrot.lane.b32.xlu2 %v14763_v14, %s9847_s0 }
 0x646   : > { %4769 = vrot.lane.b32.xlu1 %v14748_v18, %s9840_s18  ;;  %v14978_v18 = vpop.f32.mrf.mxu2 }
 0x647   : > { %v14960_v34 = vpop.permute.xlu1 %5909 }
 0x648   : > { %18547 = vst [vmem:[#allocation135_spill] sm:$0xff] %v14960_v34 }
 0x64b   : > { %v14962_v3 = vpop.permute.xlu2 %5793 }
 0x64c   : > { %18548 = vst [vmem:[#allocation136_spill] sm:$0xff] %v14962_v3 }
 0x64d   : > { %4773 = vrot.lane.b32.xlu2 %v14806_v29, %s9840_s18  ;;  %v4730_v29 = vpop.f32.mrf.mxu1 }
 0x64e   : > { %4899 = vrot.lane.b32.xlu1 %v14765_v8, %s9844_s26  ;;  %v14984_v8 = vpop.f32.mrf.mxu2 }
 0x64f   : > { %18552 = vst [vmem:[#allocation139_spill] sm:$0xff] %v14984_v8 }
 0x650   : > { %v14970_v50 = vpop.permute.xlu1 %5717 }
 0x651   : > { %18549 = vst [vmem:[#allocation137_spill] sm:$0xff] %v14970_v50  ;;  %8506 = vmatmul.msk.bf16.gmra.mxu2 %vm18550_vm8, %v13636_v24  ;;  %v8513_v50 = vmul.f32 -1.442695, %v18573_v28 }
 0x654   : > { %v14974_v30 = vpop.permute.xlu2 %5857 }
 0x655   : > { %18551 = vst [vmem:[#allocation138_spill] sm:$0xff] %v14974_v30  ;;  %4903 = vrot.lane.b32.xlu2 %v14815_v36, %s9844_s26  ;;  %v4490_v36 = vpop.f32.mrf.mxu0 }
 0x656   : > { %4837 = vrot.lane.b32.xlu1 %v14775_v53, %s9847_s0 }
 0x659   : > { %v5790_v14 = vpop.permute.xlu1 %5789 }
 0x65a   : > { %v5944_v62 = vsel %vm18555_vm11, %v5723_v5, %v5790_v14  ;;  %v4251_v14 = vpop.f32.mrf.mxu3 }
 0x65d   : > { %4841 = vrot.lane.b32.xlu2 %v14883_v23, %s9847_s0  ;;  %v14988_v24 = vpop.permute.xlu2 %5861  ;;  %v4732_v23 = vpop.f32.mrf.mxu1 }
 0x65e   : > { %4775 = vrot.lane.b32.xlu1 %v14821_v11, %s9840_s18  ;;  %18553 = vst [vmem:[#allocation140_spill] sm:$0xff] %v14988_v24  ;;  %v15000_v11 = vpop.f32.mrf.mxu2  ;;  %v4493_v17 = vpop.f32.mrf.mxu0 }
 0x65f   : > { %18558 = vst [vmem:[#allocation142_spill] sm:$0xff] %v15000_v11 }
 0x661   : > { %8507 = vmatmul.msk.bf16.gmra.mxu2 %vm18554_vm15, %v13711_v10 }
 0x662   : > { %v5854_v44 = vpop.permute.xlu1 %5853 }
 0x663   : > { %v14994_v53 = vsel %vm18556_vm1, %v5944_v62, %v5854_v44  ;;  %v18571_v62 = vld [vmem:[#allocation68_spill] sm:$0xff] }
 0x664   : > { %18557 = vst [vmem:[#allocation141_spill] sm:$0xff] %v14994_v53  ;;  %v8512_v44 = vmul.f32 -1.442695, %v18571_v62 }
 0x665   : > { %4779 = vrot.lane.b32.xlu2 %v14893_v7, %s9840_s18 }
 0x666   : > { %4905 = vrot.lane.b32.xlu1 %v14838_v41, %s9844_s26  ;;  %v15004_v57 = vpop.permute.xlu2 %5925  ;;  %v15014_v41 = vpop.f32.mrf.mxu2 }
 0x667   : > { %18560 = vst [vmem:[#allocation144_spill] sm:$0xff] %v15004_v57  ;;  %v4495_v26 = vpop.f32.mrf.mxu0 }
 0x668   : > { %18563 = vst [vmem:[#allocation146_spill] sm:$0xff] %v15014_v41 }
 0x66b   : > { %v15006_v10 = vpop.permute.xlu1 %5921 }
 0x66c   : > { %18561 = vst [vmem:[#allocation145_spill] sm:$0xff] %v15006_v10 }
 0x66d   : > { %4909 = vrot.lane.b32.xlu2 %v4730_v29, %s9844_s26 }
 0x66e   : > { %4843 = vrot.lane.b32.xlu1 %v14902_v56, %s9847_s0  ;;  %v4735_v22 = vpop.f32.mrf.mxu1  ;;  %v8510_v56 = vmul.f32 -1.442695, %v13975_v1  ;;  %v15028_v5 = vpop.f32.mrf.mxu2 }
 0x66f   : > { %4913 = vrot.lane.b32.xlu0 %v4735_v22, %s9844_s26  ;;  %v5738_v7 = vpop.permute.xlu2 %5737 }
 0x670   : > { %9498 = vpow2.f32 %v8510_v56 }
 0x671   : > { %8508 = vmatmul.msk.bf16.gmra.mxu2 %vm18562_vm6, %v13776_v47  ;;  %v18567_v47 = vld [vmem:[#allocation19_spill] sm:$0xff] }
 0x672   : > { %v8511_v61 = vmul.f32 -1.442695, %v18567_v47  ;;  %18568 = vst [vmem:[#allocation19_spill] sm:$0xff] %v15028_v5 }
 0x674   : > { %9500 = vpow2.f32 %v8511_v61 }
 0x675   : > { %4847 = vrot.lane.b32.xlu2 %v4490_v36, %s9847_s0  ;;  %v15019_v9 = vpop.permute.xlu1 %5732  ;;  %9502 = vpow2.f32 %v8512_v44  ;;  %v18578_v44 = vld [vmem:[#allocation66_spill] sm:$0xff] }
 0x676   : > { %18565 = vst [vmem:[#allocation148_spill] sm:$0xff] %v15019_v9  ;;  %4781 = vrot.lane.b32.xlu1 %v14911_v31, %s9840_s18  ;;  %v18569_v31 = vld [vmem:[#allocation71_spill] sm:$0xff]  ;;  %v4737_v22 = vpop.f32.mrf.mxu1  ;;  %v9499_v46 = vpop.eup %9498  ;;  %9504 = vpow2.f32 %v8513_v50 }
 0x677   : > { %4851 = vrot.lane.b32.xlu0 %v4495_v26, %s9847_s0  ;;  %v15030_v29 = vpop.permute.xlu2 %4761  ;;  %v15046_v56 = vadd.f32 1.0, %v9499_v46  ;;  %v4253_v46 = vpop.f32.mrf.mxu3 }
 0x679   : > { %9506 = vrcp.f32 %v15046_v56  ;;  %vm6138_vm4 = vweird.f32 %v15046_v56 }
 0x67a   : > { %v9501_v34 = vpop.eup %9500 }
 0x67b   : > { %v15049_v59 = vadd.f32 1.0, %v9501_v34 }
 0x67d   : > { %4785 = vrot.lane.b32.xlu2 %v4251_v14, %s9840_s18  ;;  %v15041_v14 = vpop.permute.xlu0 %4889  ;;  %9508 = vrcp.f32 %v15049_v59  ;;  %v6159_v52 = vand.u32 2147483648, %v15049_v59  ;;  %vm6153_vm13 = vweird.f32 %v15049_v59 }
 0x67e   : > { %4911 = vrot.lane.b32.xlu1 %v4732_v23, %s9844_s26  ;;  %v5802_v36 = vpop.permute.xlu1 %5801 }
 0x67f   : > { %v15044_v23 = vpop.permute.xlu2 %4891  ;;  %v5947_v61 = vsel %vm18574_vm0, %v5738_v7, %v5802_v36  ;;  %v4740_v9 = vpop.f32.mrf.mxu1  ;;  %v6160_v6 = vor.u32 1.1754944e-38, %v6159_v52 }
 0x681   : > { %8509 = vmatmul.msk.bf16.gmra.mxu2 %vm18570_vm5, %v18569_v31 }
 0x684   : > { %v15037_v26 = vpop.f32.mrf.mxu2 }
 0x685   : > { %18572 = vst [vmem:[#allocation71_spill] sm:$0xff] %v15037_v26  ;;  %4915 = vrot.lane.b32.xlu2 %v4737_v22, %s9844_s26  ;;  %v8515_v22 = vmul.f32 -1.442695, %v18576_v39  ;;  %v15061_v7 = vpop.permute.xlu0 %4827 }
 0x686   : > { %4849 = vrot.lane.b32.xlu1 %v4493_v17, %s9847_s0  ;;  %v9503_v17 = vpop.eup %9502 }
 0x687   : > { %v5866_v31 = vpop.permute.xlu1 %5865  ;;  %v4498_v35 = vpop.f32.mrf.mxu0  ;;  %9510 = vpow2.f32 %v8515_v22  ;;  %v15059_v50 = vadd.f32 1.0, %v9503_v17 }
 0x688   : > { %v5963_v53 = vsel %vm18575_vm9, %v5947_v61, %v5866_v31  ;;  %v9505_v34 = vpop.eup %9504  ;;  %v8514_v61 = vmul.f32 -1.442695, %v18578_v44  ;;  %v15064_v31 = vpop.permute.xlu2 %4829 }
 0x689   : > { %v15069_v10 = vpop.eup %9506  ;;  %v15071_v24 = vadd.f32 1.0, %v9505_v34  ;;  %9512 = vrcp.f32 %v15059_v50  ;;  %v4742_v41 = vpop.f32.mrf.mxu1  ;;  %vm6168_vm1 = vweird.f32 %v15059_v50 }
 0x68a   : > { %9514 = vpow2.f32 %v8514_v61  ;;  %vm6139_vm7 = vweird.f32 %v15069_v10 }
 0x68b   : > { %9516 = vrcp.f32 %v15071_v24  ;;  %vm15122_vm14 = vmor %vm6138_vm4, %vm6139_vm7  ;;  %vm6183_vm0 = vweird.f32 %v15071_v24  ;;  %vm18594_vm7 = vcmask 261120  }
 0x68c   : > { %v15054_v51 = vpop.f32.mrf.mxu2  ;;  %vm18599_vm4 = vmmov %vm18594_vm7 }
 0x68d   : > { %18577 = vst [vmem:[#allocation68_spill] sm:$0xff] %v15054_v51  ;;  %4853 = vrot.lane.b32.xlu2 %v4498_v35, %s9847_s0  ;;  %v15073_v35 = vpop.eup %9508  ;;  %v15090_v32 = vpop.permute.xlu0 %4765  ;;  %v8516_v51 = vmul.f32 -1.442695, %v18581_v42 }
 0x68e   : > { %4787 = vrot.lane.b32.xlu1 %v4253_v46, %s9840_s18  ;;  %v9511_v22 = vpop.eup %9510  ;;  %v6134_v46 = vmul.f32 %v15069_v10, %v15046_v56  ;;  %vm6154_vm10 = vweird.f32 %v15073_v35 }
 0x68f   : > { %v15084_v34 = vadd.f32 1.0, %v9511_v22  ;;  %v15088_v30 = vpop.eup %9512  ;;  %v4500_v38 = vpop.f32.mrf.mxu0  ;;  %vm15135_vm2 = vmor %vm6153_vm13, %vm6154_vm10 }
 0x690   : > { %v5930_v36 = vpop.permute.xlu1 %5929  ;;  %v9515_v25 = vpop.eup %9514  ;;  %vm6169_vm15 = vweird.f32 %v15088_v30  ;;  %vm18597_vm10 = vmmov %vm18594_vm7 }
 0x691   : > { %v15067_v57 = vsel %vm18579_vm12, %v5963_v53, %v5930_v36  ;;  %v6149_v53 = vmul.f32 %v15073_v35, %v15049_v59  ;;  %9518 = vrcp.f32 %v15084_v34  ;;  %v15093_v61 = vpop.permute.xlu2 %4767  ;;  %v15095_v16 = vpop.eup %9516  ;;  %v15104_v60 = vadd.f32 1.0, %v9515_v25  ;;  %vm15176_vm6 = vmor %vm6168_vm1, %vm6169_vm15 }
 0x692   : > { %18580 = vst [vmem:[#allocation37_spill] sm:$0xff] %v15067_v57  ;;  %v6135_v57 = vsub.f32 1.0, %v6134_v46  ;;  %v6179_v20 = vmul.f32 %v15095_v16, %v15071_v24  ;;  %9520 = vpow2.f32 %v8516_v51  ;;  %v6144_v51 = vand.u32 2147483648, %v15046_v56  ;;  %vm18611_vm1 = vmmov %vm18599_vm4 }
 0x693   : > { %v6150_v3 = vsub.f32 1.0, %v6149_v53  ;;  %v6164_v53 = vmul.f32 %v15088_v30, %v15059_v50  ;;  %9522 = vrcp.f32 %v15104_v60  ;;  %vm6184_vm11 = vweird.f32 %v15095_v16 }
 0x694   : > { %v15076_v17 = vpop.f32.mrf.mxu2  ;;  %v6136_v22 = vmul.f32 %v15069_v10, %v6135_v57  ;;  %v6145_v15 = vor.u32 1.1754944e-38, %v6144_v51  ;;  %vm15191_vm9 = vmor %vm6183_vm0, %vm6184_vm11 }
 0x695   : > { %v6151_v46 = vmul.f32 %v15073_v35, %v6150_v3  ;;  %v15131_v5 = vpop.permute.xlu0 %4895 }
 0x696   : > { %4917 = vrot.lane.b32.xlu1 %v4740_v9, %s9844_s26  ;;  %v6137_v3 = vadd.f32 %v15069_v10, %v6136_v22  ;;  %v6142_v22 = vand.u32 2147483647, %v15046_v56 }
 0x697   : > { %v15112_v57 = vpop.eup %9518  ;;  %v6152_v25 = vadd.f32 %v15073_v35, %v6151_v46  ;;  %v6157_v46 = vand.u32 2147483647, %v15049_v59 }
 0x698   : > { %v15086_v36 = vpop.permute.xlu1 %4825  ;;  %v9521_v11 = vpop.eup %9520  ;;  %v6141_v56 = vsel %vm15122_vm14, %v15069_v10, %v6137_v3  ;;  %vm6143_vm3 = vcmp.eq.f32.partialorder %v6142_v22, 8.507059e+37  ;;  %v6172_v10 = vand.u32 2147483647, %v15059_v50  ;;  %v6174_v3 = vand.u32 2147483648, %v15059_v50 }
 0x699   : > { %v6156_v59 = vsel %vm15135_vm2, %v15073_v35, %v6152_v25  ;;  %v15149_v45 = vpop.eup %9522  ;;  %vm6158_vm8 = vcmp.eq.f32.partialorder %v6157_v46, 8.507059e+37  ;;  %v6146_v63 = vsel %vm6143_vm3, %v6145_v15, %v6141_v56  ;;  %v15156_v52 = vadd.f32 1.0, %v9521_v11 }
 0x69a   : > { %v6161_v55 = vsel %vm6158_vm8, %v6160_v6, %v6156_v59  ;;  %v6189_v25 = vand.u32 2147483648, %v15071_v24  ;;  %v6194_v15 = vmul.f32 %v15149_v45, %v15104_v60  ;;  %v18586_v6 = vld [vmem:[#allocation20_spill] sm:$0xff]  ;;  %v15168_v11 = vmul.f32 %v6146_v63, %v13975_v1 }
 0x69b   : > { %v15174_v22 = vmul.f32 %v6161_v55, %v18567_v47  ;;  %vm15180_vm5 = vcmp.eq.f32.partialorder %v6172_v10, 8.507059e+37  ;;  %9524 = vrcp.f32 %v15156_v52  ;;  %v6187_v50 = vand.u32 2147483647, %v15071_v24 }
 0x69c   : > { %v15098_v9 = vpop.f32.mrf.mxu2  ;;  %v6195_v63 = vsub.f32 1.0, %v6194_v15  ;;  %v6219_v55 = vand.u32 2147483648, %v15084_v34  ;;  %vm6214_vm12 = vweird.f32 %v15112_v57  ;;  %v4940_v24 = vsel %vm18594_vm7, %v14905_v12, %v15093_v61  ;;  %v18598_v15 = vld [vmem:[#allocation44_spill] sm:$0xff] }
 0x69d   : > { %v15196_v56 = vpop.permute.xlu0 %4833  ;;  %vm18600_vm14 = vcmask 523264   ;;  %vm6188_vm13 = vcmp.eq.f32.partialorder %v6187_v50, 8.507059e+37  ;;  %vm6213_vm2 = vweird.f32 %v15084_v34  ;;  %v6217_v12 = vand.u32 2147483647, %v15084_v34 }
 0x69e   : > { %4855 = vrot.lane.b32.xlu1 %v4500_v38, %s9847_s0  ;;  %v6165_v38 = vsub.f32 1.0, %v6164_v53  ;;  %v6209_v53 = vmul.f32 %v15112_v57, %v15084_v34  ;;  %vm18601_vm3 = vcmask 785408   ;;  %vm15233_vm8 = vmor %vm6213_vm2, %vm6214_vm12  ;;  %v18605_v34 = vld [vmem:[#allocation27_spill] sm:$0xff]  ;;  %vm18620_vm12 = vcmask 1042432  }
 0x69f   : > { %v4256_v4 = vpop.f32.mrf.mxu3  ;;  %vm18606_vm15 = vmmov %vm18600_vm14  ;;  %vm6199_vm7 = vweird.f32 %v15149_v45 }
 0x6a0   : > { %v15109_v26 = vpop.permute.xlu1 %4763  ;;  %4789 = vrot.lane.b32.xlu0 %v4256_v4, %s9840_s18  ;;  %v6180_v4 = vsub.f32 1.0, %v6179_v20  ;;  %v15139_v20 = vpop.permute.xlu2 %4897  ;;  %v6166_v40 = vmul.f32 %v15088_v30, %v6165_v38  ;;  %v6210_v0 = vsub.f32 1.0, %v6209_v53  ;;  %v6190_v53 = vor.u32 1.1754944e-38, %v6189_v25  ;;  %v18596_v25 = vld [vmem:[#allocation62_spill] sm:$0xff]  ;;  %vm18607_vm11 = vmmov %vm18600_vm14 }
 0x6a1   : > { %vm18614_vm0 = vmmov %vm18601_vm3 }
 0x6a2   : > { %v6181_v21 = vmul.f32 %v15095_v16, %v6180_v4  ;;  %v6167_v35 = vadd.f32 %v15088_v30, %v6166_v40  ;;  %v6211_v40 = vmul.f32 %v15112_v57, %v6210_v0  ;;  %v6175_v0 = vor.u32 1.1754944e-38, %v6174_v3  ;;  %v18595_v3 = vld [vmem:[#allocation16_spill] sm:$0xff]  ;;  %vm18627_vm2 = vmmov %vm18611_vm1 }
 0x6a4   : > { %v15133_v49 = vpop.f32.mrf.mxu2  ;;  %v6182_v38 = vadd.f32 %v15095_v16, %v6181_v21  ;;  %v6171_v1 = vsel %vm15176_vm6, %v15088_v30, %v6167_v35  ;;  %v6212_v10 = vadd.f32 %v15112_v57, %v6211_v40  ;;  %v4938_v40 = vsel %vm18599_vm4, %v14875_v37, %v15109_v26  ;;  %v15226_v21 = vpop.eup %9524  ;;  %v18604_v26 = vld [vmem:[#allocation40_spill] sm:$0xff]  ;;  %vm18613_vm6 = vmmov %vm18601_vm3 }
 0x6a5   : > { %v6176_v47 = vsel %vm15180_vm5, %v6175_v0, %v6171_v1  ;;  %v4954_v46 = vsel %vm18607_vm11, %v4938_v40, %v15061_v7  ;;  %v18608_v1 = vld [vmem:[#allocation70_spill] sm:$0xff]  ;;  %vm6218_vm5 = vcmp.eq.f32.partialorder %v6217_v12, 8.507059e+37  ;;  %v6224_v7 = vmul.f32 %v15226_v21, %v15156_v52  ;;  %vm18624_vm4 = vmmov %vm18611_vm1 }
 0x6a6   : > { %v6186_v59 = vsel %vm15191_vm9, %v15095_v16, %v6182_v38  ;;  %v5533_v16 = vsel %vm18597_vm10, %v18596_v25, %v18595_v3  ;;  %v9779_v38 = vld [vmem:[%s17517_s8] ss:$0 sm:$0xff]  ;;  %v6196_v25 = vmul.f32 %v15149_v45, %v6195_v63  ;;  %v6220_v63 = vor.u32 1.1754944e-38, %v6219_v55  ;;  %vm18617_vm9 = vmmov %vm18607_vm11 }
 0x6a7   : > { %v4258_v27 = vpop.f32.mrf.mxu3  ;;  %v6191_v3 = vsel %vm6188_vm13, %v6190_v53, %v6186_v59  ;;  %v4990_v50 = vmul.f32 %v9779_v38, %v18604_v26  ;;  %v18612_v26 = vld [vmem:[#allocation17_spill] sm:$0xff]  ;;  %v6204_v55 = vand.u32 2147483648, %v15104_v60  ;;  %vm6228_vm10 = vweird.f32 %v15156_v52  ;;  %vm18632_vm11 = vmmov %vm18611_vm1 }
 0x6a8   : > { %v15151_v8 = vpop.permute.xlu1 %4893  ;;  %4919 = vrot.lane.b32.xlu0 %v4742_v41, %s9844_s26  ;;  %4791 = vrot.lane.b32.xlu2 %v4258_v27, %s9840_s18  ;;  %v8517_v27 = vmul.f32 -1.442695, %v18586_v6  ;;  %v18587_v41 = vld [vmem:[#allocation75_spill] sm:$0xff]  ;;  %v15202_v30 = vpop.permute.xlu2 %4835  ;;  %vm6198_vm13 = vweird.f32 %v15104_v60 }
 0x6a9   : > { %v8518_v51 = vmul.f32 -1.442695, %v18587_v41 }
 0x6aa   : > { %9526 = vpow2.f32 %v8517_v27  ;;  %v15216_v27 = vmul.f32 %v9779_v38, %v18598_v15  ;;  %v18610_v15 = vld [vmem:[#allocation45_spill] sm:$0xff] }
 0x6ab   : > { %9528 = vpow2.f32 %v8518_v51 }
 0x6ac   : > { %v5595_v4 = vpop.f32.mrf.mxu2 }
 0x6b0   : > { %v4832_v35 = vpop.permute.xlu1 %4831  ;;  %v9527_v59 = vpop.eup %9526 }
 0x6b1   : > { %v4956_v51 = vsel %vm18600_vm14, %v4940_v24, %v4832_v35  ;;  %v5549_v24 = vsel %vm18606_vm15, %v5533_v16, %v18605_v34  ;;  %v18609_v35 = vld [vmem:[#allocation30_spill] sm:$0xff]  ;;  %v15255_v16 = vmul.f32 %v6176_v47, %v18571_v62  ;;  %v5024_v34 = vrot.slane %v4990_v50, 5  ;;  %v4772_v47 = vpop.permute.xlu0 %4771  ;;  %v18618_v50 = vld [vmem:[#allocation41_spill] sm:$0xff]  ;;  %vm18626_vm14 = vmmov %vm18614_vm0 }
 0x6b2   : > { %v4972_v61 = vsel %vm18601_vm3, %v4956_v51, %v15131_v5  ;;  %v6216_v5 = vsel %vm15233_vm8, %v15112_v57, %v6212_v10  ;;  %v5531_v51 = vsel %vm18611_vm1, %v18610_v15, %v18609_v35  ;;  %v5565_v37 = vsel %vm18613_vm6, %v5549_v24, %v18612_v26  ;;  %v9529_v10 = vpop.eup %9528  ;;  %v18615_v35 = vld [vmem:[#allocation81_spill] sm:$0xff]  ;;  %v18616_v26 = vld [vmem:[#allocation55_spill] sm:$0xff]  ;;  %vm18628_vm3 = vmmov %vm18617_vm9 }
 0x6b3   : > { %v5075_v0 = vadd.f32 %v18608_v1, %v4972_v61  ;;  %v5631_v40 = vmul.f32 %v5595_v4, %v5565_v37  ;;  %v6221_v61 = vsel %vm6218_vm5, %v6220_v63, %v6216_v5  ;;  %v4970_v1 = vsel %vm18614_vm0, %v4954_v46, %v15044_v23  ;;  %vm18630_vm8 = vmmov %vm18628_vm3 }
 0x6b4   : > { %v15246_v53 = vpop.f32.mrf.mxu2  ;;  %v6376_v24 = vmul.f32 %v6191_v3, %v18573_v28  ;;  %v8519_v15 = vmul.f32 -1.442695, %v18615_v35  ;;  %v5547_v62 = vsel %vm18617_vm9, %v5531_v51, %v18616_v26  ;;  %v15269_v4 = vadd.f32 %v15149_v45, %v6196_v25  ;;  %v15277_v3 = vpop.permute.xlu2 %4773  ;;  %v18621_v51 = vld [vmem:[#allocation78_spill] sm:$0xff]  ;;  %vm18631_vm15 = vmmov %vm18611_vm1 }
 0x6b5   : > { %v5647_v12 = vadd.f32 %v5631_v40, %v5075_v0  ;;  %v15271_v37 = vadd.f32 1.0, %v9529_v10  ;;  %v4989_v5 = vmul.f32 %v9779_v38, %v18618_v50  ;;  %v18619_v23 = vrot.slane %v15216_v27, 5  ;;  %v18622_v38 = vld [vmem:[#allocation34_spill] sm:$0xff]  ;;  %v18623_v40 = vld [vmem:[#allocation92_spill] sm:$0xff]  ;;  %vm18633_vm1 = vmmov %vm18620_vm12 }
 0x6b6   : > { %v15281_v46 = vmul.f32 %v6221_v61, %v18576_v39  ;;  %v6225_v0 = vsub.f32 1.0, %v6224_v7  ;;  %v15283_v63 = vadd.f32 1.0, %v9527_v59  ;;  %v8520_v10 = vmul.f32 -1.442695, %v18621_v51  ;;  %v18625_v50 = vld [vmem:[#allocation86_spill] sm:$0xff]  ;;  %vm18636_vm6 = vmmov %vm18627_vm2 }
 0x6b7   : > { %v5027_v28 = vsel %vm18620_vm12, %v5024_v34, %v18619_v23  ;;  %v5535_v26 = vsel %vm18624_vm4, %v18623_v40, %v18622_v38  ;;  %v5563_v23 = vsel %vm18626_vm14, %v5547_v62, %v18625_v50  ;;  %9530 = vpow2.f32 %v8519_v15  ;;  %v18629_v15 = vld [vmem:[#allocation89_spill] sm:$0xff]  ;;  %vm18637_vm5 = vmmov %vm18628_vm3 }
 0x6b8   : > { %v15266_v57 = vpop.permute.xlu1 %4769  ;;  %v5073_v25 = vadd.f32 %v5027_v28, %v4970_v1  ;;  %v4937_v39 = vsel %vm18627_vm2, %v14866_v2, %v15030_v29  ;;  %v5629_v59 = vmul.f32 %v15098_v9, %v5563_v23  ;;  %v15297_v61 = vmul.f32 %v6376_v24, %v5647_v12  ;;  %vm18638_vm9 = vmmov %vm18628_vm3 }
 0x6b9   : > { %v6232_v1 = vand.u32 2147483647, %v15156_v52  ;;  %9532 = vrcp.f32 %v15271_v37  ;;  %v5023_v28 = vrot.slane %v4989_v5, 5  ;;  %v4953_v62 = vsel %vm18628_vm3, %v4937_v39, %v15086_v36  ;;  %v18634_v5 = vld [vmem:[#allocation26_spill] sm:$0xff]  ;;  %vm18641_vm12 = vmmov %vm18627_vm2  ;;  %v18646_v39 = vld [vmem:[#allocation25_spill] sm:$0xff] }
 0x6ba   : > { %v6226_v38 = vmul.f32 %v15226_v21, %v6225_v0  ;;  %9534 = vrcp.f32 %v15283_v63  ;;  %v5551_v2 = vsel %vm18630_vm8, %v5535_v26, %v18629_v15  ;;  %v5645_v29 = vadd.f32 %v5629_v59, %v5073_v25  ;;  %v18635_v36 = vld [vmem:[#allocation74_spill] sm:$0xff]  ;;  %vm18642_vm4 = vmmov %vm18614_vm0  ;;  %v4902_v59 = vpop.permute.xlu0 %4901 }
 0x6bb   : > { %9536 = vpow2.f32 %v8520_v10  ;;  %v4939_v9 = vsel %vm18631_vm15, %v14888_v19, %v15090_v32  ;;  %v4942_v24 = vsel %vm18632_vm11, %v14934_v43, %v4772_v47  ;;  %v5025_v12 = vsel %vm18633_vm1, %v5023_v28, %v5024_v34  ;;  %v18639_v19 = vld [vmem:[#allocation28_spill] sm:$0xff]  ;;  %v18640_v32 = vld [vmem:[#allocation18_spill] sm:$0xff]  ;;  %vm18644_vm14 = vmmov %vm18614_vm0 }
 0x6bc   : > { %v5600_v7 = vpop.f32.mrf.mxu2  ;;  %v5530_v0 = vsel %vm18636_vm6, %v18635_v36, %v18634_v5  ;;  %v4955_v40 = vsel %vm18637_vm5, %v4939_v9, %v15064_v31  ;;  %v4969_v25 = vsel %vm18614_vm0, %v4953_v62, %v15041_v14  ;;  %v4958_v10 = vsel %vm18638_vm9, %v4942_v24, %v15202_v30  ;;  %v18643_v47 = vld [vmem:[#allocation22_spill] sm:$0xff]  ;;  %vm18645_vm2 = vmmov %vm18614_vm0  ;;  %v18647_v30 = vld [vmem:[#allocation52_spill] sm:$0xff] }
 0x6bd   : > { %v5532_v43 = vsel %vm18641_vm12, %v18640_v32, %v18639_v19  ;;  %v4971_v34 = vsel %vm18642_vm4, %v4955_v40, %v15151_v8  ;;  %v5567_v50 = vsel %vm18644_vm14, %v5551_v2, %v18643_v47  ;;  %v9531_v31 = vpop.eup %9530  ;;  %v15334_v15 = vmul.f32 %v15174_v22, %v5645_v29  ;;  %v18648_v8 = vld [vmem:[#allocation58_spill] sm:$0xff]  ;;  %vm18649_vm15 = vmmov %vm18628_vm3  ;;  %v18650_v5 = vld [vmem:[#allocation39_spill] sm:$0xff] }
 0x6be   : > { %v5548_v14 = vsel %vm18628_vm3, %v5532_v43, %v18646_v39  ;;  %v5633_v28 = vmul.f32 %v5600_v7, %v5567_v50  ;;  %vm6229_vm8 = vweird.f32 %v15226_v21  ;;  %v5546_v2 = vsel %vm18649_vm15, %v5530_v0, %v18648_v8  ;;  %vm18653_vm11 = vmmov %vm18633_vm1  ;;  %v15346_v7 = vpop.permute.xlu2 %4903  ;;  %v18654_v29 = vld [vmem:[#allocation51_spill] sm:$0xff] }
 0x6bf   : > { %v15336_v9 = vpop.eup %9532  ;;  %v5072_v24 = vadd.f32 %v5025_v12, %v4969_v25  ;;  %v18651_v36 = vrot.slane %v18650_v5, 5  ;;  %v18652_v40 = vrot.slane %v15216_v27, 5  ;;  %v6234_v22 = vand.u32 2147483648, %v15156_v52  ;;  %vm18655_vm1 = vmmov %vm18614_vm0  ;;  %v18675_v27 = vld [vmem:[#allocation102_spill] sm:$0xff] }
 0x6c0   : > { %v4900_v26 = vpop.permute.xlu1 %4899  ;;  %v5562_v19 = vsel %vm18655_vm1, %v5546_v2, %v18654_v29  ;;  %vm15357_vm6 = vmor %vm6198_vm13, %vm6199_vm7  ;;  %v6227_v12 = vadd.f32 %v15226_v21, %v6226_v38  ;;  %v15362_v25 = vadd.f32 1.0, %v9531_v31  ;;  %v6406_v31 = vmul.f32 %v15334_v15, %v15334_v15 }
 0x6c1   : > { %v4974_v23 = vsel %vm18645_vm2, %v4958_v10, %v4900_v26  ;;  %v5029_v10 = vsel %vm18653_vm11, %v18652_v40, %v18651_v36  ;;  %v15348_v26 = vpop.eup %9534  ;;  %v5628_v50 = vmul.f32 %v15076_v17, %v5562_v19  ;;  %vm18659_vm5 = vmmov %vm18614_vm0  ;;  %v6201_v52 = vsel %vm15357_vm6, %v15149_v45, %v15269_v4  ;;  %v18669_v36 = vld [vmem:[#allocation69_spill] sm:$0xff] }
 0x6c2   : > { %v5077_v62 = vadd.f32 %v18647_v30, %v4974_v23  ;;  %v5074_v32 = vadd.f32 %v5029_v10, %v4971_v34  ;;  %v9537_v0 = vpop.eup %9536  ;;  %v18658_v23 = vld [vmem:[#allocation79_spill] sm:$0xff]  ;;  %vm15371_vm0 = vmor %vm6228_vm10, %vm6229_vm8  ;;  %v6205_v30 = vor.u32 1.1754944e-38, %v6204_v55  ;;  %vm15390_vm7 = vcmp.eq.f32.partialorder %v6232_v1, 8.507059e+37  ;;  %v4840_v19 = vpop.permute.xlu0 %4839 }
 0x6c3   : > { %v5564_v34 = vsel %vm18659_vm5, %v5548_v14, %v18658_v23  ;;  %v6202_v14 = vand.u32 2147483647, %v15104_v60  ;;  %vm18664_vm10 = vmmov %vm18641_vm12  ;;  %v6231_v45 = vsel %vm15371_vm0, %v15226_v21, %v6227_v12  ;;  %9538 = vrcp.f32 %v15362_v25 }
 0x6c4   : > { %v5649_v43 = vadd.f32 %v5633_v28, %v5077_v62  ;;  %v5603_v47 = vpop.f32.mrf.mxu2  ;;  %v6254_v28 = vmul.f32 %v15336_v9, %v15271_v37  ;;  %v5630_v38 = vmul.f32 %v15133_v49, %v5564_v34  ;;  %v5644_v62 = vadd.f32 %v5628_v50, %v5072_v24  ;;  %vm18665_vm13 = vmmov %vm18628_vm3  ;;  %v18668_v24 = vld [vmem:[#allocation98_spill] sm:$0xff] }
 0x6c5   : > { %v6235_v49 = vor.u32 1.1754944e-38, %v6234_v22  ;;  %v15401_v60 = vadd.f32 1.0, %v9537_v0  ;;  %v6239_v4 = vmul.f32 %v15348_v26, %v15283_v63  ;;  %vm18666_vm9 = vmmov %vm18664_vm10  ;;  %vm6203_vm4 = vcmp.eq.f32.partialorder %v6202_v14, 8.507059e+37  ;;  %v18671_v22 = vld [vmem:[#allocation100_spill] sm:$0xff] }
 0x6c6   : > { %v15381_v17 = vmul.f32 %v15281_v46, %v5649_v43  ;;  %v4943_v46 = vsel %vm18664_vm10, %v14944_v33, %v15277_v3  ;;  %v5646_v2 = vadd.f32 %v5630_v38, %v5074_v32  ;;  %v6255_v1 = vsub.f32 1.0, %v6254_v28  ;;  %vm18667_vm12 = vmmov %vm18655_vm1  ;;  %v18673_v32 = vld [vmem:[#allocation57_spill] sm:$0xff]  ;;  %v18677_v38 = vld [vmem:[#allocation83_spill] sm:$0xff] }
 0x6c7   : > { %v4941_v33 = vsel %vm18666_vm9, %v14921_v54, %v15266_v57  ;;  %vm18670_vm14 = vmmov %vm18666_vm9  ;;  %v15414_v40 = vmul.f32 %v15168_v11, %v5644_v62  ;;  %v6206_v10 = vsel %vm6203_vm4, %v6205_v30, %v6201_v52  ;;  %v6236_v57 = vsel %vm15390_vm7, %v6235_v49, %v6231_v45 }
 0x6c8   : > { %v4838_v5 = vpop.permute.xlu1 %4837  ;;  %6423 = vadd.xlane.f32.xlu1 %v6406_v31  ;;  %v5536_v21 = vsel %vm18670_vm14, %v18669_v36, %v18668_v24  ;;  %vm18672_vm2 = vmmov %vm18628_vm3  ;;  %v15422_v54 = vmul.f32 %v15255_v16, %v5646_v2  ;;  %9540 = vrcp.f32 %v15401_v60  ;;  %v6240_v50 = vsub.f32 1.0, %v6239_v4  ;;  %v18678_v31 = vld [vmem:[#allocation60_spill] sm:$0xff] }
 0x6c9   : > { %v4959_v55 = vsel %vm18665_vm13, %v4943_v46, %v4838_v5  ;;  %v5552_v29 = vsel %vm18672_vm2, %v5536_v21, %v18671_v22  ;;  %vm18674_vm3 = vmmov %vm18672_vm2  ;;  %v6256_v23 = vmul.f32 %v15336_v9, %v6255_v1  ;;  %v6410_v16 = vmul.f32 %v15381_v17, %v15381_v17  ;;  %v15434_v39 = vpop.eup %9538  ;;  %v18684_v1 = vld [vmem:[#allocation32_spill] sm:$0xff]  ;;  %v18689_v21 = vld [vmem:[#allocation90_spill] sm:$0xff] }
 0x6ca   : > { %v4975_v3 = vsel %vm18667_vm12, %v4959_v55, %v4902_v59  ;;  %v4842_v59 = vpop.permute.xlu2 %4841  ;;  %v4957_v11 = vsel %vm18674_vm3, %v4941_v33, %v15196_v56  ;;  %vm18676_vm8 = vmmov %vm18655_vm1  ;;  %vm6258_vm15 = vweird.f32 %v15271_v37  ;;  %vm6259_vm11 = vweird.f32 %v15336_v9  ;;  %v4778_v36 = vpop.permute.xlu0 %4777 }
 0x6cb   : > { %v5078_v43 = vadd.f32 %v18673_v32, %v4975_v3  ;;  %v5568_v12 = vsel %vm18676_vm8, %v5552_v29, %v18675_v27  ;;  %v6262_v28 = vand.u32 2147483647, %v15271_v37  ;;  %v6405_v56 = vmul.f32 %v15414_v40, %v15414_v40  ;;  %vm18679_vm1 = vmmov %vm18666_vm9  ;;  %v18686_v3 = vld [vmem:[#allocation36_spill] sm:$0xff]  ;;  %v18691_v32 = vld [vmem:[#allocation93_spill] sm:$0xff] }
 0x6cc   : > { %v15419_v0 = vpop.f32.mrf.mxu2  ;;  %v5634_v34 = vmul.f32 %v5603_v47, %v5568_v12  ;;  %v5534_v52 = vsel %vm18679_vm1, %v18678_v31, %v18677_v38  ;;  %vm18680_vm6 = vmmov %vm18659_vm5  ;;  %v6407_v62 = vmul.f32 %v15422_v54, %v15422_v54  ;;  %v6377_v8 = vmul.f32 %v6206_v10, %v18578_v44 }
 0x6cd   : > { %v4973_v47 = vsel %vm18680_vm6, %v4957_v11, %v15139_v20  ;;  %v6379_v49 = vmul.f32 %v6236_v57, %v18581_v42  ;;  %vm6243_vm5 = vweird.f32 %v15283_v63  ;;  %v6264_v46 = vand.u32 2147483648, %v15271_v37  ;;  %vm18681_vm0 = vmmov %vm18679_vm1 }
 0x6ce   : > { %v5650_v14 = vadd.f32 %v5634_v34, %v5078_v43  ;;  %v6241_v2 = vmul.f32 %v15348_v26, %v6240_v50  ;;  %v6257_v5 = vadd.f32 %v15336_v9, %v6256_v23  ;;  %v6269_v20 = vmul.f32 %v15434_v39, %v15362_v25  ;;  %v15458_v55 = vpop.eup %9540  ;;  %vm15466_vm7 = vmor %vm6258_vm15, %vm6259_vm11  ;;  %v18692_v43 = vld [vmem:[#allocation107_spill] sm:$0xff] }
 0x6cf   : > { %v6247_v42 = vand.u32 2147483647, %v15283_v63  ;;  %v6249_v44 = vand.u32 2147483648, %v15283_v63  ;;  %vm18685_vm10 = vmmov %vm18672_vm2  ;;  %vm6244_vm13 = vweird.f32 %v15348_v26  ;;  %vm15474_vm9 = vcmp.eq.f32.partialorder %v6262_v28, 8.507059e+37  ;;  %v18696_v28 = vld [vmem:[#allocation94_spill] sm:$0xff]  ;;  %v18712_v63 = vld [vmem:[#allocation48_spill] sm:$0xff] }
 0x6d0   : > { %v4776_v30 = vpop.permute.xlu1 %4775  ;;  %6431 = vadd.xlane.f32.xlu1 %v6410_v16  ;;  %v5550_v33 = vsel %vm18685_vm10, %v5534_v52, %v18684_v1  ;;  %vm18690_vm12 = vmmov %vm18680_vm6  ;;  %v15480_v22 = vmul.f32 %v6379_v49, %v5650_v14  ;;  %v6265_v29 = vor.u32 1.1754944e-38, %v6264_v46  ;;  %v6242_v12 = vadd.f32 %v15348_v26, %v6241_v2  ;;  %v18695_v16 = vld [vmem:[#allocation97_spill] sm:$0xff]  ;;  %v18703_v49 = vld [vmem:[#allocation99_spill] sm:$0xff] }
 0x6d1   : > { %6421 = vadd.xlane.f32.xlu2 %v6405_v56  ;;  %v4944_v45 = vsel %vm18681_vm0, %v14954_v13, %v4776_v30  ;;  %v5076_v13 = vadd.f32 %v18686_v3, %v4973_v47  ;;  %v5566_v10 = vsel %vm18690_vm12, %v5550_v33, %v18689_v21  ;;  %vm18693_vm4 = vmmov %vm18681_vm0  ;;  %v6261_v50 = vsel %vm15466_vm7, %v15336_v9, %v6257_v5  ;;  %v18701_v47 = vld [vmem:[#allocation96_spill] sm:$0xff]  ;;  %v18711_v1 = vld [vmem:[#allocation85_spill] sm:$0xff] }
 0x6d2   : > { %6425 = vadd.xlane.f32.xlu0 %v6407_v62  ;;  %v5538_v57 = vsel %vm18693_vm4, %v18692_v43, %v18691_v32  ;;  %v5632_v11 = vmul.f32 %v15246_v53, %v5566_v10  ;;  %vm18694_vm14 = vmmov %vm18672_vm2  ;;  %v6270_v23 = vsub.f32 1.0, %v6269_v20  ;;  %v6284_v34 = vmul.f32 %v15458_v55, %v15401_v60  ;;  %v4780_v53 = vpop.permute.xlu2 %4779  ;;  %v18705_v2 = vld [vmem:[#allocation108_spill] sm:$0xff]  ;;  %v18713_v10 = vld [vmem:[#allocation91_spill] sm:$0xff] }
 0x6d3   : > { %v4960_v27 = vsel %vm18694_vm14, %v4944_v45, %v4840_v19  ;;  %vm18697_vm2 = vmmov %vm18681_vm0  ;;  %v6408_v19 = vmul.f32 %v15297_v61, %v15297_v61  ;;  %v6411_v62 = vmul.f32 %v15480_v22, %v15480_v22  ;;  %v6250_v45 = vor.u32 1.1754944e-38, %v6249_v44 }
 0x6d4   : > { %v5608_v37 = vpop.f32.mrf.mxu2  ;;  %v5537_v56 = vsel %vm18697_vm2, %v18696_v28, %v18695_v16  ;;  %vm18698_vm3 = vmmov %vm18681_vm0  ;;  %v5648_v31 = vadd.f32 %v5632_v11, %v5076_v13  ;;  %v6271_v13 = vmul.f32 %v15434_v39, %v6270_v23  ;;  %v6285_v21 = vsub.f32 1.0, %v6284_v34 }
 0x6d5   : > { %v4945_v38 = vsel %vm18698_vm3, %v14964_v48, %v4778_v36  ;;  %vm18699_vm8 = vmmov %vm18685_vm10  ;;  %v6266_v48 = vsel %vm15474_vm9, %v6265_v29, %v6261_v50  ;;  %vm15522_vm10 = vcmp.eq.f32.partialorder %v6247_v42, 8.507059e+37  ;;  %vm6274_vm9 = vweird.f32 %v15434_v39  ;;  %v4908_v50 = vpop.permute.xlu0 %4907 }
 0x6d6   : > { %v4961_v52 = vsel %vm18699_vm8, %v4945_v38, %v4842_v59  ;;  %vm18700_vm15 = vmmov %vm18680_vm6  ;;  %v15532_v36 = vmul.f32 %v6377_v8, %v5648_v31  ;;  %v6381_v42 = vmul.f32 %v6266_v48, %v18587_v41  ;;  %v6279_v43 = vand.u32 2147483648, %v15362_v25  ;;  %v18715_v41 = vld [vmem:[#allocation104_spill] sm:$0xff] }
 0x6d7   : > { %v4976_v9 = vsel %vm18700_vm15, %v4960_v27, %v15346_v7  ;;  %vm18702_vm11 = vmmov %vm18699_vm8  ;;  %v6286_v16 = vmul.f32 %v15458_v55, %v6285_v21  ;;  %vm6288_vm15 = vweird.f32 %v15401_v60  ;;  %v18728_v48 = vld [vmem:[#allocation56_spill] sm:$0xff] }
 0x6d8   : > { %v5554_v14 = vsel %vm18702_vm11, %v5538_v57, %v18701_v47  ;;  %v4906_v30 = vpop.permute.xlu1 %4905  ;;  %vm18704_vm1 = vmmov %vm18699_vm8  ;;  %v5079_v24 = vadd.f32 %v18712_v63, %v4976_v9  ;;  %v18716_v57 = vld [vmem:[#allocation101_spill] sm:$0xff]  ;;  %v6409_v23 = vmul.f32 %v15532_v36, %v15532_v36  ;;  %v18724_v9 = vld [vmem:[#allocation106_spill] sm:$0xff]  ;;  %vm6289_vm11 = vweird.f32 %v15458_v55 }
 0x6d9   : > { %v5553_v46 = vsel %vm18704_vm1, %v5537_v56, %v18703_v49  ;;  %v5570_v5 = vsel %vm18680_vm6, %v5554_v14, %v18705_v2  ;;  %vm18706_vm0 = vmmov %vm18680_vm6  ;;  %6427 = vadd.xlane.f32.xlu2 %v6408_v19  ;;  %v6287_v2 = vadd.f32 %v15458_v55, %v6286_v16 }
 0x6da   : > { %v4977_v59 = vsel %vm18706_vm0, %v4961_v52, %v4906_v30  ;;  %vm15518_vm7 = vmor %vm6243_vm5, %vm6244_vm13  ;;  %v5636_v4 = vmul.f32 %v5608_v37, %v5570_v5  ;;  %6433 = vadd.xlane.f32.xlu0 %v6411_v62  ;;  %vm6273_vm13 = vweird.f32 %v15362_v25  ;;  %v4910_v14 = vpop.permute.xlu2 %4909  ;;  %v6280_v62 = vor.u32 1.1754944e-38, %v6279_v43  ;;  %v18740_v43 = vld [vmem:[#allocation115_spill] sm:$0xff] }
 0x6db   : > { %v5080_v33 = vadd.f32 %v18711_v1, %v4977_v59  ;;  %v6246_v3 = vsel %vm15518_vm7, %v15348_v26, %v6242_v12  ;;  %vm18714_vm5 = vmmov %vm18706_vm0  ;;  %v6277_v26 = vand.u32 2147483647, %v15362_v25  ;;  %v6272_v12 = vadd.f32 %v15434_v39, %v6271_v13  ;;  %v18720_v25 = vld [vmem:[#allocation65_spill] sm:$0xff] }
 0x6dc   : > { %v5569_v44 = vsel %vm18714_vm5, %v5553_v46, %v18713_v10  ;;  %v5610_v29 = vpop.f32.mrf.mxu2  ;;  %v6251_v8 = vsel %vm15522_vm10, %v6250_v45, %v6246_v3  ;;  %vm18717_vm12 = vmmov %vm18697_vm2  ;;  %v8522_v28 = vmul.f32 -1.442695, %v18720_v25  ;;  %v6292_v5 = vand.u32 2147483647, %v15401_v60  ;;  %v18729_v59 = vld [vmem:[#allocation105_spill] sm:$0xff]  ;;  %v18735_v10 = vld [vmem:[#allocation139_spill] sm:$0xff] }
 0x6dd   : > { %v5652_v37 = vadd.f32 %v5636_v4, %v5080_v33  ;;  %v5635_v32 = vmul.f32 %v15419_v0, %v5569_v44  ;;  %v5539_v11 = vsel %vm18717_vm12, %v18716_v57, %v18715_v41  ;;  %vm15552_vm4 = vmor %vm6273_vm13, %vm6274_vm9  ;;  %v6380_v31 = vmul.f32 %v6251_v8, %v18586_v6  ;;  %v4846_v33 = vpop.permute.xlu0 %4845  ;;  %v18751_v45 = vld [vmem:[#allocation80_spill] sm:$0xff] }
 0x6de   : > { %vm18721_vm14 = vmmov %vm18697_vm2  ;;  %vm15563_vm2 = vcmp.eq.f32.partialorder %v6277_v26, 8.507059e+37  ;;  %v6276_v6 = vsel %vm15552_vm4, %v15434_v39, %v6272_v12  ;;  %9542 = vpow2.f32 %v8522_v28  ;;  %vm6293_vm7 = vcmp.eq.f32.partialorder %v6292_v5, 8.507059e+37 }
 0x6df   : > { %v15547_v27 = vmul.f32 %v6381_v42, %v5652_v37  ;;  %v5651_v34 = vadd.f32 %v5635_v32, %v5079_v24  ;;  %v4946_v56 = vsel %vm18721_vm14, %v14978_v18, %v4780_v53  ;;  %vm18725_vm3 = vmmov %vm18704_vm1  ;;  %v6294_v53 = vand.u32 2147483648, %v15401_v60  ;;  %v18733_v42 = vld [vmem:[#allocation109_spill] sm:$0xff] }
 0x6e0   : > { %v4844_v38 = vpop.permute.xlu1 %4843  ;;  %v5555_v47 = vsel %vm18725_vm3, %v5539_v11, %v18724_v9  ;;  %vm18726_vm8 = vmmov %vm18704_vm1  ;;  %v6281_v4 = vsel %vm15563_vm2, %v6280_v62, %v6276_v6  ;;  %v18744_v11 = vld [vmem:[#allocation111_spill] sm:$0xff] }
 0x6e1   : > { %v6413_v19 = vmul.f32 %v15547_v27, %v15547_v27  ;;  %v4962_v30 = vsel %vm18726_vm8, %v4946_v56, %v4844_v38  ;;  %6429 = vadd.xlane.f32.xlu2 %v6409_v23  ;;  %vm18727_vm1 = vmmov %vm18706_vm0  ;;  %v15578_v46 = vmul.f32 %v6380_v31, %v5651_v34  ;;  %v6295_v1 = vor.u32 1.1754944e-38, %v6294_v53  ;;  %v18745_v23 = vld [vmem:[#allocation63_spill] sm:$0xff] }
 0x6e2   : > { %v4978_v18 = vsel %vm18727_vm1, %v4962_v30, %v4908_v50  ;;  %vm18730_vm6 = vmmov %vm18706_vm0  ;;  %v6382_v24 = vmul.f32 %v6281_v4, %v18615_v35  ;;  %v18752_v4 = vld [vmem:[#allocation122_spill] sm:$0xff] }
 0x6e3   : > { %6437 = vadd.xlane.f32.xlu1 %v6413_v19  ;;  %v5081_v49 = vadd.f32 %v18728_v48, %v4978_v18  ;;  %v5571_v7 = vsel %vm18730_vm6, %v5555_v47, %v18729_v59  ;;  %vm15584_vm0 = vmor %vm6288_vm15, %vm6289_vm11  ;;  %v6412_v13 = vmul.f32 %v15578_v46, %v15578_v46  ;;  %v18747_v18 = vld [vmem:[#allocation146_spill] sm:$0xff] }
 0x6e4   : > { %v5613_v20 = vpop.f32.mrf.mxu2  ;;  %v5637_v39 = vmul.f32 %v5610_v29, %v5571_v7  ;;  %v6291_v60 = vsel %vm15584_vm0, %v15458_v55, %v6287_v2  ;;  %vm18734_vm10 = vmmov %vm18717_vm12  ;;  %v9543_v37 = vpop.eup %9542  ;;  %v18737_v29 = vld [vmem:[#allocation113_spill] sm:$0xff] }
 0x6e5   : > { %v5540_v21 = vsel %vm18734_vm10, %v18733_v42, %v14684_v58  ;;  %vm18736_vm5 = vmmov %vm18734_vm10  ;;  %v6296_v8 = vsel %vm6293_vm7, %v6295_v1, %v6291_v60  ;;  %v15604_v55 = vpop.permute.xlu2 %4847  ;;  %v18743_v58 = vld [vmem:[#allocation103_spill] sm:$0xff]  ;;  %v6129_v0 = vadd.f32 1.0, %v9543_v37  ;;  %v15623_v9 = vpop.permute.xlu0 %4783  ;;  %v18753_v1 = vld [vmem:[#allocation116_spill] sm:$0xff] }
 0x6e6   : > { %v5653_v3 = vadd.f32 %v5637_v39, %v5081_v49  ;;  %vm18738_vm13 = vmmov %vm18725_vm3  ;;  %v5215_v12 = vsub.f32 %v18744_v11, %v18743_v58  ;;  %v6383_v16 = vmul.f32 %v6296_v8, %v18621_v51  ;;  %v18746_v51 = vld [vmem:[#allocation72_spill] sm:$0xff]  ;;  %v18749_v49 = vld [vmem:[#allocation95_spill] sm:$0xff]  ;;  %v5214_v39 = vsub.f32 %v18744_v11, %v18751_v45 }
 0x6e7   : > { %v5556_v26 = vsel %vm18738_vm13, %v5540_v21, %v18737_v29  ;;  %vm18739_vm9 = vmmov %vm18725_vm3  ;;  %9544 = vrcp.f32 %v6129_v0  ;;  %v5213_v2 = vsub.f32 %v18744_v11, %v18749_v49  ;;  %v18756_v60 = vld [vmem:[#allocation84_spill] sm:$0xff]  ;;  %vm6318_vm15 = vweird.f32 %v6129_v0 }
 0x6e8   : > { %v4782_v63 = vpop.permute.xlu1 %4781  ;;  %vm18741_vm12 = vmmov %vm18727_vm1  ;;  %v15609_v57 = vmul.f32 %v6382_v24, %v5653_v3  ;;  %v5240_v19 = vmul.f32 1.442695, %v5215_v12  ;;  %v6324_v8 = vand.u32 2147483648, %v6129_v0 }
 0x6e9   : > { %v4947_v44 = vsel %vm18736_vm5, %v18735_v10, %v4782_v63  ;;  %6435 = vadd.xlane.f32.xlu2 %v6412_v13  ;;  %v5572_v35 = vsel %vm18741_vm12, %v5556_v26, %v18740_v43  ;;  %vm18742_vm4 = vmmov %vm18727_vm1  ;;  %v5236_v24 = vmul.f32 1.442695, %v5213_v2  ;;  %v5238_v10 = vmul.f32 1.442695, %v5214_v39 }
 0x6ea   : > { %v4963_v32 = vsel %vm18739_vm9, %v4947_v44, %v4846_v33  ;;  %v5638_v50 = vmul.f32 %v5613_v20, %v5572_v35  ;;  %v6414_v38 = vmul.f32 %v15609_v57, %v15609_v57  ;;  %9546 = vpow2.f32 %v5240_v19  ;;  %vm18748_vm14 = vmmov %vm18736_vm5  ;;  %v8723_v44 = vld [vmem:[%s17519_s10 + $0x38] sm:$0xff]  ;;  %v18760_v19 = vld [vmem:[#allocation73_spill] sm:$0xff] }
 0x6eb   : > { %v4979_v41 = vsel %vm18742_vm4, %v4963_v32, %v4910_v14  ;;  %v8521_v14 = vmul.f32 -1.442695, %v18746_v51  ;;  %vm18750_vm2 = vmmov %vm18725_vm3  ;;  %6760 = vmatpush.bf16.msra.mxu0 %v8723_v44  ;;  %v18757_v32 = vmov 33   ;;  %v6322_v35 = vand.u32 2147483647, %v6129_v0  ;;  %v18774_v44 = vld [vmem:[#allocation110_spill] sm:$0xff] }
 0x6ec   : > { %v5082_v34 = vadd.f32 %v18745_v23, %v4979_v41  ;;  %v15615_v28 = vpop.f32.mrf.mxu2  ;;  %vm18754_vm3 = vmmov %vm18727_vm1  ;;  %v6325_v12 = vor.u32 1.1754944e-38, %v6324_v8  ;;  %v18758_v23 = vld [vmem:[#allocation29_spill] sm:$0xff] }
 0x6ed   : > { %v4786_v30 = vpop.permute.xlu2 %4785  ;;  %v9545_v62 = vpop.eup %9544  ;;  %9548 = vpow2.f32 %v8521_v14  ;;  %v5574_v33 = vsel %vm18754_vm3, %v18753_v1, %v18752_v4  ;;  %vm18755_vm8 = vmmov %vm18727_vm1  ;;  %vm6323_vm6 = vcmp.eq.f32.partialorder %v6322_v35, 8.507059e+37 }
 0x6ee   : > { %v5654_v56 = vadd.f32 %v5638_v50, %v5082_v34  ;;  %v4949_v6 = vsel %vm18748_vm14, %v18747_v18, %v4786_v30  ;;  %v4914_v5 = vpop.permute.xlu0 %4913  ;;  %v6314_v20 = vmul.f32 %v9545_v62, %v6129_v0  ;;  %9550 = vpow2.f32 %v5236_v24  ;;  %v8722_v0 = vld [vmem:[%s17519_s10 + $0x30] sm:$0xff]  ;;  %vm18763_vm10 = vmmov %vm18736_vm5 }
 0x6ef   : > { %9552 = vpow2.f32 %v5238_v10  ;;  %vm6319_vm11 = vweird.f32 %v9545_v62  ;;  %v5210_v34 = vsub.f32 %v18744_v11, %v18758_v23  ;;  %6761 = vmatpush.bf16.msra.mxu0 %v8722_v0  ;;  %vm18764_vm5 = vmmov %vm18750_vm2  ;;  %v9854_v10 = vmov 128.0  }
 0x6f0   : > { %v15619_v31 = vpop.permute.xlu1 %4911  ;;  %v15621_v52 = vmul.f32 %v6383_v16, %v5654_v56  ;;  %v15633_v7 = vpop.eup %9546  ;;  %v6315_v21 = vsub.f32 1.0, %v6314_v20  ;;  %vm6320_vm1 = vmor %vm6318_vm15, %vm6319_vm11  ;;  %v18759_v16 = vmov 35  }
 0x6f1   : > { %6439 = vadd.xlane.f32.xlu2 %v6414_v38  ;;  %v5230_v14 = vmul.f32 1.442695, %v5210_v34  ;;  %vm18769_vm9 = vmmov %vm18763_vm10 }
 0x6f2   : > { %v6415_v47 = vmul.f32 %v15621_v52, %v15621_v52  ;;  %v6316_v29 = vmul.f32 %v9545_v62, %v6315_v21  ;;  %vm18770_vm12 = vmmov %vm18754_vm3 }
 0x6f3   : > { %v9549_v37 = vpop.eup %9548  ;;  %vm18772_vm4 = vmmov %vm18750_vm2 }
 0x6f4   : > { %6441 = vadd.xlane.f32.xlu0 %v6415_v47  ;;  %v5618_v53 = vpop.f32.mrf.mxu2  ;;  %v6128_v26 = vadd.f32 1.0, %v9549_v37  ;;  %v6317_v43 = vadd.f32 %v9545_v62, %v6316_v29  ;;  %v15648_v41 = vpop.eup %9550  ;;  %v8523_v47 = vmul.f32 -1.442695, %v18760_v19  ;;  %v18776_v29 = vmov 32   ;;  %vm18782_vm11 = vmmov %vm18772_vm4 }
 0x6f5   : > { %v5640_v13 = vmul.f32 %v5618_v53, %v5574_v33  ;;  %v15650_v58 = vpop.eup %9552  ;;  %v18767_v33 = vld [vmem:[#allocation119_spill] sm:$0xff] }
 0x6f6   : > { %9554 = vrcp.f32 %v6128_v26  ;;  %v6321_v50 = vsel %vm6320_vm1, %v9545_v62, %v6317_v43  ;;  %v18761_v62 = vmov 34   ;;  %vm6303_vm0 = vweird.f32 %v6128_v26  ;;  %v18778_v43 = vld [vmem:[#allocation46_spill] sm:$0xff] }
 0x6f7   : > { %v6326_v38 = vsel %vm6323_vm6, %v6325_v12, %v6321_v50  ;;  %9556 = vpow2.f32 %v8523_v47  ;;  %v6307_v39 = vand.u32 2147483647, %v6128_v26  ;;  %v5209_v35 = vsub.f32 %v18744_v11, %v18778_v43 }
 0x6f8   : > { %v4850_v48 = vpop.permute.xlu1 %4849  ;;  %v6385_v18 = vmul.f32 %v6326_v38, %v18720_v25  ;;  %9558 = vpow2.f32 %v5230_v14  ;;  %v4916_v14 = vpop.permute.xlu2 %4915 }
 0x6f9   : > { %v4965_v59 = vsel %vm18750_vm2, %v4949_v6, %v4850_v48  ;;  %vm6308_vm14 = vcmp.eq.f32.partialorder %v6307_v39, 8.507059e+37  ;;  %vm18775_vm2 = vmmov %vm18754_vm3 }
 0x6fa   : > { %v4981_v3 = vsel %vm18755_vm8, %v4965_v59, %v4914_v5  ;;  %v6309_v5 = vand.u32 2147483648, %v6128_v26  ;;  %v18762_v59 = vld [vmem:[#allocation142_spill] sm:$0xff]  ;;  %vm18781_vm3 = vmmov %vm18769_vm9 }
 0x6fb   : > { %v5084_v63 = vadd.f32 %v18756_v60, %v4981_v3  ;;  %v4948_v20 = vsel %vm18763_vm10, %v18762_v59, %v15623_v9  ;;  %v18768_v3 = vld [vmem:[#allocation118_spill] sm:$0xff]  ;;  %v18771_v9 = vld [vmem:[#allocation121_spill] sm:$0xff]  ;;  %v18780_v59 = vld [vmem:[#allocation19_spill] sm:$0xff] }
 0x6fc   : > { %5707 = vperm.xlu1 %9048, %v15633_v7   ;;  %v9555_v56 = vpop.eup %9554  ;;  %v4964_v4 = vsel %vm18764_vm5, %v4948_v20, %v15604_v55  ;;  %vm18787_vm6 = vmmov %vm18781_vm3 }
 0x6fd   : > { %v5656_v42 = vadd.f32 %v5640_v13, %v5084_v63  ;;  %v6299_v30 = vmul.f32 %v9555_v56, %v6128_v26  ;;  %v9557_v48 = vpop.eup %9556  ;;  %vm6304_vm7 = vweird.f32 %v9555_v56  ;;  %v5541_v13 = vsel %vm18769_vm9, %v18768_v3, %v18767_v33  ;;  %v18777_v26 = vld [vmem:[#allocation123_spill] sm:$0xff]  ;;  %vm18790_vm5 = vmmov %vm18772_vm4 }
 0x6fe   : > { %v15668_v49 = vpop.eup %9558  ;;  %v15671_v25 = vadd.f32 1.0, %v9557_v48  ;;  %vm15680_vm13 = vmor %vm6303_vm0, %vm6304_vm7  ;;  %v4980_v60 = vsel %vm18770_vm12, %v4964_v4, %v15619_v31  ;;  %v6310_v63 = vor.u32 1.1754944e-38, %v6309_v5 }
 0x6ff   : > { %v15666_v6 = vmul.f32 %v6385_v18, %v5656_v42  ;;  %v6300_v53 = vsub.f32 1.0, %v6299_v30  ;;  %v18773_v42 = vld [vmem:[#allocation61_spill] sm:$0xff]  ;;  %v4852_v18 = vpop.permute.xlu0 %4851  ;;  %vm18788_vm0 = vmmov %vm18775_vm2 }
 0x700   : > { %9560 = vrcp.f32 %v15671_v25  ;;  %v4788_v24 = vpop.permute.xlu1 %4787  ;;  %v5083_v21 = vadd.f32 %v18773_v42, %v4980_v60  ;;  %vm6333_vm8 = vweird.f32 %v15671_v25  ;;  %v6339_v4 = vand.u32 2147483648, %v15671_v25  ;;  %v18785_v42 = vld [vmem:[#allocation114_spill] sm:$0xff] }
 0x701   : > { %v6301_v2 = vmul.f32 %v9555_v56, %v6300_v53  ;;  %9562 = vrcp.f32 %v9854_v10  ;;  %v4950_v20 = vsel %vm18781_vm3, %v18780_v59, %v4788_v24  ;;  %v6337_v33 = vand.u32 2147483647, %v15671_v25  ;;  %v8721_v24 = vld [vmem:[%s17519_s10 + $0x28] sm:$0xff] }
 0x702   : > { %v4966_v3 = vsel %vm18782_vm11, %v4950_v20, %v4852_v18  ;;  %6762 = vmatpush.bf16.msra.mxu0 %v8721_v24  ;;  %v18794_v18 = vld [vmem:[#allocation125_spill] sm:$0xff] }
 0x703   : > { %v6302_v45 = vadd.f32 %v9555_v56, %v6301_v2  ;;  %v18779_v2 = vld [vmem:[#allocation47_spill] sm:$0xff]  ;;  %vm6338_vm10 = vcmp.eq.f32.partialorder %v6337_v33, 8.507059e+37 }
 0x704   : > { %9050 = vset.pattern.permute.xlu1 %v18757_v32 }
 0x705   : > { %5777 = vperm.xlu1 %9050, %v15633_v7   ;;  %v6306_v55 = vsel %vm15680_vm13, %v9555_v56, %v6302_v45  ;;  %v5228_v56 = vmul.f32 1.442695, %v5209_v35  ;;  %v18791_v35 = vld [vmem:[#allocation14_spill] sm:$0xff]  ;;  %vm18793_vm13 = vmmov %vm18788_vm0 }
 0x706   : > { %v6311_v8 = vsel %vm6308_vm14, %v6310_v63, %v6306_v55  ;;  %v9561_v12 = vpop.eup %9560  ;;  %v6417_v63 = vmul.f32 %v15666_v6, %v15666_v6  ;;  %v6340_v55 = vor.u32 1.1754944e-38, %v6339_v4 }
 0x707   : > { %v9563_v23 = vpop.eup %9562  ;;  %v6384_v34 = vmul.f32 %v6311_v8, %v18746_v51  ;;  %v6329_v0 = vmul.f32 %v9561_v12, %v15671_v25  ;;  %9564 = vpow2.f32 %v5228_v56  ;;  %v8524_v51 = vmul.f32 -1.442695, %v18779_v2  ;;  %v18789_v8 = vld [vmem:[#allocation120_spill] sm:$0xff] }
 0x708   : > { %5897 = vperm.xlu0 %9038, %v15648_v41   ;;  %v15707_v47 = vpop.permute.xlu1 %4917  ;;  %vm6334_vm15 = vweird.f32 %v9561_v12  ;;  %vm6458_vm7 = vweird.f32 %v9563_v23  ;;  %v18792_v56 = vld [vmem:[#allocation124_spill] sm:$0xff] }
 0x709   : > { %5773 = vperm.xlu2 %9049, %v15650_v58   ;;  %v6330_v30 = vsub.f32 1.0, %v6329_v0  ;;  %9566 = vpow2.f32 %v8524_v51  ;;  %vm15726_vm1 = vmor %vm6333_vm8, %vm6334_vm15 }
 0x70b   : > { %v6331_v5 = vmul.f32 %v9561_v12, %v6330_v30 }
 0x70d   : > { %9052 = vset.pattern.permute.xlu1 %v18759_v16  ;;  %v15715_v45 = vpop.eup %9564  ;;  %v6332_v1 = vadd.f32 %v9561_v12, %v6331_v5 }
 0x710   : > { %9060 = vset.pattern.permute.xlu0 %v18761_v62 }
 0x711   : > { %5841 = vperm.xlu0 %9060, %v15633_v7   ;;  %9051 = vset.pattern.permute.xlu2 %v18761_v62 }
 0x712   : > { %5837 = vperm.xlu2 %9051, %v15650_v58   ;;  %v15724_v60 = vpop.permute.xlu0 %4789 }
 0x719   : > { %5821 = vperm.xlu0 %9060, %v15668_v49  }
 0x71a   : > { %9053 = vset.pattern.permute.xlu2 %v18759_v16  ;;  %v15760_v59 = vpop.permute.xlu0 %4919 }
 0x71b   : > { %5905 = vperm.xlu2 %9053, %v15633_v7   ;;  %v5557_v7 = vsel %vm18772_vm4, %v5541_v13, %v18771_v9  ;;  %v15722_v13 = vpop.permute.xlu1 %4855  ;;  %vm18799_vm4 = vmmov %vm18781_vm3 }
 0x71c   : > { %v5573_v37 = vsel %vm18775_vm2, %v5557_v7, %v18774_v44  ;;  %v15730_v7 = vpop.permute.xlu2 %4853  ;;  %v4982_v44 = vsel %vm18788_vm0, %v4966_v3, %v4916_v14  ;;  %v18796_v3 = vld [vmem:[#allocation112_spill] sm:$0xff]  ;;  %vm18802_vm3 = vmmov %vm18790_vm5 }
 0x71d   : > { %v5639_v31 = vmul.f32 %v15615_v28, %v5573_v37  ;;  %v6454_v28 = vmul.f32 128.0, %v9563_v23  ;;  %v6336_v37 = vsel %vm15726_vm1, %v9561_v12, %v6332_v1 }
 0x71e   : > { %v6341_v0 = vsel %vm6338_vm10, %v6340_v55, %v6336_v37 }
 0x71f   : > { %v5655_v50 = vadd.f32 %v5639_v31, %v5083_v21  ;;  %v6455_v48 = vsub.f32 1.0, %v6454_v28  ;;  %v18786_v21 = vld [vmem:[#allocation117_spill] sm:$0xff]  ;;  %v9567_v31 = vpop.eup %9566  ;;  %v6386_v5 = vmul.f32 %v6341_v0, %v18760_v19 }
 0x720   : > { %v5543_v10 = vsel %vm18787_vm6, %v18786_v21, %v18785_v42  ;;  %v15751_v14 = vadd.f32 1.0, %v9567_v31  ;;  %vm18809_vm6 = vmmov %vm18799_vm4 }
 0x721   : > { %9065 = vset.pattern.permute.xlu0 %v18776_v29  ;;  %v15705_v38 = vmul.f32 %v6384_v34, %v5655_v50  ;;  %v6456_v39 = vmul.f32 %v9563_v23, %v6455_v48  ;;  %v5559_v43 = vsel %vm18790_vm5, %v5543_v10, %v18789_v8  ;;  %v5085_v50 = vadd.f32 %v18791_v35, %v4982_v44 }
 0x722   : > { %5727 = vperm.xlu0 %9065, %v18777_v26   ;;  %v5620_v26 = vpop.f32.mrf.mxu2  ;;  %v5575_v28 = vsel %vm18793_vm13, %v5559_v43, %v18792_v56  ;;  %9568 = vrcp.f32 %v15751_v14  ;;  %v18797_v43 = vld [vmem:[#allocation59_spill] sm:$0xff]  ;;  %vm6348_vm9 = vweird.f32 %v15751_v14  ;;  %vm18814_vm13 = vmmov %vm18788_vm0 }
 0x723   : > { %9055 = vset.pattern.permute.xlu2 %v18776_v29  ;;  %v6416_v53 = vmul.f32 %v15705_v38, %v15705_v38  ;;  %v6457_v25 = vadd.f32 %v9563_v23, %v6456_v39  ;;  %v5641_v30 = vmul.f32 %v5620_v26, %v5575_v28  ;;  %v8720_v39 = vld [vmem:[%s17519_s10 + $0x20] sm:$0xff]  ;;  %v8525_v35 = vmul.f32 -1.442695, %v18797_v43 }
 0x724   : > { %v15756_v51 = vpop.permute.xlu2 %4791  ;;  %6763 = vmatpush.bf16.msra.mxu0 %v8720_v39  ;;  %v6352_v39 = vand.u32 2147483647, %v15751_v14 }
 0x725   : > { %v15746_v34 = vsel %vm6458_vm7, %v9563_v23, %v6457_v25  ;;  %v5657_v20 = vadd.f32 %v5641_v30, %v5085_v50  ;;  %v8718_v30 = vld [vmem:[%s17519_s10 + $0x10] sm:$0xff]  ;;  %vm18811_vm7 = vmmov %vm18802_vm3 }
 0x726   : > { %vm15838_vm15 = vcmp.eq.f32.partialorder %v6352_v39, 8.507059e+37 }
 0x727   : > { %v15768_v1 = vmul.f32 %v6386_v5, %v5657_v20 }
 0x728   : > { %v15777_v24 = vpop.eup %9568 }
 0x729   : > { %v6418_v19 = vmul.f32 %v15768_v1, %v15768_v1  ;;  %v6344_v37 = vmul.f32 %v15777_v24, %v15751_v14  ;;  %vm6349_vm12 = vweird.f32 %v15777_v24 }
 0x72a   : > { %5702 = vperm.xlu0 %9065, %v15650_v58   ;;  %vm15831_vm2 = vmor %vm6348_vm9, %vm6349_vm12 }
 0x72b   : > { %v6345_v0 = vsub.f32 1.0, %v6344_v37 }
 0x72d   : > { %v6346_v20 = vmul.f32 %v15777_v24, %v6345_v0 }
 0x72f   : > { %6443 = vadd.xlane.f32.xlu1 %v6416_v53  ;;  %v18795_v53 = vld [vmem:[#allocation11_spill] sm:$0xff] }
 0x730   : > { %v5212_v48 = vsub.f32 %v18744_v11, %v18795_v53 }
 0x732   : > { %5677 = vperm.xlu0 %9065, %v15715_v45   ;;  %v5234_v33 = vmul.f32 1.442695, %v5212_v48 }
 0x737   : > { %6445 = vadd.xlane.f32.xlu1 %v6417_v63  ;;  %v8719_v63 = vld [vmem:[%s17519_s10 + $0x18] sm:$0xff] }
 0x738   : > { %6764 = vmatpush.bf16.msra.mxu0 %v8719_v63 }
 0x73a   : > { %9070 = vset.pattern.permute.xlu0 %v18757_v32 }
 0x73b   : > { %v6424_v12 = vpop.xlane.xlu1 %6423  ;;  %5797 = vperm.xlu0 %9070, %v18794_v18  }
 0x73c   : > { %v6461_v23 = vmul.f32 %v15746_v34, %v6424_v12  ;;  %6765 = vmatpush.bf16.msra.mxu0 %v8718_v30 }
 0x73e   : > { %v15765_v4 = vadd.f32 1e-05, %v6461_v23  ;;  %v8717_v23 = vld [vmem:[%s17519_s10 + $0x8] sm:$0xff] }
 0x740   : > { %9570 = vrsqrt.f32 %v15765_v4  ;;  %6766 = vmatpush.bf16.msra.mxu0 %v8717_v23  ;;  %vm6508_vm8 = vweird.f32 %v15765_v4  ;;  %v18807_v23 = vld [vmem:[#allocation35_spill] sm:$0xff] }
 0x741   : > { %9572 = vpow2.f32 %v5234_v33  ;;  %v6354_v33 = vand.u32 2147483648, %v15751_v14 }
 0x743   : > { %5785 = vperm.xlu0 %9070, %v18796_v3   ;;  %v6432_v18 = vpop.xlane.xlu1 %6431  ;;  %v18798_v3 = vld [vmem:[#allocation71_spill] sm:$0xff] }
 0x744   : > { %v6422_v9 = vpop.xlane.xlu2 %6421  ;;  %6447 = vadd.xlane.f32.xlu2 %v6418_v19 }
 0x745   : > { %v6460_v25 = vmul.f32 %v15746_v34, %v6422_v9  ;;  %v6426_v55 = vpop.xlane.xlu0 %6425  ;;  %v6465_v9 = vmul.f32 %v15746_v34, %v6432_v18 }
 0x746   : > { %v15780_v42 = vpop.eup %9570  ;;  %v6462_v21 = vmul.f32 %v15746_v34, %v6426_v55 }
 0x747   : > { %v6503_v10 = vmul.f32 %v15780_v42, %v15765_v4  ;;  %v15785_v44 = vadd.f32 1e-05, %v6460_v25  ;;  %v15793_v8 = vpop.eup %9572  ;;  %vm6509_vm14 = vweird.f32 %v15780_v42 }
 0x748   : > { %v15789_v31 = vadd.f32 1e-05, %v6462_v21  ;;  %v8716_v21 = vld [vmem:[%s17519_s10] sm:$0xff]  ;;  %vm15844_vm11 = vmor %vm6508_vm8, %vm6509_vm14 }
 0x749   : > { %v6504_v26 = vmul.f32 %v15780_v42, %v6503_v10  ;;  %9574 = vrsqrt.f32 %v15785_v44  ;;  %6767 = vmatpush.bf16.msra.mxu0 %v8716_v21  ;;  %vm6498_vm10 = vweird.f32 %v15785_v44  ;;  %v18812_v21 = vld [vmem:[#allocation10_spill] sm:$0xff] }
 0x74a   : > { %9576 = vrsqrt.f32 %v15789_v31 }
 0x74b   : > { %v6505_v50 = vmul.f32 0.5, %v6504_v26  ;;  %5765 = vperm.xlu0 %9070, %v15793_v8   ;;  %9578 = vpow2.f32 %v8525_v35 }
 0x74c   : > { %v6428_v56 = vpop.xlane.xlu2 %6427 }
 0x74d   : > { %v6463_v28 = vmul.f32 %v15746_v34, %v6428_v56  ;;  %v6506_v12 = vsub.f32 1.5, %v6505_v50  ;;  %v6355_v56 = vor.u32 1.1754944e-38, %v6354_v33 }
 0x74f   : > { %v9575_v53 = vpop.eup %9574  ;;  %v15803_v48 = vadd.f32 1e-05, %v6463_v28  ;;  %v6507_v63 = vmul.f32 %v15780_v42, %v6506_v12  ;;  %v15848_v28 = vadd.f32 1e-05, %v6465_v9 }
 0x750   : > { %5901 = vperm.xlu1 %9052, %v15650_v58   ;;  %v15809_v5 = vpop.eup %9576  ;;  %v6493_v19 = vmul.f32 %v9575_v53, %v15785_v44  ;;  %v4951_v58 = vsel %vm18799_vm4, %v18798_v3, %v15724_v60  ;;  %v6347_v60 = vadd.f32 %v15777_v24, %v6346_v20  ;;  %vm6499_vm1 = vweird.f32 %v9575_v53  ;;  %v18808_v20 = vld [vmem:[#allocation127_spill] sm:$0xff] }
 0x751   : > { %v6513_v55 = vmul.f32 %v15809_v5, %v15789_v31  ;;  %9580 = vrsqrt.f32 %v15803_v48  ;;  %v9579_v10 = vpop.eup %9578  ;;  %v4967_v26 = vsel %vm18802_vm3, %v4951_v58, %v15730_v7  ;;  %v6511_v7 = vsel %vm15844_vm11, %v15780_v42, %v6507_v63  ;;  %v18810_v58 = vld [vmem:[#allocation21_spill] sm:$0xff]  ;;  %vm6500_vm5 = vmor %vm6498_vm10, %vm6499_vm1 }
 0x752   : > { %v6494_v25 = vmul.f32 %v9575_v53, %v6493_v19  ;;  %v15855_v18 = vadd.f32 1.0, %v9579_v10  ;;  %v5544_v39 = vsel %vm18809_vm6, %v18808_v20, %v18807_v23  ;;  %v4983_v33 = vsel %vm18788_vm0, %v4967_v26, %v15707_v47  ;;  %v15874_v47 = vld [vmem:[%s17518_s9] ss:$0 sm:$0xff]  ;;  %vm18816_vm1 = vmmov %vm18809_vm6 }
 0x753   : > { %v6514_v12 = vmul.f32 %v15809_v5, %v6513_v55  ;;  %v6351_v42 = vsel %vm15831_vm2, %v15777_v24, %v6347_v60  ;;  %v5560_v9 = vsel %vm18811_vm7, %v5544_v39, %v18810_v58  ;;  %v6653_v55 = vmul.f32 %v6511_v7, %v15334_v15  ;;  %v18813_v26 = vld [vmem:[#allocation147_spill] sm:$0xff]  ;;  %vm18821_vm10 = vmmov %vm18816_vm1 }
 0x754   : > { %v6495_v35 = vmul.f32 0.5, %v6494_v25  ;;  %v6430_v50 = vpop.xlane.xlu2 %6429  ;;  %v5623_v25 = vpop.f32.mrf.mxu2  ;;  %9582 = vrsqrt.f32 %v15848_v28  ;;  %v5086_v10 = vadd.f32 %v18812_v21, %v4983_v33  ;;  %v6356_v44 = vsel %vm15838_vm15, %v6355_v56, %v6351_v42 }
 0x755   : > { %v6464_v30 = vmul.f32 %v15746_v34, %v6430_v50  ;;  %v6515_v37 = vmul.f32 0.5, %v6514_v12  ;;  %v6387_v0 = vmul.f32 %v6356_v44, %v18779_v2  ;;  %v6434_v12 = vpop.xlane.xlu0 %6433  ;;  %vm6519_vm12 = vweird.f32 %v15809_v5 }
 0x756   : > { %v6496_v4 = vsub.f32 1.5, %v6495_v35  ;;  %v5576_v35 = vsel %vm18814_vm13, %v5560_v9, %v18813_v26  ;;  %vm6528_vm4 = vweird.f32 %v15803_v48  ;;  %vm6518_vm2 = vweird.f32 %v15789_v31 }
 0x757   : > { %v15862_v19 = vadd.f32 1e-05, %v6464_v30  ;;  %v9581_v3 = vpop.eup %9580  ;;  %v5642_v14 = vmul.f32 %v5623_v25, %v5576_v35  ;;  %v6516_v56 = vsub.f32 1.5, %v6515_v37  ;;  %vm6520_vm3 = vmor %vm6518_vm2, %vm6519_vm12  ;;  %vm6363_vm8 = vweird.f32 %v15855_v18 }
 0x758   : > { %9054 = vset.pattern.permute.xlu1 %v18776_v29  ;;  %v6497_v63 = vmul.f32 %v9575_v53, %v6496_v4  ;;  %v6523_v24 = vmul.f32 %v9581_v3, %v15803_v48  ;;  %vm6529_vm9 = vweird.f32 %v9581_v3  ;;  %vm6548_vm12 = vweird.f32 %v15848_v28 }
 0x759   : > { %9584 = vrsqrt.f32 %v15862_v19  ;;  %v5658_v23 = vadd.f32 %v5642_v14, %v5086_v10  ;;  %vm6530_vm14 = vmor %vm6528_vm4, %vm6529_vm9  ;;  %vm6538_vm7 = vweird.f32 %v15862_v19  ;;  %vm18825_vm9 = vcmask 785408  }
 0x75a   : > { %v6501_v60 = vsel %vm6500_vm5, %v9575_v53, %v6497_v63  ;;  %v6524_v50 = vmul.f32 %v9581_v3, %v6523_v24  ;;  %9586 = vrcp.f32 %v15855_v18  ;;  %v6673_v53 = vmul.f32 %v15874_v47, %v6653_v55  ;;  %v15892_v20 = vpop.eup %9582 }
 0x75b   : > { %v6652_v15 = vmul.f32 %v6501_v60, %v15414_v40  ;;  %v15897_v58 = vmul.f32 %v6387_v0, %v5658_v23  ;;  %v6466_v63 = vmul.f32 %v15746_v34, %v6434_v12  ;;  %v6543_v55 = vmul.f32 %v15892_v20, %v15848_v28  ;;  %v18830_v28 = vld [vmem:[#allocation126_spill] sm:$0xff] }
 0x75c   : > { %v6436_v30 = vpop.xlane.xlu2 %6435  ;;  %5697 = vperm.xlu2 %9055, %v15648_v41   ;;  %v6525_v4 = vmul.f32 0.5, %v6524_v50  ;;  %v6517_v24 = vmul.f32 %v15809_v5, %v6516_v56  ;;  %v6438_v56 = vpop.xlane.xlu1 %6437  ;;  %v6367_v23 = vand.u32 2147483647, %v15855_v18  ;;  %vm6549_vm0 = vweird.f32 %v15892_v20 }
 0x75d   : > { %v6672_v7 = vmul.f32 %v15874_v47, %v6652_v15  ;;  %v6467_v39 = vmul.f32 %v15746_v34, %v6436_v30  ;;  %v15916_v44 = vadd.f32 1e-05, %v6466_v63  ;;  %v6544_v26 = vmul.f32 %v15892_v20, %v6543_v55  ;;  %v18815_v63 = vld [vmem:[#allocation68_spill] sm:$0xff] }
 0x75e   : > { %v6526_v40 = vsub.f32 1.5, %v6525_v4  ;;  %v6521_v48 = vsel %vm6520_vm3, %v15809_v5, %v6517_v24  ;;  %v6468_v55 = vmul.f32 %v15746_v34, %v6438_v56  ;;  %vm18822_vm5 = vcmask 523264   ;;  %vm18834_vm3 = vmmov %vm18825_vm9 }
 0x75f   : > { %v6688_v33 = vpack.c.bf16 %v6673_v53, %v6672_v7  ;;  %v15895_v42 = vpop.eup %9584  ;;  %v15909_v21 = vadd.f32 1e-05, %v6467_v39  ;;  %v6654_v15 = vmul.f32 %v6521_v48, %v15422_v54  ;;  %v6545_v50 = vmul.f32 0.5, %v6544_v26  ;;  %vm18831_vm2 = vmmov %vm18822_vm5 }
 0x760   : > { %v6527_v9 = vmul.f32 %v9581_v3, %v6526_v40  ;;  %v6533_v2 = vmul.f32 %v15895_v42, %v15862_v19  ;;  %v15902_v25 = vpop.eup %9586  ;;  %vm6539_vm11 = vweird.f32 %v15895_v42  ;;  %vm15976_vm4 = vcmp.eq.f32.partialorder %v6367_v23, 8.507059e+37 }
 0x761   : > { %6768 = vmatmul.bf16.vlgmr.msra.gmra.mxu0 %v6688_v33  ;;  %v6359_v37 = vmul.f32 %v15902_v25, %v15855_v18  ;;  %9588 = vrsqrt.f32 %v15909_v21  ;;  %v6674_v5 = vmul.f32 %v15874_v47, %v6654_v15  ;;  %v6546_v0 = vsub.f32 1.5, %v6545_v50  ;;  %vm15963_vm13 = vmor %vm6538_vm7, %vm6539_vm11 }
 0x762   : > { %v6531_v10 = vsel %vm6530_vm14, %v9581_v3, %v6527_v9  ;;  %v6534_v60 = vmul.f32 %v15895_v42, %v6533_v2  ;;  %9590 = vrsqrt.f32 %v15916_v44  ;;  %vm6364_vm15 = vweird.f32 %v15902_v25  ;;  %vm15980_vm14 = vmor %vm6548_vm12, %vm6549_vm0 }
 0x763   : > { %v6655_v35 = vmul.f32 %v6531_v10, %v15297_v61  ;;  %v6360_v3 = vsub.f32 1.0, %v6359_v37  ;;  %v6369_v9 = vand.u32 2147483648, %v15855_v18  ;;  %v4952_v2 = vsel %vm18816_vm1, %v18815_v63, %v15756_v51  ;;  %vm15945_vm6 = vmor %vm6363_vm8, %vm6364_vm15  ;;  %v18819_v37 = vld [vmem:[#allocation130_spill] sm:$0xff]  ;;  %v18820_v51 = vld [vmem:[#allocation143_spill] sm:$0xff] }
 0x764   : > { %9057 = vset.pattern.permute.xlu2 %v18761_v62  ;;  %v6535_v31 = vmul.f32 0.5, %v6534_v60  ;;  %v6440_v53 = vpop.xlane.xlu2 %6439  ;;  %v6547_v10 = vmul.f32 %v15892_v20, %v6546_v0  ;;  %v5545_v26 = vsel %vm18821_vm10, %v18820_v51, %v18819_v37  ;;  %v4968_v48 = vsel %vm18822_vm5, %v4952_v2, %v15722_v13  ;;  %v18832_v0 = vld [vmem:[#allocation88_spill] sm:$0xff] }
 0x765   : > { %v6675_v14 = vmul.f32 %v15874_v47, %v6655_v35  ;;  %v6361_v4 = vmul.f32 %v15902_v25, %v6360_v3  ;;  %v6469_v54 = vmul.f32 %v15746_v34, %v6440_v53  ;;  %v4984_v19 = vsel %vm18825_vm9, %v4968_v48, %v15760_v59  ;;  %v5625_v53 = vpop.f32.mrf.mxu2 }
 0x766   : > { %v6536_v30 = vsub.f32 1.5, %v6535_v31  ;;  %v6370_v50 = vor.u32 1.1754944e-38, %v6369_v9  ;;  %v5087_v56 = vadd.f32 %v18832_v0, %v4984_v19  ;;  %vm6568_vm11 = vweird.f32 %v15909_v21 }
 0x767   : > { %v15925_v7 = vpop.eup %9588  ;;  %v6689_v12 = vpack.c.bf16 %v6675_v14, %v6674_v5  ;;  %v6362_v33 = vadd.f32 %v15902_v25, %v6361_v4  ;;  %v15954_v18 = vpop.xlane.xlu0 %6441  ;;  %v15967_v31 = vadd.f32 1e-05, %v6469_v54  ;;  %v6551_v4 = vsel %vm15980_vm14, %v15892_v20, %v6547_v10  ;;  %vm18839_vm14 = vmmov %vm18831_vm2 }
 0x768   : > { %v15929_v61 = vpop.eup %9590  ;;  %v6537_v40 = vmul.f32 %v15895_v42, %v6536_v30  ;;  %v6563_v39 = vmul.f32 %v15925_v7, %v15909_v21  ;;  %v15984_v30 = vadd.f32 1e-05, %v6468_v55  ;;  %v6419_v54 = vmul.f32 %v15897_v58, %v15897_v58 }
 0x769   : > { %v6553_v60 = vmul.f32 %v15929_v61, %v15916_v44  ;;  %v6366_v59 = vsel %vm15945_vm6, %v15902_v25, %v6362_v33  ;;  %9592 = vrsqrt.f32 %v15967_v31  ;;  %v18833_v25 = vld [vmem:[#allocation132_spill] sm:$0xff]  ;;  %v6657_v20 = vmul.f32 %v6551_v4, %v15381_v17 }
 0x76a   : > { %v6541_v3 = vsel %vm15963_vm13, %v15895_v42, %v6537_v40  ;;  %v6564_v15 = vmul.f32 %v15925_v7, %v6563_v39  ;;  %v5561_v42 = vsel %vm18831_vm2, %v5545_v26, %v18830_v28  ;;  %9594 = vrsqrt.f32 %v15984_v30 }
 0x76b   : > { %v6554_v5 = vmul.f32 %v15929_v61, %v6553_v60  ;;  %v5577_v23 = vsel %vm18834_vm3, %v5561_v42, %v18833_v25  ;;  %v6371_v33 = vsel %vm15976_vm4, %v6370_v50, %v6366_v59  ;;  %v6677_v60 = vmul.f32 %v15874_v47, %v6657_v20 }
 0x76c   : > { %v6565_v40 = vmul.f32 0.5, %v6564_v15  ;;  %v5643_v39 = vmul.f32 %v5625_v53, %v5577_v23  ;;  %v6388_v10 = vmul.f32 %v6371_v33, %v18797_v43  ;;  %vm6569_vm8 = vweird.f32 %v15925_v7  ;;  %v16050_v33 = vpop.permute.xlu2 %5773 }
 0x76d   : > { %v6555_v9 = vmul.f32 0.5, %v6554_v5  ;;  %vm6559_vm15 = vweird.f32 %v15929_v61  ;;  %vm6570_vm1 = vmor %vm6568_vm11, %vm6569_vm8  ;;  %vm6558_vm6 = vweird.f32 %v15916_v44  ;;  %v6470_v44 = vmul.f32 %v15746_v34, %v15954_v18 }
 0x76e   : > { %v5659_v2 = vadd.f32 %v5643_v39, %v5087_v56  ;;  %vm6560_vm0 = vmor %vm6558_vm6, %vm6559_vm15  ;;  %vm6588_vm5 = vweird.f32 %v15967_v31  ;;  %vm6578_vm9 = vweird.f32 %v15984_v30  ;;  %vm18837_vm4 = vcmask 261120  }
 0x76f   : > { %v9593_v24 = vpop.eup %9592  ;;  %v6556_v37 = vsub.f32 1.5, %v6555_v9  ;;  %vm18841_vm3 = vmmov %vm18837_vm4  ;;  %vm18845_vm11 = vcmask 785408  }
 0x770   : > { %v9595_v51 = vpop.eup %9594  ;;  %v16011_v48 = vmul.f32 %v6388_v10, %v5659_v2  ;;  %v6583_v35 = vmul.f32 %v9593_v24, %v15967_v31  ;;  %vm6589_vm7 = vweird.f32 %v9593_v24  ;;  %vm18843_vm8 = vmmov %vm18839_vm14 }
 0x771   : > { %6773 = vmatmul.bf16.gmra.mxu0 %v6689_v12  ;;  %v6656_v12 = vmul.f32 %v6541_v3, %v15532_v36  ;;  %v6566_v36 = vsub.f32 1.5, %v6565_v40  ;;  %v6557_v19 = vmul.f32 %v15929_v61, %v6556_v37  ;;  %v6573_v43 = vmul.f32 %v9595_v51, %v15984_v30  ;;  %vm6590_vm13 = vmor %vm6588_vm5, %vm6589_vm7 }
 0x772   : > { %v6420_v15 = vmul.f32 %v16011_v48, %v16011_v48  ;;  %v6584_v50 = vmul.f32 %v9593_v24, %v6583_v35  ;;  %vm6579_vm10 = vweird.f32 %v9595_v51  ;;  %vm18861_vm5 = vmmov %vm18843_vm8 }
 0x773   : > { %v6676_v55 = vmul.f32 %v15874_v47, %v6656_v12  ;;  %v6567_v17 = vmul.f32 %v15925_v7, %v6566_v36  ;;  %v6561_v14 = vsel %vm6560_vm0, %v15929_v61, %v6557_v19  ;;  %v6574_v59 = vmul.f32 %v9595_v51, %v6573_v43  ;;  %vm6580_vm12 = vmor %vm6578_vm9, %vm6579_vm10 }
 0x774   : > { %v6585_v42 = vmul.f32 0.5, %v6584_v50  ;;  %v6658_v21 = vmul.f32 %v6561_v14, %v15480_v22  ;;  %vm18855_vm0 = vmmov %vm18841_vm3 }
 0x775   : > { %v6690_v26 = vpack.c.bf16 %v6677_v60, %v6676_v55  ;;  %v6571_v13 = vsel %vm6570_vm1, %v15925_v7, %v6567_v17  ;;  %v6575_v53 = vmul.f32 0.5, %v6574_v59  ;;  %v18835_v55 = vld [vmem:[#allocation8_spill] sm:$0xff]  ;;  %v16068_v17 = vpop.permute.xlu2 %5837  ;;  %v18838_v59 = vld [vmem:[#allocation138_spill] sm:$0xff]  ;;  %vm18847_vm1 = vmmov %vm18845_vm11 }
 0x776   : > { %v6659_v28 = vmul.f32 %v6571_v13, %v15578_v46  ;;  %v6586_v0 = vsub.f32 1.5, %v6585_v42  ;;  %v6678_v7 = vmul.f32 %v15874_v47, %v6658_v21  ;;  %v16037_v46 = vadd.f32 1e-05, %v6470_v44  ;;  %vm18858_vm7 = vmmov %vm18847_vm1 }
 0x777   : > { %v6576_v56 = vsub.f32 1.5, %v6575_v53  ;;  %v5211_v36 = vsub.f32 %v18744_v11, %v18835_v55  ;;  %v18853_v55 = vld [vmem:[#allocation129_spill] sm:$0xff]  ;;  %vm18864_vm9 = vmmov %vm18847_vm1 }
 0x778   : > { %v6679_v5 = vmul.f32 %v15874_v47, %v6659_v28  ;;  %v6587_v12 = vmul.f32 %v9593_v24, %v6586_v0  ;;  %9596 = vrsqrt.f32 %v16037_v46  ;;  %vm6598_vm15 = vweird.f32 %v16037_v46 }
 0x779   : > { %v6577_v22 = vmul.f32 %v9595_v51, %v6576_v56  ;;  %v5232_v37 = vmul.f32 1.442695, %v5211_v36  ;;  %v18842_v56 = vld [vmem:[#allocation140_spill] sm:$0xff] }
 0x77a   : > { %6449 = vadd.xlane.f32.xlu1 %v6419_v54  ;;  %v16006_v63 = vpop.permute.xlu0 %5897  ;;  %v16035_v54 = vpop.permute.xlu1 %5707  ;;  %v6691_v61 = vpack.c.bf16 %v6679_v5, %v6678_v7  ;;  %v6591_v18 = vsel %vm6590_vm13, %v9593_v24, %v6587_v12  ;;  %v18840_v5 = vld [vmem:[#allocation148_spill] sm:$0xff]  ;;  %v18844_v12 = vld [vmem:[#allocation145_spill] sm:$0xff] }
 0x77b   : > { %v6581_v23 = vsel %vm6580_vm12, %v9595_v51, %v6577_v22  ;;  %v6661_v40 = vmul.f32 %v6591_v18, %v15609_v57  ;;  %v18846_v18 = vld [vmem:[#allocation144_spill] sm:$0xff] }
 0x77c   : > { %v6660_v20 = vmul.f32 %v6581_v23, %v15547_v27  ;;  %v18848_v23 = vld [vmem:[#allocation9_spill] sm:$0xff]  ;;  %v18854_v36 = vld [vmem:[#allocation128_spill] sm:$0xff] }
 0x77d   : > { %v6681_v30 = vmul.f32 %v15874_v47, %v6661_v40  ;;  %v5906_v44 = vpop.permute.xlu2 %5905  ;;  %v18849_v40 = vld [vmem:[#allocation37_spill] sm:$0xff] }
 0x77e   : > { %v16048_v31 = vpop.eup %9596  ;;  %v6680_v57 = vmul.f32 %v15874_v47, %v6660_v20  ;;  %v5995_v20 = vmul.f32 %v18849_v40, %v18848_v23  ;;  %v18869_v23 = vld [vmem:[#allocation133_spill] sm:$0xff] }
 0x77f   : > { %v6593_v2 = vmul.f32 %v16048_v31, %v16037_v46  ;;  %vm6599_vm2 = vweird.f32 %v16048_v31  ;;  %v5942_v46 = vsel %vm18855_vm0, %v18854_v36, %v18853_v55 }
 0x780   : > { %v6692_v27 = vpack.c.bf16 %v6681_v30, %v6680_v57  ;;  %vm16099_vm6 = vmor %vm6598_vm15, %vm6599_vm2 }
 0x781   : > { %6778 = vmatmul.bf16.gmra.mxu0 %v6690_v26  ;;  %v6594_v10 = vmul.f32 %v16048_v31, %v6593_v2  ;;  %v18852_v2 = vld [vmem:[#allocation24_spill] sm:$0xff]  ;;  %vm18870_vm2 = vmmov %vm18847_vm1 }
 0x782   : > { %v16044_v39 = vpop.permute.xlu1 %5777  ;;  %vm18876_vm15 = vmmov %vm18855_vm0 }
 0x783   : > { %v16020_v3 = vpop.permute.xlu0 %5841  ;;  %v6595_v35 = vmul.f32 0.5, %v6594_v10  ;;  %v18857_v10 = vld [vmem:[#allocation141_spill] sm:$0xff] }
 0x785   : > { %6451 = vadd.xlane.f32.xlu2 %v6420_v15  ;;  %v6596_v43 = vsub.f32 1.5, %v6595_v35  ;;  %v18836_v15 = vld [vmem:[#allocation136_spill] sm:$0xff] }
 0x787   : > { %v6597_v53 = vmul.f32 %v16048_v31, %v6596_v43  ;;  %v18859_v43 = vld [vmem:[#allocation38_spill] sm:$0xff] }
 0x78b   : > { %v16029_v4 = vpop.permute.xlu0 %5821 }
 0x791   : > { %6783 = vmatmul.bf16.gmra.mxu0 %v6691_v61 }
 0x793   : > { %5692 = vperm.xlu1 %9054, %v15793_v8  }
 0x794   : > { %v5728_v25 = vpop.permute.xlu0 %5727 }
 0x795   : > { %v5945_v13 = vsel %vm18837_vm4, %v5728_v25, %v18836_v15  ;;  %vm18866_vm4 = vmmov %vm18855_vm0 }
 0x796   : > { %v5961_v28 = vsel %vm18839_vm14, %v5945_v13, %v18838_v59  ;;  %vm18868_vm14 = vmmov %vm18861_vm5 }
 0x797   : > { %v5977_v22 = vsel %vm18845_vm11, %v5961_v28, %v18844_v12  ;;  %v18862_v28 = vld [vmem:[#allocation15_spill] sm:$0xff]  ;;  %vm18877_vm11 = vmmov %vm18847_vm1 }
 0x798   : > { %v5993_v15 = vmul.f32 %v5977_v22, %v18859_v43 }
 0x79b   : > { %9056 = vset.pattern.permute.xlu1 %v18757_v32 }
 0x79c   : > { %5769 = vperm.xlu1 %9056, %v15648_v41   ;;  %v16054_v9 = vpop.permute.xlu0 %5702 }
 0x79d   : > { %5829 = vperm.xlu2 %9057, %v15793_v8   ;;  %v5940_v43 = vsel %vm18876_vm15, %v16054_v9, %v16050_v33  ;;  %v18880_v9 = vld [vmem:[#allocation67_spill] sm:$0xff] }
 0x7a1   : > { %6788 = vmatmul.bf16.gmra.mxu0 %v6692_v27 }
 0x7a2   : > { %v6444_v24 = vpop.xlane.xlu1 %6443 }
 0x7a3   : > { %v6471_v60 = vmul.f32 %v15746_v34, %v6444_v24  ;;  %v18856_v24 = vld [vmem:[#allocation149_spill] sm:$0xff] }
 0x7a4   : > { %9058 = vset.pattern.permute.xlu1 %v18761_v62  ;;  %v16066_v26 = vpop.permute.xlu0 %5677 }
 0x7a5   : > { %v6487_v51 = vadd.f32 1e-05, %v6471_v60  ;;  %5833 = vperm.xlu1 %9058, %v15648_v41   ;;  %9059 = vset.pattern.permute.xlu2 %v18759_v16  ;;  %v5976_v60 = vsel %vm18858_vm7, %v18857_v10, %v18856_v24  ;;  %v18873_v24 = vld [vmem:[#allocation87_spill] sm:$0xff] }
 0x7a6   : > { %5893 = vperm.xlu2 %9059, %v15793_v8   ;;  %v5208_v10 = vsub.f32 %v18744_v11, %v18873_v24 }
 0x7a7   : > { %9598 = vrsqrt.f32 %v6487_v51  ;;  %vm6608_vm13 = vweird.f32 %v6487_v51 }
 0x7a8   : > { %9600 = vpow2.f32 %v5232_v37  ;;  %v6601_v37 = vsel %vm16099_vm6, %v16048_v31, %v6597_v53  ;;  %v18863_v53 = vld [vmem:[#allocation135_spill] sm:$0xff]  ;;  %vm18879_vm6 = vmmov %vm18870_vm2 }
 0x7aa   : > { %v6446_v19 = vpop.xlane.xlu1 %6445 }
 0x7ab   : > { %v6472_v50 = vmul.f32 %v15746_v34, %v6446_v19 }
 0x7ad   : > { %v9599_v14 = vpop.eup %9598  ;;  %v16075_v41 = vadd.f32 1e-05, %v6472_v50  ;;  %9061 = vset.pattern.permute.xlu1 %v18776_v29  ;;  %v5798_v8 = vpop.permute.xlu0 %5797  ;;  %v18860_v50 = vld [vmem:[#allocation134_spill] sm:$0xff] }
 0x7ae   : > { %v6603_v42 = vmul.f32 %v9599_v14, %v6487_v51  ;;  %5682 = vperm.xlu1 %9061, %v15668_v49   ;;  %v16081_v21 = vpop.eup %9600  ;;  %v5946_v0 = vsel %vm18841_vm3, %v18840_v5, %v5798_v8  ;;  %9062 = vset.pattern.permute.xlu2 %v18776_v29  ;;  %vm6609_vm10 = vweird.f32 %v9599_v14  ;;  %v5958_v59 = vsel %vm18861_vm5, %v5942_v46, %v18860_v50  ;;  %v18867_v51 = vld [vmem:[#allocation131_spill] sm:$0xff]  ;;  %vm18874_vm3 = vmmov %vm18855_vm0 }
 0x7af   : > { %9602 = vrsqrt.f32 %v16075_v41  ;;  %v5962_v61 = vsel %vm18843_vm8, %v5946_v0, %v18842_v56  ;;  %5687 = vperm.xlu2 %9062, %v16081_v21   ;;  %v5974_v0 = vsel %vm18864_vm9, %v5958_v59, %v18863_v53  ;;  %vm6610_vm12 = vmor %vm6608_vm13, %vm6609_vm10  ;;  %vm6618_vm7 = vweird.f32 %v16075_v41 }
 0x7b0   : > { %v6604_v7 = vmul.f32 %v9599_v14, %v6603_v42  ;;  %v5978_v25 = vsel %vm18847_vm1, %v5962_v61, %v18846_v18  ;;  %v5992_v42 = vmul.f32 %v5976_v60, %v18862_v28  ;;  %v6662_v61 = vmul.f32 %v6601_v37, %v15621_v52  ;;  %vm18875_vm8 = vmmov %vm18861_vm5 }
 0x7b1   : > { %v5994_v27 = vmul.f32 %v5978_v25, %v18852_v2  ;;  %vm18878_vm1 = vmmov %vm18861_vm5 }
 0x7b2   : > { %v6605_v57 = vmul.f32 0.5, %v6604_v7  ;;  %v18865_v7 = vld [vmem:[#allocation137_spill] sm:$0xff]  ;;  %v6002_v25 = vpack.c.bf16 %v5993_v15, %v5992_v42  ;;  %v6682_v36 = vmul.f32 %v15874_v47, %v6662_v61  ;;  %v5226_v15 = vmul.f32 1.442695, %v5208_v10 }
 0x7b3   : > { %v6003_v19 = vpack.c.bf16 %v5995_v20, %v5994_v27 }
 0x7b4   : > { %v6606_v35 = vsub.f32 1.5, %v6605_v57  ;;  %v18871_v57 = vld [vmem:[#allocation23_spill] sm:$0xff] }
 0x7b5   : > { %v16114_v13 = vpop.eup %9602  ;;  %6051 = vmatpush.bf16.msra.mxu3 %v6003_v19  ;;  %v5786_v31 = vpop.permute.xlu0 %5785  ;;  %v5990_v2 = vmul.f32 %v5974_v0, %v18871_v57 }
 0x7b6   : > { %v6607_v8 = vmul.f32 %v9599_v14, %v6606_v35  ;;  %v6613_v5 = vmul.f32 %v16114_v13, %v16075_v41  ;;  %9063 = vset.pattern.permute.xlu1 %v18757_v32  ;;  %v5943_v56 = vsel %vm18866_vm4, %v18865_v7, %v5786_v31  ;;  %vm6619_vm0 = vweird.f32 %v16114_v13  ;;  %vm18885_vm4 = vmmov %vm18878_vm1 }
 0x7b7   : > { %5757 = vperm.xlu1 %9063, %v15668_v49   ;;  %v5959_v22 = vsel %vm18868_vm14, %v5943_v56, %v18867_v51  ;;  %v6448_v18 = vpop.xlane.xlu2 %6447  ;;  %9064 = vset.pattern.permute.xlu2 %v18757_v32  ;;  %vm6620_vm10 = vmor %vm6618_vm7, %vm6619_vm0  ;;  %vm18888_vm0 = vcmask 785408  }
 0x7b8   : > { %v6611_v12 = vsel %vm6610_vm12, %v9599_v14, %v6607_v8  ;;  %v5975_v40 = vsel %vm18870_vm2, %v5959_v22, %v18869_v23  ;;  %v6473_v20 = vmul.f32 %v15746_v34, %v6448_v18  ;;  %5761 = vperm.xlu2 %9064, %v16081_v21   ;;  %v6614_v52 = vmul.f32 %v16114_v13, %v6613_v5  ;;  %v18872_v14 = vld [vmem:[#allocation33_spill] sm:$0xff]  ;;  %v18881_v8 = vld [vmem:[#allocation12_spill] sm:$0xff]  ;;  %vm18882_vm12 = vmmov %vm18878_vm1 }
 0x7b9   : > { %v6663_v30 = vmul.f32 %v6611_v12, %v15705_v38  ;;  %6052 = vmatpush.bf16.msra.mxu3 %v6002_v25  ;;  %v5991_v27 = vmul.f32 %v5975_v40, %v18872_v14  ;;  %v5941_v38 = vsel %vm18874_vm3, %v16035_v54, %v16044_v39  ;;  %v18883_v40 = vld [vmem:[#allocation82_spill] sm:$0xff] }
 0x7ba   : > { %v6489_v55 = vadd.f32 1e-05, %v6473_v20  ;;  %v5957_v35 = vsel %vm18875_vm8, %v5941_v38, %v16020_v3  ;;  %v6615_v19 = vmul.f32 0.5, %v6614_v52  ;;  %v5956_v3 = vsel %vm18878_vm1, %v5940_v43, %v16068_v17  ;;  %v9781_v43 = vld [vmem:[%s9975_s20 + $0x8] sm:$0xff] }
 0x7bb   : > { %v6683_v46 = vmul.f32 %v15874_v47, %v6663_v30  ;;  %v6001_v60 = vpack.c.bf16 %v5991_v27, %v5990_v2  ;;  %v5973_v50 = vsel %vm18877_vm11, %v5957_v35, %v5906_v44  ;;  %v5206_v20 = vsub.f32 %v18744_v11, %v18883_v40  ;;  %v18884_v30 = vld [vmem:[#allocation77_spill] sm:$0xff] }
 0x7bc   : > { %9604 = vrsqrt.f32 %v6489_v55  ;;  %v6616_v54 = vsub.f32 1.5, %v6615_v19  ;;  %v5989_v28 = vmul.f32 %v5973_v50, %v18880_v9  ;;  %vm6628_vm13 = vweird.f32 %v6489_v55 }
 0x7bd   : > { %v6693_v37 = vpack.c.bf16 %v6683_v46, %v6682_v36  ;;  %6053 = vmatpush.bf16.msra.mxu3 %v6001_v60  ;;  %9606 = vpow2.f32 %v5226_v15  ;;  %v5207_v57 = vsub.f32 %v18744_v11, %v18884_v30  ;;  %v5222_v2 = vmul.f32 1.442695, %v5206_v20  ;;  %v9782_v30 = vld [vmem:[%s9975_s20 + $0x20] sm:$0xff] }
 0x7be   : > { %v6617_v44 = vmul.f32 %v16114_v13, %v6616_v54  ;;  %vm18886_vm1 = vcmask 261120  }
 0x7bf   : > { %9066 = vset.pattern.permute.xlu1 %v18761_v62  ;;  %6793 = vmatmul.bf16.gmra.mxu0 %v6693_v37  ;;  %v5224_v52 = vmul.f32 1.442695, %v5207_v57  ;;  %9608 = vpow2.f32 %v5222_v2  ;;  %v5698_v46 = vpop.permute.xlu2 %5697  ;;  %vm18889_vm7 = vmmov %vm18886_vm1  ;;  %v18892_v2 = vld [vmem:[#allocation31_spill] sm:$0xff] }
 0x7c0   : > { %5825 = vperm.xlu1 %9066, %v16081_v21   ;;  %9067 = vset.pattern.permute.xlu2 %v18759_v16  ;;  %v6621_v0 = vsel %vm6620_vm10, %v16114_v13, %v6617_v44  ;;  %vm18890_vm10 = vmmov %vm18885_vm4 }
 0x7c1   : > { %5885 = vperm.xlu2 %9067, %v15668_v49   ;;  %v6664_v41 = vmul.f32 %v6621_v0, %v15666_v6  ;;  %9610 = vpow2.f32 %v5224_v52 }
 0x7c2   : > { %v5902_v39 = vpop.permute.xlu1 %5901  ;;  %v9605_v59 = vpop.eup %9604 }
 0x7c3   : > { %v5972_v33 = vsel %vm18879_vm6, %v5956_v3, %v5902_v39  ;;  %v6623_v42 = vmul.f32 %v9605_v59, %v6489_v55  ;;  %v9607_v49 = vpop.eup %9606  ;;  %vm6629_vm5 = vweird.f32 %v9605_v59  ;;  %vm18887_vm6 = vmmov %vm18885_vm4 }
 0x7c4   : > { %v5988_v5 = vmul.f32 %v5972_v33, %v18881_v8  ;;  %vm6630_vm9 = vmor %vm6628_vm13, %vm6629_vm5 }
 0x7c5   : > { %v6624_v31 = vmul.f32 %v9605_v59, %v6623_v42  ;;  %v16193_v24 = vpop.eup %9608  ;;  %vm18891_vm5 = vmmov %vm18888_vm0 }
 0x7c6   : > { %v6000_v53 = vpack.c.bf16 %v5989_v28, %v5988_v5  ;;  %vm18894_vm13 = vmmov %vm18885_vm4 }
 0x7c7   : > { %v6625_v17 = vmul.f32 0.5, %v6624_v31  ;;  %v16196_v10 = vpop.eup %9610 }
 0x7c8   : > { %9068 = vset.pattern.permute.xlu1 %v18759_v16  ;;  %6054 = vmatpush.bf16.msra.mxu3 %v6000_v53 }
 0x7c9   : > { %5889 = vperm.xlu1 %9068, %v16081_v21   ;;  %v6626_v7 = vsub.f32 1.5, %v6625_v17  ;;  %9069 = vset.pattern.permute.xlu2 %v18776_v29  ;;  %v6684_v21 = vmul.f32 %v15874_v47, %v6664_v41 }
 0x7ca   : > { %5672 = vperm.xlu2 %9069, %v9607_v49  }
 0x7cb   : > { %v6627_v56 = vmul.f32 %v9605_v59, %v6626_v7 }
 0x7cd   : > { %v6631_v61 = vsel %vm6630_vm9, %v9605_v59, %v6627_v56  ;;  %vm18895_vm9 = vmmov %vm18885_vm4 }
 0x7ce   : > { %v6665_v12 = vmul.f32 %v6631_v61, %v15768_v1  ;;  %v9780_v1 = vld [vmem:[%s9975_s20] sm:$0xff] }
 0x7d0   : > { %v6685_v13 = vmul.f32 %v15874_v47, %v6665_v12 }
 0x7d1   : > { %9071 = vset.pattern.permute.xlu1 %v18757_v32 }
 0x7d2   : > { %5749 = vperm.xlu1 %9071, %v9607_v49   ;;  %9072 = vset.pattern.permute.xlu2 %v18757_v32  ;;  %v6694_v51 = vpack.c.bf16 %v6685_v13, %v6684_v21  ;;  %v5766_v13 = vpop.permute.xlu0 %5765 }
 0x7d3   : > { %5753 = vperm.xlu2 %9072, %v15715_v45  }
 0x7d4   : > { %6798 = vmatmul.bf16.gmra.mxu0 %v6694_v51 }
 0x7da   : > { %9073 = vset.pattern.permute.xlu1 %v18761_v62 }
 0x7db   : > { %5813 = vperm.xlu1 %9073, %v9607_v49   ;;  %9074 = vset.pattern.permute.xlu2 %v18761_v62 }
 0x7dc   : > { %5817 = vperm.xlu2 %9074, %v15715_v45  }
 0x7de   : > { %v6769_v6 = vpop.f32.mrf.mxu0 }
 0x7df   : > { %v16179_v22 = vadd.f32 %v9780_v1, %v6769_v6 }
 0x7e1   : > { %v6825_v18 = vmul.f32 %v16179_v22, %v16179_v22 }
 0x7e3   : > { %v6841_v25 = vsel %vm18882_vm12, %v6825_v18, 0.0  ;;  %vm18896_vm12 = vmmov %vm18886_vm1 }
 0x7e4   : > { %6842 = vadd.xlane.f32.xlu0 %v6841_v25  ;;  %9075 = vset.pattern.permute.xlu2 %v18759_v16 }
 0x7e5   : > { %5877 = vperm.xlu2 %9075, %v9607_v49  }
 0x7e6   : > { %v6771_v23 = vpop.f32.mrf.mxu0 }
 0x7e7   : > { %v16204_v15 = vadd.f32 %v9781_v43, %v6771_v23 }
 0x7e9   : > { %v6826_v3 = vmul.f32 %v16204_v15, %v16204_v15 }
 0x7ed   : > { %v6450_v14 = vpop.xlane.xlu1 %6449  ;;  %5881 = vperm.xlu2 %9075, %v15715_v45  }
 0x7ee   : > { %v6474_v27 = vmul.f32 %v15746_v34, %v6450_v14  ;;  %v16191_v55 = vpop.f32.mrf.mxu0  ;;  %v18893_v14 = vld [vmem:[#allocation13_spill] sm:$0xff] }
 0x7f0   : > { %v6490_v36 = vadd.f32 1e-05, %v6474_v27 }
 0x7f2   : > { %9612 = vrsqrt.f32 %v6490_v36  ;;  %vm6638_vm2 = vweird.f32 %v6490_v36 }
 0x7f5   : > { %9076 = vset.pattern.permute.xlu2 %v18776_v29 }
 0x7f6   : > { %5662 = vperm.xlu2 %9076, %v16193_v24   ;;  %v16199_v60 = vpop.f32.mrf.mxu0 }
 0x7f8   : > { %v9613_v38 = vpop.eup %9612  ;;  %5745 = vperm.xlu0 %9070, %v16196_v10   ;;  %v6452_v37 = vpop.xlane.xlu2 %6451 }
 0x7f9   : > { %v6633_v45 = vmul.f32 %v9613_v38, %v6490_v36  ;;  %v6475_v35 = vmul.f32 %v15746_v34, %v6452_v37  ;;  %v6844_v34 = vsel %vm18885_vm4, %v6826_v3, 0.0  ;;  %vm6639_vm14 = vweird.f32 %v9613_v38 }
 0x7fa   : > { %vm6640_vm3 = vmor %vm6638_vm2, %vm6639_vm14 }
 0x7fb   : > { %v6634_v19 = vmul.f32 %v9613_v38, %v6633_v45  ;;  %v6491_v50 = vadd.f32 1e-05, %v6475_v35  ;;  %vm18897_vm14 = vmmov %vm18886_vm1 }
 0x7fc   : > { %vm18898_vm2 = vmmov %vm18888_vm0 }
 0x7fd   : > { %9614 = vrsqrt.f32 %v6491_v50  ;;  %v6635_v54 = vmul.f32 0.5, %v6634_v19  ;;  %vm6648_vm15 = vweird.f32 %v6491_v50  ;;  %v9783_v19 = vld [vmem:[%s9975_s20 + $0x48] sm:$0xff] }
 0x7fe   : > { %5667 = vperm.xlu2 %9076, %v16196_v10   ;;  %v6779_v39 = vpop.f32.mrf.mxu0 }
 0x7ff   : > { %v6636_v33 = vsub.f32 1.5, %v6635_v54  ;;  %v16234_v57 = vadd.f32 %v9782_v30, %v6779_v39 }
 0x800   : > { %v5830_v59 = vpop.permute.xlu2 %5829  ;;  %9082 = vset.pattern.permute.xlu0 %v18761_v62 }
 0x801   : > { %v6637_v8 = vmul.f32 %v9613_v38, %v6636_v33 }
 0x803   : > { %v9615_v9 = vpop.eup %9614  ;;  %v6641_v17 = vsel %vm6640_vm3, %v9613_v38, %v6637_v8  ;;  %vm18899_vm3 = vmmov %vm18885_vm4  ;;  %v18901_v8 = vld [vmem:[#allocation64_spill] sm:$0xff] }
 0x804   : > { %v6643_v28 = vmul.f32 %v9615_v9, %v6491_v50  ;;  %vm6649_vm8 = vweird.f32 %v9615_v9  ;;  %v6666_v56 = vmul.f32 %v6641_v17, %v15897_v58  ;;  %v9784_v17 = vld [vmem:[%s9975_s20 + $0x18] sm:$0xff] }
 0x805   : > { %6845 = vadd.xlane.f32.xlu1 %v6844_v34  ;;  %v5693_v42 = vpop.permute.xlu1 %5692  ;;  %vm6650_vm11 = vmor %vm6648_vm15, %vm6649_vm8 }
 0x806   : > { %v6644_v5 = vmul.f32 %v9615_v9, %v6643_v28  ;;  %9077 = vset.pattern.permute.xlu2 %v18757_v32  ;;  %v16212_v44 = vpop.f32.mrf.mxu0  ;;  %v6686_v51 = vmul.f32 %v15874_v47, %v6666_v56  ;;  %v5938_v1 = vsel %vm18886_vm1, %v5693_v42, %v5766_v13  ;;  %vm18900_vm8 = vmmov %vm18888_vm0  ;;  %v9785_v56 = vld [vmem:[%s9975_s20 + $0x10] sm:$0xff] }
 0x807   : > { %5741 = vperm.xlu2 %9077, %v16193_v24   ;;  %v5954_v58 = vsel %vm18887_vm6, %v5938_v1, %v5830_v59  ;;  %vm18903_vm15 = vmmov %vm18899_vm3  ;;  %v9787_v1 = vld [vmem:[%s9975_s20 + $0x28] sm:$0xff] }
 0x808   : > { %v6645_v31 = vmul.f32 0.5, %v6644_v5  ;;  %v5894_v53 = vpop.permute.xlu2 %5893  ;;  %vm18905_vm6 = vmmov %vm18899_vm3 }
 0x809   : > { %v5970_v25 = vsel %vm18888_vm0, %v5954_v58, %v5894_v53  ;;  %vm18906_vm0 = vmmov %vm18886_vm1 }
 0x80a   : > { %v6646_v49 = vsub.f32 1.5, %v6645_v31  ;;  %v5986_v52 = vmul.f32 %v5970_v25, %v18892_v2  ;;  %v18902_v31 = vld [vmem:[#allocation42_spill] sm:$0xff]  ;;  %v9788_v2 = vld [vmem:[%s9975_s20 + $0x40] sm:$0xff] }
 0x80c   : > { %v6647_v0 = vmul.f32 %v9615_v9, %v6646_v49  ;;  %v16263_v49 = vadd.f32 %v9784_v17, %v16199_v60 }
 0x80e   : > { %v5770_v7 = vpop.permute.xlu1 %5769  ;;  %v6651_v41 = vsel %vm6650_vm11, %v9615_v9, %v6647_v0  ;;  %v16216_v61 = vpop.f32.mrf.mxu0  ;;  %vm18904_vm11 = vmmov %vm18899_vm3 }
 0x80f   : > { %9078 = vset.pattern.permute.xlu2 %v18761_v62  ;;  %v6667_v12 = vmul.f32 %v6651_v41, %v16011_v48  ;;  %v5939_v62 = vsel %vm18889_vm7, %v5698_v46, %v5770_v7  ;;  %v16267_v41 = vadd.f32 %v9785_v56, %v16191_v55  ;;  %vm18907_vm7 = vmmov %vm18898_vm2 }
 0x810   : > { %5809 = vperm.xlu2 %9078, %v16196_v10   ;;  %v5688_v21 = vpop.permute.xlu2 %5687 }
 0x811   : > { %v6687_v6 = vmul.f32 %v15874_v47, %v6667_v12  ;;  %v6828_v12 = vmul.f32 %v16263_v49, %v16263_v49  ;;  %v6827_v13 = vmul.f32 %v16267_v41, %v16267_v41 }
 0x813   : > { %v6695_v18 = vpack.c.bf16 %v6687_v6, %v6686_v51  ;;  %v9786_v51 = vld [vmem:[%s9975_s20 + $0x30] sm:$0xff]  ;;  %v6850_v60 = vsel %vm18903_vm15, %v6828_v12, 0.0  ;;  %v6847_v25 = vsel %vm18904_vm11, %v6827_v13, 0.0 }
 0x814   : > { %v16275_v6 = vadd.f32 %v9786_v51, %v16216_v61 }
 0x815   : > { %6803 = vmatmul.bf16.gmra.mxu0 %v6695_v18  ;;  %v16280_v18 = vadd.f32 %v9787_v1, %v16212_v44  ;;  %v8730_v1 = vld [vmem:[%s17521_s12 + $0x34] sm:$0xf] }
 0x816   : > { %v16227_v23 = vpop.f32.mrf.mxu0  ;;  %v6831_v61 = vmul.f32 %v16275_v6, %v16275_v6 }
 0x817   : > { %v5834_v48 = vpop.permute.xlu1 %5833  ;;  %v6830_v30 = vmul.f32 %v16280_v18, %v16280_v18 }
 0x818   : > { %v5955_v40 = vsel %vm18890_vm10, %v5939_v62, %v5834_v48  ;;  %9079 = vset.pattern.permute.xlu2 %v18759_v16  ;;  %v5762_v47 = vpop.permute.xlu2 %5761  ;;  %vm18908_vm10 = vmmov %vm18899_vm3 }
 0x819   : > { %v5971_v20 = vsel %vm18891_vm5, %v5955_v40, %v16006_v63  ;;  %5869 = vperm.xlu2 %9079, %v16193_v24   ;;  %v6829_v63 = vmul.f32 %v16234_v57, %v16234_v57  ;;  %v5937_v9 = vsel %vm18897_vm14, %v5688_v21, %v5762_v47  ;;  %vm18909_vm5 = vmmov %vm18898_vm2 }
 0x81a   : > { %v5987_v27 = vmul.f32 %v5971_v20, %v18893_v14  ;;  %vm18916_vm14 = vmmov %vm18899_vm3 }
 0x81b   : > { %v6853_v37 = vsel %vm18894_vm13, %v6829_v63, 0.0  ;;  %vm18910_vm13 = vmmov %vm18899_vm3  ;;  %v18912_v63 = vld [vmem:[#allocation50_spill] sm:$0xff] }
 0x81c   : > { %v5999_v36 = vpack.c.bf16 %v5987_v27, %v5986_v52  ;;  %v6859_v14 = vsel %vm18910_vm13, %v6831_v61, 0.0  ;;  %v18911_v27 = vld [vmem:[#allocation53_spill] sm:$0xff]  ;;  %vm18922_vm13 = vmmov %vm18906_vm0 }
 0x81e   : > { %5805 = vperm.xlu1 %9073, %v16193_v24   ;;  %6055 = vmatpush.bf16.msra.mxu3 %v5999_v36  ;;  %v6789_v46 = vpop.f32.mrf.mxu0 }
 0x820   : > { %v5683_v38 = vpop.permute.xlu1 %5682  ;;  %v5886_v45 = vpop.permute.xlu2 %5885 }
 0x821   : > { %5873 = vperm.xlu2 %9079, %v16196_v10  }
 0x822   : > { %6854 = vadd.xlane.f32.xlu0 %v6853_v37 }
 0x826   : > { %9081 = vset.pattern.permute.xlu1 %v18757_v32  ;;  %v6791_v35 = vpop.f32.mrf.mxu0 }
 0x827   : > { %v16246_v43 = vadd.f32 %v9783_v19, %v6791_v35 }
 0x828   : > { %v5673_v24 = vpop.permute.xlu2 %5672 }
 0x829   : > { %v5758_v50 = vpop.permute.xlu1 %5757  ;;  %v6834_v54 = vmul.f32 %v16246_v43, %v16246_v43  ;;  %9080 = vset.pattern.permute.xlu2 %v18776_v29 }
 0x82a   : > { %v5936_v59 = vsel %vm18896_vm12, %v5683_v38, %v5758_v50  ;;  %v9790_v50 = vld [vmem:[%s9975_s20 + $0x60] sm:$0xff]  ;;  %vm18914_vm12 = vmmov %vm18899_vm3 }
 0x82b   : > { %v6868_v39 = vsel %vm18895_vm9, %v6834_v54, 0.0  ;;  %v5952_v32 = vsel %vm18885_vm4, %v5936_v59, %v16029_v4  ;;  %vm18913_vm9 = vmmov %vm18899_vm3 }
 0x82c   : > { %6869 = vadd.xlane.f32.xlu0 %v6868_v39  ;;  %v5968_v34 = vsel %vm18898_vm2, %v5952_v32, %v5886_v45  ;;  %v9789_v45 = vld [vmem:[%s9975_s20 + $0x38] sm:$0xff]  ;;  %v6856_v19 = vsel %vm18913_vm9, %v6830_v30, 0.0  ;;  %vm18915_vm4 = vmmov %vm18899_vm3  ;;  %vm18923_vm9 = vcmask 785408  }
 0x82d   : > { %v5984_v53 = vmul.f32 %v5968_v34, %v18902_v31  ;;  %v16302_v37 = vadd.f32 %v9789_v45, %v16227_v23  ;;  %vm18917_vm2 = vmmov %vm18899_vm3 }
 0x82f   : > { %v6832_v23 = vmul.f32 %v16302_v37, %v16302_v37 }
 0x830   : > { %v5754_v10 = vpop.permute.xlu2 %5753 }
 0x831   : > { %v5935_v62 = vsel %vm18886_vm1, %v16066_v26, %v5754_v10  ;;  %v16294_v26 = vadd.f32 %v9788_v2, %v6789_v46  ;;  %v9791_v10 = vld [vmem:[%s9975_s20 + $0x58] sm:$0xff]  ;;  %v6862_v34 = vsel %vm18916_vm14, %v6832_v23, 0.0  ;;  %vm18928_vm14 = vmmov %vm18917_vm2 }
 0x832   : > { %v5826_v3 = vpop.permute.xlu1 %5825 }
 0x833   : > { %v5953_v28 = vsel %vm18899_vm3, %v5937_v9, %v5826_v3  ;;  %v6833_v54 = vmul.f32 %v16294_v26, %v16294_v26  ;;  %vm18918_vm3 = vmmov %vm18917_vm2 }
 0x835   : > { %v6865_v59 = vsel %vm18914_vm12, %v6833_v54, 0.0  ;;  %vm18924_vm12 = vmmov %vm18917_vm2 }
 0x838   : > { %v5818_v33 = vpop.permute.xlu2 %5817 }
 0x839   : > { %v5951_v48 = vsel %vm18905_vm6, %v5935_v62, %v5818_v33  ;;  %v9792_v33 = vld [vmem:[%s9975_s20 + $0x50] sm:$0xff]  ;;  %v8578_v62 = vld [vmem:[%s17521_s12 + $0x28] sm:$0xf0] }
 0x83b   : > { %v5890_v29 = vpop.permute.xlu1 %5889 }
 0x83c   : > { %v5969_v42 = vsel %vm18900_vm8, %v5953_v28, %v5890_v29  ;;  %v6794_v0 = vpop.f32.mrf.mxu0  ;;  %vm18920_vm8 = vmmov %vm18917_vm2 }
 0x83d   : > { %v5985_v5 = vmul.f32 %v5969_v42, %v18901_v8  ;;  %v16320_v9 = vadd.f32 %v9792_v33, %v6794_v0  ;;  %v18919_v0 = vld [vmem:[#allocation7_spill] sm:$0xff] }
 0x83f   : > { %v5998_v4 = vpack.c.bf16 %v5985_v5, %v5984_v53  ;;  %v6835_v42 = vmul.f32 %v16320_v9, %v16320_v9  ;;  %v9793_v53 = vld [vmem:[%s9975_s20 + $0x68] sm:$0xff] }
 0x840   : > { %v5878_v7 = vpop.permute.xlu2 %5877 }
 0x841   : > { %6056 = vmatpush.bf16.msra.mxu3 %v5998_v4  ;;  %v6871_v4 = vsel %vm18918_vm3, %v6835_v42, 0.0  ;;  %vm18929_vm3 = vmmov %vm18917_vm2 }
 0x844   : > { %v5750_v21 = vpop.permute.xlu1 %5749  ;;  %v6796_v55 = vpop.f32.mrf.mxu0 }
 0x845   : > { %v5934_v40 = vsel %vm18906_vm0, %v5673_v24, %v5750_v21  ;;  %v16315_v3 = vadd.f32 %v9791_v10, %v6796_v55  ;;  %v8586_v55 = vld [vmem:[%s17521_s12 + $0x38] sm:$0xf0] }
 0x847   : > { %v6836_v29 = vmul.f32 %v16315_v3, %v16315_v3 }
 0x848   : > { %6851 = vadd.xlane.f32.xlu1 %v6850_v60  ;;  %v5882_v58 = vpop.permute.xlu2 %5881 }
 0x849   : > { %v5967_v20 = vsel %vm18907_vm7, %v5951_v48, %v5882_v58  ;;  %v6874_v5 = vsel %vm18917_vm2, %v6836_v29, 0.0  ;;  %v8728_v58 = vld [vmem:[%s17521_s12 + $0x24] sm:$0xf]  ;;  %v16385_v29 = vld [vmem:[%s17520_s11] ss:$0 sm:$0xff] }
 0x84a   : > { %6848 = vadd.xlane.f32.xlu2 %v6847_v25  ;;  %v5983_v36 = vmul.f32 %v5967_v20, %v18911_v27  ;;  %v16347_v25 = vor.u32 %v8730_v1, %v8586_v55  ;;  %v16353_v48 = vor.u32 %v8728_v58, %v8578_v62  ;;  %v8570_v20 = vld [vmem:[%s17521_s12 + $0x18] sm:$0xf0]  ;;  %v18926_v55 = vld [vmem:[#allocation49_spill] sm:$0xff]  ;;  %v18927_v62 = vld [vmem:[#allocation43_spill] sm:$0xff] }
 0x84c   : > { %7256 = vmatpush.bf16.msrb.mxu1 %v16347_v25 }
 0x84d   : > { %v5814_v44 = vpop.permute.xlu1 %5813 }
 0x84e   : > { %v5950_v47 = vsel %vm18908_vm10, %v5934_v40, %v5814_v44  ;;  %v8726_v40 = vld [vmem:[%s17521_s12 + $0x14] sm:$0xf] }
 0x84f   : > { %v5966_v52 = vsel %vm18909_vm5, %v5950_v47, %v5878_v7  ;;  %v5254_v47 = vmul.f32 1.442695, %v18744_v11  ;;  %vm18921_vm5 = vmmov %vm18917_vm2 }
 0x850   : > { %v5982_v38 = vmul.f32 %v5966_v52, %v18912_v63  ;;  %6860 = vadd.xlane.f32.xlu1 %v6859_v14  ;;  %v16323_v28 = vpop.permute.xlu2 %5662  ;;  %7257 = vmatpush.bf16.msrb.mxu1 %v16353_v48  ;;  %v16364_v14 = vor.u32 %v8726_v40, %v8570_v20  ;;  %v8562_v63 = vld [vmem:[%s17521_s12 + $0x8] sm:$0xf0]  ;;  %v9794_v20 = vld [vmem:[%s9975_s20 + $0x70] sm:$0xff] }
 0x851   : > { %v6799_v35 = vpop.f32.mrf.mxu0 }
 0x852   : > { %v5997_v46 = vpack.c.bf16 %v5983_v36, %v5982_v38  ;;  %v16306_v24 = vadd.f32 %v9790_v50, %v6799_v35  ;;  %6857 = vadd.xlane.f32.xlu2 %v6856_v19  ;;  %v8724_v36 = vld [vmem:[%s17521_s12 + $0x4] sm:$0xf] }
 0x853   : > { %v16373_v38 = vor.u32 %v8724_v36, %v8562_v63  ;;  %v8729_v36 = vld [vmem:[%s17521_s12 + $0x24] sm:$0xf0] }
 0x854   : > { %6057 = vmatpush.bf16.msra.mxu3 %v5997_v46  ;;  %v6837_v39 = vmul.f32 %v16306_v24, %v16306_v24  ;;  %7258 = vmatpush.bf16.msrb.mxu1 %v16364_v14 }
 0x856   : > { %v6877_v32 = vsel %vm18915_vm4, %v6837_v39, 0.0  ;;  %vm18925_vm4 = vmmov %vm18923_vm9 }
 0x857   : > { %6878 = vadd.xlane.f32.xlu0 %v6877_v32  ;;  %v6843_v31 = vpop.xlane.xlu0 %6842 }
 0x858   : > { %6866 = vadd.xlane.f32.xlu1 %v6865_v59  ;;  %v6889_v7 = vmul.f32 %v6843_v31, %v18919_v0  ;;  %v5668_v56 = vpop.permute.xlu2 %5667  ;;  %7259 = vmatpush.bf16.msrb.mxu1 %v16373_v38 }
 0x859   : > { %v6801_v8 = vpop.f32.mrf.mxu0 }
 0x85a   : > { %6863 = vadd.xlane.f32.xlu2 %v6862_v34  ;;  %v16331_v17 = vadd.f32 %v9793_v53, %v6801_v8  ;;  %v6905_v21 = vadd.f32 1e-06, %v6889_v7 }
 0x85c   : > { %v6838_v12 = vmul.f32 %v16331_v17, %v16331_v17  ;;  %9616 = vrsqrt.f32 %v6905_v21  ;;  %vm6927_vm11 = vweird.f32 %v6905_v21 }
 0x85d   : > { %9618 = vpow2.f32 %v5254_v47 }
 0x85e   : > { %v6880_v13 = vsel %vm18920_vm8, %v6838_v12, 0.0  ;;  %vm18930_vm8 = vmmov %vm18917_vm2 }
 0x860   : > { %6875 = vadd.xlane.f32.xlu1 %v6874_v5 }
 0x861   : > { %v5742_v51 = vpop.permute.xlu2 %5741 }
 0x862   : > { %6872 = vadd.xlane.f32.xlu2 %v6871_v4  ;;  %v9617_v60 = vpop.eup %9616  ;;  %v5932_v4 = vsel %vm18922_vm13, %v16323_v28, %v5742_v51  ;;  %v8584_v28 = vld [vmem:[%s17521_s12 + $0x30] sm:$0xf]  ;;  %v8731_v51 = vld [vmem:[%s17521_s12 + $0x34] sm:$0xf0]  ;;  %vm18932_vm13 = vmmov %vm18917_vm2 }
 0x863   : > { %v6922_v61 = vmul.f32 %v9617_v60, %v6905_v21  ;;  %v16375_v45 = vpop.eup %9618  ;;  %vm6928_vm15 = vweird.f32 %v9617_v60 }
 0x864   : > { %vm6929_vm1 = vmor %vm6927_vm11, %vm6928_vm15 }
 0x865   : > { %v6923_v52 = vmul.f32 %v9617_v60, %v6922_v61 }
 0x867   : > { %v6924_v11 = vmul.f32 0.5, %v6923_v52 }
 0x869   : > { %v6925_v35 = vsub.f32 1.5, %v6924_v11 }
 0x86a   : > { %6881 = vadd.xlane.f32.xlu2 %v6880_v13  ;;  %v5810_v30 = vpop.permute.xlu2 %5809  ;;  %v5746_v10 = vpop.permute.xlu0 %5745 }
 0x86b   : > { %v6926_v54 = vmul.f32 %v9617_v60, %v6925_v35  ;;  %v5933_v33 = vsel %vm18906_vm0, %v5668_v56, %v5746_v10  ;;  %v9795_v35 = vld [vmem:[%s9975_s20 + $0x78] sm:$0xff]  ;;  %v8560_v10 = vld [vmem:[%s17521_s12] sm:$0xf] }
 0x86c   : > { %v5949_v53 = vsel %vm18921_vm5, %v5933_v33, %v5810_v30  ;;  %vm18931_vm5 = vmmov %vm18917_vm2 }
 0x86d   : > { %v6930_v59 = vsel %vm6929_vm1, %v9617_v60, %v6926_v54 }
 0x86e   : > { %v7081_v42 = vmul.f32 %v6930_v59, %v16179_v22  ;;  %v8725_v59 = vld [vmem:[%s17521_s12 + $0x4] sm:$0xf0] }
 0x870   : > { %v7101_v12 = vmul.f32 %v16385_v29, %v7081_v42 }
 0x873   : > { %v5870_v46 = vpop.permute.xlu2 %5869 }
 0x878   : > { %v6846_v44 = vpop.xlane.xlu1 %6845 }
 0x879   : > { %v6890_v2 = vmul.f32 %v6846_v44, %v18919_v0 }
 0x87b   : > { %v6906_v27 = vadd.f32 1e-06, %v6890_v2  ;;  %v5874_v8 = vpop.permute.xlu2 %5873  ;;  %v8585_v2 = vor.u32 %v8731_v51, %v8584_v28 }
 0x87c   : > { %v5965_v7 = vsel %vm18923_vm9, %v5949_v53, %v5874_v8 }
 0x87d   : > { %9620 = vrsqrt.f32 %v6906_v27  ;;  %vm6937_vm7 = vweird.f32 %v6906_v27  ;;  %v5981_v58 = vmul.f32 %v5965_v7, %v18926_v55 }
 0x882   : > { %6006 = vperm.xlu2 %9080, %v16375_v45  }
 0x883   : > { %v9621_v19 = vpop.eup %9620 }
 0x884   : > { %v6932_v50 = vmul.f32 %v9621_v19, %v6906_v27  ;;  %vm6938_vm6 = vweird.f32 %v9621_v19  ;;  %v8576_v27 = vld [vmem:[%s17521_s12 + $0x20] sm:$0xf] }
 0x885   : > { %vm6939_vm10 = vmor %vm6937_vm7, %vm6938_vm6  ;;  %v8577_v11 = vor.u32 %v8729_v36, %v8576_v27 }
 0x886   : > { %v6933_v39 = vmul.f32 %v9621_v19, %v6932_v50  ;;  %v8727_v50 = vld [vmem:[%s17521_s12 + $0x14] sm:$0xf0] }
 0x888   : > { %v6934_v23 = vmul.f32 0.5, %v6933_v39 }
 0x88a   : > { %v6935_v32 = vsub.f32 1.5, %v6934_v23  ;;  %9083 = vset.pattern.permute.xlu2 %v18759_v16 }
 0x88b   : > { %6018 = vperm.xlu2 %9083, %v16375_v45  }
 0x88c   : > { %v6936_v34 = vmul.f32 %v9621_v19, %v6935_v32  ;;  %v8561_v32 = vor.u32 %v8725_v59, %v8560_v10 }
 0x88e   : > { %v6940_v5 = vsel %vm6939_vm10, %v9621_v19, %v6936_v34 }
 0x88f   : > { %v7082_v31 = vmul.f32 %v6940_v5, %v16204_v15 }
 0x890   : > { %v5806_v56 = vpop.permute.xlu1 %5805 }
 0x891   : > { %v7102_v21 = vmul.f32 %v16385_v29, %v7082_v31  ;;  %v5948_v13 = vsel %vm18924_vm12, %v5932_v4, %v5806_v56 }
 0x892   : > { %v5964_v60 = vsel %vm18925_vm4, %v5948_v13, %v5870_v46  ;;  %v6804_v40 = vpop.f32.mrf.mxu0  ;;  %v8568_v46 = vld [vmem:[%s17521_s12 + $0x10] sm:$0xf] }
 0x893   : > { %v7117_v1 = vpack.c.bf16 %v7102_v21, %v7101_v12  ;;  %v5980_v61 = vmul.f32 %v5964_v60, %v18927_v62  ;;  %v16400_v44 = vadd.f32 %v9794_v20, %v6804_v40  ;;  %v8569_v39 = vor.u32 %v8727_v50, %v8568_v46 }
 0x895   : > { %8598 = vmatmul.msk.bf16.vlgmr.msrb.gmra.mxu1 %vm18928_vm14, %v7117_v1  ;;  %v5996_v47 = vpack.c.bf16 %v5981_v58, %v5980_v61  ;;  %v6839_v30 = vmul.f32 %v16400_v44, %v16400_v44  ;;  %v6855_v42 = vpop.xlane.xlu0 %6854 }
 0x897   : > { %6058 = vmatpush.bf16.msra.mxu3 %v5996_v47  ;;  %v6883_v52 = vsel %vm18917_vm2, %v6839_v30, 0.0 }
 0x898   : > { %6884 = vadd.xlane.f32.xlu1 %v6883_v52 }
 0x89a   : > { %8789 = vmatmul.lmr.bf16.vlgmr.msra.gmra.2.mxu3  ;;  %v6806_v63 = vpop.f32.mrf.mxu0 }
 0x89b   : > { %7207 = vmatpush.bf16.msra.mxu3 %v8585_v2  ;;  %v16419_v19 = vadd.f32 %v9795_v35, %v6806_v63 }
 0x89d   : > { %v6840_v54 = vmul.f32 %v16419_v19, %v16419_v19 }
 0x89f   : > { %7208 = vmatpush.bf16.msra.mxu3 %v8577_v11  ;;  %v6886_v23 = vsel %vm18929_vm3, %v6840_v54, 0.0 }
 0x8a0   : > { %6887 = vadd.xlane.f32.xlu0 %v6886_v23 }
 0x8a2   : > { %8790 = vmatmul.lmr.bf16.gmra.2.mxu3 }
 0x8a3   : > { %7209 = vmatpush.bf16.msra.mxu3 %v8569_v39 }
 0x8a7   : > { %7210 = vmatpush.bf16.msra.mxu3 %v8561_v32 }
 0x8aa   : > { %8590 = vmatmul.msk.bf16.vlgmr.msra.gmra.mxu3 %vm18930_vm8, %v7117_v1  ;;  %vm18933_vm8 = vmmov %vm18931_vm5 }
 0x8ab   : > { %8752 = vmatpush.bf16.msra.mxu3 %v16347_v25 }
 0x8af   : > { %8753 = vmatpush.bf16.msra.mxu3 %v16353_v48  ;;  %v6893_v48 = vmul.f32 %v6855_v42, %v18919_v0  ;;  %v6870_v42 = vpop.xlane.xlu0 %6869 }
 0x8b1   : > { %6010 = vperm.xlu1 %9081, %v16375_v45  }
 0x8b3   : > { %8754 = vmatpush.bf16.msra.mxu3 %v16364_v14  ;;  %v16447_v14 = vadd.f32 1e-06, %v6893_v48 }
 0x8b4   : > { %6014 = vperm.xlu0 %9082, %v16375_v45  }
 0x8b5   : > { %vm6967_vm14 = vweird.f32 %v16447_v14 }
 0x8b7   : > { %8755 = vmatpush.bf16.msra.mxu3 %v16373_v38 }
 0x8bb   : > { %v6852_v33 = vpop.xlane.xlu1 %6851 }
 0x8bc   : > { %v6892_v34 = vmul.f32 %v6852_v33, %v18919_v0  ;;  %9084 = vset.pattern.permute.xlu0 %v18759_v16 }
 0x8bd   : > { %v6849_v5 = vpop.xlane.xlu2 %6848 }
 0x8be   : > { %v6908_v8 = vadd.f32 1e-06, %v6892_v34  ;;  %v6891_v25 = vmul.f32 %v6849_v5, %v18919_v0 }
 0x8c0   : > { %9622 = vrsqrt.f32 %v6908_v8  ;;  %v6907_v31 = vadd.f32 1e-06, %v6891_v25  ;;  %vm6957_vm1 = vweird.f32 %v6908_v8 }
 0x8c2   : > { %9624 = vrsqrt.f32 %v6907_v31  ;;  %vm6947_vm0 = vweird.f32 %v6907_v31 }
 0x8c3   : > { %9626 = vrsqrt.f32 %v16447_v14  ;;  %v6861_v1 = vpop.xlane.xlu1 %6860 }
 0x8c4   : > { %v6895_v20 = vmul.f32 %v6861_v1, %v18919_v0 }
 0x8c5   : > { %v6858_v53 = vpop.xlane.xlu2 %6857 }
 0x8c6   : > { %v9623_v45 = vpop.eup %9622  ;;  %v6894_v4 = vmul.f32 %v6858_v53, %v18919_v0  ;;  %v16456_v27 = vadd.f32 1e-06, %v6895_v20 }
 0x8c7   : > { %v6952_v38 = vmul.f32 %v9623_v45, %v6908_v8  ;;  %vm6958_vm15 = vweird.f32 %v9623_v45 }
 0x8c8   : > { %v9625_v7 = vpop.eup %9624  ;;  %v6910_v56 = vadd.f32 1e-06, %v6894_v4  ;;  %vm6959_vm6 = vmor %vm6957_vm1, %vm6958_vm15 }
 0x8c9   : > { %v6953_v16 = vmul.f32 %v9623_v45, %v6952_v38  ;;  %v6942_v12 = vmul.f32 %v9625_v7, %v6907_v31  ;;  %v9627_v55 = vpop.eup %9626  ;;  %vm6948_vm11 = vweird.f32 %v9625_v7  ;;  %vm18934_vm15 = vmmov %vm18931_vm5 }
 0x8ca   : > { %9628 = vrsqrt.f32 %v6910_v56  ;;  %v6962_v51 = vmul.f32 %v9627_v55, %v16447_v14  ;;  %vm6949_vm7 = vmor %vm6947_vm0, %vm6948_vm11  ;;  %vm6968_vm9 = vweird.f32 %v9627_v55  ;;  %vm6977_vm12 = vweird.f32 %v6910_v56 }
 0x8cb   : > { %v6954_v21 = vmul.f32 0.5, %v6953_v16  ;;  %v6943_v13 = vmul.f32 %v9625_v7, %v6942_v12  ;;  %v6867_v10 = vpop.xlane.xlu1 %6866  ;;  %vm6969_vm2 = vmor %vm6967_vm14, %vm6968_vm9  ;;  %vm6987_vm0 = vweird.f32 %v16456_v27 }
 0x8cc   : > { %v6963_v63 = vmul.f32 %v9627_v55, %v6962_v51  ;;  %v6897_v5 = vmul.f32 %v6867_v10, %v18919_v0 }
 0x8cd   : > { %v6955_v60 = vsub.f32 1.5, %v6954_v21  ;;  %v6944_v58 = vmul.f32 0.5, %v6943_v13  ;;  %v6864_v62 = vpop.xlane.xlu2 %6863 }
 0x8ce   : > { %v6896_v61 = vmul.f32 %v6864_v62, %v18919_v0  ;;  %v6964_v39 = vmul.f32 0.5, %v6963_v63  ;;  %v16473_v4 = vadd.f32 1e-06, %v6897_v5 }
 0x8cf   : > { %v6945_v40 = vsub.f32 1.5, %v6944_v58  ;;  %v6956_v47 = vmul.f32 %v9623_v45, %v6955_v60 }
 0x8d0   : > { %v9629_v28 = vpop.eup %9628  ;;  %v16454_v52 = vadd.f32 1e-06, %v6896_v61  ;;  %v6965_v34 = vsub.f32 1.5, %v6964_v39 }
 0x8d1   : > { %v6946_v30 = vmul.f32 %v9625_v7, %v6945_v40  ;;  %v6972_v2 = vmul.f32 %v9629_v28, %v6910_v56  ;;  %v6960_v11 = vsel %vm6959_vm6, %v9623_v45, %v6956_v47  ;;  %vm6978_vm10 = vweird.f32 %v9629_v28 }
 0x8d2   : > { %9630 = vrsqrt.f32 %v16454_v52  ;;  %v7084_v50 = vmul.f32 %v6960_v11, %v16263_v49  ;;  %v6898_v45 = vmul.f32 %v6870_v42, %v18919_v0  ;;  %v6966_v53 = vmul.f32 %v9627_v55, %v6965_v34  ;;  %vm6979_vm4 = vmor %vm6977_vm12, %vm6978_vm10 }
 0x8d3   : > { %v6973_v36 = vmul.f32 %v9629_v28, %v6972_v2  ;;  %v6950_v35 = vsel %vm6949_vm7, %v9625_v7, %v6946_v30  ;;  %9632 = vrsqrt.f32 %v16456_v27  ;;  %vm6997_vm1 = vweird.f32 %v16454_v52 }
 0x8d4   : > { %v7083_v54 = vmul.f32 %v6950_v35, %v16267_v41  ;;  %v7104_v33 = vmul.f32 %v16385_v29, %v7084_v50  ;;  %v16477_v12 = vadd.f32 1e-06, %v6898_v45  ;;  %v6970_v21 = vsel %vm6969_vm2, %v9627_v55, %v6966_v53 }
 0x8d5   : > { %v6974_v46 = vmul.f32 0.5, %v6973_v36  ;;  %9634 = vrsqrt.f32 %v16473_v4  ;;  %v7085_v56 = vmul.f32 %v6970_v21, %v16234_v57  ;;  %v6873_v40 = vpop.xlane.xlu2 %6872  ;;  %vm7007_vm12 = vweird.f32 %v16473_v4 }
 0x8d6   : > { %v7103_v32 = vmul.f32 %v16385_v29, %v7083_v54  ;;  %9636 = vrsqrt.f32 %v16477_v12  ;;  %v6899_v36 = vmul.f32 %v6873_v40, %v18919_v0  ;;  %vm7017_vm14 = vweird.f32 %v16477_v12 }
 0x8d7   : > { %v6975_v23 = vsub.f32 1.5, %v6974_v46  ;;  %v7105_v20 = vmul.f32 %v16385_v29, %v7085_v56 }
 0x8d8   : > { %v16462_v59 = vpop.eup %9630  ;;  %v7118_v25 = vpack.c.bf16 %v7104_v33, %v7103_v32  ;;  %v16500_v54 = vadd.f32 1e-06, %v6899_v36 }
 0x8d9   : > { %v9633_v8 = vpop.eup %9632  ;;  %v6976_v48 = vmul.f32 %v9629_v28, %v6975_v23  ;;  %v6992_v31 = vmul.f32 %v16462_v59, %v16454_v52  ;;  %vm6998_vm3 = vweird.f32 %v16462_v59 }
 0x8da   : > { %8591 = vmatmul.msk.bf16.gmra.mxu3 %vm18931_vm5, %v7118_v25  ;;  %8599 = vmatmul.msk.bf16.gmra.mxu1 %vm18932_vm13, %v7118_v25  ;;  %v6982_v38 = vmul.f32 %v9633_v8, %v16456_v27  ;;  %vm6988_vm11 = vweird.f32 %v9633_v8  ;;  %vm6999_vm6 = vmor %vm6997_vm1, %vm6998_vm3  ;;  %9638 = vrsqrt.f32 %v16500_v54  ;;  %vm7027_vm1 = vweird.f32 %v16500_v54 }
 0x8db   : > { %v6980_v7 = vsel %vm6979_vm4, %v9629_v28, %v6976_v48  ;;  %v6993_v16 = vmul.f32 %v16462_v59, %v6992_v31  ;;  %v16484_v61 = vpop.eup %9634  ;;  %v6876_v28 = vpop.xlane.xlu1 %6875  ;;  %vm6989_vm7 = vmor %vm6987_vm0, %vm6988_vm11 }
 0x8dc   : > { %v6983_v13 = vmul.f32 %v9633_v8, %v6982_v38  ;;  %v7086_v60 = vmul.f32 %v6980_v7, %v16280_v18  ;;  %v9637_v51 = vpop.eup %9636  ;;  %v7002_v30 = vmul.f32 %v16484_v61, %v16473_v4  ;;  %v6900_v63 = vmul.f32 %v6876_v28, %v18919_v0  ;;  %vm18935_vm13 = vmmov %vm18931_vm5 }
 0x8dd   : > { %v6994_v1 = vmul.f32 0.5, %v6993_v16  ;;  %v7012_v11 = vmul.f32 %v9637_v51, %v16477_v12  ;;  %v6882_v42 = vpop.xlane.xlu2 %6881  ;;  %vm7008_vm10 = vweird.f32 %v16484_v61  ;;  %vm7018_vm9 = vweird.f32 %v9637_v51 }
 0x8de   : > { %v6984_v58 = vmul.f32 0.5, %v6983_v13  ;;  %v7106_v14 = vmul.f32 %v16385_v29, %v7086_v60  ;;  %v7003_v46 = vmul.f32 %v16484_v61, %v7002_v30  ;;  %v16502_v39 = vadd.f32 1e-06, %v6900_v63  ;;  %vm7009_vm4 = vmor %vm7007_vm12, %vm7008_vm10 }
 0x8df   : > { %v6995_v62 = vsub.f32 1.5, %v6994_v1  ;;  %v7013_v23 = vmul.f32 %v9637_v51, %v7012_v11  ;;  %v6902_v45 = vmul.f32 %v6882_v42, %v18919_v0  ;;  %vm7019_vm2 = vmor %vm7017_vm14, %vm7018_vm9 }
 0x8e0   : > { %v6985_v55 = vsub.f32 1.5, %v6984_v58  ;;  %v7119_v47 = vpack.c.bf16 %v7106_v14, %v7105_v20  ;;  %v7004_v33 = vmul.f32 0.5, %v7003_v46  ;;  %9640 = vrsqrt.f32 %v16502_v39  ;;  %v16510_v25 = vpop.eup %9638 }
 0x8e1   : > { %v6996_v2 = vmul.f32 %v16462_v59, %v6995_v62  ;;  %v7014_v27 = vmul.f32 0.5, %v7013_v23  ;;  %v7022_v16 = vmul.f32 %v16510_v25, %v16500_v54  ;;  %v16525_v60 = vadd.f32 1e-06, %v6902_v45 }
 0x8e2   : > { %v6986_v35 = vmul.f32 %v9633_v8, %v6985_v55  ;;  %vm7028_vm3 = vweird.f32 %v16510_v25 }
 0x8e3   : > { %v7000_v50 = vsel %vm6999_vm6, %v16462_v59, %v6996_v2  ;;  %v7005_v59 = vsub.f32 1.5, %v7004_v33  ;;  %v7015_v48 = vsub.f32 1.5, %v7014_v27  ;;  %v7023_v58 = vmul.f32 %v16510_v25, %v7022_v16  ;;  %vm7029_vm0 = vmor %vm7027_vm1, %vm7028_vm3  ;;  %v8747_v16 = vld [vmem:[%s17523_s14 + $0x78] sm:$0xff] }
 0x8e4   : > { %v6990_v10 = vsel %vm6989_vm7, %v9633_v8, %v6986_v35  ;;  %v7088_v32 = vmul.f32 %v7000_v50, %v16302_v37  ;;  %v6879_v8 = vpop.xlane.xlu0 %6878  ;;  %9642 = vrsqrt.f32 %v16525_v60  ;;  %vm7037_vm6 = vweird.f32 %v16502_v39  ;;  %8134 = vmatpush.bf16.msra.mxu0 %v8747_v16 }
 0x8e5   : > { %v7087_v52 = vmul.f32 %v6990_v10, %v16275_v6  ;;  %v7006_v38 = vmul.f32 %v16484_v61, %v7005_v59  ;;  %v6901_v7 = vmul.f32 %v6879_v8, %v18919_v0  ;;  %v7016_v21 = vmul.f32 %v9637_v51, %v7015_v48 }
 0x8e6   : > { %v7108_v34 = vmul.f32 %v16385_v29, %v7088_v32  ;;  %v16512_v31 = vpop.eup %9640  ;;  %v7024_v20 = vmul.f32 0.5, %v7023_v58  ;;  %vm7057_vm12 = vweird.f32 %v16525_v60  ;;  %vm18940_vm3 = vcmask 261120  }
 0x8e7   : > { %v7107_v5 = vmul.f32 %v16385_v29, %v7087_v52  ;;  %v7032_v13 = vmul.f32 %v16512_v31, %v16502_v39  ;;  %v7010_v1 = vsel %vm7009_vm4, %v16484_v61, %v7006_v38  ;;  %v16529_v56 = vadd.f32 1e-06, %v6901_v7 }
 0x8e8   : > { %v7020_v14 = vsel %vm7019_vm2, %v9637_v51, %v7016_v21  ;;  %v7089_v4 = vmul.f32 %v7010_v1, %v16294_v26  ;;  %v7025_v28 = vsub.f32 1.5, %v7024_v20  ;;  %v16544_v51 = vld [vmem:[%s17522_s13] sm:$0x3]  ;;  %vm7038_vm11 = vweird.f32 %v16512_v31  ;;  %v8739_v21 = vld [vmem:[%s17523_s14 + $0x38] sm:$0xff] }
 0x8e9   : > { %v7120_v53 = vpack.c.bf16 %v7108_v34, %v7107_v5  ;;  %v7033_v62 = vmul.f32 %v16512_v31, %v7032_v13  ;;  %v7090_v40 = vmul.f32 %v7020_v14, %v16246_v43  ;;  %9644 = vrsqrt.f32 %v16529_v56  ;;  %vm7039_vm7 = vmor %vm7037_vm6, %vm7038_vm11  ;;  %8085 = vmatpush.bf16.msrb.mxu2 %v8739_v21 }
 0x8ea   : > { %8592 = vmatmul.msk.bf16.gmra.mxu3 %vm18933_vm8, %v7119_v47  ;;  %8600 = vmatmul.msk.bf16.gmra.mxu1 %vm18934_vm15, %v7119_v47  ;;  %v7109_v61 = vmul.f32 %v16385_v29, %v7089_v4  ;;  %v16538_v55 = vpop.eup %9642  ;;  %v16551_v35 = vperm.slane %v16544_v51, 1  ;;  %v7026_v46 = vmul.f32 %v16510_v25, %v7025_v28  ;;  %vm18936_vm8 = vmmov %vm18931_vm5  ;;  %v8746_v4 = vld [vmem:[%s17523_s14 + $0x70] sm:$0xff]  ;;  %vm7047_vm14 = vweird.f32 %v16529_v56 }
 0x8eb   : > { %v7034_v12 = vmul.f32 0.5, %v7033_v62  ;;  %v7110_v47 = vmul.f32 %v16385_v29, %v7090_v40  ;;  %v7052_v11 = vmul.f32 %v16538_v55, %v16525_v60  ;;  %vm18937_vm15 = vmmov %vm18931_vm5  ;;  %vm7058_vm10 = vweird.f32 %v16538_v55  ;;  %8135 = vmatpush.bf16.msra.mxu0 %v8746_v4 }
 0x8ec   : > { %v7030_v27 = vsel %vm7029_vm0, %v16510_v25, %v7026_v46  ;;  %vm18939_vm9 = vmmov %vm18936_vm8 }
 0x8ed   : > { %v7035_v30 = vsub.f32 1.5, %v7034_v12  ;;  %v7121_v63 = vpack.c.bf16 %v7110_v47, %v7109_v61  ;;  %v7053_v33 = vmul.f32 %v16538_v55, %v7052_v11  ;;  %v7091_v48 = vmul.f32 %v7030_v27, %v16320_v9  ;;  %v6007_v47 = vpop.permute.xlu2 %6006  ;;  %v8745_v11 = vld [vmem:[%s17523_s14 + $0x68] sm:$0xff]  ;;  %vm7059_vm4 = vmor %vm7057_vm12, %vm7058_vm10  ;;  %v8744_v27 = vld [vmem:[%s17523_s14 + $0x60] sm:$0xff] }
 0x8ef   : > { %v16546_v36 = vpop.eup %9644  ;;  %v7036_v10 = vmul.f32 %v16512_v31, %v7035_v30  ;;  %v7054_v8 = vmul.f32 0.5, %v7053_v33  ;;  %8136 = vmatpush.bf16.msra.mxu0 %v8745_v11 }
 0x8f0   : > { %v7042_v23 = vmul.f32 %v16546_v36, %v16529_v56 }
 0x8f1   : > { %v7040_v5 = vsel %vm7039_vm7, %v16512_v31, %v7036_v10  ;;  %v7055_v7 = vsub.f32 1.5, %v7054_v8  ;;  %vm18942_vm7 = vmmov %vm18936_vm8 }
 0x8f2   : > { %v7043_v42 = vmul.f32 %v16546_v36, %v7042_v23  ;;  %vm18943_vm10 = vmmov %vm18942_vm7 }
 0x8f3   : > { %v7056_v28 = vmul.f32 %v16538_v55, %v7055_v7  ;;  %8137 = vmatpush.bf16.msra.mxu0 %v8744_v27 }
 0x8f4   : > { %v7044_v25 = vmul.f32 0.5, %v7043_v42 }
 0x8f5   : > { %v7060_v46 = vsel %vm7059_vm4, %v16538_v55, %v7056_v28  ;;  %v9797_v28 = vld [vmem:[#allocation2 + $0x8] sm:$0xff] }
 0x8f6   : > { %v7045_v58 = vsub.f32 1.5, %v7044_v25  ;;  %v7094_v56 = vmul.f32 %v7060_v46, %v16331_v17  ;;  %v8742_v46 = vld [vmem:[%s17523_s14 + $0x50] sm:$0xff] }
 0x8f8   : > { %v7046_v30 = vmul.f32 %v16546_v36, %v7045_v58  ;;  %v7114_v7 = vmul.f32 %v16385_v29, %v7094_v56  ;;  %v8743_v58 = vld [vmem:[%s17523_s14 + $0x58] sm:$0xff] }
 0x8f9   : > { %8138 = vmatpush.bf16.msra.mxu0 %v8743_v58 }
 0x8fa   : > { %8593 = vmatmul.msk.bf16.gmra.mxu3 %vm18931_vm5, %v7120_v53  ;;  %8601 = vmatmul.msk.bf16.gmra.mxu1 %vm18935_vm13, %v7120_v53  ;;  %v7092_v53 = vmul.f32 %v7040_v5, %v16315_v3  ;;  %vm7048_vm5 = vweird.f32 %v16546_v36  ;;  %vm18938_vm13 = vmmov %vm18936_vm8 }
 0x8fb   : > { %vm7049_vm2 = vmor %vm7047_vm14, %vm7048_vm5 }
 0x8fc   : > { %v7112_v13 = vmul.f32 %v16385_v29, %v7092_v53  ;;  %v7050_v23 = vsel %vm7049_vm2, %v16546_v36, %v7046_v30 }
 0x8fd   : > { %8139 = vmatpush.bf16.msra.mxu0 %v8742_v46  ;;  %v8735_v46 = vld [vmem:[%s17523_s14 + $0x18] sm:$0xff] }
 0x90a   : > { %8594 = vmatmul.msk.bf16.gmra.mxu3 %vm18936_vm8, %v7121_v63  ;;  %8602 = vmatmul.msk.bf16.gmra.mxu1 %vm18937_vm15, %v7121_v63  ;;  %vm18941_vm15 = vcmask 785408  }
 0x90b   : > { %v6885_v2 = vpop.xlane.xlu1 %6884 }
 0x90c   : > { %v6903_v50 = vmul.f32 %v6885_v2, %v18919_v0 }
 0x90e   : > { %v16569_v34 = vadd.f32 1e-06, %v6903_v50 }
 0x912   : > { %v7261_v32 = vpop.f32.mrf.mxu1 }
 0x913   : > { %v16566_v52 = vadd.f32 %v7261_v32, %v16551_v35  ;;  %v6888_v59 = vpop.xlane.xlu0 %6887 }
 0x914   : > { %v6904_v39 = vmul.f32 %v6888_v59, %v18919_v0  ;;  %v7111_v0 = vmul.f32 %v16385_v29, %v7091_v48  ;;  %v6019_v48 = vpop.permute.xlu2 %6018 }
 0x915   : > { %v8607_v54 = vmul.f32 -1.442695, %v16566_v52 }
 0x916   : > { %v16576_v45 = vadd.f32 1e-06, %v6904_v39  ;;  %v7122_v12 = vpack.c.bf16 %v7112_v13, %v7111_v0  ;;  %v16641_v0 = vperm.slane %v16544_v51, 0 }
 0x917   : > { %9646 = vpow2.f32 %v8607_v54  ;;  %v7093_v54 = vmul.f32 %v7050_v23, %v16306_v24 }
 0x918   : > { %9648 = vrsqrt.f32 %v16569_v34  ;;  %vm7077_vm0 = vweird.f32 %v16576_v45 }
 0x919   : > { %9650 = vrsqrt.f32 %v16576_v45 }
 0x91a   : > { %v7263_v38 = vpop.f32.mrf.mxu1  ;;  %8595 = vmatmul.msk.bf16.gmra.mxu3 %vm18938_vm13, %v7122_v12  ;;  %8603 = vmatmul.msk.bf16.gmra.mxu1 %vm18939_vm9, %v7122_v12  ;;  %v9796_v12 = vld [vmem:[#allocation2] sm:$0xff]  ;;  %vm7067_vm9 = vweird.f32 %v16569_v34 }
 0x91b   : > { %v16582_v31 = vadd.f32 %v7263_v38, %v16551_v35 }
 0x91d   : > { %v9647_v1 = vpop.eup %9646  ;;  %v8609_v14 = vmul.f32 -1.442695, %v16582_v31  ;;  %v16593_v62 = vpop.f32.mrf.mxu3 }
 0x91e   : > { %v16598_v40 = vpop.eup %9648  ;;  %v16600_v20 = vadd.f32 1.0, %v9647_v1  ;;  %v7113_v1 = vmul.f32 %v16385_v29, %v7093_v54 }
 0x91f   : > { %v16602_v61 = vpop.eup %9650  ;;  %9652 = vpow2.f32 %v8609_v14  ;;  %v7062_v2 = vmul.f32 %v16598_v40, %v16569_v34  ;;  %v8738_v14 = vld [vmem:[%s17523_s14 + $0x30] sm:$0xff]  ;;  %vm7068_vm11 = vweird.f32 %v16598_v40 }
 0x920   : > { %9654 = vrcp.f32 %v16600_v20  ;;  %v7072_v63 = vmul.f32 %v16602_v61, %v16576_v45  ;;  %vm7078_vm6 = vweird.f32 %v16602_v61  ;;  %8086 = vmatpush.bf16.msrb.mxu2 %v8738_v14  ;;  %vm7449_vm5 = vweird.f32 %v16600_v20  ;;  %vm16695_vm14 = vmor %vm7067_vm9, %vm7068_vm11 }
 0x921   : > { %v7063_v10 = vmul.f32 %v16598_v40, %v7062_v2  ;;  %vm16674_vm13 = vmor %vm7077_vm0, %vm7078_vm6 }
 0x922   : > { %v7073_v50 = vmul.f32 %v16602_v61, %v7072_v63  ;;  %v7123_v63 = vpack.c.bf16 %v7114_v7, %v7113_v1  ;;  %vm18950_vm11 = vmmov %vm18942_vm7 }
 0x923   : > { %v6011_v32 = vpop.permute.xlu1 %6010  ;;  %v7064_v8 = vmul.f32 0.5, %v7063_v10 }
 0x924   : > { %v7074_v5 = vmul.f32 0.5, %v7073_v50  ;;  %v6021_v39 = vsel %vm18940_vm3, %v6007_v47, %v6011_v32  ;;  %v7455_v32 = vand.u32 2147483648, %v16600_v20 }
 0x925   : > { %v9653_v60 = vpop.eup %9652  ;;  %v6062_v33 = vpop.f32.mrf.mxu3  ;;  %v7065_v4 = vsub.f32 1.5, %v7064_v8 }
 0x926   : > { %v16627_v59 = vpop.eup %9654  ;;  %v16630_v55 = vadd.f32 1.0, %v9653_v60  ;;  %v6015_v36 = vpop.permute.xlu0 %6014  ;;  %v7075_v21 = vsub.f32 1.5, %v7074_v5  ;;  %v7453_v5 = vand.u32 2147483647, %v16600_v20  ;;  %v7456_v8 = vor.u32 1.1754944e-38, %v7455_v32  ;;  %v8733_v32 = vld [vmem:[%s17523_s14 + $0x8] sm:$0xff] }
 0x927   : > { %v7445_v42 = vmul.f32 %v16627_v59, %v16600_v20  ;;  %v6022_v25 = vsel %vm18936_vm8, %v6021_v39, %v6015_v36  ;;  %vm7450_vm1 = vweird.f32 %v16627_v59 }
 0x928   : > { %9656 = vrcp.f32 %v16630_v55  ;;  %v6023_v38 = vsel %vm18941_vm15, %v6022_v25, %v6019_v48  ;;  %v7076_v60 = vmul.f32 %v16602_v61, %v7075_v21  ;;  %vm16681_vm12 = vmor %vm7449_vm5, %vm7450_vm1  ;;  %v7483_v36 = vand.u32 2147483647, %v16630_v55  ;;  %v8741_v21 = vld [vmem:[%s17523_s14 + $0x48] sm:$0xff] }
 0x929   : > { %v7446_v53 = vsub.f32 1.0, %v7445_v42  ;;  %v6024_v13 = vperm.slane %v6023_v38, 0  ;;  %v7066_v42 = vmul.f32 %v16598_v40, %v7065_v4  ;;  %v7485_v20 = vand.u32 2147483648, %v16630_v55  ;;  %8140 = vmatpush.bf16.msra.mxu0 %v8741_v21  ;;  %v8740_v4 = vld [vmem:[%s17523_s14 + $0x40] sm:$0xff] }
 0x92a   : > { %8596 = vmatmul.msk.bf16.gmra.mxu3 %vm18942_vm7, %v7123_v63  ;;  %8604 = vmatmul.msk.bf16.gmra.mxu1 %vm18943_vm10, %v7123_v63  ;;  %v7080_v34 = vsel %vm16674_vm13, %v16602_v61, %v7076_v60  ;;  %vm7454_vm2 = vcmp.eq.f32.partialorder %v7453_v5, 8.507059e+37  ;;  %vm7479_vm3 = vweird.f32 %v16630_v55  ;;  %vm7484_vm15 = vcmp.eq.f32.partialorder %v7483_v36, 8.507059e+37  ;;  %vm18951_vm13 = vmmov %vm18950_vm11 }
 0x92b   : > { %v7447_v16 = vmul.f32 %v16627_v59, %v7446_v53  ;;  %v6025_v51 = vmul.f32 %v9796_v12, %v6024_v13  ;;  %v6026_v47 = vmul.f32 %v9797_v28, %v6024_v13  ;;  %v7070_v53 = vsel %vm16695_vm14, %v16598_v40, %v7066_v42  ;;  %v8737_v40 = vld [vmem:[%s17523_s14 + $0x28] sm:$0xff]  ;;  %v8736_v12 = vld [vmem:[%s17523_s14 + $0x20] sm:$0xff] }
 0x92c   : > { %v7096_v61 = vmul.f32 %v7080_v34, %v16419_v19  ;;  %v7486_v7 = vor.u32 1.1754944e-38, %v7485_v20  ;;  %v7095_v1 = vmul.f32 %v7070_v53, %v16400_v44  ;;  %8087 = vmatpush.bf16.msrb.mxu2 %v8737_v40 }
 0x92d   : > { %v7212_v30 = vpop.f32.mrf.mxu3  ;;  %v7448_v50 = vadd.f32 %v16627_v59, %v7447_v16  ;;  %v6065_v10 = vadd.f32 %v16593_v62, %v6025_v51  ;;  %v6066_v27 = vadd.f32 %v6062_v33, %v6026_v47  ;;  %8141 = vmatpush.bf16.msra.mxu0 %v8740_v4 }
 0x92e   : > { %v9657_v2 = vpop.eup %9656  ;;  %v16655_v11 = vadd.f32 %v7212_v30, %v16641_v0  ;;  %v7116_v30 = vmul.f32 %v16385_v29, %v7096_v61  ;;  %v7115_v63 = vmul.f32 %v16385_v29, %v7095_v1 }
 0x92f   : > { %v7475_v23 = vmul.f32 %v9657_v2, %v16630_v55  ;;  %6067 = vst [vmem:[#allocation2] sm:$0xff] %v6065_v10  ;;  %v7452_v54 = vsel %vm16681_vm12, %v16627_v59, %v7448_v50  ;;  %vm7480_vm4 = vweird.f32 %v9657_v2 }
 0x930   : > { %v8606_v56 = vmul.f32 -1.442695, %v16655_v11  ;;  %6068 = vst [vmem:[#allocation2 + $0x8] sm:$0xff] %v6066_v27  ;;  %v7457_v38 = vsel %vm7454_vm2, %v7456_v8, %v7452_v54  ;;  %vm7481_vm8 = vmor %vm7479_vm3, %vm7480_vm4  ;;  %8088 = vmatpush.bf16.msrb.mxu2 %v8736_v12  ;;  %v7124_v50 = vpack.c.bf16 %v7116_v30, %v7115_v63 }
 0x931   : > { %v7476_v45 = vsub.f32 1.0, %v7475_v23  ;;  %v7910_v51 = vmul.f32 %v7457_v38, %v16566_v52  ;;  %v8734_v52 = vld [vmem:[%s17523_s14 + $0x10] sm:$0xff] }
 0x932   : > { %9658 = vpow2.f32 %v8606_v56  ;;  %v8732_v56 = vld [vmem:[%s17523_s14] sm:$0xff] }
 0x933   : > { %v7477_v39 = vmul.f32 %v9657_v2, %v7476_v45 }
 0x934   : > { %8089 = vmatpush.bf16.msrb.mxu2 %v8735_v46 }
 0x935   : > { %v7478_v25 = vadd.f32 %v9657_v2, %v7477_v39  ;;  %v7214_v59 = vpop.f32.mrf.mxu3 }
 0x936   : > { %v16705_v16 = vadd.f32 %v7214_v59, %v16641_v0 }
 0x937   : > { %v7482_v13 = vsel %vm7481_vm8, %v9657_v2, %v7478_v25 }
 0x938   : > { %v9659_v55 = vpop.eup %9658  ;;  %v7487_v58 = vsel %vm7484_vm15, %v7486_v7, %v7482_v13  ;;  %v8608_v14 = vmul.f32 -1.442695, %v16705_v16  ;;  %8090 = vmatpush.bf16.msrb.mxu2 %v8734_v52 }
 0x939   : > { %v7912_v28 = vmul.f32 %v7487_v58, %v16582_v31  ;;  %v7397_v47 = vadd.f32 1.0, %v9659_v55 }
 0x93a   : > { %9660 = vpow2.f32 %v8608_v14  ;;  %8597 = vmatmul.msk.bf16.gmra.mxu3 %vm18950_vm11, %v7124_v50 }
 0x93b   : > { %v7942_v2 = vpack.c.bf16 %v7912_v28, %v7910_v51  ;;  %9662 = vrcp.f32 %v7397_v47  ;;  %v7440_v45 = vand.u32 2147483648, %v7397_v47  ;;  %vm7434_vm6 = vweird.f32 %v7397_v47 }
 0x93c   : > { %8091 = vmatpush.bf16.msrb.mxu2 %v8733_v32  ;;  %v7438_v33 = vand.u32 2147483647, %v7397_v47 }
 0x93d   : > { %8142 = vmatmul.bf16.vlgmr.msra.gmra.mxu0 %v7942_v2  ;;  %v7441_v48 = vor.u32 1.1754944e-38, %v7440_v45 }
 0x93e   : > { %vm7439_vm10 = vcmp.eq.f32.partialorder %v7438_v33, 8.507059e+37 }
 0x940   : > { %v9661_v60 = vpop.eup %9660  ;;  %8092 = vmatpush.bf16.msrb.mxu2 %v8732_v56 }
 0x941   : > { %v9663_v31 = vpop.eup %9662  ;;  %v7399_v23 = vadd.f32 1.0, %v9661_v60 }
 0x942   : > { %v7430_v10 = vmul.f32 %v9663_v31, %v7397_v47  ;;  %vm7435_vm1 = vweird.f32 %v9663_v31 }
 0x943   : > { %9664 = vrcp.f32 %v7399_v23  ;;  %vm7436_vm0 = vmor %vm7434_vm6, %vm7435_vm1  ;;  %v7470_v20 = vand.u32 2147483648, %v7399_v23  ;;  %v7468_v39 = vand.u32 2147483647, %v7399_v23  ;;  %vm7464_vm5 = vweird.f32 %v7399_v23 }
 0x944   : > { %v7431_v29 = vsub.f32 1.0, %v7430_v10 }
 0x945   : > { %v7471_v25 = vor.u32 1.1754944e-38, %v7470_v20  ;;  %vm7469_vm12 = vcmp.eq.f32.partialorder %v7468_v39, 8.507059e+37 }
 0x946   : > { %v7432_v27 = vmul.f32 %v9663_v31, %v7431_v29 }
 0x948   : > { %v7433_v5 = vadd.f32 %v9663_v31, %v7432_v27 }
 0x949   : > { %v9665_v42 = vpop.eup %9664 }
 0x94a   : > { %v7460_v62 = vmul.f32 %v9665_v42, %v7399_v23  ;;  %v7437_v54 = vsel %vm7436_vm0, %v9663_v31, %v7433_v5  ;;  %vm7465_vm7 = vweird.f32 %v9665_v42  ;;  %8605 = vmatmul.msk.bf16.vlgmr.msra.gmra.mxu3 %vm18951_vm13, %v7124_v50 }
 0x94b   : > { %v7442_v53 = vsel %vm7439_vm10, %v7441_v48, %v7437_v54  ;;  %vm7466_vm9 = vmor %vm7464_vm5, %vm7465_vm7 }
 0x94c   : > { %v7461_v36 = vsub.f32 1.0, %v7460_v62  ;;  %v7909_v61 = vmul.f32 %v7442_v53, %v16655_v11 }
 0x94e   : > { %v7462_v34 = vmul.f32 %v9665_v42, %v7461_v36 }
 0x950   : > { %v7463_v8 = vadd.f32 %v9665_v42, %v7462_v34 }
 0x952   : > { %v7467_v59 = vsel %vm7466_vm9, %v9665_v42, %v7463_v8 }
 0x953   : > { %v7472_v38 = vsel %vm7469_vm12, %v7471_v25, %v7467_v59 }
 0x954   : > { %v7911_v7 = vmul.f32 %v7472_v38, %v16705_v16 }
 0x956   : > { %v7941_v21 = vpack.c.bf16 %v7911_v7, %v7909_v61 }
 0x957   : > { %v7266_v40 = vpop.f32.mrf.mxu1 }
 0x958   : > { %8093 = vmatmul.bf16.vlgmr.msrb.gmra.mxu2 %v7941_v21  ;;  %v16742_v13 = vadd.f32 %v7266_v40, %v16551_v35 }
 0x95a   : > { %v8611_v55 = vmul.f32 -1.442695, %v16742_v13 }
 0x95c   : > { %9666 = vpow2.f32 %v8611_v55 }
 0x95d   : > { %v7217_v1 = vpop.f32.mrf.mxu3 }
 0x95e   : > { %v16746_v58 = vadd.f32 %v7217_v1, %v16641_v0 }
 0x95f   : > { %v7268_v14 = vpop.f32.mrf.mxu1 }
 0x960   : > { %v8610_v4 = vmul.f32 -1.442695, %v16746_v58  ;;  %v16750_v11 = vadd.f32 %v7268_v14, %v16551_v35 }
 0x962   : > { %v9667_v16 = vpop.eup %9666  ;;  %9668 = vpow2.f32 %v8610_v4  ;;  %v8613_v12 = vmul.f32 -1.442695, %v16750_v11 }
 0x963   : > { %v16753_v51 = vadd.f32 1.0, %v9667_v16 }
 0x964   : > { %9670 = vpow2.f32 %v8613_v12 }
 0x965   : > { %v7219_v28 = vpop.f32.mrf.mxu3  ;;  %9672 = vrcp.f32 %v16753_v51  ;;  %v7515_v53 = vand.u32 2147483648, %v16753_v51  ;;  %v7513_v25 = vand.u32 2147483647, %v16753_v51  ;;  %vm7509_vm4 = vweird.f32 %v16753_v51 }
 0x966   : > { %v16756_v47 = vadd.f32 %v7219_v28, %v16641_v0 }
 0x967   : > { %v7271_v30 = vpop.f32.mrf.mxu1  ;;  %v7516_v4 = vor.u32 1.1754944e-38, %v7515_v53  ;;  %vm16814_vm3 = vcmp.eq.f32.partialorder %v7513_v25, 8.507059e+37 }
 0x968   : > { %v9669_v2 = vpop.eup %9668  ;;  %v8612_v63 = vmul.f32 -1.442695, %v16756_v47  ;;  %v16761_v46 = vadd.f32 %v7271_v30, %v16551_v35 }
 0x969   : > { %v16763_v50 = vadd.f32 1.0, %v9669_v2 }
 0x96a   : > { %v9671_v60 = vpop.eup %9670  ;;  %9674 = vpow2.f32 %v8612_v63  ;;  %v8615_v52 = vmul.f32 -1.442695, %v16761_v46 }
 0x96b   : > { %9676 = vrcp.f32 %v16763_v50  ;;  %v16767_v31 = vadd.f32 1.0, %v9671_v60  ;;  %v16769_v23 = vpop.eup %9672  ;;  %vm7494_vm14 = vweird.f32 %v16763_v50 }
 0x96c   : > { %9678 = vpow2.f32 %v8615_v52  ;;  %v7505_v56 = vmul.f32 %v16769_v23, %v16753_v51  ;;  %vm7510_vm2 = vweird.f32 %v16769_v23 }
 0x96d   : > { %v7222_v10 = vpop.f32.mrf.mxu3  ;;  %9680 = vrcp.f32 %v16767_v31  ;;  %v7543_v2 = vand.u32 2147483647, %v16767_v31  ;;  %vm7539_vm15 = vweird.f32 %v16767_v31  ;;  %vm16839_vm11 = vmor %vm7509_vm4, %vm7510_vm2 }
 0x96e   : > { %v16773_v29 = vadd.f32 %v7222_v10, %v16641_v0  ;;  %v7506_v54 = vsub.f32 1.0, %v7505_v56  ;;  %v7500_v56 = vand.u32 2147483648, %v16763_v50 }
 0x96f   : > { %v7273_v32 = vpop.f32.mrf.mxu1  ;;  %vm16855_vm0 = vcmp.eq.f32.partialorder %v7543_v2, 8.507059e+37 }
 0x970   : > { %v9675_v27 = vpop.eup %9674  ;;  %v16778_v42 = vadd.f32 %v7273_v32, %v16551_v35  ;;  %v8614_v45 = vmul.f32 -1.442695, %v16773_v29  ;;  %v7507_v7 = vmul.f32 %v16769_v23, %v7506_v54  ;;  %v7545_v54 = vand.u32 2147483648, %v16767_v31 }
 0x971   : > { %v16780_v5 = vpop.eup %9676  ;;  %v16782_v62 = vadd.f32 1.0, %v9675_v27  ;;  %v7498_v27 = vand.u32 2147483647, %v16763_v50 }
 0x972   : > { %v9679_v33 = vpop.eup %9678  ;;  %v7490_v36 = vmul.f32 %v16780_v5, %v16763_v50  ;;  %v8617_v39 = vmul.f32 -1.442695, %v16778_v42  ;;  %v7508_v52 = vadd.f32 %v16769_v23, %v7507_v7  ;;  %vm7495_vm1 = vweird.f32 %v16780_v5 }
 0x973   : > { %9682 = vrcp.f32 %v16782_v62  ;;  %v16788_v20 = vpop.eup %9680  ;;  %v16790_v34 = vadd.f32 1.0, %v9679_v33  ;;  %vm16870_vm10 = vmor %vm7494_vm14, %vm7495_vm1  ;;  %vm7524_vm5 = vweird.f32 %v16782_v62  ;;  %vm7499_vm9 = vcmp.eq.f32.partialorder %v7498_v27, 8.507059e+37 }
 0x974   : > { %9684 = vpow2.f32 %v8614_v45  ;;  %v7535_v48 = vmul.f32 %v16788_v20, %v16767_v31  ;;  %v7491_v59 = vsub.f32 1.0, %v7490_v36  ;;  %vm7540_vm8 = vweird.f32 %v16788_v20 }
 0x975   : > { %v7224_v8 = vpop.f32.mrf.mxu3  ;;  %9686 = vrcp.f32 %v16790_v34  ;;  %v7512_v25 = vsel %vm16839_vm11, %v16769_v23, %v7508_v52  ;;  %vm16851_vm6 = vmor %vm7539_vm15, %vm7540_vm8  ;;  %vm7569_vm4 = vweird.f32 %v16790_v34 }
 0x976   : > { %v7536_v38 = vsub.f32 1.0, %v7535_v48  ;;  %9688 = vpow2.f32 %v8617_v39  ;;  %v16800_v21 = vadd.f32 %v7224_v8, %v16641_v0  ;;  %v7492_v30 = vmul.f32 %v16780_v5, %v7491_v59 }
 0x977   : > { %v7276_v61 = vpop.f32.mrf.mxu1  ;;  %v7575_v59 = vand.u32 2147483648, %v16790_v34 }
 0x978   : > { %v16803_v40 = vadd.f32 %v7276_v61, %v16551_v35  ;;  %v7537_v1 = vmul.f32 %v16788_v20, %v7536_v38  ;;  %v8616_v12 = vmul.f32 -1.442695, %v16800_v21  ;;  %v7493_v53 = vadd.f32 %v16780_v5, %v7492_v30 }
 0x979   : > { %v16805_v55 = vpop.eup %9682 }
 0x97a   : > { %v9685_v14 = vpop.eup %9684  ;;  %v7520_v16 = vmul.f32 %v16805_v55, %v16782_v62  ;;  %9690 = vpow2.f32 %v8616_v12  ;;  %v8619_v32 = vmul.f32 -1.442695, %v16803_v40  ;;  %v7538_v45 = vadd.f32 %v16788_v20, %v7537_v1 }
 0x97b   : > { %v16820_v63 = vadd.f32 1.0, %v9685_v14  ;;  %v16822_v60 = vpop.eup %9686  ;;  %vm7525_vm7 = vweird.f32 %v16805_v55  ;;  %v7546_v14 = vor.u32 1.1754944e-38, %v7545_v54  ;;  %v7530_v12 = vand.u32 2147483648, %v16782_v62 }
 0x97c   : > { %v7521_v10 = vsub.f32 1.0, %v7520_v16  ;;  %v9689_v36 = vpop.eup %9688  ;;  %v7565_v48 = vmul.f32 %v16822_v60, %v16790_v34  ;;  %v7542_v38 = vsel %vm16851_vm6, %v16788_v20, %v7538_v45  ;;  %v7528_v16 = vand.u32 2147483647, %v16782_v62  ;;  %vm16891_vm13 = vmor %vm7524_vm5, %vm7525_vm7 }
 0x97d   : > { %v7227_v33 = vpop.f32.mrf.mxu3  ;;  %9692 = vrcp.f32 %v16820_v63  ;;  %v16846_v31 = vadd.f32 1.0, %v9689_v36  ;;  %v7497_v2 = vsel %vm16870_vm10, %v16780_v5, %v7493_v53  ;;  %v7547_v45 = vsel %vm16855_vm0, %v7546_v14, %v7542_v38 }
 0x97e   : > { %v7522_v39 = vmul.f32 %v16805_v55, %v7521_v10  ;;  %9694 = vpow2.f32 %v8619_v32  ;;  %v16866_v23 = vadd.f32 %v7227_v33, %v16641_v0  ;;  %v7566_v20 = vsub.f32 1.0, %v7565_v48 }
 0x97f   : > { %9696 = vrcp.f32 %v16846_v31  ;;  %v7278_v30 = vpop.f32.mrf.mxu1  ;;  %v7517_v10 = vsel %vm16814_vm3, %v7516_v4, %v7512_v25  ;;  %v7501_v32 = vor.u32 1.1754944e-38, %v7500_v56  ;;  %vm7529_vm12 = vcmp.eq.f32.partialorder %v7528_v16, 8.507059e+37 }
 0x980   : > { %v7523_v61 = vadd.f32 %v16805_v55, %v7522_v39  ;;  %v9691_v7 = vpop.eup %9690  ;;  %v16883_v50 = vadd.f32 %v7278_v30, %v16551_v35  ;;  %v8618_v4 = vmul.f32 -1.442695, %v16866_v23  ;;  %v7531_v36 = vor.u32 1.1754944e-38, %v7530_v12 }
 0x981   : > { %v16880_v52 = vadd.f32 1.0, %v9691_v7  ;;  %v7502_v56 = vsel %vm7499_vm9, %v7501_v32, %v7497_v2  ;;  %v7567_v54 = vmul.f32 %v16822_v60, %v7566_v20  ;;  %v7914_v8 = vmul.f32 %v7517_v10, %v16742_v13 }
 0x982   : > { %v7527_v62 = vsel %vm16891_vm13, %v16805_v55, %v7523_v61  ;;  %v7916_v27 = vmul.f32 %v7547_v45, %v16750_v11  ;;  %v8621_v55 = vmul.f32 -1.442695, %v16883_v50  ;;  %v7573_v25 = vand.u32 2147483647, %v16790_v34 }
 0x983   : > { %v16895_v5 = vpop.eup %9692  ;;  %9698 = vrcp.f32 %v16880_v52  ;;  %v7532_v53 = vsel %vm7529_vm12, %v7531_v36, %v7527_v62  ;;  %v7913_v38 = vmul.f32 %v7502_v56, %v16746_v58  ;;  %vm7570_vm14 = vweird.f32 %v16822_v60 }
 0x984   : > { %v9695_v28 = vpop.eup %9694  ;;  %9700 = vpow2.f32 %v8618_v4  ;;  %v7568_v13 = vadd.f32 %v16822_v60, %v7567_v54  ;;  %v7550_v11 = vmul.f32 %v16895_v5, %v16820_v63  ;;  %v7915_v16 = vmul.f32 %v7532_v53, %v16756_v47  ;;  %vm16933_vm3 = vmor %vm7569_vm4, %vm7570_vm14 }
 0x985   : > { %v7229_v39 = vpop.f32.mrf.mxu3  ;;  %v9697_v48 = vpop.eup %9696  ;;  %v16912_v61 = vadd.f32 1.0, %v9695_v28  ;;  %9702 = vpow2.f32 %v8621_v55  ;;  %v7944_v12 = vpack.c.bf16 %v7916_v27, %v7914_v8  ;;  %v7605_v2 = vand.u32 2147483648, %v16846_v31 }
 0x986   : > { %v7595_v51 = vmul.f32 %v9697_v48, %v16846_v31  ;;  %v16921_v58 = vadd.f32 %v7229_v39, %v16641_v0  ;;  %vm7600_vm2 = vweird.f32 %v9697_v48  ;;  %vm7599_vm8 = vweird.f32 %v16846_v31 }
 0x987   : > { %v7281_v1 = vpop.f32.mrf.mxu1  ;;  %v7603_v32 = vand.u32 2147483647, %v16846_v31  ;;  %9704 = vrcp.f32 %v16912_v61  ;;  %8147 = vmatmul.bf16.gmra.mxu0 %v7944_v12  ;;  %v7572_v33 = vsel %vm16933_vm3, %v16822_v60, %v7568_v13  ;;  %v7551_v62 = vsub.f32 1.0, %v7550_v11  ;;  %vm7601_vm15 = vmor %vm7599_vm8, %vm7600_vm2 }
 0x988   : > { %v7596_v7 = vsub.f32 1.0, %v7595_v51  ;;  %v16924_v20 = vadd.f32 %v7281_v1, %v16551_v35  ;;  %v8620_v45 = vmul.f32 -1.442695, %v16921_v58  ;;  %v7943_v31 = vpack.c.bf16 %v7915_v16, %v7913_v38 }
 0x989   : > { %v16917_v14 = vpop.eup %9698  ;;  %v7576_v8 = vor.u32 1.1754944e-38, %v7575_v59  ;;  %v7606_v55 = vor.u32 1.1754944e-38, %v7605_v2  ;;  %vm7574_vm11 = vcmp.eq.f32.partialorder %v7573_v25, 8.507059e+37  ;;  %vm7604_vm1 = vcmp.eq.f32.partialorder %v7603_v32, 8.507059e+37 }
 0x98a   : > { %v7597_v30 = vmul.f32 %v9697_v48, %v7596_v7  ;;  %v7580_v10 = vmul.f32 %v16917_v14, %v16880_v52  ;;  %v8623_v34 = vmul.f32 -1.442695, %v16924_v20  ;;  %v9701_v56 = vpop.eup %9700  ;;  %9706 = vpow2.f32 %v8620_v45  ;;  %8098 = vmatmul.bf16.gmra.mxu2 %v7943_v31 }
 0x98b   : > { %v9703_v39 = vpop.eup %9702  ;;  %v7577_v60 = vsel %vm7574_vm11, %v7576_v8, %v7572_v33  ;;  %v7552_v53 = vmul.f32 %v16895_v5, %v7551_v62  ;;  %v16950_v13 = vadd.f32 1.0, %v9701_v56  ;;  %vm7555_vm6 = vweird.f32 %v16895_v5 }
 0x98c   : > { %v7598_v4 = vadd.f32 %v9697_v48, %v7597_v30  ;;  %v7581_v36 = vsub.f32 1.0, %v7580_v10  ;;  %v16955_v1 = vadd.f32 1.0, %v9703_v39  ;;  %9708 = vpow2.f32 %v8623_v34 }
 0x98d   : > { %v7232_v28 = vpop.f32.mrf.mxu3  ;;  %v16952_v7 = vpop.eup %9704  ;;  %v7918_v16 = vmul.f32 %v7577_v60, %v16761_v46  ;;  %v7553_v30 = vadd.f32 %v16895_v5, %v7552_v53  ;;  %vm7585_vm0 = vweird.f32 %v16917_v14  ;;  %vm7554_vm7 = vweird.f32 %v16820_v63 }
 0x98e   : > { %v16947_v54 = vadd.f32 %v7232_v28, %v16641_v0  ;;  %v7602_v27 = vsel %vm7601_vm15, %v9697_v48, %v7598_v4  ;;  %v7582_v38 = vmul.f32 %v16917_v14, %v7581_v36  ;;  %9710 = vrcp.f32 %v16955_v1  ;;  %vm16980_vm10 = vmor %vm7554_vm7, %vm7555_vm6 }
 0x98f   : > { %v7607_v51 = vsel %vm7604_vm1, %v7606_v55, %v7602_v27  ;;  %v7283_v11 = vpop.f32.mrf.mxu1  ;;  %v7625_v2 = vmul.f32 %v16952_v7, %v16912_v61  ;;  %9712 = vrcp.f32 %v16950_v13  ;;  %v7560_v32 = vand.u32 2147483648, %v16820_v63 }
 0x990   : > { %v8622_v48 = vmul.f32 -1.442695, %v16947_v54  ;;  %v16959_v25 = vadd.f32 %v7283_v11, %v16551_v35  ;;  %v9707_v59 = vpop.eup %9706  ;;  %v7920_v12 = vmul.f32 %v7607_v51, %v16778_v42  ;;  %v7583_v47 = vadd.f32 %v16917_v14, %v7582_v38 }
 0x991   : > { %v16969_v10 = vadd.f32 1.0, %v9707_v59  ;;  %v7558_v42 = vand.u32 2147483647, %v16820_v63  ;;  %v7590_v45 = vand.u32 2147483648, %v16880_v52  ;;  %vm7584_vm5 = vweird.f32 %v16880_v52 }
 0x992   : > { %9714 = vpow2.f32 %v8622_v48  ;;  %v8625_v46 = vmul.f32 -1.442695, %v16959_v25  ;;  %v9709_v62 = vpop.eup %9708  ;;  %v7588_v34 = vand.u32 2147483647, %v16880_v52  ;;  %v7946_v28 = vpack.c.bf16 %v7920_v12, %v7918_v16  ;;  %vm16992_vm13 = vmor %vm7584_vm5, %vm7585_vm0 }
 0x993   : > { %9716 = vrcp.f32 %v16969_v10  ;;  %v7557_v63 = vsel %vm16980_vm10, %v16895_v5, %v7553_v30  ;;  %v7626_v36 = vsub.f32 1.0, %v7625_v2  ;;  %v7587_v52 = vsel %vm16992_vm13, %v16917_v14, %v7583_v47 }
 0x994   : > { %v16996_v31 = vpop.eup %9710  ;;  %v17001_v39 = vadd.f32 1.0, %v9709_v62  ;;  %9718 = vpow2.f32 %v8625_v46  ;;  %v7561_v27 = vor.u32 1.1754944e-38, %v7560_v32  ;;  %v7591_v55 = vor.u32 1.1754944e-38, %v7590_v45 }
 0x995   : > { %v7234_v33 = vpop.f32.mrf.mxu3  ;;  %v17006_v5 = vpop.eup %9712  ;;  %v7655_v60 = vmul.f32 %v16996_v31, %v16955_v1  ;;  %vm7559_vm9 = vcmp.eq.f32.partialorder %v7558_v42, 8.507059e+37  ;;  %vm7589_vm12 = vcmp.eq.f32.partialorder %v7588_v34, 8.507059e+37  ;;  %v7633_v51 = vand.u32 2147483647, %v16912_v61 }
 0x996   : > { %v17004_v8 = vadd.f32 %v7234_v33, %v16641_v0  ;;  %v7635_v14 = vand.u32 2147483648, %v16912_v61  ;;  %v7562_v11 = vsel %vm7559_vm9, %v7561_v27, %v7557_v63  ;;  %v7592_v38 = vsel %vm7589_vm12, %v7591_v55, %v7587_v52 }
 0x997   : > { %8152 = vmatmul.bf16.gmra.mxu0 %v7946_v28  ;;  %v7627_v48 = vmul.f32 %v16952_v7, %v7626_v36  ;;  %v7656_v59 = vsub.f32 1.0, %v7655_v60  ;;  %v7286_v16 = vpop.f32.mrf.mxu1  ;;  %v7610_v30 = vmul.f32 %v17006_v5, %v16950_v13  ;;  %9720 = vrcp.f32 %v17001_v39 }
 0x998   : > { %v9715_v53 = vpop.eup %9714  ;;  %v8624_v2 = vmul.f32 -1.442695, %v17004_v8  ;;  %v17020_v47 = vadd.f32 %v7286_v16, %v16551_v35  ;;  %vm7630_vm4 = vweird.f32 %v16952_v7  ;;  %v7919_v33 = vmul.f32 %v7592_v38, %v16800_v21 }
 0x999   : > { %v17013_v12 = vpop.eup %9716  ;;  %v7657_v46 = vmul.f32 %v16996_v31, %v7656_v59  ;;  %v17026_v32 = vadd.f32 1.0, %v9715_v53  ;;  %vm7659_vm14 = vweird.f32 %v16955_v1  ;;  %vm7660_vm2 = vweird.f32 %v16996_v31 }
 0x99a   : > { %v7640_v42 = vmul.f32 %v17013_v12, %v16969_v10  ;;  %v9719_v45 = vpop.eup %9718  ;;  %v7663_v62 = vand.u32 2147483647, %v16955_v1  ;;  %v7628_v4 = vadd.f32 %v16952_v7, %v7627_v48  ;;  %v7665_v28 = vand.u32 2147483648, %v16955_v1  ;;  %vm17043_vm15 = vmor %vm7659_vm14, %vm7660_vm2 }
 0x99b   : > { %v7658_v34 = vadd.f32 %v16996_v31, %v7657_v46  ;;  %v7611_v56 = vsub.f32 1.0, %v7610_v30  ;;  %v17035_v36 = vadd.f32 1.0, %v9719_v45  ;;  %9722 = vpow2.f32 %v8624_v2 }
 0x99c   : > { %v7641_v63 = vsub.f32 1.0, %v7640_v42  ;;  %v8627_v52 = vmul.f32 -1.442695, %v17020_v47  ;;  %vm7629_vm3 = vweird.f32 %v16912_v61  ;;  %vm17039_vm8 = vcmp.eq.f32.partialorder %v7633_v51, 8.507059e+37 }
 0x99d   : > { %v7636_v27 = vor.u32 1.1754944e-38, %v7635_v14  ;;  %9724 = vrcp.f32 %v17026_v32  ;;  %v7237_v1 = vpop.f32.mrf.mxu3  ;;  %v17048_v60 = vpop.eup %9720  ;;  %v7917_v53 = vmul.f32 %v7562_v11, %v16773_v29  ;;  %vm17053_vm11 = vmor %vm7629_vm3, %vm7630_vm4  ;;  %v7662_v51 = vsel %vm17043_vm15, %v16996_v31, %v7658_v34 }
 0x99e   : > { %v7642_v14 = vmul.f32 %v17013_v12, %v7641_v63  ;;  %9726 = vrcp.f32 %v17035_v36  ;;  %v7632_v38 = vsel %vm17053_vm11, %v16952_v7, %v7628_v4  ;;  %vm7614_vm1 = vweird.f32 %v16950_v13 }
 0x99f   : > { %vm7664_vm6 = vcmp.eq.f32.partialorder %v7663_v62, 8.507059e+37  ;;  %v7666_v29 = vor.u32 1.1754944e-38, %v7665_v28  ;;  %v7612_v11 = vmul.f32 %v17006_v5, %v7611_v56  ;;  %9728 = vpow2.f32 %v8627_v52  ;;  %v7288_v7 = vpop.f32.mrf.mxu1 }
 0x9a0   : > { %v7945_v48 = vpack.c.bf16 %v7919_v33, %v7917_v53  ;;  %v17068_v59 = vadd.f32 %v7237_v1, %v16641_v0  ;;  %vm7615_vm0 = vweird.f32 %v17006_v5  ;;  %v7620_v31 = vand.u32 2147483648, %v16950_v13 }
 0x9a1   : > { %v7667_v16 = vsel %vm7664_vm6, %v7666_v29, %v7662_v51  ;;  %v7685_v30 = vmul.f32 %v17048_v60, %v17001_v39  ;;  %v9723_v2 = vpop.eup %9722  ;;  %v7637_v46 = vsel %vm17039_vm8, %v7636_v27, %v7632_v38  ;;  %v7643_v42 = vadd.f32 %v17013_v12, %v7642_v14  ;;  %vm17113_vm13 = vmor %vm7614_vm1, %vm7615_vm0 }
 0x9a2   : > { %vm7645_vm7 = vweird.f32 %v17013_v12  ;;  %8103 = vmatmul.bf16.gmra.mxu2 %v7945_v48  ;;  %v8626_v45 = vmul.f32 -1.442695, %v17068_v59  ;;  %vm7644_vm10 = vweird.f32 %v16969_v10  ;;  %v7648_v62 = vand.u32 2147483647, %v16969_v10 }
 0x9a3   : > { %v17079_v33 = vpop.eup %9724  ;;  %v7650_v4 = vand.u32 2147483648, %v16969_v10  ;;  %v17084_v34 = vadd.f32 1.0, %v9723_v2  ;;  %v7613_v63 = vadd.f32 %v17006_v5, %v7612_v11  ;;  %v7924_v56 = vmul.f32 %v7667_v16, %v16883_v50  ;;  %vm17096_vm5 = vmor %vm7644_vm10, %vm7645_vm7 }
 0x9a4   : > { %v17086_v28 = vpop.eup %9726  ;;  %9730 = vpow2.f32 %v8626_v45  ;;  %v17091_v52 = vadd.f32 %v7288_v7, %v16551_v35  ;;  %v7618_v21 = vand.u32 2147483647, %v16950_v13  ;;  %v7621_v27 = vor.u32 1.1754944e-38, %v7620_v31 }
 0x9a5   : > { %v7686_v10 = vsub.f32 1.0, %v7685_v30  ;;  %v7715_v1 = vmul.f32 %v17086_v28, %v17035_v36  ;;  %v9729_v53 = vpop.eup %9728  ;;  %v7922_v50 = vmul.f32 %v7637_v46, %v16803_v40  ;;  %v7647_v61 = vsel %vm17096_vm5, %v17013_v12, %v7643_v42  ;;  %v7239_v12 = vpop.f32.mrf.mxu3 }
 0x9a6   : > { %v7670_v51 = vmul.f32 %v17079_v33, %v17026_v32  ;;  %9732 = vrcp.f32 %v17084_v34  ;;  %vm7649_vm9 = vcmp.eq.f32.partialorder %v7648_v62, 8.507059e+37  ;;  %v7651_v38 = vor.u32 1.1754944e-38, %v7650_v4 }
 0x9a7   : > { %v7693_v40 = vand.u32 2147483647, %v17001_v39  ;;  %v7695_v29 = vand.u32 2147483648, %v17001_v39  ;;  %v7617_v11 = vsel %vm17113_vm13, %v17006_v5, %v7613_v63  ;;  %v17122_v48 = vadd.f32 1.0, %v9729_v53  ;;  %v7291_v63 = vpop.f32.mrf.mxu1 }
 0x9a8   : > { %v8629_v31 = vmul.f32 -1.442695, %v17091_v52  ;;  %v7948_v13 = vpack.c.bf16 %v7924_v56, %v7922_v50  ;;  %v7652_v16 = vsel %vm7649_vm9, %v7651_v38, %v7647_v61  ;;  %v7687_v30 = vmul.f32 %v17048_v60, %v7686_v10 }
 0x9a9   : > { %v7716_v7 = vsub.f32 1.0, %v7715_v1  ;;  %v17127_v2 = vadd.f32 %v7239_v12, %v16641_v0  ;;  %vm7619_vm12 = vcmp.eq.f32.partialorder %v7618_v21, 8.507059e+37  ;;  %vm7689_vm4 = vweird.f32 %v17001_v39 }
 0x9aa   : > { %v9731_v46 = vpop.eup %9730  ;;  %v7671_v42 = vsub.f32 1.0, %v7670_v51  ;;  %9734 = vrcp.f32 %v17122_v48  ;;  %8157 = vmatmul.bf16.gmra.mxu0 %v7948_v13  ;;  %v7622_v5 = vsel %vm7619_vm12, %v7621_v27, %v7617_v11  ;;  %vm17131_vm14 = vcmp.eq.f32.partialorder %v7693_v40, 8.507059e+37 }
 0x9ab   : > { %v7696_v62 = vor.u32 1.1754944e-38, %v7695_v29  ;;  %v17135_v4 = vadd.f32 1.0, %v9731_v46  ;;  %v7923_v55 = vmul.f32 %v7652_v16, %v16921_v58  ;;  %vm7674_vm2 = vweird.f32 %v17026_v32 }
 0x9ac   : > { %v17137_v56 = vpop.eup %9732  ;;  %9736 = vpow2.f32 %v8629_v31  ;;  %v8628_v21 = vmul.f32 -1.442695, %v17127_v2  ;;  %v17143_v10 = vadd.f32 %v7291_v63, %v16551_v35  ;;  %v7688_v27 = vadd.f32 %v17048_v60, %v7687_v30 }
 0x9ad   : > { %vm7690_vm3 = vweird.f32 %v17048_v60  ;;  %v7717_v1 = vmul.f32 %v17086_v28, %v7716_v7  ;;  %v7700_v53 = vmul.f32 %v17137_v56, %v17084_v34  ;;  %v7921_v50 = vmul.f32 %v7622_v5, %v16866_v23  ;;  %v7242_v40 = vpop.f32.mrf.mxu3 }
 0x9ae   : > { %v7672_v58 = vmul.f32 %v17079_v33, %v7671_v42  ;;  %v7678_v61 = vand.u32 2147483647, %v17026_v32  ;;  %9738 = vrcp.f32 %v17135_v4  ;;  %v7680_v51 = vand.u32 2147483648, %v17026_v32  ;;  %vm17160_vm8 = vmor %vm7689_vm4, %vm7690_vm3 }
 0x9af   : > { %v7725_v14 = vand.u32 2147483648, %v17035_v36  ;;  %v7701_v38 = vsub.f32 1.0, %v7700_v53  ;;  %9740 = vpow2.f32 %v8628_v21  ;;  %vm7675_vm15 = vweird.f32 %v17079_v33 }
 0x9b0   : > { %v17156_v29 = vpop.eup %9734  ;;  %v8631_v23 = vmul.f32 -1.442695, %v17143_v10  ;;  %v7947_v11 = vpack.c.bf16 %v7923_v55, %v7921_v50  ;;  %v17167_v31 = vadd.f32 %v7242_v40, %v16641_v0  ;;  %v7692_v13 = vsel %vm17160_vm8, %v17048_v60, %v7688_v27  ;;  %vm17202_vm7 = vmor %vm7674_vm2, %vm7675_vm15 }
 0x9b1   : > { %v7718_v16 = vadd.f32 %v17086_v28, %v7717_v1  ;;  %vm7720_vm11 = vweird.f32 %v17086_v28  ;;  %v7702_v39 = vmul.f32 %v17137_v56, %v7701_v38  ;;  %v7673_v7 = vadd.f32 %v17079_v33, %v7672_v58  ;;  %v7293_v58 = vpop.f32.mrf.mxu1 }
 0x9b2   : > { %v9737_v30 = vpop.eup %9736  ;;  %v7745_v46 = vmul.f32 %v17156_v29, %v17122_v48  ;;  %9742 = vpow2.f32 %v8631_v23  ;;  %8108 = vmatmul.bf16.gmra.mxu2 %v7947_v11  ;;  %v8630_v42 = vmul.f32 -1.442695, %v17167_v31  ;;  %vm17179_vm1 = vcmp.eq.f32.partialorder %v7678_v61, 8.507059e+37 }
 0x9b3   : > { %vm7719_vm6 = vweird.f32 %v17035_v36  ;;  %v7723_v60 = vand.u32 2147483647, %v17035_v36  ;;  %v17185_v63 = vadd.f32 1.0, %v9737_v30  ;;  %v7697_v21 = vsel %vm17131_vm14, %v7696_v62, %v7692_v13 }
 0x9b4   : > { %v17187_v55 = vpop.eup %9738  ;;  %v7681_v27 = vor.u32 1.1754944e-38, %v7680_v51  ;;  %vm17193_vm0 = vmor %vm7719_vm6, %vm7720_vm11  ;;  %v7726_v53 = vor.u32 1.1754944e-38, %v7725_v14  ;;  %v7708_v50 = vand.u32 2147483647, %v17084_v34  ;;  %v7703_v62 = vadd.f32 %v17137_v56, %v7702_v39 }
 0x9b5   : > { %v9741_v61 = vpop.eup %9740  ;;  %v7722_v45 = vsel %vm17193_vm0, %v17086_v28, %v7718_v16  ;;  %vm7705_vm10 = vweird.f32 %v17137_v56  ;;  %9744 = vpow2.f32 %v8630_v42  ;;  %v7677_v51 = vsel %vm17202_vm7, %v17079_v33, %v7673_v7  ;;  %v7244_v39 = vpop.f32.mrf.mxu3 }
 0x9b6   : > { %v7710_v14 = vand.u32 2147483648, %v17084_v34  ;;  %v7746_v32 = vsub.f32 1.0, %v7745_v46  ;;  %9746 = vrcp.f32 %v17185_v63  ;;  %v7926_v38 = vmul.f32 %v7697_v21, %v16924_v20 }
 0x9b7   : > { %vm7724_vm5 = vcmp.eq.f32.partialorder %v7723_v60, 8.507059e+37  ;;  %vm7704_vm13 = vweird.f32 %v17084_v34  ;;  %v17219_v28 = vadd.f32 %v7293_v58, %v16551_v35  ;;  %v7755_v33 = vand.u32 2147483648, %v17122_v48 }
 0x9b8   : > { %v9743_v40 = vpop.eup %9742  ;;  %v7727_v12 = vsel %vm7724_vm5, %v7726_v53, %v7722_v45  ;;  %vm17221_vm9 = vmor %vm7704_vm13, %vm7705_vm10  ;;  %v7730_v11 = vmul.f32 %v17187_v55, %v17135_v4  ;;  %v17228_v13 = vadd.f32 1.0, %v9741_v61  ;;  %v7682_v20 = vsel %vm17179_vm1, %v7681_v27, %v7677_v51 }
 0x9b9   : > { %v7707_v34 = vsel %vm17221_vm9, %v17137_v56, %v7703_v62  ;;  %vm7709_vm12 = vcmp.eq.f32.partialorder %v7708_v50, 8.507059e+37  ;;  %v17235_v16 = vadd.f32 1.0, %v9743_v40  ;;  %v7711_v30 = vor.u32 1.1754944e-38, %v7710_v14 }
 0x9ba   : > { %v7747_v7 = vmul.f32 %v17156_v29, %v7746_v32  ;;  %v7753_v46 = vand.u32 2147483647, %v17122_v48  ;;  %9748 = vrcp.f32 %v17228_v13  ;;  %v7928_v60 = vmul.f32 %v7727_v12, %v16959_v25 }
 0x9bb   : > { %v9745_v42 = vpop.eup %9744  ;;  %vm7749_vm4 = vweird.f32 %v17122_v48  ;;  %9750 = vrcp.f32 %v17235_v16  ;;  %v8633_v56 = vmul.f32 -1.442695, %v17219_v28  ;;  %v7925_v21 = vmul.f32 %v7682_v20, %v16947_v54 }
 0x9bc   : > { %v9747_v5 = vpop.eup %9746  ;;  %v7712_v27 = vsel %vm7709_vm12, %v7711_v30, %v7707_v34  ;;  %v7756_v1 = vor.u32 1.1754944e-38, %v7755_v33  ;;  %v7731_v53 = vsub.f32 1.0, %v7730_v11  ;;  %vm7750_vm14 = vweird.f32 %v17156_v29 }
 0x9bd   : > { %v7738_v50 = vand.u32 2147483647, %v17135_v4  ;;  %v7740_v58 = vand.u32 2147483648, %v17135_v4  ;;  %v7775_v25 = vmul.f32 %v9747_v5, %v17185_v63  ;;  %v7748_v61 = vadd.f32 %v17156_v29, %v7747_v7  ;;  %vm17270_vm11 = vmor %vm7749_vm4, %vm7750_vm14  ;;  %v7247_v20 = vpop.f32.mrf.mxu3 }
 0x9be   : > { %vm17250_vm2 = vcmp.eq.f32.partialorder %v7753_v46, 8.507059e+37  ;;  %vm7734_vm3 = vweird.f32 %v17135_v4  ;;  %v7783_v54 = vand.u32 2147483647, %v17185_v63  ;;  %v7785_v45 = vand.u32 2147483648, %v17185_v63 }
 0x9bf   : > { %v17257_v62 = vadd.f32 1.0, %v9745_v42  ;;  %v7927_v51 = vmul.f32 %v7712_v27, %v17004_v8  ;;  %v7776_v14 = vsub.f32 1.0, %v7775_v25  ;;  %9752 = vpow2.f32 %v8633_v56 }
 0x9c0   : > { %v7950_v32 = vpack.c.bf16 %v7928_v60, %v7926_v38  ;;  %v9749_v40 = vpop.eup %9748  ;;  %v7732_v12 = vmul.f32 %v17187_v55, %v7731_v53  ;;  %vm7735_vm8 = vweird.f32 %v17187_v55  ;;  %vm7779_vm15 = vweird.f32 %v17185_v63 }
 0x9c1   : > { %9754 = vrcp.f32 %v17257_v62  ;;  %v17264_v23 = vpop.eup %9750  ;;  %v7777_v38 = vmul.f32 %v9747_v5, %v7776_v14  ;;  %vm7780_vm1 = vweird.f32 %v9747_v5  ;;  %v7760_v33 = vmul.f32 %v9749_v40, %v17228_v13  ;;  %vm17309_vm10 = vmor %vm7734_vm3, %vm7735_vm8 }
 0x9c2   : > { %8162 = vmatmul.bf16.gmra.mxu0 %v7950_v32  ;;  %v17276_v11 = vadd.f32 %v7244_v39, %v16641_v0  ;;  %v7752_v34 = vsel %vm17270_vm11, %v17156_v29, %v7748_v61  ;;  %vm17281_vm6 = vcmp.eq.f32.partialorder %v7783_v54, 8.507059e+37  ;;  %v7786_v48 = vor.u32 1.1754944e-38, %v7785_v45  ;;  %vm7781_vm0 = vmor %vm7779_vm15, %vm7780_vm1 }
 0x9c3   : > { %v7805_v7 = vmul.f32 %v17264_v23, %v17235_v16  ;;  %v7778_v46 = vadd.f32 %v9747_v5, %v7777_v38  ;;  %v7761_v42 = vsub.f32 1.0, %v7760_v33  ;;  %v7949_v56 = vpack.c.bf16 %v7927_v51, %v7925_v21 }
 0x9c4   : > { %v8632_v60 = vmul.f32 -1.442695, %v17276_v11  ;;  %v7733_v39 = vadd.f32 %v17187_v55, %v7732_v12  ;;  %v7768_v29 = vand.u32 2147483647, %v17228_v13  ;;  %v7770_v27 = vand.u32 2147483648, %v17228_v13 }
 0x9c5   : > { %v17294_v53 = vadd.f32 %v7247_v20, %v16641_v0  ;;  %v9753_v25 = vpop.eup %9752  ;;  %v7782_v61 = vsel %vm7781_vm0, %v9747_v5, %v7778_v46  ;;  %v7762_v54 = vmul.f32 %v9749_v40, %v7761_v42  ;;  %vm7765_vm7 = vweird.f32 %v9749_v40  ;;  %8113 = vmatmul.bf16.gmra.mxu2 %v7949_v56  ;;  %v7249_v20 = vpop.f32.mrf.mxu3 }
 0x9c6   : > { %9756 = vpow2.f32 %v8632_v60  ;;  %v7741_v21 = vor.u32 1.1754944e-38, %v7740_v58  ;;  %v7787_v63 = vsel %vm17281_vm6, %v7786_v48, %v7782_v61  ;;  %v17300_v51 = vadd.f32 1.0, %v9753_v25 }
 0x9c7   : > { %v17296_v45 = vpop.eup %9754  ;;  %v8634_v14 = vmul.f32 -1.442695, %v17294_v53  ;;  %v7757_v32 = vsel %vm17250_vm2, %v7756_v1, %v7752_v34  ;;  %v7763_v12 = vadd.f32 %v9749_v40, %v7762_v54  ;;  %vm7764_vm5 = vweird.f32 %v17228_v13 }
 0x9c8   : > { %v7806_v58 = vsub.f32 1.0, %v7805_v7  ;;  %v7737_v8 = vsel %vm17309_vm10, %v17187_v55, %v7733_v39  ;;  %vm7766_vm13 = vmor %vm7764_vm5, %vm7765_vm7  ;;  %v7771_v38 = vor.u32 1.1754944e-38, %v7770_v27  ;;  %v7790_v1 = vmul.f32 %v17296_v45, %v17257_v62 }
 0x9c9   : > { %9758 = vrcp.f32 %v17300_v51  ;;  %v7932_v36 = vmul.f32 %v7787_v63, %v17091_v52  ;;  %v7767_v33 = vsel %vm7766_vm13, %v9749_v40, %v7763_v12  ;;  %vm7769_vm9 = vcmp.eq.f32.partialorder %v7768_v29, 8.507059e+37 }
 0x9ca   : > { %9760 = vpow2.f32 %v8634_v14  ;;  %vm7739_vm12 = vcmp.eq.f32.partialorder %v7738_v50, 8.507059e+37  ;;  %v7772_v13 = vsel %vm7769_vm9, %v7771_v38, %v7767_v33  ;;  %v7930_v55 = vmul.f32 %v7757_v32, %v17020_v47 }
 0x9cb   : > { %v7742_v30 = vsel %vm7739_vm12, %v7741_v21, %v7737_v8  ;;  %v7807_v48 = vmul.f32 %v17264_v23, %v7806_v58  ;;  %v7791_v7 = vsub.f32 1.0, %v7790_v1  ;;  %v17328_v42 = vadd.f32 %v7249_v20, %v16641_v0 }
 0x9cc   : > { %v9757_v34 = vpop.eup %9756  ;;  %v7931_v52 = vmul.f32 %v7772_v13, %v17127_v2  ;;  %v7813_v40 = vand.u32 2147483647, %v17235_v16  ;;  %v7952_v60 = vpack.c.bf16 %v7932_v36, %v7930_v55  ;;  %v7929_v50 = vmul.f32 %v7742_v30, %v17068_v59 }
 0x9cd   : > { %v17325_v46 = vadd.f32 1.0, %v9757_v34  ;;  %v7815_v56 = vand.u32 2147483648, %v17235_v16  ;;  %v7808_v39 = vadd.f32 %v17264_v23, %v7807_v48  ;;  %vm7810_vm4 = vweird.f32 %v17264_v23  ;;  %v7296_v54 = vpop.f32.mrf.mxu3 }
 0x9ce   : > { %v8636_v29 = vmul.f32 -1.442695, %v17328_v42  ;;  %vm7809_vm14 = vweird.f32 %v17235_v16  ;;  %v7792_v2 = vmul.f32 %v17296_v45, %v7791_v7  ;;  %vm17343_vm2 = vcmp.eq.f32.partialorder %v7813_v40, 8.507059e+37 }
 0x9cf   : > { %v9759_v4 = vpop.eup %9758  ;;  %9762 = vrcp.f32 %v17325_v46  ;;  %v7951_v61 = vpack.c.bf16 %v7931_v52, %v7929_v50  ;;  %vm17347_vm3 = vmor %vm7809_vm14, %vm7810_vm4  ;;  %v7816_v63 = vor.u32 1.1754944e-38, %v7815_v56  ;;  %v7843_v16 = vand.u32 2147483647, %v17300_v51 }
 0x9d0   : > { %v9761_v47 = vpop.eup %9760  ;;  %v7835_v0 = vmul.f32 %v9759_v4, %v17300_v51  ;;  %9764 = vpow2.f32 %v8636_v29  ;;  %v7845_v14 = vand.u32 2147483648, %v17300_v51  ;;  %v7812_v32 = vsel %vm17347_vm3, %v17264_v23, %v7808_v39 }
 0x9d1   : > { %v17341_v27 = vadd.f32 1.0, %v9761_v47  ;;  %vm7840_vm8 = vweird.f32 %v9759_v4  ;;  %v17358_v12 = vadd.f32 %v7296_v54, %v16551_v35  ;;  %v7793_v8 = vadd.f32 %v17296_v45, %v7792_v2 }
 0x9d2   : > { %v7836_v25 = vsub.f32 1.0, %v7835_v0  ;;  %8167 = vmatmul.bf16.gmra.mxu0 %v7952_v60  ;;  %vm7794_vm15 = vweird.f32 %v17257_v62  ;;  %vm7795_vm11 = vweird.f32 %v17296_v45  ;;  %v7798_v38 = vand.u32 2147483647, %v17257_v62  ;;  %v8143_v60 = vpop.f32.mrf.mxu0 }
 0x9d3   : > { %9766 = vrcp.f32 %v17341_v27  ;;  %vm7839_vm1 = vweird.f32 %v17300_v51  ;;  %v8635_v23 = vmul.f32 -1.442695, %v17358_v12  ;;  %v7817_v33 = vsel %vm17343_vm2, %v7816_v63, %v7812_v32  ;;  %vm17370_vm7 = vmor %vm7794_vm15, %vm7795_vm11 }
 0x9d4   : > { %v7837_v5 = vmul.f32 %v9759_v4, %v7836_v25  ;;  %v7800_v20 = vand.u32 2147483648, %v17257_v62  ;;  %vm7841_vm6 = vmor %vm7839_vm1, %vm7840_vm8  ;;  %vm7844_vm0 = vcmp.eq.f32.partialorder %v7843_v16, 8.507059e+37  ;;  %v7846_v13 = vor.u32 1.1754944e-38, %v7845_v14 }
 0x9d5   : > { %v9763_v58 = vpop.eup %9762  ;;  %8118 = vmatmul.bf16.gmra.mxu2 %v7951_v61  ;;  %v7828_v48 = vand.u32 2147483647, %v17325_v46  ;;  %9768 = vpow2.f32 %v8635_v23  ;;  %v7797_v52 = vsel %vm17370_vm7, %v17296_v45, %v7793_v8  ;;  %v7830_v40 = vand.u32 2147483648, %v17325_v46  ;;  %v7298_v39 = vpop.f32.mrf.mxu3 }
 0x9d6   : > { %v7838_v1 = vadd.f32 %v9759_v4, %v7837_v5  ;;  %v7820_v36 = vmul.f32 %v9763_v58, %v17325_v46  ;;  %v9765_v34 = vpop.eup %9764  ;;  %vm7825_vm10 = vweird.f32 %v9763_v58  ;;  %vm7799_vm5 = vcmp.eq.f32.partialorder %v7798_v38, 8.507059e+37 }
 0x9d7   : > { %v17381_v50 = vadd.f32 1.0, %v9765_v34  ;;  %v7801_v29 = vor.u32 1.1754944e-38, %v7800_v20  ;;  %v7934_v45 = vmul.f32 %v7817_v33, %v17143_v10  ;;  %vm7824_vm13 = vweird.f32 %v17325_v46 }
 0x9d8   : > { %v7842_v30 = vsel %vm7841_vm6, %v9759_v4, %v7838_v1  ;;  %v7821_v51 = vsub.f32 1.0, %v7820_v36  ;;  %v17390_v59 = vadd.f32 %v7298_v39, %v16551_v35  ;;  %vm7826_vm9 = vmor %vm7824_vm13, %vm7825_vm10  ;;  %vm7829_vm12 = vcmp.eq.f32.partialorder %v7828_v48, 8.507059e+37  ;;  %v17399_v35 = vld [vmem:[%s17524_s15] ss:$0 sm:$0xff] }
 0x9d9   : > { %v17375_v7 = vpop.eup %9766  ;;  %v7847_v62 = vsel %vm7844_vm0, %v7846_v13, %v7842_v30  ;;  %9770 = vrcp.f32 %v17381_v50  ;;  %v7831_v25 = vor.u32 1.1754944e-38, %v7830_v40  ;;  %vm19006_vm14 = vcmask 523264  }
 0x9da   : > { %v7936_v56 = vmul.f32 %v7847_v62, %v17219_v28  ;;  %v7822_v47 = vmul.f32 %v9763_v58, %v7821_v51  ;;  %v7850_v4 = vmul.f32 %v17375_v7, %v17341_v27  ;;  %v7802_v28 = vsel %vm7799_vm5, %v7801_v29, %v7797_v52  ;;  %v8145_v23 = vpop.f32.mrf.mxu0  ;;  %vm19009_vm6 = vmmov %vm19006_vm14 }
 0x9db   : > { %v8094_v0 = vpop.f32.mrf.mxu2  ;;  %v9769_v54 = vpop.eup %9768  ;;  %v8637_v14 = vmul.f32 -1.442695, %v17390_v59  ;;  %v7933_v46 = vmul.f32 %v7802_v28, %v17167_v31  ;;  %vm7855_vm4 = vweird.f32 %v17375_v7  ;;  %v7888_v31 = vand.u32 2147483647, %v17381_v50 }
 0x9dc   : > { %v7823_v2 = vadd.f32 %v9763_v58, %v7822_v47  ;;  %v8144_v61 = vadd.f32 %v8143_v60, %v8094_v0  ;;  %v7851_v63 = vsub.f32 1.0, %v7850_v4  ;;  %v7954_v16 = vpack.c.bf16 %v7936_v56, %v7934_v45 }
 0x9dd   : > { %v17393_v5 = vadd.f32 1.0, %v9769_v54  ;;  %9772 = vpow2.f32 %v8637_v14  ;;  %vm7854_vm3 = vweird.f32 %v17341_v27  ;;  %v7858_v52 = vand.u32 2147483647, %v17341_v27 }
 0x9de   : > { %v7827_v21 = vsel %vm7826_vm9, %v9763_v58, %v7823_v2  ;;  %v8183_v10 = vadd.f32 %v8144_v61, %v16179_v22  ;;  %v7852_v38 = vmul.f32 %v17375_v7, %v7851_v63  ;;  %v7860_v62 = vand.u32 2147483648, %v17341_v27  ;;  %vm17419_vm8 = vmor %vm7854_vm3, %vm7855_vm4 }
 0x9df   : > { %v7832_v32 = vsel %vm7829_vm12, %v7831_v25, %v7827_v21  ;;  %v9771_v58 = vpop.eup %9770  ;;  %9774 = vrcp.f32 %v17393_v5  ;;  %vm7884_vm15 = vweird.f32 %v17381_v50  ;;  %vm7889_vm1 = vcmp.eq.f32.partialorder %v7888_v31, 8.507059e+37 }
 0x9e0   : > { %v7935_v8 = vmul.f32 %v7832_v32, %v17276_v11  ;;  %v7880_v1 = vmul.f32 %v9771_v58, %v17381_v50  ;;  %v8203_v33 = vadd.f32 %v17399_v35, %v8183_v10  ;;  %v7890_v11 = vand.u32 2147483648, %v17381_v50 }
 0x9e1   : > { %v7853_v55 = vadd.f32 %v17375_v7, %v7852_v38  ;;  %vm7885_vm2 = vweird.f32 %v9771_v58  ;;  %v7861_v29 = vor.u32 1.1754944e-38, %v7860_v62  ;;  %vm7859_vm0 = vcmp.eq.f32.partialorder %v7858_v52, 8.507059e+37 }
 0x9e2   : > { %8172 = vmatmul.bf16.gmra.mxu0 %v7954_v16  ;;  %v7953_v22 = vpack.c.bf16 %v7935_v8, %v7933_v46  ;;  %v7881_v20 = vsub.f32 1.0, %v7880_v1  ;;  %8219 = vst.msk [vmem:[%s9980_s23] sm:$0xff] %vm19006_vm14, %v8203_v33  ;;  %vm7886_vm11 = vmor %vm7884_vm15, %vm7885_vm2  ;;  %v7891_v4 = vor.u32 1.1754944e-38, %v7890_v11  ;;  %vm7869_vm10 = vweird.f32 %v17393_v5 }
 0x9e3   : > { %v8096_v36 = vpop.f32.mrf.mxu2  ;;  %v9773_v34 = vpop.eup %9772  ;;  %v7857_v27 = vsel %vm17419_vm8, %v17375_v7, %v7853_v55  ;;  %v7875_v7 = vand.u32 2147483648, %v17393_v5  ;;  %v7873_v63 = vand.u32 2147483647, %v17393_v5  ;;  %vm19010_vm2 = vmmov %vm19009_vm6 }
 0x9e4   : > { %v8146_v13 = vadd.f32 %v8145_v23, %v8096_v36  ;;  %v7882_v30 = vmul.f32 %v9771_v58, %v7881_v20  ;;  %v7428_v40 = vadd.f32 1.0, %v9773_v34  ;;  %v7862_v2 = vsel %vm7859_vm0, %v7861_v29, %v7857_v27  ;;  %vm19011_vm3 = vmmov %vm19010_vm2 }
 0x9e5   : > { %8123 = vmatmul.bf16.gmra.mxu2 %v7953_v22  ;;  %v9775_v48 = vpop.eup %9774  ;;  %v7937_v61 = vmul.f32 %v7862_v2, %v17294_v53  ;;  %v7876_v8 = vor.u32 1.1754944e-38, %v7875_v7  ;;  %vm7874_vm9 = vcmp.eq.f32.partialorder %v7873_v63, 8.507059e+37  ;;  %vm19012_vm8 = vmmov %vm19010_vm2 }
 0x9e6   : > { %v8184_v51 = vadd.f32 %v8146_v13, %v16204_v15  ;;  %v7883_v56 = vadd.f32 %v9771_v58, %v7882_v30  ;;  %v7865_v15 = vmul.f32 %v9775_v48, %v17393_v5  ;;  %9776 = vrcp.f32 %v7428_v40  ;;  %vm19013_vm15 = vmmov %vm19010_vm2 }
 0x9e7   : > { %vm7870_vm7 = vweird.f32 %v9775_v48  ;;  %v7905_v32 = vand.u32 2147483648, %v7428_v40  ;;  %vm7899_vm12 = vweird.f32 %v7428_v40 }
 0x9e8   : > { %v8204_v47 = vadd.f32 %v17399_v35, %v8184_v51  ;;  %v7887_v39 = vsel %vm7886_vm11, %v9771_v58, %v7883_v56  ;;  %v7866_v0 = vsub.f32 1.0, %v7865_v15  ;;  %vm7871_vm5 = vmor %vm7869_vm10, %vm7870_vm7 }
 0x9e9   : > { %v7892_v45 = vsel %vm7889_vm1, %v7891_v4, %v7887_v39  ;;  %v7906_v38 = vor.u32 1.1754944e-38, %v7905_v32  ;;  %vm19014_vm11 = vmmov %vm19010_vm2 }
 0x9ea   : > { %8220 = vst.msk [vmem:[%s9980_s23 + $0x8] sm:$0xff] %vm19009_vm6, %v8204_v47  ;;  %v7867_v50 = vmul.f32 %v9775_v48, %v7866_v0  ;;  %v7939_v28 = vmul.f32 %v7892_v45, %v17328_v42  ;;  %v7903_v42 = vand.u32 2147483647, %v7428_v40  ;;  %vm19015_vm1 = vmmov %vm19010_vm2 }
 0x9eb   : > { %vm19016_vm6 = vmmov %vm19015_vm1 }
 0x9ec   : > { %v9777_v25 = vpop.eup %9776  ;;  %v7868_v54 = vadd.f32 %v9775_v48, %v7867_v50  ;;  %v7955_v14 = vpack.c.bf16 %v7939_v28, %v7937_v61  ;;  %vm7904_vm14 = vcmp.eq.f32.partialorder %v7903_v42, 8.507059e+37  ;;  %vm19017_vm0 = vmmov %vm19015_vm1 }
 0x9ed   : > { %v7895_v21 = vmul.f32 %v9777_v25, %v7428_v40  ;;  %vm7900_vm13 = vweird.f32 %v9777_v25  ;;  %vm19018_vm7 = vmmov %vm19017_vm0 }
 0x9ee   : > { %v7872_v10 = vsel %vm7871_vm5, %v9775_v48, %v7868_v54  ;;  %vm7901_vm4 = vmor %vm7899_vm12, %vm7900_vm13 }
 0x9ef   : > { %v7896_v16 = vsub.f32 1.0, %v7895_v21  ;;  %v7877_v58 = vsel %vm7874_vm9, %v7876_v8, %v7872_v10  ;;  %vm19019_vm10 = vmmov %vm19017_vm0 }
 0x9f0   : > { %v7938_v22 = vmul.f32 %v7877_v58, %v17358_v12  ;;  %vm19020_vm5 = vmmov %vm19017_vm0 }
 0x9f1   : > { %v7897_v46 = vmul.f32 %v9777_v25, %v7896_v16  ;;  %vm19021_vm13 = vmmov %vm19017_vm0 }
 0x9f2   : > { %vm19022_vm9 = vmmov %vm19017_vm0 }
 0x9f3   : > { %v7898_v53 = vadd.f32 %v9777_v25, %v7897_v46  ;;  %vm19023_vm12 = vmmov %vm19017_vm0 }
 0x9f5   : > { %8128 = vmatmul.bf16.gmra.mxu2 %v7955_v14  ;;  %v7902_v1 = vsel %vm7901_vm4, %v9777_v25, %v7898_v53 }
 0x9f6   : > { %v7907_v5 = vsel %vm7904_vm14, %v7906_v38, %v7902_v1 }
 0x9f7   : > { %v7940_v36 = vmul.f32 %v7907_v5, %v17390_v59 }
 0x9f9   : > { %v7956_v23 = vpack.c.bf16 %v7940_v36, %v7938_v22 }
 0x9fb   : > { %8177 = vmatmul.bf16.gmra.mxu0 %v7956_v23 }
 0xa04   : > { %v8148_v33 = vpop.f32.mrf.mxu0 }
 0xa0c   : > { %v8150_v20 = vpop.f32.mrf.mxu0 }
 0xa0d   : > { %v8099_v13 = vpop.f32.mrf.mxu2 }
 0xa0e   : > { %v8149_v31 = vadd.f32 %v8148_v33, %v8099_v13 }
 0xa10   : > { %v8185_v11 = vadd.f32 %v8149_v31, %v16267_v41 }
 0xa12   : > { %v8205_v34 = vadd.f32 %v17399_v35, %v8185_v11 }
 0xa14   : > { %8221 = vst.msk [vmem:[%s9980_s23 + $0x10] sm:$0xff] %vm19010_vm2, %v8205_v34  ;;  %v8153_v30 = vpop.f32.mrf.mxu0 }
 0xa15   : > { %v8101_v55 = vpop.f32.mrf.mxu2 }
 0xa16   : > { %v8151_v12 = vadd.f32 %v8150_v20, %v8101_v55 }
 0xa18   : > { %v8186_v51 = vadd.f32 %v8151_v12, %v16263_v49 }
 0xa1a   : > { %v8206_v59 = vadd.f32 %v17399_v35, %v8186_v51 }
 0xa1c   : > { %8222 = vst.msk [vmem:[%s9980_s23 + $0x18] sm:$0xff] %vm19011_vm3, %v8206_v59  ;;  %v8155_v48 = vpop.f32.mrf.mxu0 }
 0xa25   : > { %v8104_v52 = vpop.f32.mrf.mxu2 }
 0xa26   : > { %v8154_v62 = vadd.f32 %v8153_v30, %v8104_v52 }
 0xa27   : > { %v8158_v60 = vpop.f32.mrf.mxu0 }
 0xa28   : > { %v8187_v41 = vadd.f32 %v8154_v62, %v16234_v57 }
 0xa2a   : > { %v8207_v40 = vadd.f32 %v17399_v35, %v8187_v41 }
 0xa2c   : > { %8223 = vst.msk [vmem:[%s9980_s23 + $0x20] sm:$0xff] %vm19012_vm8, %v8207_v40 }
 0xa2d   : > { %v8106_v56 = vpop.f32.mrf.mxu2 }
 0xa2e   : > { %v8156_v15 = vadd.f32 %v8155_v48, %v8106_v56 }
 0xa2f   : > { %v8160_v4 = vpop.f32.mrf.mxu0 }
 0xa30   : > { %v8188_v49 = vadd.f32 %v8156_v15, %v16280_v18 }
 0xa32   : > { %v8208_v47 = vadd.f32 %v17399_v35, %v8188_v49 }
 0xa34   : > { %8224 = vst.msk [vmem:[%s9980_s23 + $0x28] sm:$0xff] %vm19013_vm15, %v8208_v47 }
 0xa35   : > { %v8109_v27 = vpop.f32.mrf.mxu2 }
 0xa36   : > { %v8159_v39 = vadd.f32 %v8158_v60, %v8109_v27 }
 0xa38   : > { %v8189_v57 = vadd.f32 %v8159_v39, %v16275_v6 }
 0xa3a   : > { %v8209_v0 = vadd.f32 %v17399_v35, %v8189_v57 }
 0xa3c   : > { %8225 = vst.msk [vmem:[%s9980_s23 + $0x30] sm:$0xff] %vm19014_vm11, %v8209_v0 }
 0xa3d   : > { %v8111_v29 = vpop.f32.mrf.mxu2 }
 0xa3e   : > { %v8161_v50 = vadd.f32 %v8160_v4, %v8111_v29 }
 0xa3f   : > { %v8163_v45 = vpop.f32.mrf.mxu0 }
 0xa40   : > { %v8190_v18 = vadd.f32 %v8161_v50, %v16302_v37 }
 0xa42   : > { %v8210_v2 = vadd.f32 %v17399_v35, %v8190_v18 }
 0xa44   : > { %8226 = vst.msk [vmem:[%s9980_s23 + $0x38] sm:$0xff] %vm19015_vm1, %v8210_v2 }
 0xa47   : > { %v8165_v28 = vpop.f32.mrf.mxu0 }
 0xa48   : > { %v8114_v25 = vpop.f32.mrf.mxu2 }
 0xa49   : > { %v8164_v61 = vadd.f32 %v8163_v45, %v8114_v25 }
 0xa4b   : > { %v8191_v6 = vadd.f32 %v8164_v61, %v16294_v26 }
 0xa4d   : > { %v8211_v54 = vadd.f32 %v17399_v35, %v8191_v6 }
 0xa4f   : > { %8227 = vst.msk [vmem:[%s9980_s23 + $0x40] sm:$0xff] %vm19016_vm6, %v8211_v54  ;;  %v8168_v63 = vpop.f32.mrf.mxu0 }
 0xa50   : > { %v8116_v21 = vpop.f32.mrf.mxu2 }
 0xa51   : > { %v8166_v7 = vadd.f32 %v8165_v28, %v8116_v21 }
 0xa53   : > { %v8192_v37 = vadd.f32 %v8166_v7, %v16246_v43 }
 0xa55   : > { %v8212_v16 = vadd.f32 %v17399_v35, %v8192_v37 }
 0xa57   : > { %8228 = vst.msk [vmem:[%s9980_s23 + $0x48] sm:$0xff] %vm19017_vm0, %v8212_v16  ;;  %v8170_v26 = vpop.f32.mrf.mxu0 }
 0xa58   : > { %v8119_v14 = vpop.f32.mrf.mxu2 }
 0xa59   : > { %v8169_v32 = vadd.f32 %v8168_v63, %v8119_v14 }
 0xa5b   : > { %v8193_v10 = vadd.f32 %v8169_v32, %v16320_v9 }
 0xa5d   : > { %v8213_v46 = vadd.f32 %v17399_v35, %v8193_v10 }
 0xa5f   : > { %8229 = vst.msk [vmem:[%s9980_s23 + $0x50] sm:$0xff] %vm19018_vm7, %v8213_v46  ;;  %v8173_v58 = vpop.f32.mrf.mxu0 }
 0xa60   : > { %v8121_v42 = vpop.f32.mrf.mxu2 }
 0xa61   : > { %v8171_v8 = vadd.f32 %v8170_v26, %v8121_v42 }
 0xa63   : > { %v8194_v53 = vadd.f32 %v8171_v8, %v16315_v3 }
 0xa65   : > { %v8214_v43 = vadd.f32 %v17399_v35, %v8194_v53 }
 0xa67   : > { %8230 = vst.msk [vmem:[%s9980_s23 + $0x58] sm:$0xff] %vm19019_vm10, %v8214_v43  ;;  %v8175_v22 = vpop.f32.mrf.mxu0 }
 0xa68   : > { %v8124_v38 = vpop.f32.mrf.mxu2 }
 0xa69   : > { %v8174_v1 = vadd.f32 %v8173_v58, %v8124_v38 }
 0xa6b   : > { %v8195_v9 = vadd.f32 %v8174_v1, %v16306_v24 }
 0xa6d   : > { %v8215_v5 = vadd.f32 %v17399_v35, %v8195_v9 }
 0xa6f   : > { %8231 = vst.msk [vmem:[%s9980_s23 + $0x60] sm:$0xff] %vm19020_vm5, %v8215_v5 }
 0xa70   : > { %v8126_v36 = vpop.f32.mrf.mxu2 }
 0xa71   : > { %v8176_v23 = vadd.f32 %v8175_v22, %v8126_v36 }
 0xa73   : > { %v8196_v3 = vadd.f32 %v8176_v23, %v16331_v17 }
 0xa75   : > { %v8216_v33 = vadd.f32 %v17399_v35, %v8196_v3 }
 0xa77   : > { %8232 = vst.msk [vmem:[%s9980_s23 + $0x68] sm:$0xff] %vm19021_vm13, %v8216_v33 }
 0xa78   : > { %v8129_v20 = vpop.f32.mrf.mxu2  ;;  %v8178_v13 = vpop.f32.mrf.mxu0 }
 0xa79   : > { %v8179_v31 = vadd.f32 %v8178_v13, %v8129_v20 }
 0xa7b   : > { %v8197_v11 = vadd.f32 %v8179_v31, %v16400_v44 }
 0xa7d   : > { %v8217_v24 = vadd.f32 %v17399_v35, %v8197_v11 }
 0xa7f   : > { %8233 = vst.msk [vmem:[%s9980_s23 + $0x70] sm:$0xff] %vm19022_vm9, %v8217_v24 }
 0xa80   : > { %v8131_v34 = vpop.f32.mrf.mxu2  ;;  %v8180_v55 = vpop.f32.mrf.mxu0 }
 0xa81   : > { %v8181_v30 = vadd.f32 %v8180_v55, %v8131_v34 }
 0xa83   : > { %v8198_v12 = vadd.f32 %v8181_v30, %v16419_v19 }
 0xa85   : > { %v8218_v17 = vadd.f32 %v17399_v35, %v8198_v12 }
 0xa87   : > { %8234 = vst.msk [vmem:[%s9980_s23 + $0x78] sm:$0xff] %vm19023_vm12, %v8218_v17 }
 0xa88 PF: > { %s26_s25 = sadd.s32 1, %s9836_s25   ;;  %s19024_s21 = sld [smem:[#allocation4_spill]] }
 0xa89   : > { %p23_p8 = scmp.ge.s32.totalorder %s26_s25, 6   ;;  %s19025_s22 = sld [smem:[#allocation5_spill]] }
 0xa8a   : > { %s19026_s23 = sld [smem:[#allocation6_spill]]  ;;  %s19027_s24 = smov %s19033_s27 }
 0xa8b   :  { %25 = sbr.rel (!%p23_p8) target bundleno = 3 (0x3), region = 121 }

</bundles_post_ra>
